<compile_context>
chip_gen: v7x
topology: tpu7x:2x2x1
jax: 0.10.0
libtpu: 0.0.40
codegen_flags: <defaults>
</compile_context>

<pallas_src>
import functools

import jax
import jax.numpy as jnp
from jax.experimental import pallas as pl
from jax.experimental.pallas import tpu as pltpu


# ----------------------------- small helpers ---------------------------------
def _round_up(x, m):
    return ((x + m - 1) // m) * m


_VMEM_LIMIT = None


def _vmem_limit_bytes():
    """Generation-aware VMEM limit: leave ~25% headroom for Mosaic scratch."""
    global _VMEM_LIMIT
    if _VMEM_LIMIT is None:
        try:
            cap = int(pltpu.get_tpu_info().vmem_capacity_bytes)
        except Exception:
            cap = 64 * 1024 * 1024  # conservative fallback (v7x physical size)
        _VMEM_LIMIT = int(min(cap - cap // 4, 96 * 1024 * 1024))
    return _VMEM_LIMIT


def _probe_kernel(x_ref, o_ref):
    o_ref[...] = x_ref[...]


_SINGLE_BUFFER_OK = None


def _single_buffer_supported():
    """Probe (once, tiny compile) whether pipeline_mode=pl.Buffered(1) is usable."""
    global _SINGLE_BUFFER_OK
    if _SINGLE_BUFFER_OK is None:
        try:
            spec = pl.BlockSpec((8, 128), lambda i: (0, 0),
                                pipeline_mode=pl.Buffered(1))
            fn = pl.pallas_call(
                _probe_kernel,
                out_shape=jax.ShapeDtypeStruct((8, 128), jnp.float32),
                grid=(2,),
                in_specs=[spec],
                out_specs=pl.BlockSpec((8, 128), lambda i: (0, 0)),
            )
            jax.jit(fn).lower(
                jax.ShapeDtypeStruct((8, 128), jnp.float32)).compile()
            _SINGLE_BUFFER_OK = True
        except Exception:
            _SINGLE_BUFFER_OK = False
    return _SINGLE_BUFFER_OK


def _const_spec(block_shape, index_map):
    """Grid-invariant operand (constant index_map): single-buffer if supported."""
    if _single_buffer_supported():
        return pl.BlockSpec(block_shape, index_map, pipeline_mode=pl.Buffered(1))
    return pl.BlockSpec(block_shape, index_map)


# ----------------------------- Pallas kernel ---------------------------------
def _fused_conv_kernel(*refs, kh, qmax, sh, Ho, Wo, apply_norm, apply_act,
                       eps, slope):
    """Fused conv (in-kernel im2col) + InstanceNorm2d + LeakyReLU for one sample.

    refs (apply_norm=True):  x_ref, w_ref, o_ref, y_ref(scratch)
    refs (apply_norm=False): x_ref, w_ref, b_ref, o_ref

    x_ref: (1, Hp, Wq, Cs)      bf16 padded, W-space-to-depth'd activation
    w_ref: (kh*qmax, Cs, Cpad)  bf16 rearranged conv weight (zero-padded)
    b_ref: (1, Cpad)            f32 bias (final conv only)
    o_ref: (1, Ho, Wo, Cpad)    lane-dense output block
    y_ref: (Ho, Wo, Cpad)       f32 VMEM scratch holding pre-norm rows
    """
    if apply_norm:
        x_ref, w_ref, o_ref, y_ref = refs
    else:
        x_ref, w_ref, b_ref, o_ref = refs
    cpad = o_ref.shape[-1]

    if apply_norm:
        s = jnp.zeros((1, cpad), jnp.float32)
        ss = jnp.zeros((1, cpad), jnp.float32)
    else:
        bias = b_ref[...]                                         # (1, Cpad) f32

    # ---- conv: per output row, accumulate kh*qmax MXU dots (bf16 -> f32) ----
    # All slice offsets are static Python ints -> plain (Wo, Cs) 2D loads, no
    # strided/sublane-gather reads; single traversal also accumulates IN stats.
    for ho in range(Ho):
        y = jnp.zeros((Wo, cpad), jnp.float32)
        for i in range(kh):
            row = ho * sh + i
            for q in range(qmax):
                xs = x_ref[0, row, q:q + Wo, :]                   # (Wo, Cs) bf16
                y = y + jnp.dot(xs, w_ref[i * qmax + q],
                                preferred_element_type=jnp.float32)
        if apply_norm:
            # bias is mathematically cancelled by the mean subtraction -> skipped.
            y_ref[ho] = y
            s = s + jnp.sum(y, axis=0, keepdims=True)
            ss = ss + jnp.sum(y * y, axis=0, keepdims=True)
        else:
            o_ref[0, ho] = (y + bias).astype(o_ref.dtype)

    # ---- InstanceNorm2d (affine=False) + optional LeakyReLU, then store ----
    if apply_norm:
        inv_hw = 1.0 / float(Ho * Wo)
        mean = s * inv_hw
        # One-pass biased variance; clamped at 0 (can differ from the two-pass
        # PyTorch form at the bf16-tolerance margin, never NaNs).
        var = jnp.maximum(ss * inv_hw - mean * mean, 0.0)
        scale = jax.lax.rsqrt(var + eps)                          # EUP slot
        for ho in range(Ho):
            yn = (y_ref[ho] - mean) * scale
            if apply_act:
                yn = jnp.where(yn >= 0.0, yn, slope * yn)         # LeakyReLU(0.2)
            o_ref[0, ho] = yn.astype(o_ref.dtype)


# ------------------------------- JAX glue -------------------------------------
def conv_layer_pallas(x_nhwc, w, b, stride, pad, *, apply_norm, apply_act,
                      out_dtype):
    """Conv2d (+ optional InstanceNorm2d, LeakyReLU) as one fused Pallas kernel.

    x_nhwc: (N, H, W, Cs_store) channel-last activation; channels >= w.shape[1]
            are zero lane-padding carried over from the previous layer.
    w:      (Cout, Cin, kh, kw) PyTorch-layout weight (f32 master copy).
    b:      (Cout,) bias, or None (ignored when apply_norm=True: exact cancel).
    Returns (N, Ho, Wo, Cpad) in out_dtype with Cpad = round_up(Cout, 128);
    channels >= Cout are zero and flow into the next layer unsliced.
    """
    N, H, W, Cs_store = x_nhwc.shape
    Cout, Cin, kh, kw = w.shape
    sh = sw = int(stride)
    ph = pw = int(pad)

    Hp = H + 2 * ph
    Ho = (Hp - kh) // sh + 1
    Wo = (W + 2 * pw - kw) // sw + 1
    qmax = -(-kw // sw)                               # ceil(kw / sw) column taps
    Wq = max(-(-(W + 2 * pw) // sw), Wo + qmax - 1)   # super-columns after s2d
    w_right = Wq * sw - W - pw                        # right pad (>= pw)
    Cs = sw * Cs_store                                # lane dim after s2d
    Cpad = _round_up(Cout, 128)
    kwp = qmax * sw

    # Pad once, then a *free* row-major reshape folds the W stride into the lane
    # axis: (N, Hp, Wq*sw, Cs_store) -> (N, Hp, Wq, sw*Cs_store).  No im2col copy
    # in HBM and no strided reads inside the kernel.
    xq = jnp.pad(x_nhwc.astype(jnp.bfloat16),
                 ((0, 0), (ph, ph), (pw, w_right), (0, 0)))
    xq = xq.reshape(N, Hp, Wq, Cs)

    # Weight: (Cout, Cin, kh, kw) -> (kh*qmax, sw*Cs_store, Cpad) matching the
    # space-to-depth channel order.  Rows for carried zero-pad input channels and
    # columns for the Cout->Cpad lane padding are zero (exactly neutral).
    wfull = jnp.zeros((Cout, Cs_store, kh, kwp), jnp.float32)
    wfull = wfull.at[:, :Cin, :, :kw].set(w.astype(jnp.float32))
    wk = wfull.reshape(Cout, Cs_store, kh, qmax, sw)
    wk = wk.transpose(2, 3, 4, 1, 0).reshape(kh * qmax, Cs, Cout)
    wk = jnp.pad(wk, ((0, 0), (0, 0), (0, Cpad - Cout))).astype(jnp.bfloat16)

    kern = functools.partial(
        _fused_conv_kernel, kh=kh, qmax=qmax, sh=sh, Ho=Ho, Wo=Wo,
        apply_norm=apply_norm, apply_act=apply_act, eps=1e-5, slope=0.2)

    in_specs = [
        pl.BlockSpec((1, Hp, Wq, Cs), lambda n: (n, 0, 0, 0)),
        _const_spec((kh * qmax, Cs, Cpad), lambda n: (0, 0, 0)),
    ]
    inputs = [xq, wk]
    scratch = []
    if apply_norm:
        # Pre-norm rows for one sample; the stats need every row before writing.
        scratch.append(pltpu.VMEM((Ho, Wo, Cpad), jnp.float32))
    else:
        bvec = jnp.pad(b, (0, Cpad - Cout)).reshape(1, Cpad).astype(jnp.float32)
        in_specs.append(_const_spec((1, Cpad), lambda n: (0, 0)))
        inputs.append(bvec)

    out = pl.pallas_call(
        kern,
        out_shape=jax.ShapeDtypeStruct((N, Ho, Wo, Cpad), out_dtype),
        grid=(N,),
        in_specs=in_specs,
        out_specs=pl.BlockSpec((1, Ho, Wo, Cpad), lambda n: (n, 0, 0, 0)),
        scratch_shapes=tuple(scratch),
        compiler_params=pltpu.CompilerParams(
            # Batch axis is fully independent -> sharded across v7x's two
            # TensorCores; neutral on single-TC v5e/v6e.
            dimension_semantics=("parallel",),
            vmem_limit_bytes=_vmem_limit_bytes(),
        ),
    )(*inputs)
    return out


# --------------------------- Discriminator module -----------------------------
class Discriminator:
    def __init__(self, input_dim, conv_filters, conv_kernels, conv_strides,
                 conv_pads, norm, key):
        self.input_dim = input_dim
        self.conv_filters = list(conv_filters)
        self.conv_kernels = list(conv_kernels)
        self.conv_strides = list(conv_strides)
        self.conv_pads = list(conv_pads)
        self.norm = norm
        self.num_layers = len(self.conv_filters)

        chans = [input_dim] + self.conv_filters
        self.params = []
        for i in range(self.num_layers):
            key, kw_, kb_ = jax.random.split(key, 3)
            cin, cout, k = chans[i], chans[i + 1], self.conv_kernels[i]
            fan_in = cin * k * k
            bound = 1.0 / jnp.sqrt(fan_in)
            w = jax.random.uniform(kw_, (cout, cin, k, k), jnp.float32,
                                   -bound, bound)
            # Hidden-layer biases exist for parameter parity with the PyTorch
            # module but are never applied: InstanceNorm2d's mean subtraction
            # cancels a per-channel bias exactly.
            b = jax.random.uniform(kb_, (cout,), jnp.float32, -bound, bound)
            self.params.append((w, b))

        # final out conv: Conv2d(conv_filters[-1], 1, kernel=3, stride=1, pad=1)
        key, kw_, kb_ = jax.random.split(key, 3)
        cin = self.conv_filters[-1]
        fan_in = cin * 3 * 3
        bound = 1.0 / jnp.sqrt(fan_in)
        self.out_w = jax.random.uniform(kw_, (1, cin, 3, 3), jnp.float32,
                                        -bound, bound)
        self.out_b = jax.random.uniform(kb_, (1,), jnp.float32, -bound, bound)

        # Warm the host-side probes eagerly (outside any jit trace).
        _single_buffer_supported()
        _vmem_limit_bytes()

    def __call__(self, x_nchw):
        # NCHW -> NHWC once at the entry; channel-last (lane axis = C) in between.
        x = x_nchw.transpose(0, 2, 3, 1)
        for i in range(self.num_layers):
            w, _ = self.params[i]
            # Matches the PyTorch reference exactly: hidden layers always apply
            # InstanceNorm2d; LeakyReLU(0.2) is present only when norm=True.
            x = conv_layer_pallas(
                x, w, None, self.conv_strides[i], self.conv_pads[i],
                apply_norm=True, apply_act=self.norm, out_dtype=jnp.bfloat16)
        # final output conv: plain Conv2d with bias (no norm, no act), f32 result.
        x = conv_layer_pallas(x, self.out_w, self.out_b, 1, 1,
                              apply_norm=False, apply_act=False,
                              out_dtype=jnp.float32)
        # TODO(synk): the 1-channel head still uses 128 MXU columns/lanes; fold it
        # into the previous layer's epilogue if it ever shows up in a profile.
        x = x[..., :self.out_w.shape[0]]
        # NHWC -> NCHW once at the exit (matches the PyTorch output layout).
        return x.transpose(0, 3, 1, 2)


# ---------------------------------- main --------------------------------------
if __name__ == "__main__":
    key = jax.random.PRNGKey(0)
    k_in, k_params = jax.random.split(key)

    # Small shapes consistent with the module: N=2, C=4, H=W=16
    x = jax.random.normal(k_in, (2, 4, 16, 16), jnp.float32)

    disc = Discriminator(
        input_dim=4,
        conv_filters=[8, 16],
        conv_kernels=[4, 4],
        conv_strides=[2, 2],
        conv_pads=[1, 1],
        norm=True,
        key=k_params,
    )

    y = jax.jit(disc.__call__)(x)
    jax.block_until_ready(y)
    assert y.shape == (2, 1, 4, 4), y.shape
    print("KERNEL_OK")
</pallas_src>

<mosaic_0001>
module attributes {stable_mosaic.version = 11 : i64} {
  func.func @_fused_conv_kernel(%arg0: i32, %arg1: memref<1x6x6x128xbf16, #tpu.memory_space<vmem>>, %arg2: memref<9x128x128xbf16, #tpu.memory_space<vmem>>, %arg3: memref<1x128xf32, #tpu.memory_space<vmem>>, %arg4: memref<1x4x4x128xf32, #tpu.memory_space<vmem>>) attributes {dimension_semantics = [#tpu.dimension_semantics<parallel>], iteration_bounds = array<i64: 2>, scalar_prefetch = 0 : i64, scratch_operands = 0 : i64, tpu.core_type = #tpu.core_type<tc>, window_params = [{transform_indices = @transform_0, window_bounds = array<i64: 1, 6, 6, 128>}, {pipeline_mode = #tpu.pipeline_mode<synchronous>, transform_indices = @transform_1, window_bounds = array<i64: 9, 128, 128>}, {pipeline_mode = #tpu.pipeline_mode<synchronous>, transform_indices = @transform_2, window_bounds = array<i64: 1, 128>}, {transform_indices = @transform_3, window_bounds = array<i64: 1, 4, 4, 128>}]} {
    %c0 = arith.constant 0 : index
    %c0_0 = arith.constant 0 : index
    %0 = vector.load %arg3[%c0, %c0_0] : memref<1x128xf32, #tpu.memory_space<vmem>>, vector<1x128xf32>
    %cst = arith.constant 0.000000e+00 : f32
    %1 = vector.broadcast %cst : f32 to vector<4x128xf32>
    %c0_1 = arith.constant 0 : index
    %c0_2 = arith.constant 0 : index
    %c0_3 = arith.constant 0 : index
    %c0_4 = arith.constant 0 : index
    %2 = vector.load %arg1[%c0_1, %c0_2, %c0_3, %c0_4] : memref<1x6x6x128xbf16, #tpu.memory_space<vmem>>, vector<1x1x4x128xbf16>
    %3 = vector.shape_cast %2 : vector<1x1x4x128xbf16> to vector<4x128xbf16>
    %c0_5 = arith.constant 0 : index
    %c0_6 = arith.constant 0 : index
    %c0_7 = arith.constant 0 : index
    %4 = vector.load %arg2[%c0_5, %c0_6, %c0_7] : memref<9x128x128xbf16, #tpu.memory_space<vmem>>, vector<1x128x128xbf16>
    %5 = vector.shape_cast %4 : vector<1x128x128xbf16> to vector<128x128xbf16>
    %cst_8 = arith.constant dense<0.000000e+00> : vector<4x128xf32>
    %6 = tpu.matmul %3, %5, %cst_8 {dimension_numbers = #tpu.dot_dimension_numbers<[1], [0], [0], [1], [0, 0, 1, 1], [], []>} : vector<4x128xbf16>, vector<128x128xbf16>, vector<4x128xf32> -> vector<4x128xf32>
    %7 = arith.addf %1, %6 : vector<4x128xf32>
    %c0_9 = arith.constant 0 : index
    %c0_10 = arith.constant 0 : index
    %c1 = arith.constant 1 : index
    %c0_11 = arith.constant 0 : index
    %8 = vector.load %arg1[%c0_9, %c0_10, %c1, %c0_11] : memref<1x6x6x128xbf16, #tpu.memory_space<vmem>>, vector<1x1x4x128xbf16>
    %9 = vector.shape_cast %8 : vector<1x1x4x128xbf16> to vector<4x128xbf16>
    %c1_12 = arith.constant 1 : index
    %c0_13 = arith.constant 0 : index
    %c0_14 = arith.constant 0 : index
    %10 = vector.load %arg2[%c1_12, %c0_13, %c0_14] : memref<9x128x128xbf16, #tpu.memory_space<vmem>>, vector<1x128x128xbf16>
    %11 = vector.shape_cast %10 : vector<1x128x128xbf16> to vector<128x128xbf16>
    %cst_15 = arith.constant dense<0.000000e+00> : vector<4x128xf32>
    %12 = tpu.matmul %9, %11, %cst_15 {dimension_numbers = #tpu.dot_dimension_numbers<[1], [0], [0], [1], [0, 0, 1, 1], [], []>} : vector<4x128xbf16>, vector<128x128xbf16>, vector<4x128xf32> -> vector<4x128xf32>
    %13 = arith.addf %7, %12 : vector<4x128xf32>
    %c0_16 = arith.constant 0 : index
    %c0_17 = arith.constant 0 : index
    %c2 = arith.constant 2 : index
    %c0_18 = arith.constant 0 : index
    %14 = vector.load %arg1[%c0_16, %c0_17, %c2, %c0_18] : memref<1x6x6x128xbf16, #tpu.memory_space<vmem>>, vector<1x1x4x128xbf16>
    %15 = vector.shape_cast %14 : vector<1x1x4x128xbf16> to vector<4x128xbf16>
    %c2_19 = arith.constant 2 : index
    %c0_20 = arith.constant 0 : index
    %c0_21 = arith.constant 0 : index
    %16 = vector.load %arg2[%c2_19, %c0_20, %c0_21] : memref<9x128x128xbf16, #tpu.memory_space<vmem>>, vector<1x128x128xbf16>
    %17 = vector.shape_cast %16 : vector<1x128x128xbf16> to vector<128x128xbf16>
    %cst_22 = arith.constant dense<0.000000e+00> : vector<4x128xf32>
    %18 = tpu.matmul %15, %17, %cst_22 {dimension_numbers = #tpu.dot_dimension_numbers<[1], [0], [0], [1], [0, 0, 1, 1], [], []>} : vector<4x128xbf16>, vector<128x128xbf16>, vector<4x128xf32> -> vector<4x128xf32>
    %19 = arith.addf %13, %18 : vector<4x128xf32>
    %c0_23 = arith.constant 0 : index
    %c1_24 = arith.constant 1 : index
    %c0_25 = arith.constant 0 : index
    %c0_26 = arith.constant 0 : index
    %20 = vector.load %arg1[%c0_23, %c1_24, %c0_25, %c0_26] : memref<1x6x6x128xbf16, #tpu.memory_space<vmem>>, vector<1x1x4x128xbf16>
    %21 = vector.shape_cast %20 : vector<1x1x4x128xbf16> to vector<4x128xbf16>
    %c3 = arith.constant 3 : index
    %c0_27 = arith.constant 0 : index
    %c0_28 = arith.constant 0 : index
    %22 = vector.load %arg2[%c3, %c0_27, %c0_28] : memref<9x128x128xbf16, #tpu.memory_space<vmem>>, vector<1x128x128xbf16>
    %23 = vector.shape_cast %22 : vector<1x128x128xbf16> to vector<128x128xbf16>
    %cst_29 = arith.constant dense<0.000000e+00> : vector<4x128xf32>
    %24 = tpu.matmul %21, %23, %cst_29 {dimension_numbers = #tpu.dot_dimension_numbers<[1], [0], [0], [1], [0, 0, 1, 1], [], []>} : vector<4x128xbf16>, vector<128x128xbf16>, vector<4x128xf32> -> vector<4x128xf32>
    %25 = arith.addf %19, %24 : vector<4x128xf32>
    %c0_30 = arith.constant 0 : index
    %c1_31 = arith.constant 1 : index
    %c1_32 = arith.constant 1 : index
    %c0_33 = arith.constant 0 : index
    %26 = vector.load %arg1[%c0_30, %c1_31, %c1_32, %c0_33] : memref<1x6x6x128xbf16, #tpu.memory_space<vmem>>, vector<1x1x4x128xbf16>
    %27 = vector.shape_cast %26 : vector<1x1x4x128xbf16> to vector<4x128xbf16>
    %c4 = arith.constant 4 : index
    %c0_34 = arith.constant 0 : index
    %c0_35 = arith.constant 0 : index
    %28 = vector.load %arg2[%c4, %c0_34, %c0_35] : memref<9x128x128xbf16, #tpu.memory_space<vmem>>, vector<1x128x128xbf16>
    %29 = vector.shape_cast %28 : vector<1x128x128xbf16> to vector<128x128xbf16>
    %cst_36 = arith.constant dense<0.000000e+00> : vector<4x128xf32>
    %30 = tpu.matmul %27, %29, %cst_36 {dimension_numbers = #tpu.dot_dimension_numbers<[1], [0], [0], [1], [0, 0, 1, 1], [], []>} : vector<4x128xbf16>, vector<128x128xbf16>, vector<4x128xf32> -> vector<4x128xf32>
    %31 = arith.addf %25, %30 : vector<4x128xf32>
    %c0_37 = arith.constant 0 : index
    %c1_38 = arith.constant 1 : index
    %c2_39 = arith.constant 2 : index
    %c0_40 = arith.constant 0 : index
    %32 = vector.load %arg1[%c0_37, %c1_38, %c2_39, %c0_40] : memref<1x6x6x128xbf16, #tpu.memory_space<vmem>>, vector<1x1x4x128xbf16>
    %33 = vector.shape_cast %32 : vector<1x1x4x128xbf16> to vector<4x128xbf16>
    %c5 = arith.constant 5 : index
    %c0_41 = arith.constant 0 : index
    %c0_42 = arith.constant 0 : index
    %34 = vector.load %arg2[%c5, %c0_41, %c0_42] : memref<9x128x128xbf16, #tpu.memory_space<vmem>>, vector<1x128x128xbf16>
    %35 = vector.shape_cast %34 : vector<1x128x128xbf16> to vector<128x128xbf16>
    %cst_43 = arith.constant dense<0.000000e+00> : vector<4x128xf32>
    %36 = tpu.matmul %33, %35, %cst_43 {dimension_numbers = #tpu.dot_dimension_numbers<[1], [0], [0], [1], [0, 0, 1, 1], [], []>} : vector<4x128xbf16>, vector<128x128xbf16>, vector<4x128xf32> -> vector<4x128xf32>
    %37 = arith.addf %31, %36 : vector<4x128xf32>
    %c0_44 = arith.constant 0 : index
    %c2_45 = arith.constant 2 : index
    %c0_46 = arith.constant 0 : index
    %c0_47 = arith.constant 0 : index
    %38 = vector.load %arg1[%c0_44, %c2_45, %c0_46, %c0_47] : memref<1x6x6x128xbf16, #tpu.memory_space<vmem>>, vector<1x1x4x128xbf16>
    %39 = vector.shape_cast %38 : vector<1x1x4x128xbf16> to vector<4x128xbf16>
    %c6 = arith.constant 6 : index
    %c0_48 = arith.constant 0 : index
    %c0_49 = arith.constant 0 : index
    %40 = vector.load %arg2[%c6, %c0_48, %c0_49] : memref<9x128x128xbf16, #tpu.memory_space<vmem>>, vector<1x128x128xbf16>
    %41 = vector.shape_cast %40 : vector<1x128x128xbf16> to vector<128x128xbf16>
    %cst_50 = arith.constant dense<0.000000e+00> : vector<4x128xf32>
    %42 = tpu.matmul %39, %41, %cst_50 {dimension_numbers = #tpu.dot_dimension_numbers<[1], [0], [0], [1], [0, 0, 1, 1], [], []>} : vector<4x128xbf16>, vector<128x128xbf16>, vector<4x128xf32> -> vector<4x128xf32>
    %43 = arith.addf %37, %42 : vector<4x128xf32>
    %c0_51 = arith.constant 0 : index
    %c2_52 = arith.constant 2 : index
    %c1_53 = arith.constant 1 : index
    %c0_54 = arith.constant 0 : index
    %44 = vector.load %arg1[%c0_51, %c2_52, %c1_53, %c0_54] : memref<1x6x6x128xbf16, #tpu.memory_space<vmem>>, vector<1x1x4x128xbf16>
    %45 = vector.shape_cast %44 : vector<1x1x4x128xbf16> to vector<4x128xbf16>
    %c7 = arith.constant 7 : index
    %c0_55 = arith.constant 0 : index
    %c0_56 = arith.constant 0 : index
    %46 = vector.load %arg2[%c7, %c0_55, %c0_56] : memref<9x128x128xbf16, #tpu.memory_space<vmem>>, vector<1x128x128xbf16>
    %47 = vector.shape_cast %46 : vector<1x128x128xbf16> to vector<128x128xbf16>
    %cst_57 = arith.constant dense<0.000000e+00> : vector<4x128xf32>
    %48 = tpu.matmul %45, %47, %cst_57 {dimension_numbers = #tpu.dot_dimension_numbers<[1], [0], [0], [1], [0, 0, 1, 1], [], []>} : vector<4x128xbf16>, vector<128x128xbf16>, vector<4x128xf32> -> vector<4x128xf32>
    %49 = arith.addf %43, %48 : vector<4x128xf32>
    %c0_58 = arith.constant 0 : index
    %c2_59 = arith.constant 2 : index
    %c2_60 = arith.constant 2 : index
    %c0_61 = arith.constant 0 : index
    %50 = vector.load %arg1[%c0_58, %c2_59, %c2_60, %c0_61] : memref<1x6x6x128xbf16, #tpu.memory_space<vmem>>, vector<1x1x4x128xbf16>
    %51 = vector.shape_cast %50 : vector<1x1x4x128xbf16> to vector<4x128xbf16>
    %c8 = arith.constant 8 : index
    %c0_62 = arith.constant 0 : index
    %c0_63 = arith.constant 0 : index
    %52 = vector.load %arg2[%c8, %c0_62, %c0_63] : memref<9x128x128xbf16, #tpu.memory_space<vmem>>, vector<1x128x128xbf16>
    %53 = vector.shape_cast %52 : vector<1x128x128xbf16> to vector<128x128xbf16>
    %cst_64 = arith.constant dense<0.000000e+00> : vector<4x128xf32>
    %54 = tpu.matmul %51, %53, %cst_64 {dimension_numbers = #tpu.dot_dimension_numbers<[1], [0], [0], [1], [0, 0, 1, 1], [], []>} : vector<4x128xbf16>, vector<128x128xbf16>, vector<4x128xf32> -> vector<4x128xf32>
    %55 = arith.addf %49, %54 : vector<4x128xf32>
    %56 = vector.broadcast %0 : vector<1x128xf32> to vector<4x128xf32>
    %57 = arith.addf %55, %56 : vector<4x128xf32>
    %c0_65 = arith.constant 0 : index
    %c0_66 = arith.constant 0 : index
    %c0_67 = arith.constant 0 : index
    %c0_68 = arith.constant 0 : index
    %58 = vector.load %arg4[%c0_65, %c0_66, %c0_67, %c0_68] : memref<1x4x4x128xf32, #tpu.memory_space<vmem>>, vector<1x1x4x128xf32>
    %59 = vector.shape_cast %58 : vector<1x1x4x128xf32> to vector<4x128xf32>
    %60 = vector.shape_cast %57 : vector<4x128xf32> to vector<1x1x4x128xf32>
    tpu.vector_store %arg4[%c0_65, %c0_66, %c0_67, %c0_68], %60 {strides = array<i32>} : memref<1x4x4x128xf32, #tpu.memory_space<vmem>>, vector<1x1x4x128xf32>,
    %cst_69 = arith.constant 0.000000e+00 : f32
    %61 = vector.broadcast %cst_69 : f32 to vector<4x128xf32>
    %c0_70 = arith.constant 0 : index
    %c1_71 = arith.constant 1 : index
    %c0_72 = arith.constant 0 : index
    %c0_73 = arith.constant 0 : index
    %62 = vector.load %arg1[%c0_70, %c1_71, %c0_72, %c0_73] : memref<1x6x6x128xbf16, #tpu.memory_space<vmem>>, vector<1x1x4x128xbf16>
    %63 = vector.shape_cast %62 : vector<1x1x4x128xbf16> to vector<4x128xbf16>
    %c0_74 = arith.constant 0 : index
    %c0_75 = arith.constant 0 : index
    %c0_76 = arith.constant 0 : index
    %64 = vector.load %arg2[%c0_74, %c0_75, %c0_76] : memref<9x128x128xbf16, #tpu.memory_space<vmem>>, vector<1x128x128xbf16>
    %65 = vector.shape_cast %64 : vector<1x128x128xbf16> to vector<128x128xbf16>
    %cst_77 = arith.constant dense<0.000000e+00> : vector<4x128xf32>
    %66 = tpu.matmul %63, %65, %cst_77 {dimension_numbers = #tpu.dot_dimension_numbers<[1], [0], [0], [1], [0, 0, 1, 1], [], []>} : vector<4x128xbf16>, vector<128x128xbf16>, vector<4x128xf32> -> vector<4x128xf32>
    %67 = arith.addf %61, %66 : vector<4x128xf32>
    %c0_78 = arith.constant 0 : index
    %c1_79 = arith.constant 1 : index
    %c1_80 = arith.constant 1 : index
    %c0_81 = arith.constant 0 : index
    %68 = vector.load %arg1[%c0_78, %c1_79, %c1_80, %c0_81] : memref<1x6x6x128xbf16, #tpu.memory_space<vmem>>, vector<1x1x4x128xbf16>
    %69 = vector.shape_cast %68 : vector<1x1x4x128xbf16> to vector<4x128xbf16>
    %c1_82 = arith.constant 1 : index
    %c0_83 = arith.constant 0 : index
    %c0_84 = arith.constant 0 : index
    %70 = vector.load %arg2[%c1_82, %c0_83, %c0_84] : memref<9x128x128xbf16, #tpu.memory_space<vmem>>, vector<1x128x128xbf16>
    %71 = vector.shape_cast %70 : vector<1x128x128xbf16> to vector<128x128xbf16>
    %cst_85 = arith.constant dense<0.000000e+00> : vector<4x128xf32>
    %72 = tpu.matmul %69, %71, %cst_85 {dimension_numbers = #tpu.dot_dimension_numbers<[1], [0], [0], [1], [0, 0, 1, 1], [], []>} : vector<4x128xbf16>, vector<128x128xbf16>, vector<4x128xf32> -> vector<4x128xf32>
    %73 = arith.addf %67, %72 : vector<4x128xf32>
    %c0_86 = arith.constant 0 : index
    %c1_87 = arith.constant 1 : index
    %c2_88 = arith.constant 2 : index
    %c0_89 = arith.constant 0 : index
    %74 = vector.load %arg1[%c0_86, %c1_87, %c2_88, %c0_89] : memref<1x6x6x128xbf16, #tpu.memory_space<vmem>>, vector<1x1x4x128xbf16>
    %75 = vector.shape_cast %74 : vector<1x1x4x128xbf16> to vector<4x128xbf16>
    %c2_90 = arith.constant 2 : index
    %c0_91 = arith.constant 0 : index
    %c0_92 = arith.constant 0 : index
    %76 = vector.load %arg2[%c2_90, %c0_91, %c0_92] : memref<9x128x128xbf16, #tpu.memory_space<vmem>>, vector<1x128x128xbf16>
    %77 = vector.shape_cast %76 : vector<1x128x128xbf16> to vector<128x128xbf16>
    %cst_93 = arith.constant dense<0.000000e+00> : vector<4x128xf32>
    %78 = tpu.matmul %75, %77, %cst_93 {dimension_numbers = #tpu.dot_dimension_numbers<[1], [0], [0], [1], [0, 0, 1, 1], [], []>} : vector<4x128xbf16>, vector<128x128xbf16>, vector<4x128xf32> -> vector<4x128xf32>
    %79 = arith.addf %73, %78 : vector<4x128xf32>
    %c0_94 = arith.constant 0 : index
    %c2_95 = arith.constant 2 : index
    %c0_96 = arith.constant 0 : index
    %c0_97 = arith.constant 0 : index
    %80 = vector.load %arg1[%c0_94, %c2_95, %c0_96, %c0_97] : memref<1x6x6x128xbf16, #tpu.memory_space<vmem>>, vector<1x1x4x128xbf16>
    %81 = vector.shape_cast %80 : vector<1x1x4x128xbf16> to vector<4x128xbf16>
    %c3_98 = arith.constant 3 : index
    %c0_99 = arith.constant 0 : index
    %c0_100 = arith.constant 0 : index
    %82 = vector.load %arg2[%c3_98, %c0_99, %c0_100] : memref<9x128x128xbf16, #tpu.memory_space<vmem>>, vector<1x128x128xbf16>
    %83 = vector.shape_cast %82 : vector<1x128x128xbf16> to vector<128x128xbf16>
    %cst_101 = arith.constant dense<0.000000e+00> : vector<4x128xf32>
    %84 = tpu.matmul %81, %83, %cst_101 {dimension_numbers = #tpu.dot_dimension_numbers<[1], [0], [0], [1], [0, 0, 1, 1], [], []>} : vector<4x128xbf16>, vector<128x128xbf16>, vector<4x128xf32> -> vector<4x128xf32>
    %85 = arith.addf %79, %84 : vector<4x128xf32>
    %c0_102 = arith.constant 0 : index
    %c2_103 = arith.constant 2 : index
    %c1_104 = arith.constant 1 : index
    %c0_105 = arith.constant 0 : index
    %86 = vector.load %arg1[%c0_102, %c2_103, %c1_104, %c0_105] : memref<1x6x6x128xbf16, #tpu.memory_space<vmem>>, vector<1x1x4x128xbf16>
    %87 = vector.shape_cast %86 : vector<1x1x4x128xbf16> to vector<4x128xbf16>
    %c4_106 = arith.constant 4 : index
    %c0_107 = arith.constant 0 : index
    %c0_108 = arith.constant 0 : index
    %88 = vector.load %arg2[%c4_106, %c0_107, %c0_108] : memref<9x128x128xbf16, #tpu.memory_space<vmem>>, vector<1x128x128xbf16>
    %89 = vector.shape_cast %88 : vector<1x128x128xbf16> to vector<128x128xbf16>
    %cst_109 = arith.constant dense<0.000000e+00> : vector<4x128xf32>
    %90 = tpu.matmul %87, %89, %cst_109 {dimension_numbers = #tpu.dot_dimension_numbers<[1], [0], [0], [1], [0, 0, 1, 1], [], []>} : vector<4x128xbf16>, vector<128x128xbf16>, vector<4x128xf32> -> vector<4x128xf32>
    %91 = arith.addf %85, %90 : vector<4x128xf32>
    %c0_110 = arith.constant 0 : index
    %c2_111 = arith.constant 2 : index
    %c2_112 = arith.constant 2 : index
    %c0_113 = arith.constant 0 : index
    %92 = vector.load %arg1[%c0_110, %c2_111, %c2_112, %c0_113] : memref<1x6x6x128xbf16, #tpu.memory_space<vmem>>, vector<1x1x4x128xbf16>
    %93 = vector.shape_cast %92 : vector<1x1x4x128xbf16> to vector<4x128xbf16>
    %c5_114 = arith.constant 5 : index
    %c0_115 = arith.constant 0 : index
    %c0_116 = arith.constant 0 : index
    %94 = vector.load %arg2[%c5_114, %c0_115, %c0_116] : memref<9x128x128xbf16, #tpu.memory_space<vmem>>, vector<1x128x128xbf16>
    %95 = vector.shape_cast %94 : vector<1x128x128xbf16> to vector<128x128xbf16>
    %cst_117 = arith.constant dense<0.000000e+00> : vector<4x128xf32>
    %96 = tpu.matmul %93, %95, %cst_117 {dimension_numbers = #tpu.dot_dimension_numbers<[1], [0], [0], [1], [0, 0, 1, 1], [], []>} : vector<4x128xbf16>, vector<128x128xbf16>, vector<4x128xf32> -> vector<4x128xf32>
    %97 = arith.addf %91, %96 : vector<4x128xf32>
    %c0_118 = arith.constant 0 : index
    %c3_119 = arith.constant 3 : index
    %c0_120 = arith.constant 0 : index
    %c0_121 = arith.constant 0 : index
    %98 = vector.load %arg1[%c0_118, %c3_119, %c0_120, %c0_121] : memref<1x6x6x128xbf16, #tpu.memory_space<vmem>>, vector<1x1x4x128xbf16>
    %99 = vector.shape_cast %98 : vector<1x1x4x128xbf16> to vector<4x128xbf16>
    %c6_122 = arith.constant 6 : index
    %c0_123 = arith.constant 0 : index
    %c0_124 = arith.constant 0 : index
    %100 = vector.load %arg2[%c6_122, %c0_123, %c0_124] : memref<9x128x128xbf16, #tpu.memory_space<vmem>>, vector<1x128x128xbf16>
    %101 = vector.shape_cast %100 : vector<1x128x128xbf16> to vector<128x128xbf16>
    %cst_125 = arith.constant dense<0.000000e+00> : vector<4x128xf32>
    %102 = tpu.matmul %99, %101, %cst_125 {dimension_numbers = #tpu.dot_dimension_numbers<[1], [0], [0], [1], [0, 0, 1, 1], [], []>} : vector<4x128xbf16>, vector<128x128xbf16>, vector<4x128xf32> -> vector<4x128xf32>
    %103 = arith.addf %97, %102 : vector<4x128xf32>
    %c0_126 = arith.constant 0 : index
    %c3_127 = arith.constant 3 : index
    %c1_128 = arith.constant 1 : index
    %c0_129 = arith.constant 0 : index
    %104 = vector.load %arg1[%c0_126, %c3_127, %c1_128, %c0_129] : memref<1x6x6x128xbf16, #tpu.memory_space<vmem>>, vector<1x1x4x128xbf16>
    %105 = vector.shape_cast %104 : vector<1x1x4x128xbf16> to vector<4x128xbf16>
    %c7_130 = arith.constant 7 : index
    %c0_131 = arith.constant 0 : index
    %c0_132 = arith.constant 0 : index
    %106 = vector.load %arg2[%c7_130, %c0_131, %c0_132] : memref<9x128x128xbf16, #tpu.memory_space<vmem>>, vector<1x128x128xbf16>
    %107 = vector.shape_cast %106 : vector<1x128x128xbf16> to vector<128x128xbf16>
    %cst_133 = arith.constant dense<0.000000e+00> : vector<4x128xf32>
    %108 = tpu.matmul %105, %107, %cst_133 {dimension_numbers = #tpu.dot_dimension_numbers<[1], [0], [0], [1], [0, 0, 1, 1], [], []>} : vector<4x128xbf16>, vector<128x128xbf16>, vector<4x128xf32> -> vector<4x128xf32>
    %109 = arith.addf %103, %108 : vector<4x128xf32>
    %c0_134 = arith.constant 0 : index
    %c3_135 = arith.constant 3 : index
    %c2_136 = arith.constant 2 : index
    %c0_137 = arith.constant 0 : index
    %110 = vector.load %arg1[%c0_134, %c3_135, %c2_136, %c0_137] : memref<1x6x6x128xbf16, #tpu.memory_space<vmem>>, vector<1x1x4x128xbf16>
    %111 = vector.shape_cast %110 : vector<1x1x4x128xbf16> to vector<4x128xbf16>
    %c8_138 = arith.constant 8 : index
    %c0_139 = arith.constant 0 : index
    %c0_140 = arith.constant 0 : index
    %112 = vector.load %arg2[%c8_138, %c0_139, %c0_140] : memref<9x128x128xbf16, #tpu.memory_space<vmem>>, vector<1x128x128xbf16>
    %113 = vector.shape_cast %112 : vector<1x128x128xbf16> to vector<128x128xbf16>
    %cst_141 = arith.constant dense<0.000000e+00> : vector<4x128xf32>
    %114 = tpu.matmul %111, %113, %cst_141 {dimension_numbers = #tpu.dot_dimension_numbers<[1], [0], [0], [1], [0, 0, 1, 1], [], []>} : vector<4x128xbf16>, vector<128x128xbf16>, vector<4x128xf32> -> vector<4x128xf32>
    %115 = arith.addf %109, %114 : vector<4x128xf32>
    %116 = vector.broadcast %0 : vector<1x128xf32> to vector<4x128xf32>
    %117 = arith.addf %115, %116 : vector<4x128xf32>
    %c0_142 = arith.constant 0 : index
    %c1_143 = arith.constant 1 : index
    %c0_144 = arith.constant 0 : index
    %c0_145 = arith.constant 0 : index
    %118 = vector.load %arg4[%c0_142, %c1_143, %c0_144, %c0_145] : memref<1x4x4x128xf32, #tpu.memory_space<vmem>>, vector<1x1x4x128xf32>
    %119 = vector.shape_cast %118 : vector<1x1x4x128xf32> to vector<4x128xf32>
    %120 = vector.shape_cast %117 : vector<4x128xf32> to vector<1x1x4x128xf32>
    tpu.vector_store %arg4[%c0_142, %c1_143, %c0_144, %c0_145], %120 {strides = array<i32>} : memref<1x4x4x128xf32, #tpu.memory_space<vmem>>, vector<1x1x4x128xf32>,
    %cst_146 = arith.constant 0.000000e+00 : f32
    %121 = vector.broadcast %cst_146 : f32 to vector<4x128xf32>
    %c0_147 = arith.constant 0 : index
    %c2_148 = arith.constant 2 : index
    %c0_149 = arith.constant 0 : index
    %c0_150 = arith.constant 0 : index
    %122 = vector.load %arg1[%c0_147, %c2_148, %c0_149, %c0_150] : memref<1x6x6x128xbf16, #tpu.memory_space<vmem>>, vector<1x1x4x128xbf16>
    %123 = vector.shape_cast %122 : vector<1x1x4x128xbf16> to vector<4x128xbf16>
    %c0_151 = arith.constant 0 : index
    %c0_152 = arith.constant 0 : index
    %c0_153 = arith.constant 0 : index
    %124 = vector.load %arg2[%c0_151, %c0_152, %c0_153] : memref<9x128x128xbf16, #tpu.memory_space<vmem>>, vector<1x128x128xbf16>
    %125 = vector.shape_cast %124 : vector<1x128x128xbf16> to vector<128x128xbf16>
    %cst_154 = arith.constant dense<0.000000e+00> : vector<4x128xf32>
    %126 = tpu.matmul %123, %125, %cst_154 {dimension_numbers = #tpu.dot_dimension_numbers<[1], [0], [0], [1], [0, 0, 1, 1], [], []>} : vector<4x128xbf16>, vector<128x128xbf16>, vector<4x128xf32> -> vector<4x128xf32>
    %127 = arith.addf %121, %126 : vector<4x128xf32>
    %c0_155 = arith.constant 0 : index
    %c2_156 = arith.constant 2 : index
    %c1_157 = arith.constant 1 : index
    %c0_158 = arith.constant 0 : index
    %128 = vector.load %arg1[%c0_155, %c2_156, %c1_157, %c0_158] : memref<1x6x6x128xbf16, #tpu.memory_space<vmem>>, vector<1x1x4x128xbf16>
    %129 = vector.shape_cast %128 : vector<1x1x4x128xbf16> to vector<4x128xbf16>
    %c1_159 = arith.constant 1 : index
    %c0_160 = arith.constant 0 : index
    %c0_161 = arith.constant 0 : index
    %130 = vector.load %arg2[%c1_159, %c0_160, %c0_161] : memref<9x128x128xbf16, #tpu.memory_space<vmem>>, vector<1x128x128xbf16>
    %131 = vector.shape_cast %130 : vector<1x128x128xbf16> to vector<128x128xbf16>
    %cst_162 = arith.constant dense<0.000000e+00> : vector<4x128xf32>
    %132 = tpu.matmul %129, %131, %cst_162 {dimension_numbers = #tpu.dot_dimension_numbers<[1], [0], [0], [1], [0, 0, 1, 1], [], []>} : vector<4x128xbf16>, vector<128x128xbf16>, vector<4x128xf32> -> vector<4x128xf32>
    %133 = arith.addf %127, %132 : vector<4x128xf32>
    %c0_163 = arith.constant 0 : index
    %c2_164 = arith.constant 2 : index
    %c2_165 = arith.constant 2 : index
    %c0_166 = arith.constant 0 : index
    %134 = vector.load %arg1[%c0_163, %c2_164, %c2_165, %c0_166] : memref<1x6x6x128xbf16, #tpu.memory_space<vmem>>, vector<1x1x4x128xbf16>
    %135 = vector.shape_cast %134 : vector<1x1x4x128xbf16> to vector<4x128xbf16>
    %c2_167 = arith.constant 2 : index
    %c0_168 = arith.constant 0 : index
    %c0_169 = arith.constant 0 : index
    %136 = vector.load %arg2[%c2_167, %c0_168, %c0_169] : memref<9x128x128xbf16, #tpu.memory_space<vmem>>, vector<1x128x128xbf16>
    %137 = vector.shape_cast %136 : vector<1x128x128xbf16> to vector<128x128xbf16>
    %cst_170 = arith.constant dense<0.000000e+00> : vector<4x128xf32>
    %138 = tpu.matmul %135, %137, %cst_170 {dimension_numbers = #tpu.dot_dimension_numbers<[1], [0], [0], [1], [0, 0, 1, 1], [], []>} : vector<4x128xbf16>, vector<128x128xbf16>, vector<4x128xf32> -> vector<4x128xf32>
    %139 = arith.addf %133, %138 : vector<4x128xf32>
    %c0_171 = arith.constant 0 : index
    %c3_172 = arith.constant 3 : index
    %c0_173 = arith.constant 0 : index
    %c0_174 = arith.constant 0 : index
    %140 = vector.load %arg1[%c0_171, %c3_172, %c0_173, %c0_174] : memref<1x6x6x128xbf16, #tpu.memory_space<vmem>>, vector<1x1x4x128xbf16>
    %141 = vector.shape_cast %140 : vector<1x1x4x128xbf16> to vector<4x128xbf16>
    %c3_175 = arith.constant 3 : index
    %c0_176 = arith.constant 0 : index
    %c0_177 = arith.constant 0 : index
    %142 = vector.load %arg2[%c3_175, %c0_176, %c0_177] : memref<9x128x128xbf16, #tpu.memory_space<vmem>>, vector<1x128x128xbf16>
    %143 = vector.shape_cast %142 : vector<1x128x128xbf16> to vector<128x128xbf16>
    %cst_178 = arith.constant dense<0.000000e+00> : vector<4x128xf32>
    %144 = tpu.matmul %141, %143, %cst_178 {dimension_numbers = #tpu.dot_dimension_numbers<[1], [0], [0], [1], [0, 0, 1, 1], [], []>} : vector<4x128xbf16>, vector<128x128xbf16>, vector<4x128xf32> -> vector<4x128xf32>
    %145 = arith.addf %139, %144 : vector<4x128xf32>
    %c0_179 = arith.constant 0 : index
    %c3_180 = arith.constant 3 : index
    %c1_181 = arith.constant 1 : index
    %c0_182 = arith.constant 0 : index
    %146 = vector.load %arg1[%c0_179, %c3_180, %c1_181, %c0_182] : memref<1x6x6x128xbf16, #tpu.memory_space<vmem>>, vector<1x1x4x128xbf16>
    %147 = vector.shape_cast %146 : vector<1x1x4x128xbf16> to vector<4x128xbf16>
    %c4_183 = arith.constant 4 : index
    %c0_184 = arith.constant 0 : index
    %c0_185 = arith.constant 0 : index
    %148 = vector.load %arg2[%c4_183, %c0_184, %c0_185] : memref<9x128x128xbf16, #tpu.memory_space<vmem>>, vector<1x128x128xbf16>
    %149 = vector.shape_cast %148 : vector<1x128x128xbf16> to vector<128x128xbf16>
    %cst_186 = arith.constant dense<0.000000e+00> : vector<4x128xf32>
    %150 = tpu.matmul %147, %149, %cst_186 {dimension_numbers = #tpu.dot_dimension_numbers<[1], [0], [0], [1], [0, 0, 1, 1], [], []>} : vector<4x128xbf16>, vector<128x128xbf16>, vector<4x128xf32> -> vector<4x128xf32>
    %151 = arith.addf %145, %150 : vector<4x128xf32>
    %c0_187 = arith.constant 0 : index
    %c3_188 = arith.constant 3 : index
    %c2_189 = arith.constant 2 : index
    %c0_190 = arith.constant 0 : index
    %152 = vector.load %arg1[%c0_187, %c3_188, %c2_189, %c0_190] : memref<1x6x6x128xbf16, #tpu.memory_space<vmem>>, vector<1x1x4x128xbf16>
    %153 = vector.shape_cast %152 : vector<1x1x4x128xbf16> to vector<4x128xbf16>
    %c5_191 = arith.constant 5 : index
    %c0_192 = arith.constant 0 : index
    %c0_193 = arith.constant 0 : index
    %154 = vector.load %arg2[%c5_191, %c0_192, %c0_193] : memref<9x128x128xbf16, #tpu.memory_space<vmem>>, vector<1x128x128xbf16>
    %155 = vector.shape_cast %154 : vector<1x128x128xbf16> to vector<128x128xbf16>
    %cst_194 = arith.constant dense<0.000000e+00> : vector<4x128xf32>
    %156 = tpu.matmul %153, %155, %cst_194 {dimension_numbers = #tpu.dot_dimension_numbers<[1], [0], [0], [1], [0, 0, 1, 1], [], []>} : vector<4x128xbf16>, vector<128x128xbf16>, vector<4x128xf32> -> vector<4x128xf32>
    %157 = arith.addf %151, %156 : vector<4x128xf32>
    %c0_195 = arith.constant 0 : index
    %c4_196 = arith.constant 4 : index
    %c0_197 = arith.constant 0 : index
    %c0_198 = arith.constant 0 : index
    %158 = vector.load %arg1[%c0_195, %c4_196, %c0_197, %c0_198] : memref<1x6x6x128xbf16, #tpu.memory_space<vmem>>, vector<1x1x4x128xbf16>
    %159 = vector.shape_cast %158 : vector<1x1x4x128xbf16> to vector<4x128xbf16>
    %c6_199 = arith.constant 6 : index
    %c0_200 = arith.constant 0 : index
    %c0_201 = arith.constant 0 : index
    %160 = vector.load %arg2[%c6_199, %c0_200, %c0_201] : memref<9x128x128xbf16, #tpu.memory_space<vmem>>, vector<1x128x128xbf16>
    %161 = vector.shape_cast %160 : vector<1x128x128xbf16> to vector<128x128xbf16>
    %cst_202 = arith.constant dense<0.000000e+00> : vector<4x128xf32>
    %162 = tpu.matmul %159, %161, %cst_202 {dimension_numbers = #tpu.dot_dimension_numbers<[1], [0], [0], [1], [0, 0, 1, 1], [], []>} : vector<4x128xbf16>, vector<128x128xbf16>, vector<4x128xf32> -> vector<4x128xf32>
    %163 = arith.addf %157, %162 : vector<4x128xf32>
    %c0_203 = arith.constant 0 : index
    %c4_204 = arith.constant 4 : index
    %c1_205 = arith.constant 1 : index
    %c0_206 = arith.constant 0 : index
    %164 = vector.load %arg1[%c0_203, %c4_204, %c1_205, %c0_206] : memref<1x6x6x128xbf16, #tpu.memory_space<vmem>>, vector<1x1x4x128xbf16>
    %165 = vector.shape_cast %164 : vector<1x1x4x128xbf16> to vector<4x128xbf16>
    %c7_207 = arith.constant 7 : index
    %c0_208 = arith.constant 0 : index
    %c0_209 = arith.constant 0 : index
    %166 = vector.load %arg2[%c7_207, %c0_208, %c0_209] : memref<9x128x128xbf16, #tpu.memory_space<vmem>>, vector<1x128x128xbf16>
    %167 = vector.shape_cast %166 : vector<1x128x128xbf16> to vector<128x128xbf16>
    %cst_210 = arith.constant dense<0.000000e+00> : vector<4x128xf32>
    %168 = tpu.matmul %165, %167, %cst_210 {dimension_numbers = #tpu.dot_dimension_numbers<[1], [0], [0], [1], [0, 0, 1, 1], [], []>} : vector<4x128xbf16>, vector<128x128xbf16>, vector<4x128xf32> -> vector<4x128xf32>
    %169 = arith.addf %163, %168 : vector<4x128xf32>
    %c0_211 = arith.constant 0 : index
    %c4_212 = arith.constant 4 : index
    %c2_213 = arith.constant 2 : index
    %c0_214 = arith.constant 0 : index
    %170 = vector.load %arg1[%c0_211, %c4_212, %c2_213, %c0_214] : memref<1x6x6x128xbf16, #tpu.memory_space<vmem>>, vector<1x1x4x128xbf16>
    %171 = vector.shape_cast %170 : vector<1x1x4x128xbf16> to vector<4x128xbf16>
    %c8_215 = arith.constant 8 : index
    %c0_216 = arith.constant 0 : index
    %c0_217 = arith.constant 0 : index
    %172 = vector.load %arg2[%c8_215, %c0_216, %c0_217] : memref<9x128x128xbf16, #tpu.memory_space<vmem>>, vector<1x128x128xbf16>
    %173 = vector.shape_cast %172 : vector<1x128x128xbf16> to vector<128x128xbf16>
    %cst_218 = arith.constant dense<0.000000e+00> : vector<4x128xf32>
    %174 = tpu.matmul %171, %173, %cst_218 {dimension_numbers = #tpu.dot_dimension_numbers<[1], [0], [0], [1], [0, 0, 1, 1], [], []>} : vector<4x128xbf16>, vector<128x128xbf16>, vector<4x128xf32> -> vector<4x128xf32>
    %175 = arith.addf %169, %174 : vector<4x128xf32>
    %176 = vector.broadcast %0 : vector<1x128xf32> to vector<4x128xf32>
    %177 = arith.addf %175, %176 : vector<4x128xf32>
    %c0_219 = arith.constant 0 : index
    %c2_220 = arith.constant 2 : index
    %c0_221 = arith.constant 0 : index
    %c0_222 = arith.constant 0 : index
    %178 = vector.load %arg4[%c0_219, %c2_220, %c0_221, %c0_222] : memref<1x4x4x128xf32, #tpu.memory_space<vmem>>, vector<1x1x4x128xf32>
    %179 = vector.shape_cast %178 : vector<1x1x4x128xf32> to vector<4x128xf32>
    %180 = vector.shape_cast %177 : vector<4x128xf32> to vector<1x1x4x128xf32>
    tpu.vector_store %arg4[%c0_219, %c2_220, %c0_221, %c0_222], %180 {strides = array<i32>} : memref<1x4x4x128xf32, #tpu.memory_space<vmem>>, vector<1x1x4x128xf32>,
    %cst_223 = arith.constant 0.000000e+00 : f32
    %181 = vector.broadcast %cst_223 : f32 to vector<4x128xf32>
    %c0_224 = arith.constant 0 : index
    %c3_225 = arith.constant 3 : index
    %c0_226 = arith.constant 0 : index
    %c0_227 = arith.constant 0 : index
    %182 = vector.load %arg1[%c0_224, %c3_225, %c0_226, %c0_227] : memref<1x6x6x128xbf16, #tpu.memory_space<vmem>>, vector<1x1x4x128xbf16>
    %183 = vector.shape_cast %182 : vector<1x1x4x128xbf16> to vector<4x128xbf16>
    %c0_228 = arith.constant 0 : index
    %c0_229 = arith.constant 0 : index
    %c0_230 = arith.constant 0 : index
    %184 = vector.load %arg2[%c0_228, %c0_229, %c0_230] : memref<9x128x128xbf16, #tpu.memory_space<vmem>>, vector<1x128x128xbf16>
    %185 = vector.shape_cast %184 : vector<1x128x128xbf16> to vector<128x128xbf16>
    %cst_231 = arith.constant dense<0.000000e+00> : vector<4x128xf32>
    %186 = tpu.matmul %183, %185, %cst_231 {dimension_numbers = #tpu.dot_dimension_numbers<[1], [0], [0], [1], [0, 0, 1, 1], [], []>} : vector<4x128xbf16>, vector<128x128xbf16>, vector<4x128xf32> -> vector<4x128xf32>
    %187 = arith.addf %181, %186 : vector<4x128xf32>
    %c0_232 = arith.constant 0 : index
    %c3_233 = arith.constant 3 : index
    %c1_234 = arith.constant 1 : index
    %c0_235 = arith.constant 0 : index
    %188 = vector.load %arg1[%c0_232, %c3_233, %c1_234, %c0_235] : memref<1x6x6x128xbf16, #tpu.memory_space<vmem>>, vector<1x1x4x128xbf16>
    %189 = vector.shape_cast %188 : vector<1x1x4x128xbf16> to vector<4x128xbf16>
    %c1_236 = arith.constant 1 : index
    %c0_237 = arith.constant 0 : index
    %c0_238 = arith.constant 0 : index
    %190 = vector.load %arg2[%c1_236, %c0_237, %c0_238] : memref<9x128x128xbf16, #tpu.memory_space<vmem>>, vector<1x128x128xbf16>
    %191 = vector.shape_cast %190 : vector<1x128x128xbf16> to vector<128x128xbf16>
    %cst_239 = arith.constant dense<0.000000e+00> : vector<4x128xf32>
    %192 = tpu.matmul %189, %191, %cst_239 {dimension_numbers = #tpu.dot_dimension_numbers<[1], [0], [0], [1], [0, 0, 1, 1], [], []>} : vector<4x128xbf16>, vector<128x128xbf16>, vector<4x128xf32> -> vector<4x128xf32>
    %193 = arith.addf %187, %192 : vector<4x128xf32>
    %c0_240 = arith.constant 0 : index
    %c3_241 = arith.constant 3 : index
    %c2_242 = arith.constant 2 : index
    %c0_243 = arith.constant 0 : index
    %194 = vector.load %arg1[%c0_240, %c3_241, %c2_242, %c0_243] : memref<1x6x6x128xbf16, #tpu.memory_space<vmem>>, vector<1x1x4x128xbf16>
    %195 = vector.shape_cast %194 : vector<1x1x4x128xbf16> to vector<4x128xbf16>
    %c2_244 = arith.constant 2 : index
    %c0_245 = arith.constant 0 : index
    %c0_246 = arith.constant 0 : index
    %196 = vector.load %arg2[%c2_244, %c0_245, %c0_246] : memref<9x128x128xbf16, #tpu.memory_space<vmem>>, vector<1x128x128xbf16>
    %197 = vector.shape_cast %196 : vector<1x128x128xbf16> to vector<128x128xbf16>
    %cst_247 = arith.constant dense<0.000000e+00> : vector<4x128xf32>
    %198 = tpu.matmul %195, %197, %cst_247 {dimension_numbers = #tpu.dot_dimension_numbers<[1], [0], [0], [1], [0, 0, 1, 1], [], []>} : vector<4x128xbf16>, vector<128x128xbf16>, vector<4x128xf32> -> vector<4x128xf32>
    %199 = arith.addf %193, %198 : vector<4x128xf32>
    %c0_248 = arith.constant 0 : index
    %c4_249 = arith.constant 4 : index
    %c0_250 = arith.constant 0 : index
    %c0_251 = arith.constant 0 : index
    %200 = vector.load %arg1[%c0_248, %c4_249, %c0_250, %c0_251] : memref<1x6x6x128xbf16, #tpu.memory_space<vmem>>, vector<1x1x4x128xbf16>
    %201 = vector.shape_cast %200 : vector<1x1x4x128xbf16> to vector<4x128xbf16>
    %c3_252 = arith.constant 3 : index
    %c0_253 = arith.constant 0 : index
    %c0_254 = arith.constant 0 : index
    %202 = vector.load %arg2[%c3_252, %c0_253, %c0_254] : memref<9x128x128xbf16, #tpu.memory_space<vmem>>, vector<1x128x128xbf16>
    %203 = vector.shape_cast %202 : vector<1x128x128xbf16> to vector<128x128xbf16>
    %cst_255 = arith.constant dense<0.000000e+00> : vector<4x128xf32>
    %204 = tpu.matmul %201, %203, %cst_255 {dimension_numbers = #tpu.dot_dimension_numbers<[1], [0], [0], [1], [0, 0, 1, 1], [], []>} : vector<4x128xbf16>, vector<128x128xbf16>, vector<4x128xf32> -> vector<4x128xf32>
    %205 = arith.addf %199, %204 : vector<4x128xf32>
    %c0_256 = arith.constant 0 : index
    %c4_257 = arith.constant 4 : index
    %c1_258 = arith.constant 1 : index
    %c0_259 = arith.constant 0 : index
    %206 = vector.load %arg1[%c0_256, %c4_257, %c1_258, %c0_259] : memref<1x6x6x128xbf16, #tpu.memory_space<vmem>>, vector<1x1x4x128xbf16>
    %207 = vector.shape_cast %206 : vector<1x1x4x128xbf16> to vector<4x128xbf16>
    %c4_260 = arith.constant 4 : index
    %c0_261 = arith.constant 0 : index
    %c0_262 = arith.constant 0 : index
    %208 = vector.load %arg2[%c4_260, %c0_261, %c0_262] : memref<9x128x128xbf16, #tpu.memory_space<vmem>>, vector<1x128x128xbf16>
    %209 = vector.shape_cast %208 : vector<1x128x128xbf16> to vector<128x128xbf16>
    %cst_263 = arith.constant dense<0.000000e+00> : vector<4x128xf32>
    %210 = tpu.matmul %207, %209, %cst_263 {dimension_numbers = #tpu.dot_dimension_numbers<[1], [0], [0], [1], [0, 0, 1, 1], [], []>} : vector<4x128xbf16>, vector<128x128xbf16>, vector<4x128xf32> -> vector<4x128xf32>
    %211 = arith.addf %205, %210 : vector<4x128xf32>
    %c0_264 = arith.constant 0 : index
    %c4_265 = arith.constant 4 : index
    %c2_266 = arith.constant 2 : index
    %c0_267 = arith.constant 0 : index
    %212 = vector.load %arg1[%c0_264, %c4_265, %c2_266, %c0_267] : memref<1x6x6x128xbf16, #tpu.memory_space<vmem>>, vector<1x1x4x128xbf16>
    %213 = vector.shape_cast %212 : vector<1x1x4x128xbf16> to vector<4x128xbf16>
    %c5_268 = arith.constant 5 : index
    %c0_269 = arith.constant 0 : index
    %c0_270 = arith.constant 0 : index
    %214 = vector.load %arg2[%c5_268, %c0_269, %c0_270] : memref<9x128x128xbf16, #tpu.memory_space<vmem>>, vector<1x128x128xbf16>
    %215 = vector.shape_cast %214 : vector<1x128x128xbf16> to vector<128x128xbf16>
    %cst_271 = arith.constant dense<0.000000e+00> : vector<4x128xf32>
    %216 = tpu.matmul %213, %215, %cst_271 {dimension_numbers = #tpu.dot_dimension_numbers<[1], [0], [0], [1], [0, 0, 1, 1], [], []>} : vector<4x128xbf16>, vector<128x128xbf16>, vector<4x128xf32> -> vector<4x128xf32>
    %217 = arith.addf %211, %216 : vector<4x128xf32>
    %c0_272 = arith.constant 0 : index
    %c5_273 = arith.constant 5 : index
    %c0_274 = arith.constant 0 : index
    %c0_275 = arith.constant 0 : index
    %218 = vector.load %arg1[%c0_272, %c5_273, %c0_274, %c0_275] : memref<1x6x6x128xbf16, #tpu.memory_space<vmem>>, vector<1x1x4x128xbf16>
    %219 = vector.shape_cast %218 : vector<1x1x4x128xbf16> to vector<4x128xbf16>
    %c6_276 = arith.constant 6 : index
    %c0_277 = arith.constant 0 : index
    %c0_278 = arith.constant 0 : index
    %220 = vector.load %arg2[%c6_276, %c0_277, %c0_278] : memref<9x128x128xbf16, #tpu.memory_space<vmem>>, vector<1x128x128xbf16>
    %221 = vector.shape_cast %220 : vector<1x128x128xbf16> to vector<128x128xbf16>
    %cst_279 = arith.constant dense<0.000000e+00> : vector<4x128xf32>
    %222 = tpu.matmul %219, %221, %cst_279 {dimension_numbers = #tpu.dot_dimension_numbers<[1], [0], [0], [1], [0, 0, 1, 1], [], []>} : vector<4x128xbf16>, vector<128x128xbf16>, vector<4x128xf32> -> vector<4x128xf32>
    %223 = arith.addf %217, %222 : vector<4x128xf32>
    %c0_280 = arith.constant 0 : index
    %c5_281 = arith.constant 5 : index
    %c1_282 = arith.constant 1 : index
    %c0_283 = arith.constant 0 : index
    %224 = vector.load %arg1[%c0_280, %c5_281, %c1_282, %c0_283] : memref<1x6x6x128xbf16, #tpu.memory_space<vmem>>, vector<1x1x4x128xbf16>
    %225 = vector.shape_cast %224 : vector<1x1x4x128xbf16> to vector<4x128xbf16>
    %c7_284 = arith.constant 7 : index
    %c0_285 = arith.constant 0 : index
    %c0_286 = arith.constant 0 : index
    %226 = vector.load %arg2[%c7_284, %c0_285, %c0_286] : memref<9x128x128xbf16, #tpu.memory_space<vmem>>, vector<1x128x128xbf16>
    %227 = vector.shape_cast %226 : vector<1x128x128xbf16> to vector<128x128xbf16>
    %cst_287 = arith.constant dense<0.000000e+00> : vector<4x128xf32>
    %228 = tpu.matmul %225, %227, %cst_287 {dimension_numbers = #tpu.dot_dimension_numbers<[1], [0], [0], [1], [0, 0, 1, 1], [], []>} : vector<4x128xbf16>, vector<128x128xbf16>, vector<4x128xf32> -> vector<4x128xf32>
    %229 = arith.addf %223, %228 : vector<4x128xf32>
    %c0_288 = arith.constant 0 : index
    %c5_289 = arith.constant 5 : index
    %c2_290 = arith.constant 2 : index
    %c0_291 = arith.constant 0 : index
    %230 = vector.load %arg1[%c0_288, %c5_289, %c2_290, %c0_291] : memref<1x6x6x128xbf16, #tpu.memory_space<vmem>>, vector<1x1x4x128xbf16>
    %231 = vector.shape_cast %230 : vector<1x1x4x128xbf16> to vector<4x128xbf16>
    %c8_292 = arith.constant 8 : index
    %c0_293 = arith.constant 0 : index
    %c0_294 = arith.constant 0 : index
    %232 = vector.load %arg2[%c8_292, %c0_293, %c0_294] : memref<9x128x128xbf16, #tpu.memory_space<vmem>>, vector<1x128x128xbf16>
    %233 = vector.shape_cast %232 : vector<1x128x128xbf16> to vector<128x128xbf16>
    %cst_295 = arith.constant dense<0.000000e+00> : vector<4x128xf32>
    %234 = tpu.matmul %231, %233, %cst_295 {dimension_numbers = #tpu.dot_dimension_numbers<[1], [0], [0], [1], [0, 0, 1, 1], [], []>} : vector<4x128xbf16>, vector<128x128xbf16>, vector<4x128xf32> -> vector<4x128xf32>
    %235 = arith.addf %229, %234 : vector<4x128xf32>
    %236 = vector.broadcast %0 : vector<1x128xf32> to vector<4x128xf32>
    %237 = arith.addf %235, %236 : vector<4x128xf32>
    %c0_296 = arith.constant 0 : index
    %c3_297 = arith.constant 3 : index
    %c0_298 = arith.constant 0 : index
    %c0_299 = arith.constant 0 : index
    %238 = vector.load %arg4[%c0_296, %c3_297, %c0_298, %c0_299] : memref<1x4x4x128xf32, #tpu.memory_space<vmem>>, vector<1x1x4x128xf32>
    %239 = vector.shape_cast %238 : vector<1x1x4x128xf32> to vector<4x128xf32>
    %240 = vector.shape_cast %237 : vector<4x128xf32> to vector<1x1x4x128xf32>
    tpu.vector_store %arg4[%c0_296, %c3_297, %c0_298, %c0_299], %240 {strides = array<i32>} : memref<1x4x4x128xf32, #tpu.memory_space<vmem>>, vector<1x1x4x128xf32>,
    return
  }
  func.func @transform_0(%arg0: i32) -> (i32, i32, i32, i32) {
    %c0_i32 = arith.constant 0 : i32
    %c0_i32_0 = arith.constant 0 : i32
    %c0_i32_1 = arith.constant 0 : i32
    %c0_i32_2 = arith.constant 0 : i32
    return %arg0, %c0_i32, %c0_i32_0, %c0_i32_1 : i32, i32, i32, i32
  }
  func.func @transform_1(%arg0: i32) -> (i32, i32, i32) {
    %c0_i32 = arith.constant 0 : i32
    %c0_i32_0 = arith.constant 0 : i32
    %c0_i32_1 = arith.constant 0 : i32
    %c0_i32_2 = arith.constant 0 : i32
    return %c0_i32, %c0_i32_0, %c0_i32_1 : i32, i32, i32
  }
  func.func @transform_2(%arg0: i32) -> (i32, i32) {
    %c0_i32 = arith.constant 0 : i32
    %c0_i32_0 = arith.constant 0 : i32
    %c0_i32_1 = arith.constant 0 : i32
    return %c0_i32, %c0_i32_0 : i32, i32
  }
  func.func @transform_3(%arg0: i32) -> (i32, i32, i32, i32) {
    %c0_i32 = arith.constant 0 : i32
    %c0_i32_0 = arith.constant 0 : i32
    %c0_i32_1 = arith.constant 0 : i32
    %c0_i32_2 = arith.constant 0 : i32
    return %arg0, %c0_i32, %c0_i32_0, %c0_i32_1 : i32, i32, i32, i32
  }
}

module attributes {stable_mosaic.version = 11 : i64} {
  func.func @_fused_conv_kernel(%arg0: i32, %arg1: memref<1x18x9x8xbf16, #tpu.memory_space<vmem>>, %arg2: memref<8x8x128xbf16, #tpu.memory_space<vmem>>, %arg3: memref<1x8x8x128xbf16, #tpu.memory_space<vmem>>, %arg4: memref<8x8x128xf32, #tpu.memory_space<vmem>>) attributes {dimension_semantics = [#tpu.dimension_semantics<parallel>], iteration_bounds = array<i64: 2>, scalar_prefetch = 0 : i64, scratch_operands = 1 : i64, tpu.core_type = #tpu.core_type<tc>, window_params = [{transform_indices = @transform_0, window_bounds = array<i64: 1, 18, 9, 8>}, {pipeline_mode = #tpu.pipeline_mode<synchronous>, transform_indices = @transform_1, window_bounds = array<i64: 8, 8, 128>}, {transform_indices = @transform_2, window_bounds = array<i64: 1, 8, 8, 128>}]} {
    %cst = arith.constant 0.000000e+00 : f32
    %0 = vector.broadcast %cst : f32 to vector<1x128xf32>
    %cst_0 = arith.constant 0.000000e+00 : f32
    %1 = vector.broadcast %cst_0 : f32 to vector<1x128xf32>
    %cst_1 = arith.constant 0.000000e+00 : f32
    %2 = vector.broadcast %cst_1 : f32 to vector<8x128xf32>
    %c0 = arith.constant 0 : index
    %c0_2 = arith.constant 0 : index
    %c0_3 = arith.constant 0 : index
    %c0_4 = arith.constant 0 : index
    %3 = vector.load %arg1[%c0, %c0_2, %c0_3, %c0_4] : memref<1x18x9x8xbf16, #tpu.memory_space<vmem>>, vector<1x1x8x8xbf16>
    %4 = vector.shape_cast %3 : vector<1x1x8x8xbf16> to vector<8x8xbf16>
    %c0_5 = arith.constant 0 : index
    %c0_6 = arith.constant 0 : index
    %c0_7 = arith.constant 0 : index
    %5 = vector.load %arg2[%c0_5, %c0_6, %c0_7] : memref<8x8x128xbf16, #tpu.memory_space<vmem>>, vector<1x8x128xbf16>
    %6 = vector.shape_cast %5 : vector<1x8x128xbf16> to vector<8x128xbf16>
    %cst_8 = arith.constant dense<0.000000e+00> : vector<8x128xf32>
    %7 = tpu.matmul %4, %6, %cst_8 {dimension_numbers = #tpu.dot_dimension_numbers<[1], [0], [0], [1], [0, 0, 1, 1], [], []>} : vector<8x8xbf16>, vector<8x128xbf16>, vector<8x128xf32> -> vector<8x128xf32>
    %8 = arith.addf %2, %7 : vector<8x128xf32>
    %c0_9 = arith.constant 0 : index
    %c0_10 = arith.constant 0 : index
    %c1 = arith.constant 1 : index
    %c0_11 = arith.constant 0 : index
    %9 = vector.load %arg1[%c0_9, %c0_10, %c1, %c0_11] : memref<1x18x9x8xbf16, #tpu.memory_space<vmem>>, vector<1x1x8x8xbf16>
    %10 = vector.shape_cast %9 : vector<1x1x8x8xbf16> to vector<8x8xbf16>
    %c1_12 = arith.constant 1 : index
    %c0_13 = arith.constant 0 : index
    %c0_14 = arith.constant 0 : index
    %11 = vector.load %arg2[%c1_12, %c0_13, %c0_14] : memref<8x8x128xbf16, #tpu.memory_space<vmem>>, vector<1x8x128xbf16>
    %12 = vector.shape_cast %11 : vector<1x8x128xbf16> to vector<8x128xbf16>
    %cst_15 = arith.constant dense<0.000000e+00> : vector<8x128xf32>
    %13 = tpu.matmul %10, %12, %cst_15 {dimension_numbers = #tpu.dot_dimension_numbers<[1], [0], [0], [1], [0, 0, 1, 1], [], []>} : vector<8x8xbf16>, vector<8x128xbf16>, vector<8x128xf32> -> vector<8x128xf32>
    %14 = arith.addf %8, %13 : vector<8x128xf32>
    %c0_16 = arith.constant 0 : index
    %c1_17 = arith.constant 1 : index
    %c0_18 = arith.constant 0 : index
    %c0_19 = arith.constant 0 : index
    %15 = vector.load %arg1[%c0_16, %c1_17, %c0_18, %c0_19] : memref<1x18x9x8xbf16, #tpu.memory_space<vmem>>, vector<1x1x8x8xbf16>
    %16 = vector.shape_cast %15 : vector<1x1x8x8xbf16> to vector<8x8xbf16>
    %c2 = arith.constant 2 : index
    %c0_20 = arith.constant 0 : index
    %c0_21 = arith.constant 0 : index
    %17 = vector.load %arg2[%c2, %c0_20, %c0_21] : memref<8x8x128xbf16, #tpu.memory_space<vmem>>, vector<1x8x128xbf16>
    %18 = vector.shape_cast %17 : vector<1x8x128xbf16> to vector<8x128xbf16>
    %cst_22 = arith.constant dense<0.000000e+00> : vector<8x128xf32>
    %19 = tpu.matmul %16, %18, %cst_22 {dimension_numbers = #tpu.dot_dimension_numbers<[1], [0], [0], [1], [0, 0, 1, 1], [], []>} : vector<8x8xbf16>, vector<8x128xbf16>, vector<8x128xf32> -> vector<8x128xf32>
    %20 = arith.addf %14, %19 : vector<8x128xf32>
    %c0_23 = arith.constant 0 : index
    %c1_24 = arith.constant 1 : index
    %c1_25 = arith.constant 1 : index
    %c0_26 = arith.constant 0 : index
    %21 = vector.load %arg1[%c0_23, %c1_24, %c1_25, %c0_26] : memref<1x18x9x8xbf16, #tpu.memory_space<vmem>>, vector<1x1x8x8xbf16>
    %22 = vector.shape_cast %21 : vector<1x1x8x8xbf16> to vector<8x8xbf16>
    %c3 = arith.constant 3 : index
    %c0_27 = arith.constant 0 : index
    %c0_28 = arith.constant 0 : index
    %23 = vector.load %arg2[%c3, %c0_27, %c0_28] : memref<8x8x128xbf16, #tpu.memory_space<vmem>>, vector<1x8x128xbf16>
    %24 = vector.shape_cast %23 : vector<1x8x128xbf16> to vector<8x128xbf16>
    %cst_29 = arith.constant dense<0.000000e+00> : vector<8x128xf32>
    %25 = tpu.matmul %22, %24, %cst_29 {dimension_numbers = #tpu.dot_dimension_numbers<[1], [0], [0], [1], [0, 0, 1, 1], [], []>} : vector<8x8xbf16>, vector<8x128xbf16>, vector<8x128xf32> -> vector<8x128xf32>
    %26 = arith.addf %20, %25 : vector<8x128xf32>
    %c0_30 = arith.constant 0 : index
    %c2_31 = arith.constant 2 : index
    %c0_32 = arith.constant 0 : index
    %c0_33 = arith.constant 0 : index
    %27 = vector.load %arg1[%c0_30, %c2_31, %c0_32, %c0_33] : memref<1x18x9x8xbf16, #tpu.memory_space<vmem>>, vector<1x1x8x8xbf16>
    %28 = vector.shape_cast %27 : vector<1x1x8x8xbf16> to vector<8x8xbf16>
    %c4 = arith.constant 4 : index
    %c0_34 = arith.constant 0 : index
    %c0_35 = arith.constant 0 : index
    %29 = vector.load %arg2[%c4, %c0_34, %c0_35] : memref<8x8x128xbf16, #tpu.memory_space<vmem>>, vector<1x8x128xbf16>
    %30 = vector.shape_cast %29 : vector<1x8x128xbf16> to vector<8x128xbf16>
    %cst_36 = arith.constant dense<0.000000e+00> : vector<8x128xf32>
    %31 = tpu.matmul %28, %30, %cst_36 {dimension_numbers = #tpu.dot_dimension_numbers<[1], [0], [0], [1], [0, 0, 1, 1], [], []>} : vector<8x8xbf16>, vector<8x128xbf16>, vector<8x128xf32> -> vector<8x128xf32>
    %32 = arith.addf %26, %31 : vector<8x128xf32>
    %c0_37 = arith.constant 0 : index
    %c2_38 = arith.constant 2 : index
    %c1_39 = arith.constant 1 : index
    %c0_40 = arith.constant 0 : index
    %33 = vector.load %arg1[%c0_37, %c2_38, %c1_39, %c0_40] : memref<1x18x9x8xbf16, #tpu.memory_space<vmem>>, vector<1x1x8x8xbf16>
    %34 = vector.shape_cast %33 : vector<1x1x8x8xbf16> to vector<8x8xbf16>
    %c5 = arith.constant 5 : index
    %c0_41 = arith.constant 0 : index
    %c0_42 = arith.constant 0 : index
    %35 = vector.load %arg2[%c5, %c0_41, %c0_42] : memref<8x8x128xbf16, #tpu.memory_space<vmem>>, vector<1x8x128xbf16>
    %36 = vector.shape_cast %35 : vector<1x8x128xbf16> to vector<8x128xbf16>
    %cst_43 = arith.constant dense<0.000000e+00> : vector<8x128xf32>
    %37 = tpu.matmul %34, %36, %cst_43 {dimension_numbers = #tpu.dot_dimension_numbers<[1], [0], [0], [1], [0, 0, 1, 1], [], []>} : vector<8x8xbf16>, vector<8x128xbf16>, vector<8x128xf32> -> vector<8x128xf32>
    %38 = arith.addf %32, %37 : vector<8x128xf32>
    %c0_44 = arith.constant 0 : index
    %c3_45 = arith.constant 3 : index
    %c0_46 = arith.constant 0 : index
    %c0_47 = arith.constant 0 : index
    %39 = vector.load %arg1[%c0_44, %c3_45, %c0_46, %c0_47] : memref<1x18x9x8xbf16, #tpu.memory_space<vmem>>, vector<1x1x8x8xbf16>
    %40 = vector.shape_cast %39 : vector<1x1x8x8xbf16> to vector<8x8xbf16>
    %c6 = arith.constant 6 : index
    %c0_48 = arith.constant 0 : index
    %c0_49 = arith.constant 0 : index
    %41 = vector.load %arg2[%c6, %c0_48, %c0_49] : memref<8x8x128xbf16, #tpu.memory_space<vmem>>, vector<1x8x128xbf16>
    %42 = vector.shape_cast %41 : vector<1x8x128xbf16> to vector<8x128xbf16>
    %cst_50 = arith.constant dense<0.000000e+00> : vector<8x128xf32>
    %43 = tpu.matmul %40, %42, %cst_50 {dimension_numbers = #tpu.dot_dimension_numbers<[1], [0], [0], [1], [0, 0, 1, 1], [], []>} : vector<8x8xbf16>, vector<8x128xbf16>, vector<8x128xf32> -> vector<8x128xf32>
    %44 = arith.addf %38, %43 : vector<8x128xf32>
    %c0_51 = arith.constant 0 : index
    %c3_52 = arith.constant 3 : index
    %c1_53 = arith.constant 1 : index
    %c0_54 = arith.constant 0 : index
    %45 = vector.load %arg1[%c0_51, %c3_52, %c1_53, %c0_54] : memref<1x18x9x8xbf16, #tpu.memory_space<vmem>>, vector<1x1x8x8xbf16>
    %46 = vector.shape_cast %45 : vector<1x1x8x8xbf16> to vector<8x8xbf16>
    %c7 = arith.constant 7 : index
    %c0_55 = arith.constant 0 : index
    %c0_56 = arith.constant 0 : index
    %47 = vector.load %arg2[%c7, %c0_55, %c0_56] : memref<8x8x128xbf16, #tpu.memory_space<vmem>>, vector<1x8x128xbf16>
    %48 = vector.shape_cast %47 : vector<1x8x128xbf16> to vector<8x128xbf16>
    %cst_57 = arith.constant dense<0.000000e+00> : vector<8x128xf32>
    %49 = tpu.matmul %46, %48, %cst_57 {dimension_numbers = #tpu.dot_dimension_numbers<[1], [0], [0], [1], [0, 0, 1, 1], [], []>} : vector<8x8xbf16>, vector<8x128xbf16>, vector<8x128xf32> -> vector<8x128xf32>
    %50 = arith.addf %44, %49 : vector<8x128xf32>
    %c0_58 = arith.constant 0 : index
    %c0_59 = arith.constant 0 : index
    %c0_60 = arith.constant 0 : index
    %51 = vector.load %arg4[%c0_58, %c0_59, %c0_60] : memref<8x8x128xf32, #tpu.memory_space<vmem>>, vector<1x8x128xf32>
    %52 = vector.shape_cast %51 : vector<1x8x128xf32> to vector<8x128xf32>
    %53 = vector.shape_cast %50 : vector<8x128xf32> to vector<1x8x128xf32>
    tpu.vector_store %arg4[%c0_58, %c0_59, %c0_60], %53 {strides = array<i32>} : memref<8x8x128xf32, #tpu.memory_space<vmem>>, vector<1x8x128xf32>,
    %cst_61 = arith.constant dense<0.000000e+00> : vector<128xf32>
    %54 = vector.multi_reduction <add>, %50, %cst_61 [0] : vector<8x128xf32> to vector<128xf32>
    %55 = vector.shape_cast %54 : vector<128xf32> to vector<1x128xf32>
    %56 = arith.addf %0, %55 : vector<1x128xf32>
    %57 = arith.mulf %50, %50 : vector<8x128xf32>
    %cst_62 = arith.constant dense<0.000000e+00> : vector<128xf32>
    %58 = vector.multi_reduction <add>, %57, %cst_62 [0] : vector<8x128xf32> to vector<128xf32>
    %59 = vector.shape_cast %58 : vector<128xf32> to vector<1x128xf32>
    %60 = arith.addf %1, %59 : vector<1x128xf32>
    %cst_63 = arith.constant 0.000000e+00 : f32
    %61 = vector.broadcast %cst_63 : f32 to vector<8x128xf32>
    %c0_64 = arith.constant 0 : index
    %c2_65 = arith.constant 2 : index
    %c0_66 = arith.constant 0 : index
    %c0_67 = arith.constant 0 : index
    %62 = vector.load %arg1[%c0_64, %c2_65, %c0_66, %c0_67] : memref<1x18x9x8xbf16, #tpu.memory_space<vmem>>, vector<1x1x8x8xbf16>
    %63 = vector.shape_cast %62 : vector<1x1x8x8xbf16> to vector<8x8xbf16>
    %c0_68 = arith.constant 0 : index
    %c0_69 = arith.constant 0 : index
    %c0_70 = arith.constant 0 : index
    %64 = vector.load %arg2[%c0_68, %c0_69, %c0_70] : memref<8x8x128xbf16, #tpu.memory_space<vmem>>, vector<1x8x128xbf16>
    %65 = vector.shape_cast %64 : vector<1x8x128xbf16> to vector<8x128xbf16>
    %cst_71 = arith.constant dense<0.000000e+00> : vector<8x128xf32>
    %66 = tpu.matmul %63, %65, %cst_71 {dimension_numbers = #tpu.dot_dimension_numbers<[1], [0], [0], [1], [0, 0, 1, 1], [], []>} : vector<8x8xbf16>, vector<8x128xbf16>, vector<8x128xf32> -> vector<8x128xf32>
    %67 = arith.addf %61, %66 : vector<8x128xf32>
    %c0_72 = arith.constant 0 : index
    %c2_73 = arith.constant 2 : index
    %c1_74 = arith.constant 1 : index
    %c0_75 = arith.constant 0 : index
    %68 = vector.load %arg1[%c0_72, %c2_73, %c1_74, %c0_75] : memref<1x18x9x8xbf16, #tpu.memory_space<vmem>>, vector<1x1x8x8xbf16>
    %69 = vector.shape_cast %68 : vector<1x1x8x8xbf16> to vector<8x8xbf16>
    %c1_76 = arith.constant 1 : index
    %c0_77 = arith.constant 0 : index
    %c0_78 = arith.constant 0 : index
    %70 = vector.load %arg2[%c1_76, %c0_77, %c0_78] : memref<8x8x128xbf16, #tpu.memory_space<vmem>>, vector<1x8x128xbf16>
    %71 = vector.shape_cast %70 : vector<1x8x128xbf16> to vector<8x128xbf16>
    %cst_79 = arith.constant dense<0.000000e+00> : vector<8x128xf32>
    %72 = tpu.matmul %69, %71, %cst_79 {dimension_numbers = #tpu.dot_dimension_numbers<[1], [0], [0], [1], [0, 0, 1, 1], [], []>} : vector<8x8xbf16>, vector<8x128xbf16>, vector<8x128xf32> -> vector<8x128xf32>
    %73 = arith.addf %67, %72 : vector<8x128xf32>
    %c0_80 = arith.constant 0 : index
    %c3_81 = arith.constant 3 : index
    %c0_82 = arith.constant 0 : index
    %c0_83 = arith.constant 0 : index
    %74 = vector.load %arg1[%c0_80, %c3_81, %c0_82, %c0_83] : memref<1x18x9x8xbf16, #tpu.memory_space<vmem>>, vector<1x1x8x8xbf16>
    %75 = vector.shape_cast %74 : vector<1x1x8x8xbf16> to vector<8x8xbf16>
    %c2_84 = arith.constant 2 : index
    %c0_85 = arith.constant 0 : index
    %c0_86 = arith.constant 0 : index
    %76 = vector.load %arg2[%c2_84, %c0_85, %c0_86] : memref<8x8x128xbf16, #tpu.memory_space<vmem>>, vector<1x8x128xbf16>
    %77 = vector.shape_cast %76 : vector<1x8x128xbf16> to vector<8x128xbf16>
    %cst_87 = arith.constant dense<0.000000e+00> : vector<8x128xf32>
    %78 = tpu.matmul %75, %77, %cst_87 {dimension_numbers = #tpu.dot_dimension_numbers<[1], [0], [0], [1], [0, 0, 1, 1], [], []>} : vector<8x8xbf16>, vector<8x128xbf16>, vector<8x128xf32> -> vector<8x128xf32>
    %79 = arith.addf %73, %78 : vector<8x128xf32>
    %c0_88 = arith.constant 0 : index
    %c3_89 = arith.constant 3 : index
    %c1_90 = arith.constant 1 : index
    %c0_91 = arith.constant 0 : index
    %80 = vector.load %arg1[%c0_88, %c3_89, %c1_90, %c0_91] : memref<1x18x9x8xbf16, #tpu.memory_space<vmem>>, vector<1x1x8x8xbf16>
    %81 = vector.shape_cast %80 : vector<1x1x8x8xbf16> to vector<8x8xbf16>
    %c3_92 = arith.constant 3 : index
    %c0_93 = arith.constant 0 : index
    %c0_94 = arith.constant 0 : index
    %82 = vector.load %arg2[%c3_92, %c0_93, %c0_94] : memref<8x8x128xbf16, #tpu.memory_space<vmem>>, vector<1x8x128xbf16>
    %83 = vector.shape_cast %82 : vector<1x8x128xbf16> to vector<8x128xbf16>
    %cst_95 = arith.constant dense<0.000000e+00> : vector<8x128xf32>
    %84 = tpu.matmul %81, %83, %cst_95 {dimension_numbers = #tpu.dot_dimension_numbers<[1], [0], [0], [1], [0, 0, 1, 1], [], []>} : vector<8x8xbf16>, vector<8x128xbf16>, vector<8x128xf32> -> vector<8x128xf32>
    %85 = arith.addf %79, %84 : vector<8x128xf32>
    %c0_96 = arith.constant 0 : index
    %c4_97 = arith.constant 4 : index
    %c0_98 = arith.constant 0 : index
    %c0_99 = arith.constant 0 : index
    %86 = vector.load %arg1[%c0_96, %c4_97, %c0_98, %c0_99] : memref<1x18x9x8xbf16, #tpu.memory_space<vmem>>, vector<1x1x8x8xbf16>
    %87 = vector.shape_cast %86 : vector<1x1x8x8xbf16> to vector<8x8xbf16>
    %c4_100 = arith.constant 4 : index
    %c0_101 = arith.constant 0 : index
    %c0_102 = arith.constant 0 : index
    %88 = vector.load %arg2[%c4_100, %c0_101, %c0_102] : memref<8x8x128xbf16, #tpu.memory_space<vmem>>, vector<1x8x128xbf16>
    %89 = vector.shape_cast %88 : vector<1x8x128xbf16> to vector<8x128xbf16>
    %cst_103 = arith.constant dense<0.000000e+00> : vector<8x128xf32>
    %90 = tpu.matmul %87, %89, %cst_103 {dimension_numbers = #tpu.dot_dimension_numbers<[1], [0], [0], [1], [0, 0, 1, 1], [], []>} : vector<8x8xbf16>, vector<8x128xbf16>, vector<8x128xf32> -> vector<8x128xf32>
    %91 = arith.addf %85, %90 : vector<8x128xf32>
    %c0_104 = arith.constant 0 : index
    %c4_105 = arith.constant 4 : index
    %c1_106 = arith.constant 1 : index
    %c0_107 = arith.constant 0 : index
    %92 = vector.load %arg1[%c0_104, %c4_105, %c1_106, %c0_107] : memref<1x18x9x8xbf16, #tpu.memory_space<vmem>>, vector<1x1x8x8xbf16>
    %93 = vector.shape_cast %92 : vector<1x1x8x8xbf16> to vector<8x8xbf16>
    %c5_108 = arith.constant 5 : index
    %c0_109 = arith.constant 0 : index
    %c0_110 = arith.constant 0 : index
    %94 = vector.load %arg2[%c5_108, %c0_109, %c0_110] : memref<8x8x128xbf16, #tpu.memory_space<vmem>>, vector<1x8x128xbf16>
    %95 = vector.shape_cast %94 : vector<1x8x128xbf16> to vector<8x128xbf16>
    %cst_111 = arith.constant dense<0.000000e+00> : vector<8x128xf32>
    %96 = tpu.matmul %93, %95, %cst_111 {dimension_numbers = #tpu.dot_dimension_numbers<[1], [0], [0], [1], [0, 0, 1, 1], [], []>} : vector<8x8xbf16>, vector<8x128xbf16>, vector<8x128xf32> -> vector<8x128xf32>
    %97 = arith.addf %91, %96 : vector<8x128xf32>
    %c0_112 = arith.constant 0 : index
    %c5_113 = arith.constant 5 : index
    %c0_114 = arith.constant 0 : index
    %c0_115 = arith.constant 0 : index
    %98 = vector.load %arg1[%c0_112, %c5_113, %c0_114, %c0_115] : memref<1x18x9x8xbf16, #tpu.memory_space<vmem>>, vector<1x1x8x8xbf16>
    %99 = vector.shape_cast %98 : vector<1x1x8x8xbf16> to vector<8x8xbf16>
    %c6_116 = arith.constant 6 : index
    %c0_117 = arith.constant 0 : index
    %c0_118 = arith.constant 0 : index
    %100 = vector.load %arg2[%c6_116, %c0_117, %c0_118] : memref<8x8x128xbf16, #tpu.memory_space<vmem>>, vector<1x8x128xbf16>
    %101 = vector.shape_cast %100 : vector<1x8x128xbf16> to vector<8x128xbf16>
    %cst_119 = arith.constant dense<0.000000e+00> : vector<8x128xf32>
    %102 = tpu.matmul %99, %101, %cst_119 {dimension_numbers = #tpu.dot_dimension_numbers<[1], [0], [0], [1], [0, 0, 1, 1], [], []>} : vector<8x8xbf16>, vector<8x128xbf16>, vector<8x128xf32> -> vector<8x128xf32>
    %103 = arith.addf %97, %102 : vector<8x128xf32>
    %c0_120 = arith.constant 0 : index
    %c5_121 = arith.constant 5 : index
    %c1_122 = arith.constant 1 : index
    %c0_123 = arith.constant 0 : index
    %104 = vector.load %arg1[%c0_120, %c5_121, %c1_122, %c0_123] : memref<1x18x9x8xbf16, #tpu.memory_space<vmem>>, vector<1x1x8x8xbf16>
    %105 = vector.shape_cast %104 : vector<1x1x8x8xbf16> to vector<8x8xbf16>
    %c7_124 = arith.constant 7 : index
    %c0_125 = arith.constant 0 : index
    %c0_126 = arith.constant 0 : index
    %106 = vector.load %arg2[%c7_124, %c0_125, %c0_126] : memref<8x8x128xbf16, #tpu.memory_space<vmem>>, vector<1x8x128xbf16>
    %107 = vector.shape_cast %106 : vector<1x8x128xbf16> to vector<8x128xbf16>
    %cst_127 = arith.constant dense<0.000000e+00> : vector<8x128xf32>
    %108 = tpu.matmul %105, %107, %cst_127 {dimension_numbers = #tpu.dot_dimension_numbers<[1], [0], [0], [1], [0, 0, 1, 1], [], []>} : vector<8x8xbf16>, vector<8x128xbf16>, vector<8x128xf32> -> vector<8x128xf32>
    %109 = arith.addf %103, %108 : vector<8x128xf32>
    %c1_128 = arith.constant 1 : index
    %c0_129 = arith.constant 0 : index
    %c0_130 = arith.constant 0 : index
    %110 = vector.load %arg4[%c1_128, %c0_129, %c0_130] : memref<8x8x128xf32, #tpu.memory_space<vmem>>, vector<1x8x128xf32>
    %111 = vector.shape_cast %110 : vector<1x8x128xf32> to vector<8x128xf32>
    %112 = vector.shape_cast %109 : vector<8x128xf32> to vector<1x8x128xf32>
    tpu.vector_store %arg4[%c1_128, %c0_129, %c0_130], %112 {strides = array<i32>} : memref<8x8x128xf32, #tpu.memory_space<vmem>>, vector<1x8x128xf32>,
    %cst_131 = arith.constant dense<0.000000e+00> : vector<128xf32>
    %113 = vector.multi_reduction <add>, %109, %cst_131 [0] : vector<8x128xf32> to vector<128xf32>
    %114 = vector.shape_cast %113 : vector<128xf32> to vector<1x128xf32>
    %115 = arith.addf %56, %114 : vector<1x128xf32>
    %116 = arith.mulf %109, %109 : vector<8x128xf32>
    %cst_132 = arith.constant dense<0.000000e+00> : vector<128xf32>
    %117 = vector.multi_reduction <add>, %116, %cst_132 [0] : vector<8x128xf32> to vector<128xf32>
    %118 = vector.shape_cast %117 : vector<128xf32> to vector<1x128xf32>
    %119 = arith.addf %60, %118 : vector<1x128xf32>
    %cst_133 = arith.constant 0.000000e+00 : f32
    %120 = vector.broadcast %cst_133 : f32 to vector<8x128xf32>
    %c0_134 = arith.constant 0 : index
    %c4_135 = arith.constant 4 : index
    %c0_136 = arith.constant 0 : index
    %c0_137 = arith.constant 0 : index
    %121 = vector.load %arg1[%c0_134, %c4_135, %c0_136, %c0_137] : memref<1x18x9x8xbf16, #tpu.memory_space<vmem>>, vector<1x1x8x8xbf16>
    %122 = vector.shape_cast %121 : vector<1x1x8x8xbf16> to vector<8x8xbf16>
    %c0_138 = arith.constant 0 : index
    %c0_139 = arith.constant 0 : index
    %c0_140 = arith.constant 0 : index
    %123 = vector.load %arg2[%c0_138, %c0_139, %c0_140] : memref<8x8x128xbf16, #tpu.memory_space<vmem>>, vector<1x8x128xbf16>
    %124 = vector.shape_cast %123 : vector<1x8x128xbf16> to vector<8x128xbf16>
    %cst_141 = arith.constant dense<0.000000e+00> : vector<8x128xf32>
    %125 = tpu.matmul %122, %124, %cst_141 {dimension_numbers = #tpu.dot_dimension_numbers<[1], [0], [0], [1], [0, 0, 1, 1], [], []>} : vector<8x8xbf16>, vector<8x128xbf16>, vector<8x128xf32> -> vector<8x128xf32>
    %126 = arith.addf %120, %125 : vector<8x128xf32>
    %c0_142 = arith.constant 0 : index
    %c4_143 = arith.constant 4 : index
    %c1_144 = arith.constant 1 : index
    %c0_145 = arith.constant 0 : index
    %127 = vector.load %arg1[%c0_142, %c4_143, %c1_144, %c0_145] : memref<1x18x9x8xbf16, #tpu.memory_space<vmem>>, vector<1x1x8x8xbf16>
    %128 = vector.shape_cast %127 : vector<1x1x8x8xbf16> to vector<8x8xbf16>
    %c1_146 = arith.constant 1 : index
    %c0_147 = arith.constant 0 : index
    %c0_148 = arith.constant 0 : index
    %129 = vector.load %arg2[%c1_146, %c0_147, %c0_148] : memref<8x8x128xbf16, #tpu.memory_space<vmem>>, vector<1x8x128xbf16>
    %130 = vector.shape_cast %129 : vector<1x8x128xbf16> to vector<8x128xbf16>
    %cst_149 = arith.constant dense<0.000000e+00> : vector<8x128xf32>
    %131 = tpu.matmul %128, %130, %cst_149 {dimension_numbers = #tpu.dot_dimension_numbers<[1], [0], [0], [1], [0, 0, 1, 1], [], []>} : vector<8x8xbf16>, vector<8x128xbf16>, vector<8x128xf32> -> vector<8x128xf32>
    %132 = arith.addf %126, %131 : vector<8x128xf32>
    %c0_150 = arith.constant 0 : index
    %c5_151 = arith.constant 5 : index
    %c0_152 = arith.constant 0 : index
    %c0_153 = arith.constant 0 : index
    %133 = vector.load %arg1[%c0_150, %c5_151, %c0_152, %c0_153] : memref<1x18x9x8xbf16, #tpu.memory_space<vmem>>, vector<1x1x8x8xbf16>
    %134 = vector.shape_cast %133 : vector<1x1x8x8xbf16> to vector<8x8xbf16>
    %c2_154 = arith.constant 2 : index
    %c0_155 = arith.constant 0 : index
    %c0_156 = arith.constant 0 : index
    %135 = vector.load %arg2[%c2_154, %c0_155, %c0_156] : memref<8x8x128xbf16, #tpu.memory_space<vmem>>, vector<1x8x128xbf16>
    %136 = vector.shape_cast %135 : vector<1x8x128xbf16> to vector<8x128xbf16>
    %cst_157 = arith.constant dense<0.000000e+00> : vector<8x128xf32>
    %137 = tpu.matmul %134, %136, %cst_157 {dimension_numbers = #tpu.dot_dimension_numbers<[1], [0], [0], [1], [0, 0, 1, 1], [], []>} : vector<8x8xbf16>, vector<8x128xbf16>, vector<8x128xf32> -> vector<8x128xf32>
    %138 = arith.addf %132, %137 : vector<8x128xf32>
    %c0_158 = arith.constant 0 : index
    %c5_159 = arith.constant 5 : index
    %c1_160 = arith.constant 1 : index
    %c0_161 = arith.constant 0 : index
    %139 = vector.load %arg1[%c0_158, %c5_159, %c1_160, %c0_161] : memref<1x18x9x8xbf16, #tpu.memory_space<vmem>>, vector<1x1x8x8xbf16>
    %140 = vector.shape_cast %139 : vector<1x1x8x8xbf16> to vector<8x8xbf16>
    %c3_162 = arith.constant 3 : index
    %c0_163 = arith.constant 0 : index
    %c0_164 = arith.constant 0 : index
    %141 = vector.load %arg2[%c3_162, %c0_163, %c0_164] : memref<8x8x128xbf16, #tpu.memory_space<vmem>>, vector<1x8x128xbf16>
    %142 = vector.shape_cast %141 : vector<1x8x128xbf16> to vector<8x128xbf16>
    %cst_165 = arith.constant dense<0.000000e+00> : vector<8x128xf32>
    %143 = tpu.matmul %140, %142, %cst_165 {dimension_numbers = #tpu.dot_dimension_numbers<[1], [0], [0], [1], [0, 0, 1, 1], [], []>} : vector<8x8xbf16>, vector<8x128xbf16>, vector<8x128xf32> -> vector<8x128xf32>
    %144 = arith.addf %138, %143 : vector<8x128xf32>
    %c0_166 = arith.constant 0 : index
    %c6_167 = arith.constant 6 : index
    %c0_168 = arith.constant 0 : index
    %c0_169 = arith.constant 0 : index
    %145 = vector.load %arg1[%c0_166, %c6_167, %c0_168, %c0_169] : memref<1x18x9x8xbf16, #tpu.memory_space<vmem>>, vector<1x1x8x8xbf16>
    %146 = vector.shape_cast %145 : vector<1x1x8x8xbf16> to vector<8x8xbf16>
    %c4_170 = arith.constant 4 : index
    %c0_171 = arith.constant 0 : index
    %c0_172 = arith.constant 0 : index
    %147 = vector.load %arg2[%c4_170, %c0_171, %c0_172] : memref<8x8x128xbf16, #tpu.memory_space<vmem>>, vector<1x8x128xbf16>
    %148 = vector.shape_cast %147 : vector<1x8x128xbf16> to vector<8x128xbf16>
    %cst_173 = arith.constant dense<0.000000e+00> : vector<8x128xf32>
    %149 = tpu.matmul %146, %148, %cst_173 {dimension_numbers = #tpu.dot_dimension_numbers<[1], [0], [0], [1], [0, 0, 1, 1], [], []>} : vector<8x8xbf16>, vector<8x128xbf16>, vector<8x128xf32> -> vector<8x128xf32>
    %150 = arith.addf %144, %149 : vector<8x128xf32>
    %c0_174 = arith.constant 0 : index
    %c6_175 = arith.constant 6 : index
    %c1_176 = arith.constant 1 : index
    %c0_177 = arith.constant 0 : index
    %151 = vector.load %arg1[%c0_174, %c6_175, %c1_176, %c0_177] : memref<1x18x9x8xbf16, #tpu.memory_space<vmem>>, vector<1x1x8x8xbf16>
    %152 = vector.shape_cast %151 : vector<1x1x8x8xbf16> to vector<8x8xbf16>
    %c5_178 = arith.constant 5 : index
    %c0_179 = arith.constant 0 : index
    %c0_180 = arith.constant 0 : index
    %153 = vector.load %arg2[%c5_178, %c0_179, %c0_180] : memref<8x8x128xbf16, #tpu.memory_space<vmem>>, vector<1x8x128xbf16>
    %154 = vector.shape_cast %153 : vector<1x8x128xbf16> to vector<8x128xbf16>
    %cst_181 = arith.constant dense<0.000000e+00> : vector<8x128xf32>
    %155 = tpu.matmul %152, %154, %cst_181 {dimension_numbers = #tpu.dot_dimension_numbers<[1], [0], [0], [1], [0, 0, 1, 1], [], []>} : vector<8x8xbf16>, vector<8x128xbf16>, vector<8x128xf32> -> vector<8x128xf32>
    %156 = arith.addf %150, %155 : vector<8x128xf32>
    %c0_182 = arith.constant 0 : index
    %c7_183 = arith.constant 7 : index
    %c0_184 = arith.constant 0 : index
    %c0_185 = arith.constant 0 : index
    %157 = vector.load %arg1[%c0_182, %c7_183, %c0_184, %c0_185] : memref<1x18x9x8xbf16, #tpu.memory_space<vmem>>, vector<1x1x8x8xbf16>
    %158 = vector.shape_cast %157 : vector<1x1x8x8xbf16> to vector<8x8xbf16>
    %c6_186 = arith.constant 6 : index
    %c0_187 = arith.constant 0 : index
    %c0_188 = arith.constant 0 : index
    %159 = vector.load %arg2[%c6_186, %c0_187, %c0_188] : memref<8x8x128xbf16, #tpu.memory_space<vmem>>, vector<1x8x128xbf16>
    %160 = vector.shape_cast %159 : vector<1x8x128xbf16> to vector<8x128xbf16>
    %cst_189 = arith.constant dense<0.000000e+00> : vector<8x128xf32>
    %161 = tpu.matmul %158, %160, %cst_189 {dimension_numbers = #tpu.dot_dimension_numbers<[1], [0], [0], [1], [0, 0, 1, 1], [], []>} : vector<8x8xbf16>, vector<8x128xbf16>, vector<8x128xf32> -> vector<8x128xf32>
    %162 = arith.addf %156, %161 : vector<8x128xf32>
    %c0_190 = arith.constant 0 : index
    %c7_191 = arith.constant 7 : index
    %c1_192 = arith.constant 1 : index
    %c0_193 = arith.constant 0 : index
    %163 = vector.load %arg1[%c0_190, %c7_191, %c1_192, %c0_193] : memref<1x18x9x8xbf16, #tpu.memory_space<vmem>>, vector<1x1x8x8xbf16>
    %164 = vector.shape_cast %163 : vector<1x1x8x8xbf16> to vector<8x8xbf16>
    %c7_194 = arith.constant 7 : index
    %c0_195 = arith.constant 0 : index
    %c0_196 = arith.constant 0 : index
    %165 = vector.load %arg2[%c7_194, %c0_195, %c0_196] : memref<8x8x128xbf16, #tpu.memory_space<vmem>>, vector<1x8x128xbf16>
    %166 = vector.shape_cast %165 : vector<1x8x128xbf16> to vector<8x128xbf16>
    %cst_197 = arith.constant dense<0.000000e+00> : vector<8x128xf32>
    %167 = tpu.matmul %164, %166, %cst_197 {dimension_numbers = #tpu.dot_dimension_numbers<[1], [0], [0], [1], [0, 0, 1, 1], [], []>} : vector<8x8xbf16>, vector<8x128xbf16>, vector<8x128xf32> -> vector<8x128xf32>
    %168 = arith.addf %162, %167 : vector<8x128xf32>
    %c2_198 = arith.constant 2 : index
    %c0_199 = arith.constant 0 : index
    %c0_200 = arith.constant 0 : index
    %169 = vector.load %arg4[%c2_198, %c0_199, %c0_200] : memref<8x8x128xf32, #tpu.memory_space<vmem>>, vector<1x8x128xf32>
    %170 = vector.shape_cast %169 : vector<1x8x128xf32> to vector<8x128xf32>
    %171 = vector.shape_cast %168 : vector<8x128xf32> to vector<1x8x128xf32>
    tpu.vector_store %arg4[%c2_198, %c0_199, %c0_200], %171 {strides = array<i32>} : memref<8x8x128xf32, #tpu.memory_space<vmem>>, vector<1x8x128xf32>,
    %cst_201 = arith.constant dense<0.000000e+00> : vector<128xf32>
    %172 = vector.multi_reduction <add>, %168, %cst_201 [0] : vector<8x128xf32> to vector<128xf32>
    %173 = vector.shape_cast %172 : vector<128xf32> to vector<1x128xf32>
    %174 = arith.addf %115, %173 : vector<1x128xf32>
    %175 = arith.mulf %168, %168 : vector<8x128xf32>
    %cst_202 = arith.constant dense<0.000000e+00> : vector<128xf32>
    %176 = vector.multi_reduction <add>, %175, %cst_202 [0] : vector<8x128xf32> to vector<128xf32>
    %177 = vector.shape_cast %176 : vector<128xf32> to vector<1x128xf32>
    %178 = arith.addf %119, %177 : vector<1x128xf32>
    %cst_203 = arith.constant 0.000000e+00 : f32
    %179 = vector.broadcast %cst_203 : f32 to vector<8x128xf32>
    %c0_204 = arith.constant 0 : index
    %c6_205 = arith.constant 6 : index
    %c0_206 = arith.constant 0 : index
    %c0_207 = arith.constant 0 : index
    %180 = vector.load %arg1[%c0_204, %c6_205, %c0_206, %c0_207] : memref<1x18x9x8xbf16, #tpu.memory_space<vmem>>, vector<1x1x8x8xbf16>
    %181 = vector.shape_cast %180 : vector<1x1x8x8xbf16> to vector<8x8xbf16>
    %c0_208 = arith.constant 0 : index
    %c0_209 = arith.constant 0 : index
    %c0_210 = arith.constant 0 : index
    %182 = vector.load %arg2[%c0_208, %c0_209, %c0_210] : memref<8x8x128xbf16, #tpu.memory_space<vmem>>, vector<1x8x128xbf16>
    %183 = vector.shape_cast %182 : vector<1x8x128xbf16> to vector<8x128xbf16>
    %cst_211 = arith.constant dense<0.000000e+00> : vector<8x128xf32>
    %184 = tpu.matmul %181, %183, %cst_211 {dimension_numbers = #tpu.dot_dimension_numbers<[1], [0], [0], [1], [0, 0, 1, 1], [], []>} : vector<8x8xbf16>, vector<8x128xbf16>, vector<8x128xf32> -> vector<8x128xf32>
    %185 = arith.addf %179, %184 : vector<8x128xf32>
    %c0_212 = arith.constant 0 : index
    %c6_213 = arith.constant 6 : index
    %c1_214 = arith.constant 1 : index
    %c0_215 = arith.constant 0 : index
    %186 = vector.load %arg1[%c0_212, %c6_213, %c1_214, %c0_215] : memref<1x18x9x8xbf16, #tpu.memory_space<vmem>>, vector<1x1x8x8xbf16>
    %187 = vector.shape_cast %186 : vector<1x1x8x8xbf16> to vector<8x8xbf16>
    %c1_216 = arith.constant 1 : index
    %c0_217 = arith.constant 0 : index
    %c0_218 = arith.constant 0 : index
    %188 = vector.load %arg2[%c1_216, %c0_217, %c0_218] : memref<8x8x128xbf16, #tpu.memory_space<vmem>>, vector<1x8x128xbf16>
    %189 = vector.shape_cast %188 : vector<1x8x128xbf16> to vector<8x128xbf16>
    %cst_219 = arith.constant dense<0.000000e+00> : vector<8x128xf32>
    %190 = tpu.matmul %187, %189, %cst_219 {dimension_numbers = #tpu.dot_dimension_numbers<[1], [0], [0], [1], [0, 0, 1, 1], [], []>} : vector<8x8xbf16>, vector<8x128xbf16>, vector<8x128xf32> -> vector<8x128xf32>
    %191 = arith.addf %185, %190 : vector<8x128xf32>
    %c0_220 = arith.constant 0 : index
    %c7_221 = arith.constant 7 : index
    %c0_222 = arith.constant 0 : index
    %c0_223 = arith.constant 0 : index
    %192 = vector.load %arg1[%c0_220, %c7_221, %c0_222, %c0_223] : memref<1x18x9x8xbf16, #tpu.memory_space<vmem>>, vector<1x1x8x8xbf16>
    %193 = vector.shape_cast %192 : vector<1x1x8x8xbf16> to vector<8x8xbf16>
    %c2_224 = arith.constant 2 : index
    %c0_225 = arith.constant 0 : index
    %c0_226 = arith.constant 0 : index
    %194 = vector.load %arg2[%c2_224, %c0_225, %c0_226] : memref<8x8x128xbf16, #tpu.memory_space<vmem>>, vector<1x8x128xbf16>
    %195 = vector.shape_cast %194 : vector<1x8x128xbf16> to vector<8x128xbf16>
    %cst_227 = arith.constant dense<0.000000e+00> : vector<8x128xf32>
    %196 = tpu.matmul %193, %195, %cst_227 {dimension_numbers = #tpu.dot_dimension_numbers<[1], [0], [0], [1], [0, 0, 1, 1], [], []>} : vector<8x8xbf16>, vector<8x128xbf16>, vector<8x128xf32> -> vector<8x128xf32>
    %197 = arith.addf %191, %196 : vector<8x128xf32>
    %c0_228 = arith.constant 0 : index
    %c7_229 = arith.constant 7 : index
    %c1_230 = arith.constant 1 : index
    %c0_231 = arith.constant 0 : index
    %198 = vector.load %arg1[%c0_228, %c7_229, %c1_230, %c0_231] : memref<1x18x9x8xbf16, #tpu.memory_space<vmem>>, vector<1x1x8x8xbf16>
    %199 = vector.shape_cast %198 : vector<1x1x8x8xbf16> to vector<8x8xbf16>
    %c3_232 = arith.constant 3 : index
    %c0_233 = arith.constant 0 : index
    %c0_234 = arith.constant 0 : index
    %200 = vector.load %arg2[%c3_232, %c0_233, %c0_234] : memref<8x8x128xbf16, #tpu.memory_space<vmem>>, vector<1x8x128xbf16>
    %201 = vector.shape_cast %200 : vector<1x8x128xbf16> to vector<8x128xbf16>
    %cst_235 = arith.constant dense<0.000000e+00> : vector<8x128xf32>
    %202 = tpu.matmul %199, %201, %cst_235 {dimension_numbers = #tpu.dot_dimension_numbers<[1], [0], [0], [1], [0, 0, 1, 1], [], []>} : vector<8x8xbf16>, vector<8x128xbf16>, vector<8x128xf32> -> vector<8x128xf32>
    %203 = arith.addf %197, %202 : vector<8x128xf32>
    %c0_236 = arith.constant 0 : index
    %c8 = arith.constant 8 : index
    %c0_237 = arith.constant 0 : index
    %c0_238 = arith.constant 0 : index
    %204 = vector.load %arg1[%c0_236, %c8, %c0_237, %c0_238] : memref<1x18x9x8xbf16, #tpu.memory_space<vmem>>, vector<1x1x8x8xbf16>
    %205 = vector.shape_cast %204 : vector<1x1x8x8xbf16> to vector<8x8xbf16>
    %c4_239 = arith.constant 4 : index
    %c0_240 = arith.constant 0 : index
    %c0_241 = arith.constant 0 : index
    %206 = vector.load %arg2[%c4_239, %c0_240, %c0_241] : memref<8x8x128xbf16, #tpu.memory_space<vmem>>, vector<1x8x128xbf16>
    %207 = vector.shape_cast %206 : vector<1x8x128xbf16> to vector<8x128xbf16>
    %cst_242 = arith.constant dense<0.000000e+00> : vector<8x128xf32>
    %208 = tpu.matmul %205, %207, %cst_242 {dimension_numbers = #tpu.dot_dimension_numbers<[1], [0], [0], [1], [0, 0, 1, 1], [], []>} : vector<8x8xbf16>, vector<8x128xbf16>, vector<8x128xf32> -> vector<8x128xf32>
    %209 = arith.addf %203, %208 : vector<8x128xf32>
    %c0_243 = arith.constant 0 : index
    %c8_244 = arith.constant 8 : index
    %c1_245 = arith.constant 1 : index
    %c0_246 = arith.constant 0 : index
    %210 = vector.load %arg1[%c0_243, %c8_244, %c1_245, %c0_246] : memref<1x18x9x8xbf16, #tpu.memory_space<vmem>>, vector<1x1x8x8xbf16>
    %211 = vector.shape_cast %210 : vector<1x1x8x8xbf16> to vector<8x8xbf16>
    %c5_247 = arith.constant 5 : index
    %c0_248 = arith.constant 0 : index
    %c0_249 = arith.constant 0 : index
    %212 = vector.load %arg2[%c5_247, %c0_248, %c0_249] : memref<8x8x128xbf16, #tpu.memory_space<vmem>>, vector<1x8x128xbf16>
    %213 = vector.shape_cast %212 : vector<1x8x128xbf16> to vector<8x128xbf16>
    %cst_250 = arith.constant dense<0.000000e+00> : vector<8x128xf32>
    %214 = tpu.matmul %211, %213, %cst_250 {dimension_numbers = #tpu.dot_dimension_numbers<[1], [0], [0], [1], [0, 0, 1, 1], [], []>} : vector<8x8xbf16>, vector<8x128xbf16>, vector<8x128xf32> -> vector<8x128xf32>
    %215 = arith.addf %209, %214 : vector<8x128xf32>
    %c0_251 = arith.constant 0 : index
    %c9 = arith.constant 9 : index
    %c0_252 = arith.constant 0 : index
    %c0_253 = arith.constant 0 : index
    %216 = vector.load %arg1[%c0_251, %c9, %c0_252, %c0_253] : memref<1x18x9x8xbf16, #tpu.memory_space<vmem>>, vector<1x1x8x8xbf16>
    %217 = vector.shape_cast %216 : vector<1x1x8x8xbf16> to vector<8x8xbf16>
    %c6_254 = arith.constant 6 : index
    %c0_255 = arith.constant 0 : index
    %c0_256 = arith.constant 0 : index
    %218 = vector.load %arg2[%c6_254, %c0_255, %c0_256] : memref<8x8x128xbf16, #tpu.memory_space<vmem>>, vector<1x8x128xbf16>
    %219 = vector.shape_cast %218 : vector<1x8x128xbf16> to vector<8x128xbf16>
    %cst_257 = arith.constant dense<0.000000e+00> : vector<8x128xf32>
    %220 = tpu.matmul %217, %219, %cst_257 {dimension_numbers = #tpu.dot_dimension_numbers<[1], [0], [0], [1], [0, 0, 1, 1], [], []>} : vector<8x8xbf16>, vector<8x128xbf16>, vector<8x128xf32> -> vector<8x128xf32>
    %221 = arith.addf %215, %220 : vector<8x128xf32>
    %c0_258 = arith.constant 0 : index
    %c9_259 = arith.constant 9 : index
    %c1_260 = arith.constant 1 : index
    %c0_261 = arith.constant 0 : index
    %222 = vector.load %arg1[%c0_258, %c9_259, %c1_260, %c0_261] : memref<1x18x9x8xbf16, #tpu.memory_space<vmem>>, vector<1x1x8x8xbf16>
    %223 = vector.shape_cast %222 : vector<1x1x8x8xbf16> to vector<8x8xbf16>
    %c7_262 = arith.constant 7 : index
    %c0_263 = arith.constant 0 : index
    %c0_264 = arith.constant 0 : index
    %224 = vector.load %arg2[%c7_262, %c0_263, %c0_264] : memref<8x8x128xbf16, #tpu.memory_space<vmem>>, vector<1x8x128xbf16>
    %225 = vector.shape_cast %224 : vector<1x8x128xbf16> to vector<8x128xbf16>
    %cst_265 = arith.constant dense<0.000000e+00> : vector<8x128xf32>
    %226 = tpu.matmul %223, %225, %cst_265 {dimension_numbers = #tpu.dot_dimension_numbers<[1], [0], [0], [1], [0, 0, 1, 1], [], []>} : vector<8x8xbf16>, vector<8x128xbf16>, vector<8x128xf32> -> vector<8x128xf32>
    %227 = arith.addf %221, %226 : vector<8x128xf32>
    %c3_266 = arith.constant 3 : index
    %c0_267 = arith.constant 0 : index
    %c0_268 = arith.constant 0 : index
    %228 = vector.load %arg4[%c3_266, %c0_267, %c0_268] : memref<8x8x128xf32, #tpu.memory_space<vmem>>, vector<1x8x128xf32>
    %229 = vector.shape_cast %228 : vector<1x8x128xf32> to vector<8x128xf32>
    %230 = vector.shape_cast %227 : vector<8x128xf32> to vector<1x8x128xf32>
    tpu.vector_store %arg4[%c3_266, %c0_267, %c0_268], %230 {strides = array<i32>} : memref<8x8x128xf32, #tpu.memory_space<vmem>>, vector<1x8x128xf32>,
    %cst_269 = arith.constant dense<0.000000e+00> : vector<128xf32>
    %231 = vector.multi_reduction <add>, %227, %cst_269 [0] : vector<8x128xf32> to vector<128xf32>
    %232 = vector.shape_cast %231 : vector<128xf32> to vector<1x128xf32>
    %233 = arith.addf %174, %232 : vector<1x128xf32>
    %234 = arith.mulf %227, %227 : vector<8x128xf32>
    %cst_270 = arith.constant dense<0.000000e+00> : vector<128xf32>
    %235 = vector.multi_reduction <add>, %234, %cst_270 [0] : vector<8x128xf32> to vector<128xf32>
    %236 = vector.shape_cast %235 : vector<128xf32> to vector<1x128xf32>
    %237 = arith.addf %178, %236 : vector<1x128xf32>
    %cst_271 = arith.constant 0.000000e+00 : f32
    %238 = vector.broadcast %cst_271 : f32 to vector<8x128xf32>
    %c0_272 = arith.constant 0 : index
    %c8_273 = arith.constant 8 : index
    %c0_274 = arith.constant 0 : index
    %c0_275 = arith.constant 0 : index
    %239 = vector.load %arg1[%c0_272, %c8_273, %c0_274, %c0_275] : memref<1x18x9x8xbf16, #tpu.memory_space<vmem>>, vector<1x1x8x8xbf16>
    %240 = vector.shape_cast %239 : vector<1x1x8x8xbf16> to vector<8x8xbf16>
    %c0_276 = arith.constant 0 : index
    %c0_277 = arith.constant 0 : index
    %c0_278 = arith.constant 0 : index
    %241 = vector.load %arg2[%c0_276, %c0_277, %c0_278] : memref<8x8x128xbf16, #tpu.memory_space<vmem>>, vector<1x8x128xbf16>
    %242 = vector.shape_cast %241 : vector<1x8x128xbf16> to vector<8x128xbf16>
    %cst_279 = arith.constant dense<0.000000e+00> : vector<8x128xf32>
    %243 = tpu.matmul %240, %242, %cst_279 {dimension_numbers = #tpu.dot_dimension_numbers<[1], [0], [0], [1], [0, 0, 1, 1], [], []>} : vector<8x8xbf16>, vector<8x128xbf16>, vector<8x128xf32> -> vector<8x128xf32>
    %244 = arith.addf %238, %243 : vector<8x128xf32>
    %c0_280 = arith.constant 0 : index
    %c8_281 = arith.constant 8 : index
    %c1_282 = arith.constant 1 : index
    %c0_283 = arith.constant 0 : index
    %245 = vector.load %arg1[%c0_280, %c8_281, %c1_282, %c0_283] : memref<1x18x9x8xbf16, #tpu.memory_space<vmem>>, vector<1x1x8x8xbf16>
    %246 = vector.shape_cast %245 : vector<1x1x8x8xbf16> to vector<8x8xbf16>
    %c1_284 = arith.constant 1 : index
    %c0_285 = arith.constant 0 : index
    %c0_286 = arith.constant 0 : index
    %247 = vector.load %arg2[%c1_284, %c0_285, %c0_286] : memref<8x8x128xbf16, #tpu.memory_space<vmem>>, vector<1x8x128xbf16>
    %248 = vector.shape_cast %247 : vector<1x8x128xbf16> to vector<8x128xbf16>
    %cst_287 = arith.constant dense<0.000000e+00> : vector<8x128xf32>
    %249 = tpu.matmul %246, %248, %cst_287 {dimension_numbers = #tpu.dot_dimension_numbers<[1], [0], [0], [1], [0, 0, 1, 1], [], []>} : vector<8x8xbf16>, vector<8x128xbf16>, vector<8x128xf32> -> vector<8x128xf32>
    %250 = arith.addf %244, %249 : vector<8x128xf32>
    %c0_288 = arith.constant 0 : index
    %c9_289 = arith.constant 9 : index
    %c0_290 = arith.constant 0 : index
    %c0_291 = arith.constant 0 : index
    %251 = vector.load %arg1[%c0_288, %c9_289, %c0_290, %c0_291] : memref<1x18x9x8xbf16, #tpu.memory_space<vmem>>, vector<1x1x8x8xbf16>
    %252 = vector.shape_cast %251 : vector<1x1x8x8xbf16> to vector<8x8xbf16>
    %c2_292 = arith.constant 2 : index
    %c0_293 = arith.constant 0 : index
    %c0_294 = arith.constant 0 : index
    %253 = vector.load %arg2[%c2_292, %c0_293, %c0_294] : memref<8x8x128xbf16, #tpu.memory_space<vmem>>, vector<1x8x128xbf16>
    %254 = vector.shape_cast %253 : vector<1x8x128xbf16> to vector<8x128xbf16>
    %cst_295 = arith.constant dense<0.000000e+00> : vector<8x128xf32>
    %255 = tpu.matmul %252, %254, %cst_295 {dimension_numbers = #tpu.dot_dimension_numbers<[1], [0], [0], [1], [0, 0, 1, 1], [], []>} : vector<8x8xbf16>, vector<8x128xbf16>, vector<8x128xf32> -> vector<8x128xf32>
    %256 = arith.addf %250, %255 : vector<8x128xf32>
    %c0_296 = arith.constant 0 : index
    %c9_297 = arith.constant 9 : index
    %c1_298 = arith.constant 1 : index
    %c0_299 = arith.constant 0 : index
    %257 = vector.load %arg1[%c0_296, %c9_297, %c1_298, %c0_299] : memref<1x18x9x8xbf16, #tpu.memory_space<vmem>>, vector<1x1x8x8xbf16>
    %258 = vector.shape_cast %257 : vector<1x1x8x8xbf16> to vector<8x8xbf16>
    %c3_300 = arith.constant 3 : index
    %c0_301 = arith.constant 0 : index
    %c0_302 = arith.constant 0 : index
    %259 = vector.load %arg2[%c3_300, %c0_301, %c0_302] : memref<8x8x128xbf16, #tpu.memory_space<vmem>>, vector<1x8x128xbf16>
    %260 = vector.shape_cast %259 : vector<1x8x128xbf16> to vector<8x128xbf16>
    %cst_303 = arith.constant dense<0.000000e+00> : vector<8x128xf32>
    %261 = tpu.matmul %258, %260, %cst_303 {dimension_numbers = #tpu.dot_dimension_numbers<[1], [0], [0], [1], [0, 0, 1, 1], [], []>} : vector<8x8xbf16>, vector<8x128xbf16>, vector<8x128xf32> -> vector<8x128xf32>
    %262 = arith.addf %256, %261 : vector<8x128xf32>
    %c0_304 = arith.constant 0 : index
    %c10 = arith.constant 10 : index
    %c0_305 = arith.constant 0 : index
    %c0_306 = arith.constant 0 : index
    %263 = vector.load %arg1[%c0_304, %c10, %c0_305, %c0_306] : memref<1x18x9x8xbf16, #tpu.memory_space<vmem>>, vector<1x1x8x8xbf16>
    %264 = vector.shape_cast %263 : vector<1x1x8x8xbf16> to vector<8x8xbf16>
    %c4_307 = arith.constant 4 : index
    %c0_308 = arith.constant 0 : index
    %c0_309 = arith.constant 0 : index
    %265 = vector.load %arg2[%c4_307, %c0_308, %c0_309] : memref<8x8x128xbf16, #tpu.memory_space<vmem>>, vector<1x8x128xbf16>
    %266 = vector.shape_cast %265 : vector<1x8x128xbf16> to vector<8x128xbf16>
    %cst_310 = arith.constant dense<0.000000e+00> : vector<8x128xf32>
    %267 = tpu.matmul %264, %266, %cst_310 {dimension_numbers = #tpu.dot_dimension_numbers<[1], [0], [0], [1], [0, 0, 1, 1], [], []>} : vector<8x8xbf16>, vector<8x128xbf16>, vector<8x128xf32> -> vector<8x128xf32>
    %268 = arith.addf %262, %267 : vector<8x128xf32>
    %c0_311 = arith.constant 0 : index
    %c10_312 = arith.constant 10 : index
    %c1_313 = arith.constant 1 : index
    %c0_314 = arith.constant 0 : index
    %269 = vector.load %arg1[%c0_311, %c10_312, %c1_313, %c0_314] : memref<1x18x9x8xbf16, #tpu.memory_space<vmem>>, vector<1x1x8x8xbf16>
    %270 = vector.shape_cast %269 : vector<1x1x8x8xbf16> to vector<8x8xbf16>
    %c5_315 = arith.constant 5 : index
    %c0_316 = arith.constant 0 : index
    %c0_317 = arith.constant 0 : index
    %271 = vector.load %arg2[%c5_315, %c0_316, %c0_317] : memref<8x8x128xbf16, #tpu.memory_space<vmem>>, vector<1x8x128xbf16>
    %272 = vector.shape_cast %271 : vector<1x8x128xbf16> to vector<8x128xbf16>
    %cst_318 = arith.constant dense<0.000000e+00> : vector<8x128xf32>
    %273 = tpu.matmul %270, %272, %cst_318 {dimension_numbers = #tpu.dot_dimension_numbers<[1], [0], [0], [1], [0, 0, 1, 1], [], []>} : vector<8x8xbf16>, vector<8x128xbf16>, vector<8x128xf32> -> vector<8x128xf32>
    %274 = arith.addf %268, %273 : vector<8x128xf32>
    %c0_319 = arith.constant 0 : index
    %c11 = arith.constant 11 : index
    %c0_320 = arith.constant 0 : index
    %c0_321 = arith.constant 0 : index
    %275 = vector.load %arg1[%c0_319, %c11, %c0_320, %c0_321] : memref<1x18x9x8xbf16, #tpu.memory_space<vmem>>, vector<1x1x8x8xbf16>
    %276 = vector.shape_cast %275 : vector<1x1x8x8xbf16> to vector<8x8xbf16>
    %c6_322 = arith.constant 6 : index
    %c0_323 = arith.constant 0 : index
    %c0_324 = arith.constant 0 : index
    %277 = vector.load %arg2[%c6_322, %c0_323, %c0_324] : memref<8x8x128xbf16, #tpu.memory_space<vmem>>, vector<1x8x128xbf16>
    %278 = vector.shape_cast %277 : vector<1x8x128xbf16> to vector<8x128xbf16>
    %cst_325 = arith.constant dense<0.000000e+00> : vector<8x128xf32>
    %279 = tpu.matmul %276, %278, %cst_325 {dimension_numbers = #tpu.dot_dimension_numbers<[1], [0], [0], [1], [0, 0, 1, 1], [], []>} : vector<8x8xbf16>, vector<8x128xbf16>, vector<8x128xf32> -> vector<8x128xf32>
    %280 = arith.addf %274, %279 : vector<8x128xf32>
    %c0_326 = arith.constant 0 : index
    %c11_327 = arith.constant 11 : index
    %c1_328 = arith.constant 1 : index
    %c0_329 = arith.constant 0 : index
    %281 = vector.load %arg1[%c0_326, %c11_327, %c1_328, %c0_329] : memref<1x18x9x8xbf16, #tpu.memory_space<vmem>>, vector<1x1x8x8xbf16>
    %282 = vector.shape_cast %281 : vector<1x1x8x8xbf16> to vector<8x8xbf16>
    %c7_330 = arith.constant 7 : index
    %c0_331 = arith.constant 0 : index
    %c0_332 = arith.constant 0 : index
    %283 = vector.load %arg2[%c7_330, %c0_331, %c0_332] : memref<8x8x128xbf16, #tpu.memory_space<vmem>>, vector<1x8x128xbf16>
    %284 = vector.shape_cast %283 : vector<1x8x128xbf16> to vector<8x128xbf16>
    %cst_333 = arith.constant dense<0.000000e+00> : vector<8x128xf32>
    %285 = tpu.matmul %282, %284, %cst_333 {dimension_numbers = #tpu.dot_dimension_numbers<[1], [0], [0], [1], [0, 0, 1, 1], [], []>} : vector<8x8xbf16>, vector<8x128xbf16>, vector<8x128xf32> -> vector<8x128xf32>
    %286 = arith.addf %280, %285 : vector<8x128xf32>
    %c4_334 = arith.constant 4 : index
    %c0_335 = arith.constant 0 : index
    %c0_336 = arith.constant 0 : index
    %287 = vector.load %arg4[%c4_334, %c0_335, %c0_336] : memref<8x8x128xf32, #tpu.memory_space<vmem>>, vector<1x8x128xf32>
    %288 = vector.shape_cast %287 : vector<1x8x128xf32> to vector<8x128xf32>
    %289 = vector.shape_cast %286 : vector<8x128xf32> to vector<1x8x128xf32>
    tpu.vector_store %arg4[%c4_334, %c0_335, %c0_336], %289 {strides = array<i32>} : memref<8x8x128xf32, #tpu.memory_space<vmem>>, vector<1x8x128xf32>,
    %cst_337 = arith.constant dense<0.000000e+00> : vector<128xf32>
    %290 = vector.multi_reduction <add>, %286, %cst_337 [0] : vector<8x128xf32> to vector<128xf32>
    %291 = vector.shape_cast %290 : vector<128xf32> to vector<1x128xf32>
    %292 = arith.addf %233, %291 : vector<1x128xf32>
    %293 = arith.mulf %286, %286 : vector<8x128xf32>
    %cst_338 = arith.constant dense<0.000000e+00> : vector<128xf32>
    %294 = vector.multi_reduction <add>, %293, %cst_338 [0] : vector<8x128xf32> to vector<128xf32>
    %295 = vector.shape_cast %294 : vector<128xf32> to vector<1x128xf32>
    %296 = arith.addf %237, %295 : vector<1x128xf32>
    %cst_339 = arith.constant 0.000000e+00 : f32
    %297 = vector.broadcast %cst_339 : f32 to vector<8x128xf32>
    %c0_340 = arith.constant 0 : index
    %c10_341 = arith.constant 10 : index
    %c0_342 = arith.constant 0 : index
    %c0_343 = arith.constant 0 : index
    %298 = vector.load %arg1[%c0_340, %c10_341, %c0_342, %c0_343] : memref<1x18x9x8xbf16, #tpu.memory_space<vmem>>, vector<1x1x8x8xbf16>
    %299 = vector.shape_cast %298 : vector<1x1x8x8xbf16> to vector<8x8xbf16>
    %c0_344 = arith.constant 0 : index
    %c0_345 = arith.constant 0 : index
    %c0_346 = arith.constant 0 : index
    %300 = vector.load %arg2[%c0_344, %c0_345, %c0_346] : memref<8x8x128xbf16, #tpu.memory_space<vmem>>, vector<1x8x128xbf16>
    %301 = vector.shape_cast %300 : vector<1x8x128xbf16> to vector<8x128xbf16>
    %cst_347 = arith.constant dense<0.000000e+00> : vector<8x128xf32>
    %302 = tpu.matmul %299, %301, %cst_347 {dimension_numbers = #tpu.dot_dimension_numbers<[1], [0], [0], [1], [0, 0, 1, 1], [], []>} : vector<8x8xbf16>, vector<8x128xbf16>, vector<8x128xf32> -> vector<8x128xf32>
    %303 = arith.addf %297, %302 : vector<8x128xf32>
    %c0_348 = arith.constant 0 : index
    %c10_349 = arith.constant 10 : index
    %c1_350 = arith.constant 1 : index
    %c0_351 = arith.constant 0 : index
    %304 = vector.load %arg1[%c0_348, %c10_349, %c1_350, %c0_351] : memref<1x18x9x8xbf16, #tpu.memory_space<vmem>>, vector<1x1x8x8xbf16>
    %305 = vector.shape_cast %304 : vector<1x1x8x8xbf16> to vector<8x8xbf16>
    %c1_352 = arith.constant 1 : index
    %c0_353 = arith.constant 0 : index
    %c0_354 = arith.constant 0 : index
    %306 = vector.load %arg2[%c1_352, %c0_353, %c0_354] : memref<8x8x128xbf16, #tpu.memory_space<vmem>>, vector<1x8x128xbf16>
    %307 = vector.shape_cast %306 : vector<1x8x128xbf16> to vector<8x128xbf16>
    %cst_355 = arith.constant dense<0.000000e+00> : vector<8x128xf32>
    %308 = tpu.matmul %305, %307, %cst_355 {dimension_numbers = #tpu.dot_dimension_numbers<[1], [0], [0], [1], [0, 0, 1, 1], [], []>} : vector<8x8xbf16>, vector<8x128xbf16>, vector<8x128xf32> -> vector<8x128xf32>
    %309 = arith.addf %303, %308 : vector<8x128xf32>
    %c0_356 = arith.constant 0 : index
    %c11_357 = arith.constant 11 : index
    %c0_358 = arith.constant 0 : index
    %c0_359 = arith.constant 0 : index
    %310 = vector.load %arg1[%c0_356, %c11_357, %c0_358, %c0_359] : memref<1x18x9x8xbf16, #tpu.memory_space<vmem>>, vector<1x1x8x8xbf16>
    %311 = vector.shape_cast %310 : vector<1x1x8x8xbf16> to vector<8x8xbf16>
    %c2_360 = arith.constant 2 : index
    %c0_361 = arith.constant 0 : index
    %c0_362 = arith.constant 0 : index
    %312 = vector.load %arg2[%c2_360, %c0_361, %c0_362] : memref<8x8x128xbf16, #tpu.memory_space<vmem>>, vector<1x8x128xbf16>
    %313 = vector.shape_cast %312 : vector<1x8x128xbf16> to vector<8x128xbf16>
    %cst_363 = arith.constant dense<0.000000e+00> : vector<8x128xf32>
    %314 = tpu.matmul %311, %313, %cst_363 {dimension_numbers = #tpu.dot_dimension_numbers<[1], [0], [0], [1], [0, 0, 1, 1], [], []>} : vector<8x8xbf16>, vector<8x128xbf16>, vector<8x128xf32> -> vector<8x128xf32>
    %315 = arith.addf %309, %314 : vector<8x128xf32>
    %c0_364 = arith.constant 0 : index
    %c11_365 = arith.constant 11 : index
    %c1_366 = arith.constant 1 : index
    %c0_367 = arith.constant 0 : index
    %316 = vector.load %arg1[%c0_364, %c11_365, %c1_366, %c0_367] : memref<1x18x9x8xbf16, #tpu.memory_space<vmem>>, vector<1x1x8x8xbf16>
    %317 = vector.shape_cast %316 : vector<1x1x8x8xbf16> to vector<8x8xbf16>
    %c3_368 = arith.constant 3 : index
    %c0_369 = arith.constant 0 : index
    %c0_370 = arith.constant 0 : index
    %318 = vector.load %arg2[%c3_368, %c0_369, %c0_370] : memref<8x8x128xbf16, #tpu.memory_space<vmem>>, vector<1x8x128xbf16>
    %319 = vector.shape_cast %318 : vector<1x8x128xbf16> to vector<8x128xbf16>
    %cst_371 = arith.constant dense<0.000000e+00> : vector<8x128xf32>
    %320 = tpu.matmul %317, %319, %cst_371 {dimension_numbers = #tpu.dot_dimension_numbers<[1], [0], [0], [1], [0, 0, 1, 1], [], []>} : vector<8x8xbf16>, vector<8x128xbf16>, vector<8x128xf32> -> vector<8x128xf32>
    %321 = arith.addf %315, %320 : vector<8x128xf32>
    %c0_372 = arith.constant 0 : index
    %c12 = arith.constant 12 : index
    %c0_373 = arith.constant 0 : index
    %c0_374 = arith.constant 0 : index
    %322 = vector.load %arg1[%c0_372, %c12, %c0_373, %c0_374] : memref<1x18x9x8xbf16, #tpu.memory_space<vmem>>, vector<1x1x8x8xbf16>
    %323 = vector.shape_cast %322 : vector<1x1x8x8xbf16> to vector<8x8xbf16>
    %c4_375 = arith.constant 4 : index
    %c0_376 = arith.constant 0 : index
    %c0_377 = arith.constant 0 : index
    %324 = vector.load %arg2[%c4_375, %c0_376, %c0_377] : memref<8x8x128xbf16, #tpu.memory_space<vmem>>, vector<1x8x128xbf16>
    %325 = vector.shape_cast %324 : vector<1x8x128xbf16> to vector<8x128xbf16>
    %cst_378 = arith.constant dense<0.000000e+00> : vector<8x128xf32>
    %326 = tpu.matmul %323, %325, %cst_378 {dimension_numbers = #tpu.dot_dimension_numbers<[1], [0], [0], [1], [0, 0, 1, 1], [], []>} : vector<8x8xbf16>, vector<8x128xbf16>, vector<8x128xf32> -> vector<8x128xf32>
    %327 = arith.addf %321, %326 : vector<8x128xf32>
    %c0_379 = arith.constant 0 : index
    %c12_380 = arith.constant 12 : index
    %c1_381 = arith.constant 1 : index
    %c0_382 = arith.constant 0 : index
    %328 = vector.load %arg1[%c0_379, %c12_380, %c1_381, %c0_382] : memref<1x18x9x8xbf16, #tpu.memory_space<vmem>>, vector<1x1x8x8xbf16>
    %329 = vector.shape_cast %328 : vector<1x1x8x8xbf16> to vector<8x8xbf16>
    %c5_383 = arith.constant 5 : index
    %c0_384 = arith.constant 0 : index
    %c0_385 = arith.constant 0 : index
    %330 = vector.load %arg2[%c5_383, %c0_384, %c0_385] : memref<8x8x128xbf16, #tpu.memory_space<vmem>>, vector<1x8x128xbf16>
    %331 = vector.shape_cast %330 : vector<1x8x128xbf16> to vector<8x128xbf16>
    %cst_386 = arith.constant dense<0.000000e+00> : vector<8x128xf32>
    %332 = tpu.matmul %329, %331, %cst_386 {dimension_numbers = #tpu.dot_dimension_numbers<[1], [0], [0], [1], [0, 0, 1, 1], [], []>} : vector<8x8xbf16>, vector<8x128xbf16>, vector<8x128xf32> -> vector<8x128xf32>
    %333 = arith.addf %327, %332 : vector<8x128xf32>
    %c0_387 = arith.constant 0 : index
    %c13 = arith.constant 13 : index
    %c0_388 = arith.constant 0 : index
    %c0_389 = arith.constant 0 : index
    %334 = vector.load %arg1[%c0_387, %c13, %c0_388, %c0_389] : memref<1x18x9x8xbf16, #tpu.memory_space<vmem>>, vector<1x1x8x8xbf16>
    %335 = vector.shape_cast %334 : vector<1x1x8x8xbf16> to vector<8x8xbf16>
    %c6_390 = arith.constant 6 : index
    %c0_391 = arith.constant 0 : index
    %c0_392 = arith.constant 0 : index
    %336 = vector.load %arg2[%c6_390, %c0_391, %c0_392] : memref<8x8x128xbf16, #tpu.memory_space<vmem>>, vector<1x8x128xbf16>
    %337 = vector.shape_cast %336 : vector<1x8x128xbf16> to vector<8x128xbf16>
    %cst_393 = arith.constant dense<0.000000e+00> : vector<8x128xf32>
    %338 = tpu.matmul %335, %337, %cst_393 {dimension_numbers = #tpu.dot_dimension_numbers<[1], [0], [0], [1], [0, 0, 1, 1], [], []>} : vector<8x8xbf16>, vector<8x128xbf16>, vector<8x128xf32> -> vector<8x128xf32>
    %339 = arith.addf %333, %338 : vector<8x128xf32>
    %c0_394 = arith.constant 0 : index
    %c13_395 = arith.constant 13 : index
    %c1_396 = arith.constant 1 : index
    %c0_397 = arith.constant 0 : index
    %340 = vector.load %arg1[%c0_394, %c13_395, %c1_396, %c0_397] : memref<1x18x9x8xbf16, #tpu.memory_space<vmem>>, vector<1x1x8x8xbf16>
    %341 = vector.shape_cast %340 : vector<1x1x8x8xbf16> to vector<8x8xbf16>
    %c7_398 = arith.constant 7 : index
    %c0_399 = arith.constant 0 : index
    %c0_400 = arith.constant 0 : index
    %342 = vector.load %arg2[%c7_398, %c0_399, %c0_400] : memref<8x8x128xbf16, #tpu.memory_space<vmem>>, vector<1x8x128xbf16>
    %343 = vector.shape_cast %342 : vector<1x8x128xbf16> to vector<8x128xbf16>
    %cst_401 = arith.constant dense<0.000000e+00> : vector<8x128xf32>
    %344 = tpu.matmul %341, %343, %cst_401 {dimension_numbers = #tpu.dot_dimension_numbers<[1], [0], [0], [1], [0, 0, 1, 1], [], []>} : vector<8x8xbf16>, vector<8x128xbf16>, vector<8x128xf32> -> vector<8x128xf32>
    %345 = arith.addf %339, %344 : vector<8x128xf32>
    %c5_402 = arith.constant 5 : index
    %c0_403 = arith.constant 0 : index
    %c0_404 = arith.constant 0 : index
    %346 = vector.load %arg4[%c5_402, %c0_403, %c0_404] : memref<8x8x128xf32, #tpu.memory_space<vmem>>, vector<1x8x128xf32>
    %347 = vector.shape_cast %346 : vector<1x8x128xf32> to vector<8x128xf32>
    %348 = vector.shape_cast %345 : vector<8x128xf32> to vector<1x8x128xf32>
    tpu.vector_store %arg4[%c5_402, %c0_403, %c0_404], %348 {strides = array<i32>} : memref<8x8x128xf32, #tpu.memory_space<vmem>>, vector<1x8x128xf32>,
    %cst_405 = arith.constant dense<0.000000e+00> : vector<128xf32>
    %349 = vector.multi_reduction <add>, %345, %cst_405 [0] : vector<8x128xf32> to vector<128xf32>
    %350 = vector.shape_cast %349 : vector<128xf32> to vector<1x128xf32>
    %351 = arith.addf %292, %350 : vector<1x128xf32>
    %352 = arith.mulf %345, %345 : vector<8x128xf32>
    %cst_406 = arith.constant dense<0.000000e+00> : vector<128xf32>
    %353 = vector.multi_reduction <add>, %352, %cst_406 [0] : vector<8x128xf32> to vector<128xf32>
    %354 = vector.shape_cast %353 : vector<128xf32> to vector<1x128xf32>
    %355 = arith.addf %296, %354 : vector<1x128xf32>
    %cst_407 = arith.constant 0.000000e+00 : f32
    %356 = vector.broadcast %cst_407 : f32 to vector<8x128xf32>
    %c0_408 = arith.constant 0 : index
    %c12_409 = arith.constant 12 : index
    %c0_410 = arith.constant 0 : index
    %c0_411 = arith.constant 0 : index
    %357 = vector.load %arg1[%c0_408, %c12_409, %c0_410, %c0_411] : memref<1x18x9x8xbf16, #tpu.memory_space<vmem>>, vector<1x1x8x8xbf16>
    %358 = vector.shape_cast %357 : vector<1x1x8x8xbf16> to vector<8x8xbf16>
    %c0_412 = arith.constant 0 : index
    %c0_413 = arith.constant 0 : index
    %c0_414 = arith.constant 0 : index
    %359 = vector.load %arg2[%c0_412, %c0_413, %c0_414] : memref<8x8x128xbf16, #tpu.memory_space<vmem>>, vector<1x8x128xbf16>
    %360 = vector.shape_cast %359 : vector<1x8x128xbf16> to vector<8x128xbf16>
    %cst_415 = arith.constant dense<0.000000e+00> : vector<8x128xf32>
    %361 = tpu.matmul %358, %360, %cst_415 {dimension_numbers = #tpu.dot_dimension_numbers<[1], [0], [0], [1], [0, 0, 1, 1], [], []>} : vector<8x8xbf16>, vector<8x128xbf16>, vector<8x128xf32> -> vector<8x128xf32>
    %362 = arith.addf %356, %361 : vector<8x128xf32>
    %c0_416 = arith.constant 0 : index
    %c12_417 = arith.constant 12 : index
    %c1_418 = arith.constant 1 : index
    %c0_419 = arith.constant 0 : index
    %363 = vector.load %arg1[%c0_416, %c12_417, %c1_418, %c0_419] : memref<1x18x9x8xbf16, #tpu.memory_space<vmem>>, vector<1x1x8x8xbf16>
    %364 = vector.shape_cast %363 : vector<1x1x8x8xbf16> to vector<8x8xbf16>
    %c1_420 = arith.constant 1 : index
    %c0_421 = arith.constant 0 : index
    %c0_422 = arith.constant 0 : index
    %365 = vector.load %arg2[%c1_420, %c0_421, %c0_422] : memref<8x8x128xbf16, #tpu.memory_space<vmem>>, vector<1x8x128xbf16>
    %366 = vector.shape_cast %365 : vector<1x8x128xbf16> to vector<8x128xbf16>
    %cst_423 = arith.constant dense<0.000000e+00> : vector<8x128xf32>
    %367 = tpu.matmul %364, %366, %cst_423 {dimension_numbers = #tpu.dot_dimension_numbers<[1], [0], [0], [1], [0, 0, 1, 1], [], []>} : vector<8x8xbf16>, vector<8x128xbf16>, vector<8x128xf32> -> vector<8x128xf32>
    %368 = arith.addf %362, %367 : vector<8x128xf32>
    %c0_424 = arith.constant 0 : index
    %c13_425 = arith.constant 13 : index
    %c0_426 = arith.constant 0 : index
    %c0_427 = arith.constant 0 : index
    %369 = vector.load %arg1[%c0_424, %c13_425, %c0_426, %c0_427] : memref<1x18x9x8xbf16, #tpu.memory_space<vmem>>, vector<1x1x8x8xbf16>
    %370 = vector.shape_cast %369 : vector<1x1x8x8xbf16> to vector<8x8xbf16>
    %c2_428 = arith.constant 2 : index
    %c0_429 = arith.constant 0 : index
    %c0_430 = arith.constant 0 : index
    %371 = vector.load %arg2[%c2_428, %c0_429, %c0_430] : memref<8x8x128xbf16, #tpu.memory_space<vmem>>, vector<1x8x128xbf16>
    %372 = vector.shape_cast %371 : vector<1x8x128xbf16> to vector<8x128xbf16>
    %cst_431 = arith.constant dense<0.000000e+00> : vector<8x128xf32>
    %373 = tpu.matmul %370, %372, %cst_431 {dimension_numbers = #tpu.dot_dimension_numbers<[1], [0], [0], [1], [0, 0, 1, 1], [], []>} : vector<8x8xbf16>, vector<8x128xbf16>, vector<8x128xf32> -> vector<8x128xf32>
    %374 = arith.addf %368, %373 : vector<8x128xf32>
    %c0_432 = arith.constant 0 : index
    %c13_433 = arith.constant 13 : index
    %c1_434 = arith.constant 1 : index
    %c0_435 = arith.constant 0 : index
    %375 = vector.load %arg1[%c0_432, %c13_433, %c1_434, %c0_435] : memref<1x18x9x8xbf16, #tpu.memory_space<vmem>>, vector<1x1x8x8xbf16>
    %376 = vector.shape_cast %375 : vector<1x1x8x8xbf16> to vector<8x8xbf16>
    %c3_436 = arith.constant 3 : index
    %c0_437 = arith.constant 0 : index
    %c0_438 = arith.constant 0 : index
    %377 = vector.load %arg2[%c3_436, %c0_437, %c0_438] : memref<8x8x128xbf16, #tpu.memory_space<vmem>>, vector<1x8x128xbf16>
    %378 = vector.shape_cast %377 : vector<1x8x128xbf16> to vector<8x128xbf16>
    %cst_439 = arith.constant dense<0.000000e+00> : vector<8x128xf32>
    %379 = tpu.matmul %376, %378, %cst_439 {dimension_numbers = #tpu.dot_dimension_numbers<[1], [0], [0], [1], [0, 0, 1, 1], [], []>} : vector<8x8xbf16>, vector<8x128xbf16>, vector<8x128xf32> -> vector<8x128xf32>
    %380 = arith.addf %374, %379 : vector<8x128xf32>
    %c0_440 = arith.constant 0 : index
    %c14 = arith.constant 14 : index
    %c0_441 = arith.constant 0 : index
    %c0_442 = arith.constant 0 : index
    %381 = vector.load %arg1[%c0_440, %c14, %c0_441, %c0_442] : memref<1x18x9x8xbf16, #tpu.memory_space<vmem>>, vector<1x1x8x8xbf16>
    %382 = vector.shape_cast %381 : vector<1x1x8x8xbf16> to vector<8x8xbf16>
    %c4_443 = arith.constant 4 : index
    %c0_444 = arith.constant 0 : index
    %c0_445 = arith.constant 0 : index
    %383 = vector.load %arg2[%c4_443, %c0_444, %c0_445] : memref<8x8x128xbf16, #tpu.memory_space<vmem>>, vector<1x8x128xbf16>
    %384 = vector.shape_cast %383 : vector<1x8x128xbf16> to vector<8x128xbf16>
    %cst_446 = arith.constant dense<0.000000e+00> : vector<8x128xf32>
    %385 = tpu.matmul %382, %384, %cst_446 {dimension_numbers = #tpu.dot_dimension_numbers<[1], [0], [0], [1], [0, 0, 1, 1], [], []>} : vector<8x8xbf16>, vector<8x128xbf16>, vector<8x128xf32> -> vector<8x128xf32>
    %386 = arith.addf %380, %385 : vector<8x128xf32>
    %c0_447 = arith.constant 0 : index
    %c14_448 = arith.constant 14 : index
    %c1_449 = arith.constant 1 : index
    %c0_450 = arith.constant 0 : index
    %387 = vector.load %arg1[%c0_447, %c14_448, %c1_449, %c0_450] : memref<1x18x9x8xbf16, #tpu.memory_space<vmem>>, vector<1x1x8x8xbf16>
    %388 = vector.shape_cast %387 : vector<1x1x8x8xbf16> to vector<8x8xbf16>
    %c5_451 = arith.constant 5 : index
    %c0_452 = arith.constant 0 : index
    %c0_453 = arith.constant 0 : index
    %389 = vector.load %arg2[%c5_451, %c0_452, %c0_453] : memref<8x8x128xbf16, #tpu.memory_space<vmem>>, vector<1x8x128xbf16>
    %390 = vector.shape_cast %389 : vector<1x8x128xbf16> to vector<8x128xbf16>
    %cst_454 = arith.constant dense<0.000000e+00> : vector<8x128xf32>
    %391 = tpu.matmul %388, %390, %cst_454 {dimension_numbers = #tpu.dot_dimension_numbers<[1], [0], [0], [1], [0, 0, 1, 1], [], []>} : vector<8x8xbf16>, vector<8x128xbf16>, vector<8x128xf32> -> vector<8x128xf32>
    %392 = arith.addf %386, %391 : vector<8x128xf32>
    %c0_455 = arith.constant 0 : index
    %c15 = arith.constant 15 : index
    %c0_456 = arith.constant 0 : index
    %c0_457 = arith.constant 0 : index
    %393 = vector.load %arg1[%c0_455, %c15, %c0_456, %c0_457] : memref<1x18x9x8xbf16, #tpu.memory_space<vmem>>, vector<1x1x8x8xbf16>
    %394 = vector.shape_cast %393 : vector<1x1x8x8xbf16> to vector<8x8xbf16>
    %c6_458 = arith.constant 6 : index
    %c0_459 = arith.constant 0 : index
    %c0_460 = arith.constant 0 : index
    %395 = vector.load %arg2[%c6_458, %c0_459, %c0_460] : memref<8x8x128xbf16, #tpu.memory_space<vmem>>, vector<1x8x128xbf16>
    %396 = vector.shape_cast %395 : vector<1x8x128xbf16> to vector<8x128xbf16>
    %cst_461 = arith.constant dense<0.000000e+00> : vector<8x128xf32>
    %397 = tpu.matmul %394, %396, %cst_461 {dimension_numbers = #tpu.dot_dimension_numbers<[1], [0], [0], [1], [0, 0, 1, 1], [], []>} : vector<8x8xbf16>, vector<8x128xbf16>, vector<8x128xf32> -> vector<8x128xf32>
    %398 = arith.addf %392, %397 : vector<8x128xf32>
    %c0_462 = arith.constant 0 : index
    %c15_463 = arith.constant 15 : index
    %c1_464 = arith.constant 1 : index
    %c0_465 = arith.constant 0 : index
    %399 = vector.load %arg1[%c0_462, %c15_463, %c1_464, %c0_465] : memref<1x18x9x8xbf16, #tpu.memory_space<vmem>>, vector<1x1x8x8xbf16>
    %400 = vector.shape_cast %399 : vector<1x1x8x8xbf16> to vector<8x8xbf16>
    %c7_466 = arith.constant 7 : index
    %c0_467 = arith.constant 0 : index
    %c0_468 = arith.constant 0 : index
    %401 = vector.load %arg2[%c7_466, %c0_467, %c0_468] : memref<8x8x128xbf16, #tpu.memory_space<vmem>>, vector<1x8x128xbf16>
    %402 = vector.shape_cast %401 : vector<1x8x128xbf16> to vector<8x128xbf16>
    %cst_469 = arith.constant dense<0.000000e+00> : vector<8x128xf32>
    %403 = tpu.matmul %400, %402, %cst_469 {dimension_numbers = #tpu.dot_dimension_numbers<[1], [0], [0], [1], [0, 0, 1, 1], [], []>} : vector<8x8xbf16>, vector<8x128xbf16>, vector<8x128xf32> -> vector<8x128xf32>
    %404 = arith.addf %398, %403 : vector<8x128xf32>
    %c6_470 = arith.constant 6 : index
    %c0_471 = arith.constant 0 : index
    %c0_472 = arith.constant 0 : index
    %405 = vector.load %arg4[%c6_470, %c0_471, %c0_472] : memref<8x8x128xf32, #tpu.memory_space<vmem>>, vector<1x8x128xf32>
    %406 = vector.shape_cast %405 : vector<1x8x128xf32> to vector<8x128xf32>
    %407 = vector.shape_cast %404 : vector<8x128xf32> to vector<1x8x128xf32>
    tpu.vector_store %arg4[%c6_470, %c0_471, %c0_472], %407 {strides = array<i32>} : memref<8x8x128xf32, #tpu.memory_space<vmem>>, vector<1x8x128xf32>,
    %cst_473 = arith.constant dense<0.000000e+00> : vector<128xf32>
    %408 = vector.multi_reduction <add>, %404, %cst_473 [0] : vector<8x128xf32> to vector<128xf32>
    %409 = vector.shape_cast %408 : vector<128xf32> to vector<1x128xf32>
    %410 = arith.addf %351, %409 : vector<1x128xf32>
    %411 = arith.mulf %404, %404 : vector<8x128xf32>
    %cst_474 = arith.constant dense<0.000000e+00> : vector<128xf32>
    %412 = vector.multi_reduction <add>, %411, %cst_474 [0] : vector<8x128xf32> to vector<128xf32>
    %413 = vector.shape_cast %412 : vector<128xf32> to vector<1x128xf32>
    %414 = arith.addf %355, %413 : vector<1x128xf32>
    %cst_475 = arith.constant 0.000000e+00 : f32
    %415 = vector.broadcast %cst_475 : f32 to vector<8x128xf32>
    %c0_476 = arith.constant 0 : index
    %c14_477 = arith.constant 14 : index
    %c0_478 = arith.constant 0 : index
    %c0_479 = arith.constant 0 : index
    %416 = vector.load %arg1[%c0_476, %c14_477, %c0_478, %c0_479] : memref<1x18x9x8xbf16, #tpu.memory_space<vmem>>, vector<1x1x8x8xbf16>
    %417 = vector.shape_cast %416 : vector<1x1x8x8xbf16> to vector<8x8xbf16>
    %c0_480 = arith.constant 0 : index
    %c0_481 = arith.constant 0 : index
    %c0_482 = arith.constant 0 : index
    %418 = vector.load %arg2[%c0_480, %c0_481, %c0_482] : memref<8x8x128xbf16, #tpu.memory_space<vmem>>, vector<1x8x128xbf16>
    %419 = vector.shape_cast %418 : vector<1x8x128xbf16> to vector<8x128xbf16>
    %cst_483 = arith.constant dense<0.000000e+00> : vector<8x128xf32>
    %420 = tpu.matmul %417, %419, %cst_483 {dimension_numbers = #tpu.dot_dimension_numbers<[1], [0], [0], [1], [0, 0, 1, 1], [], []>} : vector<8x8xbf16>, vector<8x128xbf16>, vector<8x128xf32> -> vector<8x128xf32>
    %421 = arith.addf %415, %420 : vector<8x128xf32>
    %c0_484 = arith.constant 0 : index
    %c14_485 = arith.constant 14 : index
    %c1_486 = arith.constant 1 : index
    %c0_487 = arith.constant 0 : index
    %422 = vector.load %arg1[%c0_484, %c14_485, %c1_486, %c0_487] : memref<1x18x9x8xbf16, #tpu.memory_space<vmem>>, vector<1x1x8x8xbf16>
    %423 = vector.shape_cast %422 : vector<1x1x8x8xbf16> to vector<8x8xbf16>
    %c1_488 = arith.constant 1 : index
    %c0_489 = arith.constant 0 : index
    %c0_490 = arith.constant 0 : index
    %424 = vector.load %arg2[%c1_488, %c0_489, %c0_490] : memref<8x8x128xbf16, #tpu.memory_space<vmem>>, vector<1x8x128xbf16>
    %425 = vector.shape_cast %424 : vector<1x8x128xbf16> to vector<8x128xbf16>
    %cst_491 = arith.constant dense<0.000000e+00> : vector<8x128xf32>
    %426 = tpu.matmul %423, %425, %cst_491 {dimension_numbers = #tpu.dot_dimension_numbers<[1], [0], [0], [1], [0, 0, 1, 1], [], []>} : vector<8x8xbf16>, vector<8x128xbf16>, vector<8x128xf32> -> vector<8x128xf32>
    %427 = arith.addf %421, %426 : vector<8x128xf32>
    %c0_492 = arith.constant 0 : index
    %c15_493 = arith.constant 15 : index
    %c0_494 = arith.constant 0 : index
    %c0_495 = arith.constant 0 : index
    %428 = vector.load %arg1[%c0_492, %c15_493, %c0_494, %c0_495] : memref<1x18x9x8xbf16, #tpu.memory_space<vmem>>, vector<1x1x8x8xbf16>
    %429 = vector.shape_cast %428 : vector<1x1x8x8xbf16> to vector<8x8xbf16>
    %c2_496 = arith.constant 2 : index
    %c0_497 = arith.constant 0 : index
    %c0_498 = arith.constant 0 : index
    %430 = vector.load %arg2[%c2_496, %c0_497, %c0_498] : memref<8x8x128xbf16, #tpu.memory_space<vmem>>, vector<1x8x128xbf16>
    %431 = vector.shape_cast %430 : vector<1x8x128xbf16> to vector<8x128xbf16>
    %cst_499 = arith.constant dense<0.000000e+00> : vector<8x128xf32>
    %432 = tpu.matmul %429, %431, %cst_499 {dimension_numbers = #tpu.dot_dimension_numbers<[1], [0], [0], [1], [0, 0, 1, 1], [], []>} : vector<8x8xbf16>, vector<8x128xbf16>, vector<8x128xf32> -> vector<8x128xf32>
    %433 = arith.addf %427, %432 : vector<8x128xf32>
    %c0_500 = arith.constant 0 : index
    %c15_501 = arith.constant 15 : index
    %c1_502 = arith.constant 1 : index
    %c0_503 = arith.constant 0 : index
    %434 = vector.load %arg1[%c0_500, %c15_501, %c1_502, %c0_503] : memref<1x18x9x8xbf16, #tpu.memory_space<vmem>>, vector<1x1x8x8xbf16>
    %435 = vector.shape_cast %434 : vector<1x1x8x8xbf16> to vector<8x8xbf16>
    %c3_504 = arith.constant 3 : index
    %c0_505 = arith.constant 0 : index
    %c0_506 = arith.constant 0 : index
    %436 = vector.load %arg2[%c3_504, %c0_505, %c0_506] : memref<8x8x128xbf16, #tpu.memory_space<vmem>>, vector<1x8x128xbf16>
    %437 = vector.shape_cast %436 : vector<1x8x128xbf16> to vector<8x128xbf16>
    %cst_507 = arith.constant dense<0.000000e+00> : vector<8x128xf32>
    %438 = tpu.matmul %435, %437, %cst_507 {dimension_numbers = #tpu.dot_dimension_numbers<[1], [0], [0], [1], [0, 0, 1, 1], [], []>} : vector<8x8xbf16>, vector<8x128xbf16>, vector<8x128xf32> -> vector<8x128xf32>
    %439 = arith.addf %433, %438 : vector<8x128xf32>
    %c0_508 = arith.constant 0 : index
    %c16 = arith.constant 16 : index
    %c0_509 = arith.constant 0 : index
    %c0_510 = arith.constant 0 : index
    %440 = vector.load %arg1[%c0_508, %c16, %c0_509, %c0_510] : memref<1x18x9x8xbf16, #tpu.memory_space<vmem>>, vector<1x1x8x8xbf16>
    %441 = vector.shape_cast %440 : vector<1x1x8x8xbf16> to vector<8x8xbf16>
    %c4_511 = arith.constant 4 : index
    %c0_512 = arith.constant 0 : index
    %c0_513 = arith.constant 0 : index
    %442 = vector.load %arg2[%c4_511, %c0_512, %c0_513] : memref<8x8x128xbf16, #tpu.memory_space<vmem>>, vector<1x8x128xbf16>
    %443 = vector.shape_cast %442 : vector<1x8x128xbf16> to vector<8x128xbf16>
    %cst_514 = arith.constant dense<0.000000e+00> : vector<8x128xf32>
    %444 = tpu.matmul %441, %443, %cst_514 {dimension_numbers = #tpu.dot_dimension_numbers<[1], [0], [0], [1], [0, 0, 1, 1], [], []>} : vector<8x8xbf16>, vector<8x128xbf16>, vector<8x128xf32> -> vector<8x128xf32>
    %445 = arith.addf %439, %444 : vector<8x128xf32>
    %c0_515 = arith.constant 0 : index
    %c16_516 = arith.constant 16 : index
    %c1_517 = arith.constant 1 : index
    %c0_518 = arith.constant 0 : index
    %446 = vector.load %arg1[%c0_515, %c16_516, %c1_517, %c0_518] : memref<1x18x9x8xbf16, #tpu.memory_space<vmem>>, vector<1x1x8x8xbf16>
    %447 = vector.shape_cast %446 : vector<1x1x8x8xbf16> to vector<8x8xbf16>
    %c5_519 = arith.constant 5 : index
    %c0_520 = arith.constant 0 : index
    %c0_521 = arith.constant 0 : index
    %448 = vector.load %arg2[%c5_519, %c0_520, %c0_521] : memref<8x8x128xbf16, #tpu.memory_space<vmem>>, vector<1x8x128xbf16>
    %449 = vector.shape_cast %448 : vector<1x8x128xbf16> to vector<8x128xbf16>
    %cst_522 = arith.constant dense<0.000000e+00> : vector<8x128xf32>
    %450 = tpu.matmul %447, %449, %cst_522 {dimension_numbers = #tpu.dot_dimension_numbers<[1], [0], [0], [1], [0, 0, 1, 1], [], []>} : vector<8x8xbf16>, vector<8x128xbf16>, vector<8x128xf32> -> vector<8x128xf32>
    %451 = arith.addf %445, %450 : vector<8x128xf32>
    %c0_523 = arith.constant 0 : index
    %c17 = arith.constant 17 : index
    %c0_524 = arith.constant 0 : index
    %c0_525 = arith.constant 0 : index
    %452 = vector.load %arg1[%c0_523, %c17, %c0_524, %c0_525] : memref<1x18x9x8xbf16, #tpu.memory_space<vmem>>, vector<1x1x8x8xbf16>
    %453 = vector.shape_cast %452 : vector<1x1x8x8xbf16> to vector<8x8xbf16>
    %c6_526 = arith.constant 6 : index
    %c0_527 = arith.constant 0 : index
    %c0_528 = arith.constant 0 : index
    %454 = vector.load %arg2[%c6_526, %c0_527, %c0_528] : memref<8x8x128xbf16, #tpu.memory_space<vmem>>, vector<1x8x128xbf16>
    %455 = vector.shape_cast %454 : vector<1x8x128xbf16> to vector<8x128xbf16>
    %cst_529 = arith.constant dense<0.000000e+00> : vector<8x128xf32>
    %456 = tpu.matmul %453, %455, %cst_529 {dimension_numbers = #tpu.dot_dimension_numbers<[1], [0], [0], [1], [0, 0, 1, 1], [], []>} : vector<8x8xbf16>, vector<8x128xbf16>, vector<8x128xf32> -> vector<8x128xf32>
    %457 = arith.addf %451, %456 : vector<8x128xf32>
    %c0_530 = arith.constant 0 : index
    %c17_531 = arith.constant 17 : index
    %c1_532 = arith.constant 1 : index
    %c0_533 = arith.constant 0 : index
    %458 = vector.load %arg1[%c0_530, %c17_531, %c1_532, %c0_533] : memref<1x18x9x8xbf16, #tpu.memory_space<vmem>>, vector<1x1x8x8xbf16>
    %459 = vector.shape_cast %458 : vector<1x1x8x8xbf16> to vector<8x8xbf16>
    %c7_534 = arith.constant 7 : index
    %c0_535 = arith.constant 0 : index
    %c0_536 = arith.constant 0 : index
    %460 = vector.load %arg2[%c7_534, %c0_535, %c0_536] : memref<8x8x128xbf16, #tpu.memory_space<vmem>>, vector<1x8x128xbf16>
    %461 = vector.shape_cast %460 : vector<1x8x128xbf16> to vector<8x128xbf16>
    %cst_537 = arith.constant dense<0.000000e+00> : vector<8x128xf32>
    %462 = tpu.matmul %459, %461, %cst_537 {dimension_numbers = #tpu.dot_dimension_numbers<[1], [0], [0], [1], [0, 0, 1, 1], [], []>} : vector<8x8xbf16>, vector<8x128xbf16>, vector<8x128xf32> -> vector<8x128xf32>
    %463 = arith.addf %457, %462 : vector<8x128xf32>
    %c7_538 = arith.constant 7 : index
    %c0_539 = arith.constant 0 : index
    %c0_540 = arith.constant 0 : index
    %464 = vector.load %arg4[%c7_538, %c0_539, %c0_540] : memref<8x8x128xf32, #tpu.memory_space<vmem>>, vector<1x8x128xf32>
    %465 = vector.shape_cast %464 : vector<1x8x128xf32> to vector<8x128xf32>
    %466 = vector.shape_cast %463 : vector<8x128xf32> to vector<1x8x128xf32>
    tpu.vector_store %arg4[%c7_538, %c0_539, %c0_540], %466 {strides = array<i32>} : memref<8x8x128xf32, #tpu.memory_space<vmem>>, vector<1x8x128xf32>,
    %cst_541 = arith.constant dense<0.000000e+00> : vector<128xf32>
    %467 = vector.multi_reduction <add>, %463, %cst_541 [0] : vector<8x128xf32> to vector<128xf32>
    %468 = vector.shape_cast %467 : vector<128xf32> to vector<1x128xf32>
    %469 = arith.addf %410, %468 : vector<1x128xf32>
    %470 = arith.mulf %463, %463 : vector<8x128xf32>
    %cst_542 = arith.constant dense<0.000000e+00> : vector<128xf32>
    %471 = vector.multi_reduction <add>, %470, %cst_542 [0] : vector<8x128xf32> to vector<128xf32>
    %472 = vector.shape_cast %471 : vector<128xf32> to vector<1x128xf32>
    %473 = arith.addf %414, %472 : vector<1x128xf32>
    %cst_543 = arith.constant 1.562500e-02 : f32
    %474 = vector.broadcast %cst_543 : f32 to vector<1x128xf32>
    %475 = arith.mulf %469, %474 : vector<1x128xf32>
    %cst_544 = arith.constant 1.562500e-02 : f32
    %476 = vector.broadcast %cst_544 : f32 to vector<1x128xf32>
    %477 = arith.mulf %473, %476 : vector<1x128xf32>
    %478 = arith.mulf %475, %475 : vector<1x128xf32>
    %479 = arith.subf %477, %478 : vector<1x128xf32>
    %cst_545 = arith.constant 0.000000e+00 : f32
    %480 = vector.broadcast %cst_545 : f32 to vector<1x128xf32>
    %481 = arith.maximumf %479, %480 : vector<1x128xf32>
    %cst_546 = arith.constant 9.99999974E-6 : f32
    %482 = vector.broadcast %cst_546 : f32 to vector<1x128xf32>
    %483 = arith.addf %481, %482 : vector<1x128xf32>
    %484 = math.rsqrt %483 : vector<1x128xf32>
    %c0_547 = arith.constant 0 : index
    %c0_548 = arith.constant 0 : index
    %c0_549 = arith.constant 0 : index
    %485 = vector.load %arg4[%c0_547, %c0_548, %c0_549] : memref<8x8x128xf32, #tpu.memory_space<vmem>>, vector<1x8x128xf32>
    %486 = vector.shape_cast %485 : vector<1x8x128xf32> to vector<8x128xf32>
    %487 = vector.broadcast %475 : vector<1x128xf32> to vector<8x128xf32>
    %488 = arith.subf %486, %487 : vector<8x128xf32>
    %489 = vector.broadcast %484 : vector<1x128xf32> to vector<8x128xf32>
    %490 = arith.mulf %488, %489 : vector<8x128xf32>
    %cst_550 = arith.constant 0.000000e+00 : f32
    %491 = vector.broadcast %cst_550 : f32 to vector<8x128xf32>
    %492 = arith.cmpf oge, %490, %491 : vector<8x128xf32>
    %cst_551 = arith.constant 2.000000e-01 : f32
    %493 = vector.broadcast %cst_551 : f32 to vector<8x128xf32>
    %494 = arith.mulf %493, %490 : vector<8x128xf32>
    %495 = arith.select %492, %490, %494 : vector<8x128xi1>, vector<8x128xf32>
    %496 = arith.truncf %495 : vector<8x128xf32> to vector<8x128xbf16>
    %c0_552 = arith.constant 0 : index
    %c0_553 = arith.constant 0 : index
    %c0_554 = arith.constant 0 : index
    %c0_555 = arith.constant 0 : index
    %497 = vector.load %arg3[%c0_552, %c0_553, %c0_554, %c0_555] : memref<1x8x8x128xbf16, #tpu.memory_space<vmem>>, vector<1x1x8x128xbf16>
    %498 = vector.shape_cast %497 : vector<1x1x8x128xbf16> to vector<8x128xbf16>
    %499 = vector.shape_cast %496 : vector<8x128xbf16> to vector<1x1x8x128xbf16>
    tpu.vector_store %arg3[%c0_552, %c0_553, %c0_554, %c0_555], %499 {strides = array<i32>} : memref<1x8x8x128xbf16, #tpu.memory_space<vmem>>, vector<1x1x8x128xbf16>,
    %c1_556 = arith.constant 1 : index
    %c0_557 = arith.constant 0 : index
    %c0_558 = arith.constant 0 : index
    %500 = vector.load %arg4[%c1_556, %c0_557, %c0_558] : memref<8x8x128xf32, #tpu.memory_space<vmem>>, vector<1x8x128xf32>
    %501 = vector.shape_cast %500 : vector<1x8x128xf32> to vector<8x128xf32>
    %502 = vector.broadcast %475 : vector<1x128xf32> to vector<8x128xf32>
    %503 = arith.subf %501, %502 : vector<8x128xf32>
    %504 = vector.broadcast %484 : vector<1x128xf32> to vector<8x128xf32>
    %505 = arith.mulf %503, %504 : vector<8x128xf32>
    %cst_559 = arith.constant 0.000000e+00 : f32
    %506 = vector.broadcast %cst_559 : f32 to vector<8x128xf32>
    %507 = arith.cmpf oge, %505, %506 : vector<8x128xf32>
    %cst_560 = arith.constant 2.000000e-01 : f32
    %508 = vector.broadcast %cst_560 : f32 to vector<8x128xf32>
    %509 = arith.mulf %508, %505 : vector<8x128xf32>
    %510 = arith.select %507, %505, %509 : vector<8x128xi1>, vector<8x128xf32>
    %511 = arith.truncf %510 : vector<8x128xf32> to vector<8x128xbf16>
    %c0_561 = arith.constant 0 : index
    %c1_562 = arith.constant 1 : index
    %c0_563 = arith.constant 0 : index
    %c0_564 = arith.constant 0 : index
    %512 = vector.load %arg3[%c0_561, %c1_562, %c0_563, %c0_564] : memref<1x8x8x128xbf16, #tpu.memory_space<vmem>>, vector<1x1x8x128xbf16>
    %513 = vector.shape_cast %512 : vector<1x1x8x128xbf16> to vector<8x128xbf16>
    %514 = vector.shape_cast %511 : vector<8x128xbf16> to vector<1x1x8x128xbf16>
    tpu.vector_store %arg3[%c0_561, %c1_562, %c0_563, %c0_564], %514 {strides = array<i32>} : memref<1x8x8x128xbf16, #tpu.memory_space<vmem>>, vector<1x1x8x128xbf16>,
    %c2_565 = arith.constant 2 : index
    %c0_566 = arith.constant 0 : index
    %c0_567 = arith.constant 0 : index
    %515 = vector.load %arg4[%c2_565, %c0_566, %c0_567] : memref<8x8x128xf32, #tpu.memory_space<vmem>>, vector<1x8x128xf32>
    %516 = vector.shape_cast %515 : vector<1x8x128xf32> to vector<8x128xf32>
    %517 = vector.broadcast %475 : vector<1x128xf32> to vector<8x128xf32>
    %518 = arith.subf %516, %517 : vector<8x128xf32>
    %519 = vector.broadcast %484 : vector<1x128xf32> to vector<8x128xf32>
    %520 = arith.mulf %518, %519 : vector<8x128xf32>
    %cst_568 = arith.constant 0.000000e+00 : f32
    %521 = vector.broadcast %cst_568 : f32 to vector<8x128xf32>
    %522 = arith.cmpf oge, %520, %521 : vector<8x128xf32>
    %cst_569 = arith.constant 2.000000e-01 : f32
    %523 = vector.broadcast %cst_569 : f32 to vector<8x128xf32>
    %524 = arith.mulf %523, %520 : vector<8x128xf32>
    %525 = arith.select %522, %520, %524 : vector<8x128xi1>, vector<8x128xf32>
    %526 = arith.truncf %525 : vector<8x128xf32> to vector<8x128xbf16>
    %c0_570 = arith.constant 0 : index
    %c2_571 = arith.constant 2 : index
    %c0_572 = arith.constant 0 : index
    %c0_573 = arith.constant 0 : index
    %527 = vector.load %arg3[%c0_570, %c2_571, %c0_572, %c0_573] : memref<1x8x8x128xbf16, #tpu.memory_space<vmem>>, vector<1x1x8x128xbf16>
    %528 = vector.shape_cast %527 : vector<1x1x8x128xbf16> to vector<8x128xbf16>
    %529 = vector.shape_cast %526 : vector<8x128xbf16> to vector<1x1x8x128xbf16>
    tpu.vector_store %arg3[%c0_570, %c2_571, %c0_572, %c0_573], %529 {strides = array<i32>} : memref<1x8x8x128xbf16, #tpu.memory_space<vmem>>, vector<1x1x8x128xbf16>,
    %c3_574 = arith.constant 3 : index
    %c0_575 = arith.constant 0 : index
    %c0_576 = arith.constant 0 : index
    %530 = vector.load %arg4[%c3_574, %c0_575, %c0_576] : memref<8x8x128xf32, #tpu.memory_space<vmem>>, vector<1x8x128xf32>
    %531 = vector.shape_cast %530 : vector<1x8x128xf32> to vector<8x128xf32>
    %532 = vector.broadcast %475 : vector<1x128xf32> to vector<8x128xf32>
    %533 = arith.subf %531, %532 : vector<8x128xf32>
    %534 = vector.broadcast %484 : vector<1x128xf32> to vector<8x128xf32>
    %535 = arith.mulf %533, %534 : vector<8x128xf32>
    %cst_577 = arith.constant 0.000000e+00 : f32
    %536 = vector.broadcast %cst_577 : f32 to vector<8x128xf32>
    %537 = arith.cmpf oge, %535, %536 : vector<8x128xf32>
    %cst_578 = arith.constant 2.000000e-01 : f32
    %538 = vector.broadcast %cst_578 : f32 to vector<8x128xf32>
    %539 = arith.mulf %538, %535 : vector<8x128xf32>
    %540 = arith.select %537, %535, %539 : vector<8x128xi1>, vector<8x128xf32>
    %541 = arith.truncf %540 : vector<8x128xf32> to vector<8x128xbf16>
    %c0_579 = arith.constant 0 : index
    %c3_580 = arith.constant 3 : index
    %c0_581 = arith.constant 0 : index
    %c0_582 = arith.constant 0 : index
    %542 = vector.load %arg3[%c0_579, %c3_580, %c0_581, %c0_582] : memref<1x8x8x128xbf16, #tpu.memory_space<vmem>>, vector<1x1x8x128xbf16>
    %543 = vector.shape_cast %542 : vector<1x1x8x128xbf16> to vector<8x128xbf16>
    %544 = vector.shape_cast %541 : vector<8x128xbf16> to vector<1x1x8x128xbf16>
    tpu.vector_store %arg3[%c0_579, %c3_580, %c0_581, %c0_582], %544 {strides = array<i32>} : memref<1x8x8x128xbf16, #tpu.memory_space<vmem>>, vector<1x1x8x128xbf16>,
    %c4_583 = arith.constant 4 : index
    %c0_584 = arith.constant 0 : index
    %c0_585 = arith.constant 0 : index
    %545 = vector.load %arg4[%c4_583, %c0_584, %c0_585] : memref<8x8x128xf32, #tpu.memory_space<vmem>>, vector<1x8x128xf32>
    %546 = vector.shape_cast %545 : vector<1x8x128xf32> to vector<8x128xf32>
    %547 = vector.broadcast %475 : vector<1x128xf32> to vector<8x128xf32>
    %548 = arith.subf %546, %547 : vector<8x128xf32>
    %549 = vector.broadcast %484 : vector<1x128xf32> to vector<8x128xf32>
    %550 = arith.mulf %548, %549 : vector<8x128xf32>
    %cst_586 = arith.constant 0.000000e+00 : f32
    %551 = vector.broadcast %cst_586 : f32 to vector<8x128xf32>
    %552 = arith.cmpf oge, %550, %551 : vector<8x128xf32>
    %cst_587 = arith.constant 2.000000e-01 : f32
    %553 = vector.broadcast %cst_587 : f32 to vector<8x128xf32>
    %554 = arith.mulf %553, %550 : vector<8x128xf32>
    %555 = arith.select %552, %550, %554 : vector<8x128xi1>, vector<8x128xf32>
    %556 = arith.truncf %555 : vector<8x128xf32> to vector<8x128xbf16>
    %c0_588 = arith.constant 0 : index
    %c4_589 = arith.constant 4 : index
    %c0_590 = arith.constant 0 : index
    %c0_591 = arith.constant 0 : index
    %557 = vector.load %arg3[%c0_588, %c4_589, %c0_590, %c0_591] : memref<1x8x8x128xbf16, #tpu.memory_space<vmem>>, vector<1x1x8x128xbf16>
    %558 = vector.shape_cast %557 : vector<1x1x8x128xbf16> to vector<8x128xbf16>
    %559 = vector.shape_cast %556 : vector<8x128xbf16> to vector<1x1x8x128xbf16>
    tpu.vector_store %arg3[%c0_588, %c4_589, %c0_590, %c0_591], %559 {strides = array<i32>} : memref<1x8x8x128xbf16, #tpu.memory_space<vmem>>, vector<1x1x8x128xbf16>,
    %c5_592 = arith.constant 5 : index
    %c0_593 = arith.constant 0 : index
    %c0_594 = arith.constant 0 : index
    %560 = vector.load %arg4[%c5_592, %c0_593, %c0_594] : memref<8x8x128xf32, #tpu.memory_space<vmem>>, vector<1x8x128xf32>
    %561 = vector.shape_cast %560 : vector<1x8x128xf32> to vector<8x128xf32>
    %562 = vector.broadcast %475 : vector<1x128xf32> to vector<8x128xf32>
    %563 = arith.subf %561, %562 : vector<8x128xf32>
    %564 = vector.broadcast %484 : vector<1x128xf32> to vector<8x128xf32>
    %565 = arith.mulf %563, %564 : vector<8x128xf32>
    %cst_595 = arith.constant 0.000000e+00 : f32
    %566 = vector.broadcast %cst_595 : f32 to vector<8x128xf32>
    %567 = arith.cmpf oge, %565, %566 : vector<8x128xf32>
    %cst_596 = arith.constant 2.000000e-01 : f32
    %568 = vector.broadcast %cst_596 : f32 to vector<8x128xf32>
    %569 = arith.mulf %568, %565 : vector<8x128xf32>
    %570 = arith.select %567, %565, %569 : vector<8x128xi1>, vector<8x128xf32>
    %571 = arith.truncf %570 : vector<8x128xf32> to vector<8x128xbf16>
    %c0_597 = arith.constant 0 : index
    %c5_598 = arith.constant 5 : index
    %c0_599 = arith.constant 0 : index
    %c0_600 = arith.constant 0 : index
    %572 = vector.load %arg3[%c0_597, %c5_598, %c0_599, %c0_600] : memref<1x8x8x128xbf16, #tpu.memory_space<vmem>>, vector<1x1x8x128xbf16>
    %573 = vector.shape_cast %572 : vector<1x1x8x128xbf16> to vector<8x128xbf16>
    %574 = vector.shape_cast %571 : vector<8x128xbf16> to vector<1x1x8x128xbf16>
    tpu.vector_store %arg3[%c0_597, %c5_598, %c0_599, %c0_600], %574 {strides = array<i32>} : memref<1x8x8x128xbf16, #tpu.memory_space<vmem>>, vector<1x1x8x128xbf16>,
    %c6_601 = arith.constant 6 : index
    %c0_602 = arith.constant 0 : index
    %c0_603 = arith.constant 0 : index
    %575 = vector.load %arg4[%c6_601, %c0_602, %c0_603] : memref<8x8x128xf32, #tpu.memory_space<vmem>>, vector<1x8x128xf32>
    %576 = vector.shape_cast %575 : vector<1x8x128xf32> to vector<8x128xf32>
    %577 = vector.broadcast %475 : vector<1x128xf32> to vector<8x128xf32>
    %578 = arith.subf %576, %577 : vector<8x128xf32>
    %579 = vector.broadcast %484 : vector<1x128xf32> to vector<8x128xf32>
    %580 = arith.mulf %578, %579 : vector<8x128xf32>
    %cst_604 = arith.constant 0.000000e+00 : f32
    %581 = vector.broadcast %cst_604 : f32 to vector<8x128xf32>
    %582 = arith.cmpf oge, %580, %581 : vector<8x128xf32>
    %cst_605 = arith.constant 2.000000e-01 : f32
    %583 = vector.broadcast %cst_605 : f32 to vector<8x128xf32>
    %584 = arith.mulf %583, %580 : vector<8x128xf32>
    %585 = arith.select %582, %580, %584 : vector<8x128xi1>, vector<8x128xf32>
    %586 = arith.truncf %585 : vector<8x128xf32> to vector<8x128xbf16>
    %c0_606 = arith.constant 0 : index
    %c6_607 = arith.constant 6 : index
    %c0_608 = arith.constant 0 : index
    %c0_609 = arith.constant 0 : index
    %587 = vector.load %arg3[%c0_606, %c6_607, %c0_608, %c0_609] : memref<1x8x8x128xbf16, #tpu.memory_space<vmem>>, vector<1x1x8x128xbf16>
    %588 = vector.shape_cast %587 : vector<1x1x8x128xbf16> to vector<8x128xbf16>
    %589 = vector.shape_cast %586 : vector<8x128xbf16> to vector<1x1x8x128xbf16>
    tpu.vector_store %arg3[%c0_606, %c6_607, %c0_608, %c0_609], %589 {strides = array<i32>} : memref<1x8x8x128xbf16, #tpu.memory_space<vmem>>, vector<1x1x8x128xbf16>,
    %c7_610 = arith.constant 7 : index
    %c0_611 = arith.constant 0 : index
    %c0_612 = arith.constant 0 : index
    %590 = vector.load %arg4[%c7_610, %c0_611, %c0_612] : memref<8x8x128xf32, #tpu.memory_space<vmem>>, vector<1x8x128xf32>
    %591 = vector.shape_cast %590 : vector<1x8x128xf32> to vector<8x128xf32>
    %592 = vector.broadcast %475 : vector<1x128xf32> to vector<8x128xf32>
    %593 = arith.subf %591, %592 : vector<8x128xf32>
    %594 = vector.broadcast %484 : vector<1x128xf32> to vector<8x128xf32>
    %595 = arith.mulf %593, %594 : vector<8x128xf32>
    %cst_613 = arith.constant 0.000000e+00 : f32
    %596 = vector.broadcast %cst_613 : f32 to vector<8x128xf32>
    %597 = arith.cmpf oge, %595, %596 : vector<8x128xf32>
    %cst_614 = arith.constant 2.000000e-01 : f32
    %598 = vector.broadcast %cst_614 : f32 to vector<8x128xf32>
    %599 = arith.mulf %598, %595 : vector<8x128xf32>
    %600 = arith.select %597, %595, %599 : vector<8x128xi1>, vector<8x128xf32>
    %601 = arith.truncf %600 : vector<8x128xf32> to vector<8x128xbf16>
    %c0_615 = arith.constant 0 : index
    %c7_616 = arith.constant 7 : index
    %c0_617 = arith.constant 0 : index
    %c0_618 = arith.constant 0 : index
    %602 = vector.load %arg3[%c0_615, %c7_616, %c0_617, %c0_618] : memref<1x8x8x128xbf16, #tpu.memory_space<vmem>>, vector<1x1x8x128xbf16>
    %603 = vector.shape_cast %602 : vector<1x1x8x128xbf16> to vector<8x128xbf16>
    %604 = vector.shape_cast %601 : vector<8x128xbf16> to vector<1x1x8x128xbf16>
    tpu.vector_store %arg3[%c0_615, %c7_616, %c0_617, %c0_618], %604 {strides = array<i32>} : memref<1x8x8x128xbf16, #tpu.memory_space<vmem>>, vector<1x1x8x128xbf16>,
    return
  }
  func.func @transform_0(%arg0: i32) -> (i32, i32, i32, i32) {
    %c0_i32 = arith.constant 0 : i32
    %c0_i32_0 = arith.constant 0 : i32
    %c0_i32_1 = arith.constant 0 : i32
    %c0_i32_2 = arith.constant 0 : i32
    return %arg0, %c0_i32, %c0_i32_0, %c0_i32_1 : i32, i32, i32, i32
  }
  func.func @transform_1(%arg0: i32) -> (i32, i32, i32) {
    %c0_i32 = arith.constant 0 : i32
    %c0_i32_0 = arith.constant 0 : i32
    %c0_i32_1 = arith.constant 0 : i32
    %c0_i32_2 = arith.constant 0 : i32
    return %c0_i32, %c0_i32_0, %c0_i32_1 : i32, i32, i32
  }
  func.func @transform_2(%arg0: i32) -> (i32, i32, i32, i32) {
    %c0_i32 = arith.constant 0 : i32
    %c0_i32_0 = arith.constant 0 : i32
    %c0_i32_1 = arith.constant 0 : i32
    %c0_i32_2 = arith.constant 0 : i32
    return %arg0, %c0_i32, %c0_i32_0, %c0_i32_1 : i32, i32, i32, i32
  }
}

module attributes {stable_mosaic.version = 11 : i64} {
  func.func @_fused_conv_kernel(%arg0: i32, %arg1: memref<1x10x5x256xbf16, #tpu.memory_space<vmem>>, %arg2: memref<8x256x128xbf16, #tpu.memory_space<vmem>>, %arg3: memref<1x4x4x128xbf16, #tpu.memory_space<vmem>>, %arg4: memref<4x4x128xf32, #tpu.memory_space<vmem>>) attributes {dimension_semantics = [#tpu.dimension_semantics<parallel>], iteration_bounds = array<i64: 2>, scalar_prefetch = 0 : i64, scratch_operands = 1 : i64, tpu.core_type = #tpu.core_type<tc>, window_params = [{transform_indices = @transform_0, window_bounds = array<i64: 1, 10, 5, 256>}, {pipeline_mode = #tpu.pipeline_mode<synchronous>, transform_indices = @transform_1, window_bounds = array<i64: 8, 256, 128>}, {transform_indices = @transform_2, window_bounds = array<i64: 1, 4, 4, 128>}]} {
    %cst = arith.constant 0.000000e+00 : f32
    %0 = vector.broadcast %cst : f32 to vector<1x128xf32>
    %cst_0 = arith.constant 0.000000e+00 : f32
    %1 = vector.broadcast %cst_0 : f32 to vector<1x128xf32>
    %cst_1 = arith.constant 0.000000e+00 : f32
    %2 = vector.broadcast %cst_1 : f32 to vector<4x128xf32>
    %c0 = arith.constant 0 : index
    %c0_2 = arith.constant 0 : index
    %c0_3 = arith.constant 0 : index
    %c0_4 = arith.constant 0 : index
    %3 = vector.load %arg1[%c0, %c0_2, %c0_3, %c0_4] : memref<1x10x5x256xbf16, #tpu.memory_space<vmem>>, vector<1x1x4x256xbf16>
    %4 = vector.shape_cast %3 : vector<1x1x4x256xbf16> to vector<4x256xbf16>
    %c0_5 = arith.constant 0 : index
    %c0_6 = arith.constant 0 : index
    %c0_7 = arith.constant 0 : index
    %5 = vector.load %arg2[%c0_5, %c0_6, %c0_7] : memref<8x256x128xbf16, #tpu.memory_space<vmem>>, vector<1x256x128xbf16>
    %6 = vector.shape_cast %5 : vector<1x256x128xbf16> to vector<256x128xbf16>
    %cst_8 = arith.constant dense<0.000000e+00> : vector<4x128xf32>
    %7 = tpu.matmul %4, %6, %cst_8 {dimension_numbers = #tpu.dot_dimension_numbers<[1], [0], [0], [1], [0, 0, 1, 1], [], []>} : vector<4x256xbf16>, vector<256x128xbf16>, vector<4x128xf32> -> vector<4x128xf32>
    %8 = arith.addf %2, %7 : vector<4x128xf32>
    %c0_9 = arith.constant 0 : index
    %c0_10 = arith.constant 0 : index
    %c1 = arith.constant 1 : index
    %c0_11 = arith.constant 0 : index
    %9 = vector.load %arg1[%c0_9, %c0_10, %c1, %c0_11] : memref<1x10x5x256xbf16, #tpu.memory_space<vmem>>, vector<1x1x4x256xbf16>
    %10 = vector.shape_cast %9 : vector<1x1x4x256xbf16> to vector<4x256xbf16>
    %c1_12 = arith.constant 1 : index
    %c0_13 = arith.constant 0 : index
    %c0_14 = arith.constant 0 : index
    %11 = vector.load %arg2[%c1_12, %c0_13, %c0_14] : memref<8x256x128xbf16, #tpu.memory_space<vmem>>, vector<1x256x128xbf16>
    %12 = vector.shape_cast %11 : vector<1x256x128xbf16> to vector<256x128xbf16>
    %cst_15 = arith.constant dense<0.000000e+00> : vector<4x128xf32>
    %13 = tpu.matmul %10, %12, %cst_15 {dimension_numbers = #tpu.dot_dimension_numbers<[1], [0], [0], [1], [0, 0, 1, 1], [], []>} : vector<4x256xbf16>, vector<256x128xbf16>, vector<4x128xf32> -> vector<4x128xf32>
    %14 = arith.addf %8, %13 : vector<4x128xf32>
    %c0_16 = arith.constant 0 : index
    %c1_17 = arith.constant 1 : index
    %c0_18 = arith.constant 0 : index
    %c0_19 = arith.constant 0 : index
    %15 = vector.load %arg1[%c0_16, %c1_17, %c0_18, %c0_19] : memref<1x10x5x256xbf16, #tpu.memory_space<vmem>>, vector<1x1x4x256xbf16>
    %16 = vector.shape_cast %15 : vector<1x1x4x256xbf16> to vector<4x256xbf16>
    %c2 = arith.constant 2 : index
    %c0_20 = arith.constant 0 : index
    %c0_21 = arith.constant 0 : index
    %17 = vector.load %arg2[%c2, %c0_20, %c0_21] : memref<8x256x128xbf16, #tpu.memory_space<vmem>>, vector<1x256x128xbf16>
    %18 = vector.shape_cast %17 : vector<1x256x128xbf16> to vector<256x128xbf16>
    %cst_22 = arith.constant dense<0.000000e+00> : vector<4x128xf32>
    %19 = tpu.matmul %16, %18, %cst_22 {dimension_numbers = #tpu.dot_dimension_numbers<[1], [0], [0], [1], [0, 0, 1, 1], [], []>} : vector<4x256xbf16>, vector<256x128xbf16>, vector<4x128xf32> -> vector<4x128xf32>
    %20 = arith.addf %14, %19 : vector<4x128xf32>
    %c0_23 = arith.constant 0 : index
    %c1_24 = arith.constant 1 : index
    %c1_25 = arith.constant 1 : index
    %c0_26 = arith.constant 0 : index
    %21 = vector.load %arg1[%c0_23, %c1_24, %c1_25, %c0_26] : memref<1x10x5x256xbf16, #tpu.memory_space<vmem>>, vector<1x1x4x256xbf16>
    %22 = vector.shape_cast %21 : vector<1x1x4x256xbf16> to vector<4x256xbf16>
    %c3 = arith.constant 3 : index
    %c0_27 = arith.constant 0 : index
    %c0_28 = arith.constant 0 : index
    %23 = vector.load %arg2[%c3, %c0_27, %c0_28] : memref<8x256x128xbf16, #tpu.memory_space<vmem>>, vector<1x256x128xbf16>
    %24 = vector.shape_cast %23 : vector<1x256x128xbf16> to vector<256x128xbf16>
    %cst_29 = arith.constant dense<0.000000e+00> : vector<4x128xf32>
    %25 = tpu.matmul %22, %24, %cst_29 {dimension_numbers = #tpu.dot_dimension_numbers<[1], [0], [0], [1], [0, 0, 1, 1], [], []>} : vector<4x256xbf16>, vector<256x128xbf16>, vector<4x128xf32> -> vector<4x128xf32>
    %26 = arith.addf %20, %25 : vector<4x128xf32>
    %c0_30 = arith.constant 0 : index
    %c2_31 = arith.constant 2 : index
    %c0_32 = arith.constant 0 : index
    %c0_33 = arith.constant 0 : index
    %27 = vector.load %arg1[%c0_30, %c2_31, %c0_32, %c0_33] : memref<1x10x5x256xbf16, #tpu.memory_space<vmem>>, vector<1x1x4x256xbf16>
    %28 = vector.shape_cast %27 : vector<1x1x4x256xbf16> to vector<4x256xbf16>
    %c4 = arith.constant 4 : index
    %c0_34 = arith.constant 0 : index
    %c0_35 = arith.constant 0 : index
    %29 = vector.load %arg2[%c4, %c0_34, %c0_35] : memref<8x256x128xbf16, #tpu.memory_space<vmem>>, vector<1x256x128xbf16>
    %30 = vector.shape_cast %29 : vector<1x256x128xbf16> to vector<256x128xbf16>
    %cst_36 = arith.constant dense<0.000000e+00> : vector<4x128xf32>
    %31 = tpu.matmul %28, %30, %cst_36 {dimension_numbers = #tpu.dot_dimension_numbers<[1], [0], [0], [1], [0, 0, 1, 1], [], []>} : vector<4x256xbf16>, vector<256x128xbf16>, vector<4x128xf32> -> vector<4x128xf32>
    %32 = arith.addf %26, %31 : vector<4x128xf32>
    %c0_37 = arith.constant 0 : index
    %c2_38 = arith.constant 2 : index
    %c1_39 = arith.constant 1 : index
    %c0_40 = arith.constant 0 : index
    %33 = vector.load %arg1[%c0_37, %c2_38, %c1_39, %c0_40] : memref<1x10x5x256xbf16, #tpu.memory_space<vmem>>, vector<1x1x4x256xbf16>
    %34 = vector.shape_cast %33 : vector<1x1x4x256xbf16> to vector<4x256xbf16>
    %c5 = arith.constant 5 : index
    %c0_41 = arith.constant 0 : index
    %c0_42 = arith.constant 0 : index
    %35 = vector.load %arg2[%c5, %c0_41, %c0_42] : memref<8x256x128xbf16, #tpu.memory_space<vmem>>, vector<1x256x128xbf16>
    %36 = vector.shape_cast %35 : vector<1x256x128xbf16> to vector<256x128xbf16>
    %cst_43 = arith.constant dense<0.000000e+00> : vector<4x128xf32>
    %37 = tpu.matmul %34, %36, %cst_43 {dimension_numbers = #tpu.dot_dimension_numbers<[1], [0], [0], [1], [0, 0, 1, 1], [], []>} : vector<4x256xbf16>, vector<256x128xbf16>, vector<4x128xf32> -> vector<4x128xf32>
    %38 = arith.addf %32, %37 : vector<4x128xf32>
    %c0_44 = arith.constant 0 : index
    %c3_45 = arith.constant 3 : index
    %c0_46 = arith.constant 0 : index
    %c0_47 = arith.constant 0 : index
    %39 = vector.load %arg1[%c0_44, %c3_45, %c0_46, %c0_47] : memref<1x10x5x256xbf16, #tpu.memory_space<vmem>>, vector<1x1x4x256xbf16>
    %40 = vector.shape_cast %39 : vector<1x1x4x256xbf16> to vector<4x256xbf16>
    %c6 = arith.constant 6 : index
    %c0_48 = arith.constant 0 : index
    %c0_49 = arith.constant 0 : index
    %41 = vector.load %arg2[%c6, %c0_48, %c0_49] : memref<8x256x128xbf16, #tpu.memory_space<vmem>>, vector<1x256x128xbf16>
    %42 = vector.shape_cast %41 : vector<1x256x128xbf16> to vector<256x128xbf16>
    %cst_50 = arith.constant dense<0.000000e+00> : vector<4x128xf32>
    %43 = tpu.matmul %40, %42, %cst_50 {dimension_numbers = #tpu.dot_dimension_numbers<[1], [0], [0], [1], [0, 0, 1, 1], [], []>} : vector<4x256xbf16>, vector<256x128xbf16>, vector<4x128xf32> -> vector<4x128xf32>
    %44 = arith.addf %38, %43 : vector<4x128xf32>
    %c0_51 = arith.constant 0 : index
    %c3_52 = arith.constant 3 : index
    %c1_53 = arith.constant 1 : index
    %c0_54 = arith.constant 0 : index
    %45 = vector.load %arg1[%c0_51, %c3_52, %c1_53, %c0_54] : memref<1x10x5x256xbf16, #tpu.memory_space<vmem>>, vector<1x1x4x256xbf16>
    %46 = vector.shape_cast %45 : vector<1x1x4x256xbf16> to vector<4x256xbf16>
    %c7 = arith.constant 7 : index
    %c0_55 = arith.constant 0 : index
    %c0_56 = arith.constant 0 : index
    %47 = vector.load %arg2[%c7, %c0_55, %c0_56] : memref<8x256x128xbf16, #tpu.memory_space<vmem>>, vector<1x256x128xbf16>
    %48 = vector.shape_cast %47 : vector<1x256x128xbf16> to vector<256x128xbf16>
    %cst_57 = arith.constant dense<0.000000e+00> : vector<4x128xf32>
    %49 = tpu.matmul %46, %48, %cst_57 {dimension_numbers = #tpu.dot_dimension_numbers<[1], [0], [0], [1], [0, 0, 1, 1], [], []>} : vector<4x256xbf16>, vector<256x128xbf16>, vector<4x128xf32> -> vector<4x128xf32>
    %50 = arith.addf %44, %49 : vector<4x128xf32>
    %c0_58 = arith.constant 0 : index
    %c0_59 = arith.constant 0 : index
    %c0_60 = arith.constant 0 : index
    %51 = vector.load %arg4[%c0_58, %c0_59, %c0_60] : memref<4x4x128xf32, #tpu.memory_space<vmem>>, vector<1x4x128xf32>
    %52 = vector.shape_cast %51 : vector<1x4x128xf32> to vector<4x128xf32>
    %53 = vector.shape_cast %50 : vector<4x128xf32> to vector<1x4x128xf32>
    tpu.vector_store %arg4[%c0_58, %c0_59, %c0_60], %53 {strides = array<i32>} : memref<4x4x128xf32, #tpu.memory_space<vmem>>, vector<1x4x128xf32>,
    %cst_61 = arith.constant dense<0.000000e+00> : vector<128xf32>
    %54 = vector.multi_reduction <add>, %50, %cst_61 [0] : vector<4x128xf32> to vector<128xf32>
    %55 = vector.shape_cast %54 : vector<128xf32> to vector<1x128xf32>
    %56 = arith.addf %0, %55 : vector<1x128xf32>
    %57 = arith.mulf %50, %50 : vector<4x128xf32>
    %cst_62 = arith.constant dense<0.000000e+00> : vector<128xf32>
    %58 = vector.multi_reduction <add>, %57, %cst_62 [0] : vector<4x128xf32> to vector<128xf32>
    %59 = vector.shape_cast %58 : vector<128xf32> to vector<1x128xf32>
    %60 = arith.addf %1, %59 : vector<1x128xf32>
    %cst_63 = arith.constant 0.000000e+00 : f32
    %61 = vector.broadcast %cst_63 : f32 to vector<4x128xf32>
    %c0_64 = arith.constant 0 : index
    %c2_65 = arith.constant 2 : index
    %c0_66 = arith.constant 0 : index
    %c0_67 = arith.constant 0 : index
    %62 = vector.load %arg1[%c0_64, %c2_65, %c0_66, %c0_67] : memref<1x10x5x256xbf16, #tpu.memory_space<vmem>>, vector<1x1x4x256xbf16>
    %63 = vector.shape_cast %62 : vector<1x1x4x256xbf16> to vector<4x256xbf16>
    %c0_68 = arith.constant 0 : index
    %c0_69 = arith.constant 0 : index
    %c0_70 = arith.constant 0 : index
    %64 = vector.load %arg2[%c0_68, %c0_69, %c0_70] : memref<8x256x128xbf16, #tpu.memory_space<vmem>>, vector<1x256x128xbf16>
    %65 = vector.shape_cast %64 : vector<1x256x128xbf16> to vector<256x128xbf16>
    %cst_71 = arith.constant dense<0.000000e+00> : vector<4x128xf32>
    %66 = tpu.matmul %63, %65, %cst_71 {dimension_numbers = #tpu.dot_dimension_numbers<[1], [0], [0], [1], [0, 0, 1, 1], [], []>} : vector<4x256xbf16>, vector<256x128xbf16>, vector<4x128xf32> -> vector<4x128xf32>
    %67 = arith.addf %61, %66 : vector<4x128xf32>
    %c0_72 = arith.constant 0 : index
    %c2_73 = arith.constant 2 : index
    %c1_74 = arith.constant 1 : index
    %c0_75 = arith.constant 0 : index
    %68 = vector.load %arg1[%c0_72, %c2_73, %c1_74, %c0_75] : memref<1x10x5x256xbf16, #tpu.memory_space<vmem>>, vector<1x1x4x256xbf16>
    %69 = vector.shape_cast %68 : vector<1x1x4x256xbf16> to vector<4x256xbf16>
    %c1_76 = arith.constant 1 : index
    %c0_77 = arith.constant 0 : index
    %c0_78 = arith.constant 0 : index
    %70 = vector.load %arg2[%c1_76, %c0_77, %c0_78] : memref<8x256x128xbf16, #tpu.memory_space<vmem>>, vector<1x256x128xbf16>
    %71 = vector.shape_cast %70 : vector<1x256x128xbf16> to vector<256x128xbf16>
    %cst_79 = arith.constant dense<0.000000e+00> : vector<4x128xf32>
    %72 = tpu.matmul %69, %71, %cst_79 {dimension_numbers = #tpu.dot_dimension_numbers<[1], [0], [0], [1], [0, 0, 1, 1], [], []>} : vector<4x256xbf16>, vector<256x128xbf16>, vector<4x128xf32> -> vector<4x128xf32>
    %73 = arith.addf %67, %72 : vector<4x128xf32>
    %c0_80 = arith.constant 0 : index
    %c3_81 = arith.constant 3 : index
    %c0_82 = arith.constant 0 : index
    %c0_83 = arith.constant 0 : index
    %74 = vector.load %arg1[%c0_80, %c3_81, %c0_82, %c0_83] : memref<1x10x5x256xbf16, #tpu.memory_space<vmem>>, vector<1x1x4x256xbf16>
    %75 = vector.shape_cast %74 : vector<1x1x4x256xbf16> to vector<4x256xbf16>
    %c2_84 = arith.constant 2 : index
    %c0_85 = arith.constant 0 : index
    %c0_86 = arith.constant 0 : index
    %76 = vector.load %arg2[%c2_84, %c0_85, %c0_86] : memref<8x256x128xbf16, #tpu.memory_space<vmem>>, vector<1x256x128xbf16>
    %77 = vector.shape_cast %76 : vector<1x256x128xbf16> to vector<256x128xbf16>
    %cst_87 = arith.constant dense<0.000000e+00> : vector<4x128xf32>
    %78 = tpu.matmul %75, %77, %cst_87 {dimension_numbers = #tpu.dot_dimension_numbers<[1], [0], [0], [1], [0, 0, 1, 1], [], []>} : vector<4x256xbf16>, vector<256x128xbf16>, vector<4x128xf32> -> vector<4x128xf32>
    %79 = arith.addf %73, %78 : vector<4x128xf32>
    %c0_88 = arith.constant 0 : index
    %c3_89 = arith.constant 3 : index
    %c1_90 = arith.constant 1 : index
    %c0_91 = arith.constant 0 : index
    %80 = vector.load %arg1[%c0_88, %c3_89, %c1_90, %c0_91] : memref<1x10x5x256xbf16, #tpu.memory_space<vmem>>, vector<1x1x4x256xbf16>
    %81 = vector.shape_cast %80 : vector<1x1x4x256xbf16> to vector<4x256xbf16>
    %c3_92 = arith.constant 3 : index
    %c0_93 = arith.constant 0 : index
    %c0_94 = arith.constant 0 : index
    %82 = vector.load %arg2[%c3_92, %c0_93, %c0_94] : memref<8x256x128xbf16, #tpu.memory_space<vmem>>, vector<1x256x128xbf16>
    %83 = vector.shape_cast %82 : vector<1x256x128xbf16> to vector<256x128xbf16>
    %cst_95 = arith.constant dense<0.000000e+00> : vector<4x128xf32>
    %84 = tpu.matmul %81, %83, %cst_95 {dimension_numbers = #tpu.dot_dimension_numbers<[1], [0], [0], [1], [0, 0, 1, 1], [], []>} : vector<4x256xbf16>, vector<256x128xbf16>, vector<4x128xf32> -> vector<4x128xf32>
    %85 = arith.addf %79, %84 : vector<4x128xf32>
    %c0_96 = arith.constant 0 : index
    %c4_97 = arith.constant 4 : index
    %c0_98 = arith.constant 0 : index
    %c0_99 = arith.constant 0 : index
    %86 = vector.load %arg1[%c0_96, %c4_97, %c0_98, %c0_99] : memref<1x10x5x256xbf16, #tpu.memory_space<vmem>>, vector<1x1x4x256xbf16>
    %87 = vector.shape_cast %86 : vector<1x1x4x256xbf16> to vector<4x256xbf16>
    %c4_100 = arith.constant 4 : index
    %c0_101 = arith.constant 0 : index
    %c0_102 = arith.constant 0 : index
    %88 = vector.load %arg2[%c4_100, %c0_101, %c0_102] : memref<8x256x128xbf16, #tpu.memory_space<vmem>>, vector<1x256x128xbf16>
    %89 = vector.shape_cast %88 : vector<1x256x128xbf16> to vector<256x128xbf16>
    %cst_103 = arith.constant dense<0.000000e+00> : vector<4x128xf32>
    %90 = tpu.matmul %87, %89, %cst_103 {dimension_numbers = #tpu.dot_dimension_numbers<[1], [0], [0], [1], [0, 0, 1, 1], [], []>} : vector<4x256xbf16>, vector<256x128xbf16>, vector<4x128xf32> -> vector<4x128xf32>
    %91 = arith.addf %85, %90 : vector<4x128xf32>
    %c0_104 = arith.constant 0 : index
    %c4_105 = arith.constant 4 : index
    %c1_106 = arith.constant 1 : index
    %c0_107 = arith.constant 0 : index
    %92 = vector.load %arg1[%c0_104, %c4_105, %c1_106, %c0_107] : memref<1x10x5x256xbf16, #tpu.memory_space<vmem>>, vector<1x1x4x256xbf16>
    %93 = vector.shape_cast %92 : vector<1x1x4x256xbf16> to vector<4x256xbf16>
    %c5_108 = arith.constant 5 : index
    %c0_109 = arith.constant 0 : index
    %c0_110 = arith.constant 0 : index
    %94 = vector.load %arg2[%c5_108, %c0_109, %c0_110] : memref<8x256x128xbf16, #tpu.memory_space<vmem>>, vector<1x256x128xbf16>
    %95 = vector.shape_cast %94 : vector<1x256x128xbf16> to vector<256x128xbf16>
    %cst_111 = arith.constant dense<0.000000e+00> : vector<4x128xf32>
    %96 = tpu.matmul %93, %95, %cst_111 {dimension_numbers = #tpu.dot_dimension_numbers<[1], [0], [0], [1], [0, 0, 1, 1], [], []>} : vector<4x256xbf16>, vector<256x128xbf16>, vector<4x128xf32> -> vector<4x128xf32>
    %97 = arith.addf %91, %96 : vector<4x128xf32>
    %c0_112 = arith.constant 0 : index
    %c5_113 = arith.constant 5 : index
    %c0_114 = arith.constant 0 : index
    %c0_115 = arith.constant 0 : index
    %98 = vector.load %arg1[%c0_112, %c5_113, %c0_114, %c0_115] : memref<1x10x5x256xbf16, #tpu.memory_space<vmem>>, vector<1x1x4x256xbf16>
    %99 = vector.shape_cast %98 : vector<1x1x4x256xbf16> to vector<4x256xbf16>
    %c6_116 = arith.constant 6 : index
    %c0_117 = arith.constant 0 : index
    %c0_118 = arith.constant 0 : index
    %100 = vector.load %arg2[%c6_116, %c0_117, %c0_118] : memref<8x256x128xbf16, #tpu.memory_space<vmem>>, vector<1x256x128xbf16>
    %101 = vector.shape_cast %100 : vector<1x256x128xbf16> to vector<256x128xbf16>
    %cst_119 = arith.constant dense<0.000000e+00> : vector<4x128xf32>
    %102 = tpu.matmul %99, %101, %cst_119 {dimension_numbers = #tpu.dot_dimension_numbers<[1], [0], [0], [1], [0, 0, 1, 1], [], []>} : vector<4x256xbf16>, vector<256x128xbf16>, vector<4x128xf32> -> vector<4x128xf32>
    %103 = arith.addf %97, %102 : vector<4x128xf32>
    %c0_120 = arith.constant 0 : index
    %c5_121 = arith.constant 5 : index
    %c1_122 = arith.constant 1 : index
    %c0_123 = arith.constant 0 : index
    %104 = vector.load %arg1[%c0_120, %c5_121, %c1_122, %c0_123] : memref<1x10x5x256xbf16, #tpu.memory_space<vmem>>, vector<1x1x4x256xbf16>
    %105 = vector.shape_cast %104 : vector<1x1x4x256xbf16> to vector<4x256xbf16>
    %c7_124 = arith.constant 7 : index
    %c0_125 = arith.constant 0 : index
    %c0_126 = arith.constant 0 : index
    %106 = vector.load %arg2[%c7_124, %c0_125, %c0_126] : memref<8x256x128xbf16, #tpu.memory_space<vmem>>, vector<1x256x128xbf16>
    %107 = vector.shape_cast %106 : vector<1x256x128xbf16> to vector<256x128xbf16>
    %cst_127 = arith.constant dense<0.000000e+00> : vector<4x128xf32>
    %108 = tpu.matmul %105, %107, %cst_127 {dimension_numbers = #tpu.dot_dimension_numbers<[1], [0], [0], [1], [0, 0, 1, 1], [], []>} : vector<4x256xbf16>, vector<256x128xbf16>, vector<4x128xf32> -> vector<4x128xf32>
    %109 = arith.addf %103, %108 : vector<4x128xf32>
    %c1_128 = arith.constant 1 : index
    %c0_129 = arith.constant 0 : index
    %c0_130 = arith.constant 0 : index
    %110 = vector.load %arg4[%c1_128, %c0_129, %c0_130] : memref<4x4x128xf32, #tpu.memory_space<vmem>>, vector<1x4x128xf32>
    %111 = vector.shape_cast %110 : vector<1x4x128xf32> to vector<4x128xf32>
    %112 = vector.shape_cast %109 : vector<4x128xf32> to vector<1x4x128xf32>
    tpu.vector_store %arg4[%c1_128, %c0_129, %c0_130], %112 {strides = array<i32>} : memref<4x4x128xf32, #tpu.memory_space<vmem>>, vector<1x4x128xf32>,
    %cst_131 = arith.constant dense<0.000000e+00> : vector<128xf32>
    %113 = vector.multi_reduction <add>, %109, %cst_131 [0] : vector<4x128xf32> to vector<128xf32>
    %114 = vector.shape_cast %113 : vector<128xf32> to vector<1x128xf32>
    %115 = arith.addf %56, %114 : vector<1x128xf32>
    %116 = arith.mulf %109, %109 : vector<4x128xf32>
    %cst_132 = arith.constant dense<0.000000e+00> : vector<128xf32>
    %117 = vector.multi_reduction <add>, %116, %cst_132 [0] : vector<4x128xf32> to vector<128xf32>
    %118 = vector.shape_cast %117 : vector<128xf32> to vector<1x128xf32>
    %119 = arith.addf %60, %118 : vector<1x128xf32>
    %cst_133 = arith.constant 0.000000e+00 : f32
    %120 = vector.broadcast %cst_133 : f32 to vector<4x128xf32>
    %c0_134 = arith.constant 0 : index
    %c4_135 = arith.constant 4 : index
    %c0_136 = arith.constant 0 : index
    %c0_137 = arith.constant 0 : index
    %121 = vector.load %arg1[%c0_134, %c4_135, %c0_136, %c0_137] : memref<1x10x5x256xbf16, #tpu.memory_space<vmem>>, vector<1x1x4x256xbf16>
    %122 = vector.shape_cast %121 : vector<1x1x4x256xbf16> to vector<4x256xbf16>
    %c0_138 = arith.constant 0 : index
    %c0_139 = arith.constant 0 : index
    %c0_140 = arith.constant 0 : index
    %123 = vector.load %arg2[%c0_138, %c0_139, %c0_140] : memref<8x256x128xbf16, #tpu.memory_space<vmem>>, vector<1x256x128xbf16>
    %124 = vector.shape_cast %123 : vector<1x256x128xbf16> to vector<256x128xbf16>
    %cst_141 = arith.constant dense<0.000000e+00> : vector<4x128xf32>
    %125 = tpu.matmul %122, %124, %cst_141 {dimension_numbers = #tpu.dot_dimension_numbers<[1], [0], [0], [1], [0, 0, 1, 1], [], []>} : vector<4x256xbf16>, vector<256x128xbf16>, vector<4x128xf32> -> vector<4x128xf32>
    %126 = arith.addf %120, %125 : vector<4x128xf32>
    %c0_142 = arith.constant 0 : index
    %c4_143 = arith.constant 4 : index
    %c1_144 = arith.constant 1 : index
    %c0_145 = arith.constant 0 : index
    %127 = vector.load %arg1[%c0_142, %c4_143, %c1_144, %c0_145] : memref<1x10x5x256xbf16, #tpu.memory_space<vmem>>, vector<1x1x4x256xbf16>
    %128 = vector.shape_cast %127 : vector<1x1x4x256xbf16> to vector<4x256xbf16>
    %c1_146 = arith.constant 1 : index
    %c0_147 = arith.constant 0 : index
    %c0_148 = arith.constant 0 : index
    %129 = vector.load %arg2[%c1_146, %c0_147, %c0_148] : memref<8x256x128xbf16, #tpu.memory_space<vmem>>, vector<1x256x128xbf16>
    %130 = vector.shape_cast %129 : vector<1x256x128xbf16> to vector<256x128xbf16>
    %cst_149 = arith.constant dense<0.000000e+00> : vector<4x128xf32>
    %131 = tpu.matmul %128, %130, %cst_149 {dimension_numbers = #tpu.dot_dimension_numbers<[1], [0], [0], [1], [0, 0, 1, 1], [], []>} : vector<4x256xbf16>, vector<256x128xbf16>, vector<4x128xf32> -> vector<4x128xf32>
    %132 = arith.addf %126, %131 : vector<4x128xf32>
    %c0_150 = arith.constant 0 : index
    %c5_151 = arith.constant 5 : index
    %c0_152 = arith.constant 0 : index
    %c0_153 = arith.constant 0 : index
    %133 = vector.load %arg1[%c0_150, %c5_151, %c0_152, %c0_153] : memref<1x10x5x256xbf16, #tpu.memory_space<vmem>>, vector<1x1x4x256xbf16>
    %134 = vector.shape_cast %133 : vector<1x1x4x256xbf16> to vector<4x256xbf16>
    %c2_154 = arith.constant 2 : index
    %c0_155 = arith.constant 0 : index
    %c0_156 = arith.constant 0 : index
    %135 = vector.load %arg2[%c2_154, %c0_155, %c0_156] : memref<8x256x128xbf16, #tpu.memory_space<vmem>>, vector<1x256x128xbf16>
    %136 = vector.shape_cast %135 : vector<1x256x128xbf16> to vector<256x128xbf16>
    %cst_157 = arith.constant dense<0.000000e+00> : vector<4x128xf32>
    %137 = tpu.matmul %134, %136, %cst_157 {dimension_numbers = #tpu.dot_dimension_numbers<[1], [0], [0], [1], [0, 0, 1, 1], [], []>} : vector<4x256xbf16>, vector<256x128xbf16>, vector<4x128xf32> -> vector<4x128xf32>
    %138 = arith.addf %132, %137 : vector<4x128xf32>
    %c0_158 = arith.constant 0 : index
    %c5_159 = arith.constant 5 : index
    %c1_160 = arith.constant 1 : index
    %c0_161 = arith.constant 0 : index
    %139 = vector.load %arg1[%c0_158, %c5_159, %c1_160, %c0_161] : memref<1x10x5x256xbf16, #tpu.memory_space<vmem>>, vector<1x1x4x256xbf16>
    %140 = vector.shape_cast %139 : vector<1x1x4x256xbf16> to vector<4x256xbf16>
    %c3_162 = arith.constant 3 : index
    %c0_163 = arith.constant 0 : index
    %c0_164 = arith.constant 0 : index
    %141 = vector.load %arg2[%c3_162, %c0_163, %c0_164] : memref<8x256x128xbf16, #tpu.memory_space<vmem>>, vector<1x256x128xbf16>
    %142 = vector.shape_cast %141 : vector<1x256x128xbf16> to vector<256x128xbf16>
    %cst_165 = arith.constant dense<0.000000e+00> : vector<4x128xf32>
    %143 = tpu.matmul %140, %142, %cst_165 {dimension_numbers = #tpu.dot_dimension_numbers<[1], [0], [0], [1], [0, 0, 1, 1], [], []>} : vector<4x256xbf16>, vector<256x128xbf16>, vector<4x128xf32> -> vector<4x128xf32>
    %144 = arith.addf %138, %143 : vector<4x128xf32>
    %c0_166 = arith.constant 0 : index
    %c6_167 = arith.constant 6 : index
    %c0_168 = arith.constant 0 : index
    %c0_169 = arith.constant 0 : index
    %145 = vector.load %arg1[%c0_166, %c6_167, %c0_168, %c0_169] : memref<1x10x5x256xbf16, #tpu.memory_space<vmem>>, vector<1x1x4x256xbf16>
    %146 = vector.shape_cast %145 : vector<1x1x4x256xbf16> to vector<4x256xbf16>
    %c4_170 = arith.constant 4 : index
    %c0_171 = arith.constant 0 : index
    %c0_172 = arith.constant 0 : index
    %147 = vector.load %arg2[%c4_170, %c0_171, %c0_172] : memref<8x256x128xbf16, #tpu.memory_space<vmem>>, vector<1x256x128xbf16>
    %148 = vector.shape_cast %147 : vector<1x256x128xbf16> to vector<256x128xbf16>
    %cst_173 = arith.constant dense<0.000000e+00> : vector<4x128xf32>
    %149 = tpu.matmul %146, %148, %cst_173 {dimension_numbers = #tpu.dot_dimension_numbers<[1], [0], [0], [1], [0, 0, 1, 1], [], []>} : vector<4x256xbf16>, vector<256x128xbf16>, vector<4x128xf32> -> vector<4x128xf32>
    %150 = arith.addf %144, %149 : vector<4x128xf32>
    %c0_174 = arith.constant 0 : index
    %c6_175 = arith.constant 6 : index
    %c1_176 = arith.constant 1 : index
    %c0_177 = arith.constant 0 : index
    %151 = vector.load %arg1[%c0_174, %c6_175, %c1_176, %c0_177] : memref<1x10x5x256xbf16, #tpu.memory_space<vmem>>, vector<1x1x4x256xbf16>
    %152 = vector.shape_cast %151 : vector<1x1x4x256xbf16> to vector<4x256xbf16>
    %c5_178 = arith.constant 5 : index
    %c0_179 = arith.constant 0 : index
    %c0_180 = arith.constant 0 : index
    %153 = vector.load %arg2[%c5_178, %c0_179, %c0_180] : memref<8x256x128xbf16, #tpu.memory_space<vmem>>, vector<1x256x128xbf16>
    %154 = vector.shape_cast %153 : vector<1x256x128xbf16> to vector<256x128xbf16>
    %cst_181 = arith.constant dense<0.000000e+00> : vector<4x128xf32>
    %155 = tpu.matmul %152, %154, %cst_181 {dimension_numbers = #tpu.dot_dimension_numbers<[1], [0], [0], [1], [0, 0, 1, 1], [], []>} : vector<4x256xbf16>, vector<256x128xbf16>, vector<4x128xf32> -> vector<4x128xf32>
    %156 = arith.addf %150, %155 : vector<4x128xf32>
    %c0_182 = arith.constant 0 : index
    %c7_183 = arith.constant 7 : index
    %c0_184 = arith.constant 0 : index
    %c0_185 = arith.constant 0 : index
    %157 = vector.load %arg1[%c0_182, %c7_183, %c0_184, %c0_185] : memref<1x10x5x256xbf16, #tpu.memory_space<vmem>>, vector<1x1x4x256xbf16>
    %158 = vector.shape_cast %157 : vector<1x1x4x256xbf16> to vector<4x256xbf16>
    %c6_186 = arith.constant 6 : index
    %c0_187 = arith.constant 0 : index
    %c0_188 = arith.constant 0 : index
    %159 = vector.load %arg2[%c6_186, %c0_187, %c0_188] : memref<8x256x128xbf16, #tpu.memory_space<vmem>>, vector<1x256x128xbf16>
    %160 = vector.shape_cast %159 : vector<1x256x128xbf16> to vector<256x128xbf16>
    %cst_189 = arith.constant dense<0.000000e+00> : vector<4x128xf32>
    %161 = tpu.matmul %158, %160, %cst_189 {dimension_numbers = #tpu.dot_dimension_numbers<[1], [0], [0], [1], [0, 0, 1, 1], [], []>} : vector<4x256xbf16>, vector<256x128xbf16>, vector<4x128xf32> -> vector<4x128xf32>
    %162 = arith.addf %156, %161 : vector<4x128xf32>
    %c0_190 = arith.constant 0 : index
    %c7_191 = arith.constant 7 : index
    %c1_192 = arith.constant 1 : index
    %c0_193 = arith.constant 0 : index
    %163 = vector.load %arg1[%c0_190, %c7_191, %c1_192, %c0_193] : memref<1x10x5x256xbf16, #tpu.memory_space<vmem>>, vector<1x1x4x256xbf16>
    %164 = vector.shape_cast %163 : vector<1x1x4x256xbf16> to vector<4x256xbf16>
    %c7_194 = arith.constant 7 : index
    %c0_195 = arith.constant 0 : index
    %c0_196 = arith.constant 0 : index
    %165 = vector.load %arg2[%c7_194, %c0_195, %c0_196] : memref<8x256x128xbf16, #tpu.memory_space<vmem>>, vector<1x256x128xbf16>
    %166 = vector.shape_cast %165 : vector<1x256x128xbf16> to vector<256x128xbf16>
    %cst_197 = arith.constant dense<0.000000e+00> : vector<4x128xf32>
    %167 = tpu.matmul %164, %166, %cst_197 {dimension_numbers = #tpu.dot_dimension_numbers<[1], [0], [0], [1], [0, 0, 1, 1], [], []>} : vector<4x256xbf16>, vector<256x128xbf16>, vector<4x128xf32> -> vector<4x128xf32>
    %168 = arith.addf %162, %167 : vector<4x128xf32>
    %c2_198 = arith.constant 2 : index
    %c0_199 = arith.constant 0 : index
    %c0_200 = arith.constant 0 : index
    %169 = vector.load %arg4[%c2_198, %c0_199, %c0_200] : memref<4x4x128xf32, #tpu.memory_space<vmem>>, vector<1x4x128xf32>
    %170 = vector.shape_cast %169 : vector<1x4x128xf32> to vector<4x128xf32>
    %171 = vector.shape_cast %168 : vector<4x128xf32> to vector<1x4x128xf32>
    tpu.vector_store %arg4[%c2_198, %c0_199, %c0_200], %171 {strides = array<i32>} : memref<4x4x128xf32, #tpu.memory_space<vmem>>, vector<1x4x128xf32>,
    %cst_201 = arith.constant dense<0.000000e+00> : vector<128xf32>
    %172 = vector.multi_reduction <add>, %168, %cst_201 [0] : vector<4x128xf32> to vector<128xf32>
    %173 = vector.shape_cast %172 : vector<128xf32> to vector<1x128xf32>
    %174 = arith.addf %115, %173 : vector<1x128xf32>
    %175 = arith.mulf %168, %168 : vector<4x128xf32>
    %cst_202 = arith.constant dense<0.000000e+00> : vector<128xf32>
    %176 = vector.multi_reduction <add>, %175, %cst_202 [0] : vector<4x128xf32> to vector<128xf32>
    %177 = vector.shape_cast %176 : vector<128xf32> to vector<1x128xf32>
    %178 = arith.addf %119, %177 : vector<1x128xf32>
    %cst_203 = arith.constant 0.000000e+00 : f32
    %179 = vector.broadcast %cst_203 : f32 to vector<4x128xf32>
    %c0_204 = arith.constant 0 : index
    %c6_205 = arith.constant 6 : index
    %c0_206 = arith.constant 0 : index
    %c0_207 = arith.constant 0 : index
    %180 = vector.load %arg1[%c0_204, %c6_205, %c0_206, %c0_207] : memref<1x10x5x256xbf16, #tpu.memory_space<vmem>>, vector<1x1x4x256xbf16>
    %181 = vector.shape_cast %180 : vector<1x1x4x256xbf16> to vector<4x256xbf16>
    %c0_208 = arith.constant 0 : index
    %c0_209 = arith.constant 0 : index
    %c0_210 = arith.constant 0 : index
    %182 = vector.load %arg2[%c0_208, %c0_209, %c0_210] : memref<8x256x128xbf16, #tpu.memory_space<vmem>>, vector<1x256x128xbf16>
    %183 = vector.shape_cast %182 : vector<1x256x128xbf16> to vector<256x128xbf16>
    %cst_211 = arith.constant dense<0.000000e+00> : vector<4x128xf32>
    %184 = tpu.matmul %181, %183, %cst_211 {dimension_numbers = #tpu.dot_dimension_numbers<[1], [0], [0], [1], [0, 0, 1, 1], [], []>} : vector<4x256xbf16>, vector<256x128xbf16>, vector<4x128xf32> -> vector<4x128xf32>
    %185 = arith.addf %179, %184 : vector<4x128xf32>
    %c0_212 = arith.constant 0 : index
    %c6_213 = arith.constant 6 : index
    %c1_214 = arith.constant 1 : index
    %c0_215 = arith.constant 0 : index
    %186 = vector.load %arg1[%c0_212, %c6_213, %c1_214, %c0_215] : memref<1x10x5x256xbf16, #tpu.memory_space<vmem>>, vector<1x1x4x256xbf16>
    %187 = vector.shape_cast %186 : vector<1x1x4x256xbf16> to vector<4x256xbf16>
    %c1_216 = arith.constant 1 : index
    %c0_217 = arith.constant 0 : index
    %c0_218 = arith.constant 0 : index
    %188 = vector.load %arg2[%c1_216, %c0_217, %c0_218] : memref<8x256x128xbf16, #tpu.memory_space<vmem>>, vector<1x256x128xbf16>
    %189 = vector.shape_cast %188 : vector<1x256x128xbf16> to vector<256x128xbf16>
    %cst_219 = arith.constant dense<0.000000e+00> : vector<4x128xf32>
    %190 = tpu.matmul %187, %189, %cst_219 {dimension_numbers = #tpu.dot_dimension_numbers<[1], [0], [0], [1], [0, 0, 1, 1], [], []>} : vector<4x256xbf16>, vector<256x128xbf16>, vector<4x128xf32> -> vector<4x128xf32>
    %191 = arith.addf %185, %190 : vector<4x128xf32>
    %c0_220 = arith.constant 0 : index
    %c7_221 = arith.constant 7 : index
    %c0_222 = arith.constant 0 : index
    %c0_223 = arith.constant 0 : index
    %192 = vector.load %arg1[%c0_220, %c7_221, %c0_222, %c0_223] : memref<1x10x5x256xbf16, #tpu.memory_space<vmem>>, vector<1x1x4x256xbf16>
    %193 = vector.shape_cast %192 : vector<1x1x4x256xbf16> to vector<4x256xbf16>
    %c2_224 = arith.constant 2 : index
    %c0_225 = arith.constant 0 : index
    %c0_226 = arith.constant 0 : index
    %194 = vector.load %arg2[%c2_224, %c0_225, %c0_226] : memref<8x256x128xbf16, #tpu.memory_space<vmem>>, vector<1x256x128xbf16>
    %195 = vector.shape_cast %194 : vector<1x256x128xbf16> to vector<256x128xbf16>
    %cst_227 = arith.constant dense<0.000000e+00> : vector<4x128xf32>
    %196 = tpu.matmul %193, %195, %cst_227 {dimension_numbers = #tpu.dot_dimension_numbers<[1], [0], [0], [1], [0, 0, 1, 1], [], []>} : vector<4x256xbf16>, vector<256x128xbf16>, vector<4x128xf32> -> vector<4x128xf32>
    %197 = arith.addf %191, %196 : vector<4x128xf32>
    %c0_228 = arith.constant 0 : index
    %c7_229 = arith.constant 7 : index
    %c1_230 = arith.constant 1 : index
    %c0_231 = arith.constant 0 : index
    %198 = vector.load %arg1[%c0_228, %c7_229, %c1_230, %c0_231] : memref<1x10x5x256xbf16, #tpu.memory_space<vmem>>, vector<1x1x4x256xbf16>
    %199 = vector.shape_cast %198 : vector<1x1x4x256xbf16> to vector<4x256xbf16>
    %c3_232 = arith.constant 3 : index
    %c0_233 = arith.constant 0 : index
    %c0_234 = arith.constant 0 : index
    %200 = vector.load %arg2[%c3_232, %c0_233, %c0_234] : memref<8x256x128xbf16, #tpu.memory_space<vmem>>, vector<1x256x128xbf16>
    %201 = vector.shape_cast %200 : vector<1x256x128xbf16> to vector<256x128xbf16>
    %cst_235 = arith.constant dense<0.000000e+00> : vector<4x128xf32>
    %202 = tpu.matmul %199, %201, %cst_235 {dimension_numbers = #tpu.dot_dimension_numbers<[1], [0], [0], [1], [0, 0, 1, 1], [], []>} : vector<4x256xbf16>, vector<256x128xbf16>, vector<4x128xf32> -> vector<4x128xf32>
    %203 = arith.addf %197, %202 : vector<4x128xf32>
    %c0_236 = arith.constant 0 : index
    %c8 = arith.constant 8 : index
    %c0_237 = arith.constant 0 : index
    %c0_238 = arith.constant 0 : index
    %204 = vector.load %arg1[%c0_236, %c8, %c0_237, %c0_238] : memref<1x10x5x256xbf16, #tpu.memory_space<vmem>>, vector<1x1x4x256xbf16>
    %205 = vector.shape_cast %204 : vector<1x1x4x256xbf16> to vector<4x256xbf16>
    %c4_239 = arith.constant 4 : index
    %c0_240 = arith.constant 0 : index
    %c0_241 = arith.constant 0 : index
    %206 = vector.load %arg2[%c4_239, %c0_240, %c0_241] : memref<8x256x128xbf16, #tpu.memory_space<vmem>>, vector<1x256x128xbf16>
    %207 = vector.shape_cast %206 : vector<1x256x128xbf16> to vector<256x128xbf16>
    %cst_242 = arith.constant dense<0.000000e+00> : vector<4x128xf32>
    %208 = tpu.matmul %205, %207, %cst_242 {dimension_numbers = #tpu.dot_dimension_numbers<[1], [0], [0], [1], [0, 0, 1, 1], [], []>} : vector<4x256xbf16>, vector<256x128xbf16>, vector<4x128xf32> -> vector<4x128xf32>
    %209 = arith.addf %203, %208 : vector<4x128xf32>
    %c0_243 = arith.constant 0 : index
    %c8_244 = arith.constant 8 : index
    %c1_245 = arith.constant 1 : index
    %c0_246 = arith.constant 0 : index
    %210 = vector.load %arg1[%c0_243, %c8_244, %c1_245, %c0_246] : memref<1x10x5x256xbf16, #tpu.memory_space<vmem>>, vector<1x1x4x256xbf16>
    %211 = vector.shape_cast %210 : vector<1x1x4x256xbf16> to vector<4x256xbf16>
    %c5_247 = arith.constant 5 : index
    %c0_248 = arith.constant 0 : index
    %c0_249 = arith.constant 0 : index
    %212 = vector.load %arg2[%c5_247, %c0_248, %c0_249] : memref<8x256x128xbf16, #tpu.memory_space<vmem>>, vector<1x256x128xbf16>
    %213 = vector.shape_cast %212 : vector<1x256x128xbf16> to vector<256x128xbf16>
    %cst_250 = arith.constant dense<0.000000e+00> : vector<4x128xf32>
    %214 = tpu.matmul %211, %213, %cst_250 {dimension_numbers = #tpu.dot_dimension_numbers<[1], [0], [0], [1], [0, 0, 1, 1], [], []>} : vector<4x256xbf16>, vector<256x128xbf16>, vector<4x128xf32> -> vector<4x128xf32>
    %215 = arith.addf %209, %214 : vector<4x128xf32>
    %c0_251 = arith.constant 0 : index
    %c9 = arith.constant 9 : index
    %c0_252 = arith.constant 0 : index
    %c0_253 = arith.constant 0 : index
    %216 = vector.load %arg1[%c0_251, %c9, %c0_252, %c0_253] : memref<1x10x5x256xbf16, #tpu.memory_space<vmem>>, vector<1x1x4x256xbf16>
    %217 = vector.shape_cast %216 : vector<1x1x4x256xbf16> to vector<4x256xbf16>
    %c6_254 = arith.constant 6 : index
    %c0_255 = arith.constant 0 : index
    %c0_256 = arith.constant 0 : index
    %218 = vector.load %arg2[%c6_254, %c0_255, %c0_256] : memref<8x256x128xbf16, #tpu.memory_space<vmem>>, vector<1x256x128xbf16>
    %219 = vector.shape_cast %218 : vector<1x256x128xbf16> to vector<256x128xbf16>
    %cst_257 = arith.constant dense<0.000000e+00> : vector<4x128xf32>
    %220 = tpu.matmul %217, %219, %cst_257 {dimension_numbers = #tpu.dot_dimension_numbers<[1], [0], [0], [1], [0, 0, 1, 1], [], []>} : vector<4x256xbf16>, vector<256x128xbf16>, vector<4x128xf32> -> vector<4x128xf32>
    %221 = arith.addf %215, %220 : vector<4x128xf32>
    %c0_258 = arith.constant 0 : index
    %c9_259 = arith.constant 9 : index
    %c1_260 = arith.constant 1 : index
    %c0_261 = arith.constant 0 : index
    %222 = vector.load %arg1[%c0_258, %c9_259, %c1_260, %c0_261] : memref<1x10x5x256xbf16, #tpu.memory_space<vmem>>, vector<1x1x4x256xbf16>
    %223 = vector.shape_cast %222 : vector<1x1x4x256xbf16> to vector<4x256xbf16>
    %c7_262 = arith.constant 7 : index
    %c0_263 = arith.constant 0 : index
    %c0_264 = arith.constant 0 : index
    %224 = vector.load %arg2[%c7_262, %c0_263, %c0_264] : memref<8x256x128xbf16, #tpu.memory_space<vmem>>, vector<1x256x128xbf16>
    %225 = vector.shape_cast %224 : vector<1x256x128xbf16> to vector<256x128xbf16>
    %cst_265 = arith.constant dense<0.000000e+00> : vector<4x128xf32>
    %226 = tpu.matmul %223, %225, %cst_265 {dimension_numbers = #tpu.dot_dimension_numbers<[1], [0], [0], [1], [0, 0, 1, 1], [], []>} : vector<4x256xbf16>, vector<256x128xbf16>, vector<4x128xf32> -> vector<4x128xf32>
    %227 = arith.addf %221, %226 : vector<4x128xf32>
    %c3_266 = arith.constant 3 : index
    %c0_267 = arith.constant 0 : index
    %c0_268 = arith.constant 0 : index
    %228 = vector.load %arg4[%c3_266, %c0_267, %c0_268] : memref<4x4x128xf32, #tpu.memory_space<vmem>>, vector<1x4x128xf32>
    %229 = vector.shape_cast %228 : vector<1x4x128xf32> to vector<4x128xf32>
    %230 = vector.shape_cast %227 : vector<4x128xf32> to vector<1x4x128xf32>
    tpu.vector_store %arg4[%c3_266, %c0_267, %c0_268], %230 {strides = array<i32>} : memref<4x4x128xf32, #tpu.memory_space<vmem>>, vector<1x4x128xf32>,
    %cst_269 = arith.constant dense<0.000000e+00> : vector<128xf32>
    %231 = vector.multi_reduction <add>, %227, %cst_269 [0] : vector<4x128xf32> to vector<128xf32>
    %232 = vector.shape_cast %231 : vector<128xf32> to vector<1x128xf32>
    %233 = arith.addf %174, %232 : vector<1x128xf32>
    %234 = arith.mulf %227, %227 : vector<4x128xf32>
    %cst_270 = arith.constant dense<0.000000e+00> : vector<128xf32>
    %235 = vector.multi_reduction <add>, %234, %cst_270 [0] : vector<4x128xf32> to vector<128xf32>
    %236 = vector.shape_cast %235 : vector<128xf32> to vector<1x128xf32>
    %237 = arith.addf %178, %236 : vector<1x128xf32>
    %cst_271 = arith.constant 6.250000e-02 : f32
    %238 = vector.broadcast %cst_271 : f32 to vector<1x128xf32>
    %239 = arith.mulf %233, %238 : vector<1x128xf32>
    %cst_272 = arith.constant 6.250000e-02 : f32
    %240 = vector.broadcast %cst_272 : f32 to vector<1x128xf32>
    %241 = arith.mulf %237, %240 : vector<1x128xf32>
    %242 = arith.mulf %239, %239 : vector<1x128xf32>
    %243 = arith.subf %241, %242 : vector<1x128xf32>
    %cst_273 = arith.constant 0.000000e+00 : f32
    %244 = vector.broadcast %cst_273 : f32 to vector<1x128xf32>
    %245 = arith.maximumf %243, %244 : vector<1x128xf32>
    %cst_274 = arith.constant 9.99999974E-6 : f32
    %246 = vector.broadcast %cst_274 : f32 to vector<1x128xf32>
    %247 = arith.addf %245, %246 : vector<1x128xf32>
    %248 = math.rsqrt %247 : vector<1x128xf32>
    %c0_275 = arith.constant 0 : index
    %c0_276 = arith.constant 0 : index
    %c0_277 = arith.constant 0 : index
    %249 = vector.load %arg4[%c0_275, %c0_276, %c0_277] : memref<4x4x128xf32, #tpu.memory_space<vmem>>, vector<1x4x128xf32>
    %250 = vector.shape_cast %249 : vector<1x4x128xf32> to vector<4x128xf32>
    %251 = vector.broadcast %239 : vector<1x128xf32> to vector<4x128xf32>
    %252 = arith.subf %250, %251 : vector<4x128xf32>
    %253 = vector.broadcast %248 : vector<1x128xf32> to vector<4x128xf32>
    %254 = arith.mulf %252, %253 : vector<4x128xf32>
    %cst_278 = arith.constant 0.000000e+00 : f32
    %255 = vector.broadcast %cst_278 : f32 to vector<4x128xf32>
    %256 = arith.cmpf oge, %254, %255 : vector<4x128xf32>
    %cst_279 = arith.constant 2.000000e-01 : f32
    %257 = vector.broadcast %cst_279 : f32 to vector<4x128xf32>
    %258 = arith.mulf %257, %254 : vector<4x128xf32>
    %259 = arith.select %256, %254, %258 : vector<4x128xi1>, vector<4x128xf32>
    %260 = arith.truncf %259 : vector<4x128xf32> to vector<4x128xbf16>
    %c0_280 = arith.constant 0 : index
    %c0_281 = arith.constant 0 : index
    %c0_282 = arith.constant 0 : index
    %c0_283 = arith.constant 0 : index
    %261 = vector.load %arg3[%c0_280, %c0_281, %c0_282, %c0_283] : memref<1x4x4x128xbf16, #tpu.memory_space<vmem>>, vector<1x1x4x128xbf16>
    %262 = vector.shape_cast %261 : vector<1x1x4x128xbf16> to vector<4x128xbf16>
    %263 = vector.shape_cast %260 : vector<4x128xbf16> to vector<1x1x4x128xbf16>
    tpu.vector_store %arg3[%c0_280, %c0_281, %c0_282, %c0_283], %263 {strides = array<i32>} : memref<1x4x4x128xbf16, #tpu.memory_space<vmem>>, vector<1x1x4x128xbf16>,
    %c1_284 = arith.constant 1 : index
    %c0_285 = arith.constant 0 : index
    %c0_286 = arith.constant 0 : index
    %264 = vector.load %arg4[%c1_284, %c0_285, %c0_286] : memref<4x4x128xf32, #tpu.memory_space<vmem>>, vector<1x4x128xf32>
    %265 = vector.shape_cast %264 : vector<1x4x128xf32> to vector<4x128xf32>
    %266 = vector.broadcast %239 : vector<1x128xf32> to vector<4x128xf32>
    %267 = arith.subf %265, %266 : vector<4x128xf32>
    %268 = vector.broadcast %248 : vector<1x128xf32> to vector<4x128xf32>
    %269 = arith.mulf %267, %268 : vector<4x128xf32>
    %cst_287 = arith.constant 0.000000e+00 : f32
    %270 = vector.broadcast %cst_287 : f32 to vector<4x128xf32>
    %271 = arith.cmpf oge, %269, %270 : vector<4x128xf32>
    %cst_288 = arith.constant 2.000000e-01 : f32
    %272 = vector.broadcast %cst_288 : f32 to vector<4x128xf32>
    %273 = arith.mulf %272, %269 : vector<4x128xf32>
    %274 = arith.select %271, %269, %273 : vector<4x128xi1>, vector<4x128xf32>
    %275 = arith.truncf %274 : vector<4x128xf32> to vector<4x128xbf16>
    %c0_289 = arith.constant 0 : index
    %c1_290 = arith.constant 1 : index
    %c0_291 = arith.constant 0 : index
    %c0_292 = arith.constant 0 : index
    %276 = vector.load %arg3[%c0_289, %c1_290, %c0_291, %c0_292] : memref<1x4x4x128xbf16, #tpu.memory_space<vmem>>, vector<1x1x4x128xbf16>
    %277 = vector.shape_cast %276 : vector<1x1x4x128xbf16> to vector<4x128xbf16>
    %278 = vector.shape_cast %275 : vector<4x128xbf16> to vector<1x1x4x128xbf16>
    tpu.vector_store %arg3[%c0_289, %c1_290, %c0_291, %c0_292], %278 {strides = array<i32>} : memref<1x4x4x128xbf16, #tpu.memory_space<vmem>>, vector<1x1x4x128xbf16>,
    %c2_293 = arith.constant 2 : index
    %c0_294 = arith.constant 0 : index
    %c0_295 = arith.constant 0 : index
    %279 = vector.load %arg4[%c2_293, %c0_294, %c0_295] : memref<4x4x128xf32, #tpu.memory_space<vmem>>, vector<1x4x128xf32>
    %280 = vector.shape_cast %279 : vector<1x4x128xf32> to vector<4x128xf32>
    %281 = vector.broadcast %239 : vector<1x128xf32> to vector<4x128xf32>
    %282 = arith.subf %280, %281 : vector<4x128xf32>
    %283 = vector.broadcast %248 : vector<1x128xf32> to vector<4x128xf32>
    %284 = arith.mulf %282, %283 : vector<4x128xf32>
    %cst_296 = arith.constant 0.000000e+00 : f32
    %285 = vector.broadcast %cst_296 : f32 to vector<4x128xf32>
    %286 = arith.cmpf oge, %284, %285 : vector<4x128xf32>
    %cst_297 = arith.constant 2.000000e-01 : f32
    %287 = vector.broadcast %cst_297 : f32 to vector<4x128xf32>
    %288 = arith.mulf %287, %284 : vector<4x128xf32>
    %289 = arith.select %286, %284, %288 : vector<4x128xi1>, vector<4x128xf32>
    %290 = arith.truncf %289 : vector<4x128xf32> to vector<4x128xbf16>
    %c0_298 = arith.constant 0 : index
    %c2_299 = arith.constant 2 : index
    %c0_300 = arith.constant 0 : index
    %c0_301 = arith.constant 0 : index
    %291 = vector.load %arg3[%c0_298, %c2_299, %c0_300, %c0_301] : memref<1x4x4x128xbf16, #tpu.memory_space<vmem>>, vector<1x1x4x128xbf16>
    %292 = vector.shape_cast %291 : vector<1x1x4x128xbf16> to vector<4x128xbf16>
    %293 = vector.shape_cast %290 : vector<4x128xbf16> to vector<1x1x4x128xbf16>
    tpu.vector_store %arg3[%c0_298, %c2_299, %c0_300, %c0_301], %293 {strides = array<i32>} : memref<1x4x4x128xbf16, #tpu.memory_space<vmem>>, vector<1x1x4x128xbf16>,
    %c3_302 = arith.constant 3 : index
    %c0_303 = arith.constant 0 : index
    %c0_304 = arith.constant 0 : index
    %294 = vector.load %arg4[%c3_302, %c0_303, %c0_304] : memref<4x4x128xf32, #tpu.memory_space<vmem>>, vector<1x4x128xf32>
    %295 = vector.shape_cast %294 : vector<1x4x128xf32> to vector<4x128xf32>
    %296 = vector.broadcast %239 : vector<1x128xf32> to vector<4x128xf32>
    %297 = arith.subf %295, %296 : vector<4x128xf32>
    %298 = vector.broadcast %248 : vector<1x128xf32> to vector<4x128xf32>
    %299 = arith.mulf %297, %298 : vector<4x128xf32>
    %cst_305 = arith.constant 0.000000e+00 : f32
    %300 = vector.broadcast %cst_305 : f32 to vector<4x128xf32>
    %301 = arith.cmpf oge, %299, %300 : vector<4x128xf32>
    %cst_306 = arith.constant 2.000000e-01 : f32
    %302 = vector.broadcast %cst_306 : f32 to vector<4x128xf32>
    %303 = arith.mulf %302, %299 : vector<4x128xf32>
    %304 = arith.select %301, %299, %303 : vector<4x128xi1>, vector<4x128xf32>
    %305 = arith.truncf %304 : vector<4x128xf32> to vector<4x128xbf16>
    %c0_307 = arith.constant 0 : index
    %c3_308 = arith.constant 3 : index
    %c0_309 = arith.constant 0 : index
    %c0_310 = arith.constant 0 : index
    %306 = vector.load %arg3[%c0_307, %c3_308, %c0_309, %c0_310] : memref<1x4x4x128xbf16, #tpu.memory_space<vmem>>, vector<1x1x4x128xbf16>
    %307 = vector.shape_cast %306 : vector<1x1x4x128xbf16> to vector<4x128xbf16>
    %308 = vector.shape_cast %305 : vector<4x128xbf16> to vector<1x1x4x128xbf16>
    tpu.vector_store %arg3[%c0_307, %c3_308, %c0_309, %c0_310], %308 {strides = array<i32>} : memref<1x4x4x128xbf16, #tpu.memory_space<vmem>>, vector<1x1x4x128xbf16>,
    return
  }
  func.func @transform_0(%arg0: i32) -> (i32, i32, i32, i32) {
    %c0_i32 = arith.constant 0 : i32
    %c0_i32_0 = arith.constant 0 : i32
    %c0_i32_1 = arith.constant 0 : i32
    %c0_i32_2 = arith.constant 0 : i32
    return %arg0, %c0_i32, %c0_i32_0, %c0_i32_1 : i32, i32, i32, i32
  }
  func.func @transform_1(%arg0: i32) -> (i32, i32, i32) {
    %c0_i32 = arith.constant 0 : i32
    %c0_i32_0 = arith.constant 0 : i32
    %c0_i32_1 = arith.constant 0 : i32
    %c0_i32_2 = arith.constant 0 : i32
    return %c0_i32, %c0_i32_0, %c0_i32_1 : i32, i32, i32
  }
  func.func @transform_2(%arg0: i32) -> (i32, i32, i32, i32) {
    %c0_i32 = arith.constant 0 : i32
    %c0_i32_0 = arith.constant 0 : i32
    %c0_i32_1 = arith.constant 0 : i32
    %c0_i32_2 = arith.constant 0 : i32
    return %arg0, %c0_i32, %c0_i32_0, %c0_i32_1 : i32, i32, i32, i32
  }
}

</mosaic_0001>

<bundles_post_ra>
// kernel: a_call__.3
= control target key start
LH: loop header
LB: loop body
LE: loop exit
PB: predicated region body
PF: predicated region fallthrough
CT: control target
= control target key end

     0   :  { %7 = vsyncpa [#allocation4], 0  ;;  %s5050_s9 = smov 0   ;;  %s5554_s0 = inlined_call_operand.vmem [shape: bf16[2,18,9,8], index: 0, kind: input, shape index: {}]   ;;  %s5555_s1 = inlined_call_operand.hbm [shape: bf16[8,8,128], index: 1, kind: input, shape index: {}]   ;;  %s5556_s2 = inlined_call_operand.vmem [shape: bf16[2,8,8,128], index: 2, kind: output, shape index: {}]  }
   0x1 LB: > { %s5056_s10 = sadd.s32 4294967295, %s5028_s9   ;;  %p3996_p0 = scmp.ge.s32.totalorder %s5028_s9, 1  ;;  %s5028_s9 = sphi %s5050_s9, %s13_s9  }
   0x2   : > { %p91_p1 = scmp.lt.s32.totalorder %s5028_s9, 3  ;;  %s5030_s11 = smov [#allocation3]  }
   0x3   : > { %s103_s12 = sshll.u32 %s5030_s11, 4  ;;  %p5557_p3 = scmp.eq.s32.totalorder %s5056_s10, 0  ;;  %s104_s12 = int_to_ptr.vmem [resolvable:$true] %s103_s12 }
   0x4   : > { %p5060_p2 = pnand %p3996_p0, %p91_p1  ;;  %s4990_s17 = scalar_lea.hbm %s5555_s1, 512 }
   0x5   : > { %p4991_p6 = scmp.ne.s32.totalorder %s5555_s1, %s4990_s17  ;;  %p4997_p10 = scmp.lt.u32.totalorder %s4990_s17, %s5555_s1 }
   0x6   : > { %s5559_s13 = scalar_select %p5060_p2, 1, 0 }
   0x7   : > { %p4937_p4 = pneg %p5060_p2 }
   0x9   : > { %p5069_p5 = pnand %p5557_p3, %p4937_p4 }
   0xb   : > { %p4992_p7 = pneg %p5069_p5 }
   0xd   : > { %p4993_p8 = pnand %p4992_p7, %p4991_p6 }
   0xf   : > { %p4994_p9 = pneg %p4993_p8 }
  0x11   : > { %p4999_p11 = pnand %p4997_p10, %p4994_p9 }
  0x13   : > { %5002 = shalt.err (!%p4999_p11)
}
  0x14   : > { %s5003_s22 = scalar_lea.vmem %s104_s12, 512  ;;  %p5011_p1 = scmp.lt.s32.totalorder %s104_s12, %s104_s12 }
  0x15   : > { %p5004_p12 = scmp.ne.s32.totalorder %s104_s12, %s5003_s22  ;;  %p5012_p4 = scmp.lt.s32.totalorder %s5003_s22, %s5003_s22 }
  0x17   : > { %p5006_p13 = pnand %p5004_p12, %p4992_p7  ;;  %p5013_p3 = por %p5012_p4, %p5011_p1 }
  0x19   : > { %p5007_p0 = pneg %p5006_p13 }
  0x1b   : > { %p5014_p2 = pnand %p5013_p3, %p5007_p0 }
  0x1d   : > { %5017 = shalt.err (!%p5014_p2)
}
  0x1e   : > { %s5031_s23 = smov 64   ;;  %s5032_s24 = smov 4  }
  0x1f   : > { %4940 = dma.hbm_to_vmem [thread:$0]  (!%p5069_p5), %s5555_s1, 512, %s104_s12, [#allocation4], %s5031_s23, %s5031_s23, %s5032_s24  }
  0x20   : > { %p5561_p6 = scmp.ne.s32.totalorder %s5559_s13, 0 }
  0x21   : > { %p5562_p8 = scmp.eq.s32.totalorder (!%p5561_p6), %s5056_s10, 0 }
  0x22   : > { %127 = sbr.rel (%p5561_p6) target bundleno = 681 (0x2a9), region = 28 }
  0x29   : > { %5023 = dma.done.wait (%p5562_p8), [#allocation4], 512   ;;  %p5563_p7 = pmov %p5562_p8 }
  0x2a   : > { %p149_p2 = scmp.lt.s32.totalorder %s5056_s10, 1  ;;  %v5033_v0 = vmov 0.0   ;;  %vm5034_vm0 = vmmov 0   ;;  %vm181_vm1 = vcmask 1043456   ;;  %v164_v1 = vld [vmem:[#allocation3 + $0x4] sm:$0xf] }
  0x2b   : > { %5025 = vsyncadd (%p5563_p7), [#allocation4], 4294966784  ;;  %4324 = vmatprep.subr.bf16.mxu0 %v5033_v0  ;;  %4372 = vmatprep.subr.bf16.mxu1 %v5033_v0  ;;  %v632_v2 = vld [vmem:[#allocation3 + $0x4] sm:$0xf]  ;;  %v183_v4 = vsel %vm181_vm1, %v164_v1, 0  ;;  %vm177_vm2 = vcmask 64512  }
  0x2c   : > { %4326 = vmatprep.mubr.msk.bf16.mxu0 %vm5034_vm0, %v5033_v0  ;;  %4374 = vmatprep.mubr.msk.bf16.mxu1 %vm5034_vm0, %v5033_v0  ;;  %s5565_s10 = smov (!%p149_p2, %s5056_s10), 1  ;;  %v649_v5 = vsel %vm181_vm1, %v632_v2, 0  ;;  %v161_v13 = vld [vmem:[#allocation3] sm:$0xf]  ;;  %v274_v23 = vld [vmem:[#allocation3 + $0x8] sm:$0xf] }
  0x2d   : > { %s4932_s27 = smul.u32 144, %s5565_s10  ;;  %4325 = vmatpush3.bf16.msra.mxu0 %v183_v4  ;;  %4373 = vmatpush3.bf16.msra.mxu1 %v649_v5  ;;  %v630_v17 = vld [vmem:[#allocation3] sm:$0xf]  ;;  %v229_v20 = vsel %vm181_vm1, %v161_v13, 0  ;;  %v738_v24 = vld [vmem:[#allocation3 + $0x8] sm:$0xf] }
  0x2e   : > { %4330 = vmatprep.subr.bf16.mxu0 %v5033_v0  ;;  %4378 = vmatprep.subr.bf16.mxu1 %v5033_v0  ;;  %v695_v22 = vsel %vm181_vm1, %v630_v17, 0  ;;  %v279_v25 = vsel %vm181_vm1, %v274_v23, 0  ;;  %v743_v26 = vsel %vm181_vm1, %v738_v24, 0  ;;  %v325_v28 = vld [vmem:[#allocation3 + $0xc] sm:$0xf]  ;;  %s4195_s3 = sshll.u32 %s5565_s10, 5 }
  0x2f   : > { %s5109_s30 = scalar_lea.vmem %s5554_s0, %s4932_s27  ;;  %v788_v29 = vld [vmem:[#allocation3 + $0xc] sm:$0xf]  ;;  %v342_v32 = vsel %vm181_vm1, %v325_v28, 0  ;;  %v388_v39 = vld [vmem:[#allocation3 + $0x10] sm:$0xf]  ;;  %s5541_s6 = scalar_lea.vmem %s5556_s2, %s4195_s3 }
  0x30   : > { %v160_v3 = vld [vmem:[%s5109_s30] sm:$0xf]  ;;  %v162_v6 = vld [vmem:[%s5109_s30 + $0x4] sm:$0x1]  ;;  %v4025_v8 = vld [vmem:[%s5109_s30 + $0x10] sm:$0xf] }
  0x31   : > { %v4004_v7 = vcombine.low %v160_v3, %v162_v6  ;;  %v4026_v9 = vld [vmem:[%s5109_s30 + $0x14] sm:$0x1]  ;;  %v4007_v27 = vld [vmem:[%s5109_s30 + $0x8] sm:$0xf]  ;;  %v4959_v31 = vld [vmem:[%s5109_s30 + $0x18] sm:$0x1f]  }
  0x32   : > { %v4027_v10 = vcombine.low %v4025_v8, %v4026_v9  ;;  %v4958_v30 = vld [vmem:[%s5109_s30 + $0x8] sm:$0x1f]   ;;  %v4030_v33 = vld [vmem:[%s5109_s30 + $0x18] sm:$0xf]  ;;  %v805_v34 = vsel %vm181_vm1, %v788_v29, 0  ;;  %v797_v36 = vshll.u32 %v4959_v31, 16 }
  0x33   : > { %v171_v11 = vshrl.u32 %v4004_v7, 16  ;;  %v173_v12 = vshll.u32 %v4004_v7, 16  ;;  %v334_v35 = vshll.u32 %v4958_v30, 16  ;;  %v332_v37 = vshrl.u32 %v4958_v30, 16  ;;  %v850_v42 = vld [vmem:[#allocation3 + $0x10] sm:$0xf] }
  0x34   : > { %v639_v14 = vshrl.u32 %v4027_v10, 16  ;;  %v641_v15 = vshll.u32 %v4027_v10, 16  ;;  %v795_v40 = vshrl.u32 %v4959_v31, 16  ;;  %v799_v41 = vrot.slane %v797_v36, 1  ;;  %v439_v47 = vld [vmem:[#allocation3 + $0x14] sm:$0xf] }
  0x35   : > { %v175_v16 = vrot.slane %v173_v12, 1  ;;  %v336_v38 = vrot.slane %v334_v35, 1  ;;  %v393_v44 = vsel %vm181_vm1, %v388_v39, 0  ;;  %v855_v45 = vsel %vm181_vm1, %v850_v42, 0  ;;  %v900_v48 = vld [vmem:[#allocation3 + $0x14] sm:$0xf] }
  0x36   : > { %v643_v18 = vrot.slane %v641_v15, 1  ;;  %v800_v46 = vor.u32 %v799_v41, %v795_v40  ;;  %v4960_v49 = vld [vmem:[%s5109_s30 + $0x10] sm:$0x1f]   ;;  %v4961_v51 = vld [vmem:[%s5109_s30 + $0x20] sm:$0x1f]   ;;  %v456_v52 = vsel %vm181_vm1, %v439_v47, 0 }
  0x37   : > { %v176_v19 = vor.u32 %v175_v16, %v171_v11  ;;  %v337_v43 = vor.u32 %v336_v38, %v332_v37  ;;  %v4013_v50 = vld [vmem:[%s5109_s30 + $0x10] sm:$0xf]  ;;  %v4036_v53 = vld [vmem:[%s5109_s30 + $0x20] sm:$0xf]  ;;  %v917_v54 = vsel %vm181_vm1, %v900_v48, 0  ;;  %v448_v55 = vshll.u32 %v4960_v49, 16 }
  0x38   : > { %v644_v21 = vor.u32 %v643_v18, %v639_v14  ;;  %v909_v56 = vshll.u32 %v4961_v51, 16  ;;  %v446_v57 = vshrl.u32 %v4960_v49, 16  ;;  %v907_v59 = vshrl.u32 %v4961_v51, 16  ;;  %v502_v61 = vld [vmem:[#allocation3 + $0x18] sm:$0xf] }
  0x39   : > { %4327 = vmatmul.mubr.msk.bf16.vlgmr.msra.gmra.mrb[0].mxu0 %vm177_vm2, %v176_v19  ;;  %v450_v58 = vrot.slane %v448_v55, 1  ;;  %v962_v63 = vld [vmem:[#allocation3 + $0x18] sm:$0xf]  ;;  %v507_v2 = vsel %vm181_vm1, %v502_v61, 0  ;;  %v553_v4 = vld [vmem:[#allocation3 + $0x1c] sm:$0xf] }
  0x3a   : > { %4331 = vmatpush3.bf16.msra.mxu0 %v229_v20  ;;  %4375 = vmatmul.mubr.msk.bf16.vlgmr.msra.gmra.mrb[0].mxu1 %vm177_vm2, %v644_v21  ;;  %v911_v60 = vrot.slane %v909_v56, 1  ;;  %v1012_v5 = vld [vmem:[#allocation3 + $0x1c] sm:$0xf]  ;;  %v4019_v7 = vld [vmem:[%s5109_s30 + $0x18] sm:$0xf]  ;;  %v570_v9 = vsel %vm181_vm1, %v553_v4, 0 }
  0x3b   : > { %4379 = vmatpush3.bf16.msra.mxu1 %v695_v22  ;;  %4332 = vmatprep.mubr.msk.bf16.mxu0 %vm5034_vm0, %v5033_v0  ;;  %v451_v62 = vor.u32 %v450_v58, %v446_v57  ;;  %v4962_v6 = vld [vmem:[%s5109_s30 + $0x18] sm:$0x1f]   ;;  %v4042_v10 = vld [vmem:[%s5109_s30 + $0x28] sm:$0xf]  ;;  %v1029_v11 = vsel %vm181_vm1, %v1012_v5, 0 }
  0x3c   : > { %4336 = vmatprep.subr.bf16.mxu0 %v5033_v0  ;;  %4380 = vmatprep.mubr.msk.bf16.mxu1 %vm5034_vm0, %v5033_v0  ;;  %v912_v1 = vor.u32 %v911_v60, %v907_v59  ;;  %v562_v12 = vshll.u32 %v4962_v6, 16  ;;  %v4048_v14 = vld [vmem:[%s5109_s30 + $0x20] sm:$0xf]  ;;  %v4049_v15 = vld [vmem:[%s5109_s30 + $0x24] sm:$0x1]  ;;  %v560_v18 = vshrl.u32 %v4962_v6, 16 }
  0x3d   : > { %4384 = vmatprep.subr.bf16.mxu1 %v5033_v0  ;;  %v4071_v16 = vld [vmem:[%s5109_s30 + $0x30] sm:$0xf]  ;;  %v4072_v17 = vld [vmem:[%s5109_s30 + $0x34] sm:$0x1]  ;;  %v4050_v20 = vcombine.low %v4048_v14, %v4049_v15  ;;  %v1092_v24 = vld [vmem:[#allocation3 + $0x4] sm:$0xf] }
  0x3e   : > { %v564_v19 = vrot.slane %v562_v12, 1  ;;  %v4073_v23 = vcombine.low %v4071_v16, %v4072_v17  ;;  %v1109_v30 = vsel %vm181_vm1, %v1092_v24, 0  ;;  %v1090_v36 = vld [vmem:[#allocation3] sm:$0xf]  ;;  %v1198_v42 = vld [vmem:[#allocation3 + $0x8] sm:$0xf] }
  0x3f   : > { %v1550_v38 = vld [vmem:[#allocation3] sm:$0xf]  ;;  %v1155_v40 = vsel %vm181_vm1, %v1090_v36, 0  ;;  %v1708_v47 = vld [vmem:[#allocation3 + $0xc] sm:$0xf] }
  0x40   : > { %v1561_v29 = vshll.u32 %v4073_v23, 16  ;;  %v1615_v41 = vsel %vm181_vm1, %v1550_v38, 0  ;;  %v4966_v48 = vld [vmem:[%s5109_s30 + $0x28] sm:$0x1f]   ;;  %v1310_v60 = vld [vmem:[#allocation3 + $0x10] sm:$0xf] }
  0x41   : > { %v4053_v49 = vld [vmem:[%s5109_s30 + $0x28] sm:$0xf]  ;;  %v1255_v56 = vshrl.u32 %v4966_v48, 16  ;;  %v1820_v4 = vld [vmem:[#allocation3 + $0x14] sm:$0xf] }
  0x42   : > { %v1563_v35 = vrot.slane %v1561_v29, 1  ;;  %v4968_v5 = vld [vmem:[%s5109_s30 + $0x30] sm:$0x1f]   ;;  %v1422_v17 = vld [vmem:[#allocation3 + $0x18] sm:$0xf] }
  0x43   : > { %v4059_v6 = vld [vmem:[%s5109_s30 + $0x30] sm:$0xf]  ;;  %v1932_v24 = vld [vmem:[#allocation3 + $0x1c] sm:$0xf]  ;;  %v4088_v29 = vld [vmem:[%s5109_s30 + $0x48] sm:$0xf] }
  0x44   : > { %v4118_v36 = vld [vmem:[%s5109_s30 + $0x54] sm:$0x1] }
  0x45   : > { %4333 = vmatmul.mubr.msk.bf16.vlgmr.msra.gmra.mrb[0].mxu0 %vm177_vm2, %v160_v3  ;;  %v967_v3 = vsel %vm181_vm1, %v962_v63, 0 }
  0x46   : > { %4337 = vmatpush3.bf16.msra.mxu0 %v279_v25  ;;  %4381 = vmatmul.mubr.msk.bf16.vlgmr.msra.gmra.mrb[0].mxu1 %vm177_vm2, %v4025_v8  ;;  %v4963_v8 = vld [vmem:[%s5109_s30 + $0x28] sm:$0x1f]   ;;  %v565_v25 = vor.u32 %v564_v19, %v560_v18  ;;  %v1882_v19 = vld [vmem:[#allocation3 + $0x18] sm:$0xf] }
  0x47   : > { %4385 = vmatpush3.bf16.msra.mxu1 %v743_v26  ;;  %4338 = vmatprep.mubr.msk.bf16.mxu0 %vm5034_vm0, %v5033_v0  ;;  %v1021_v13 = vshll.u32 %v4963_v8, 16  ;;  %v1019_v21 = vshrl.u32 %v4963_v8, 16  ;;  %v1552_v26 = vld [vmem:[#allocation3 + $0x4] sm:$0xf] }
  0x48   : > { %4342 = vmatprep.subr.bf16.mxu0 %v5033_v0  ;;  %4386 = vmatprep.mubr.msk.bf16.mxu1 %vm5034_vm0, %v5033_v0  ;;  %v1569_v31 = vsel %vm181_vm1, %v1552_v26, 0  ;;  %v4065_v26 = vld [vmem:[%s5109_s30 + $0x38] sm:$0xf] }
  0x49   : > { %4390 = vmatprep.subr.bf16.mxu1 %v5033_v0  ;;  %v1023_v22 = vrot.slane %v1021_v13, 1  ;;  %v1367_v13 = vshrl.u32 %v4968_v5, 16 }
  0x4b   : > { %v1024_v28 = vor.u32 %v1023_v22, %v1019_v21  ;;  %v1427_v21 = vsel %vm181_vm1, %v1422_v17, 0  ;;  %v1887_v22 = vsel %vm181_vm1, %v1882_v19, 0 }
  0x51   : > { %4339 = vmatmul.mubr.msk.bf16.vlgmr.msra.gmra.mrb[0].mxu0 %vm177_vm2, %v4007_v27  ;;  %v1101_v27 = vshll.u32 %v4050_v20, 16 }
  0x52   : > { %4343 = vmatpush3.bf16.msra.mxu0 %v342_v32  ;;  %4387 = vmatmul.mubr.msk.bf16.vlgmr.msra.gmra.mrb[0].mxu1 %vm177_vm2, %v4030_v33  ;;  %v1099_v32 = vshrl.u32 %v4050_v20, 16 }
  0x53   : > { %4391 = vmatpush3.bf16.msra.mxu1 %v805_v34  ;;  %4344 = vmatprep.mubr.msk.bf16.mxu0 %vm5034_vm0, %v5033_v0  ;;  %v1103_v33 = vrot.slane %v1101_v27, 1  ;;  %v1559_v34 = vshrl.u32 %v4073_v23, 16  ;;  %v1472_v23 = vld [vmem:[#allocation3 + $0x1c] sm:$0xf]  ;;  %v4971_v27 = vld [vmem:[%s5109_s30 + $0x48] sm:$0x1f]  }
  0x54   : > { %4348 = vmatprep.subr.bf16.mxu0 %v5033_v0  ;;  %4392 = vmatprep.mubr.msk.bf16.mxu1 %vm5034_vm0, %v5033_v0 }
  0x55   : > { %4396 = vmatprep.subr.bf16.mxu1 %v5033_v0  ;;  %v1104_v37 = vor.u32 %v1103_v33, %v1099_v32  ;;  %v1564_v39 = vor.u32 %v1563_v35, %v1559_v34  ;;  %v1941_v32 = vshll.u32 %v4971_v27, 16  ;;  %v4094_v33 = vld [vmem:[%s5109_s30 + $0x40] sm:$0xf]  ;;  %v4095_v34 = vld [vmem:[%s5109_s30 + $0x44] sm:$0x1] }
  0x56   : > { %v4117_v35 = vld [vmem:[%s5109_s30 + $0x50] sm:$0xf] }
  0x5d   : > { %4345 = vmatmul.mubr.msk.bf16.vlgmr.msra.gmra.mrb[0].mxu0 %vm177_vm2, %v337_v43  ;;  %v1658_v43 = vld [vmem:[#allocation3 + $0x8] sm:$0xf] }
  0x5e   : > { %4349 = vmatpush3.bf16.msra.mxu0 %v393_v44  ;;  %4393 = vmatmul.mubr.msk.bf16.vlgmr.msra.gmra.mrb[0].mxu1 %vm177_vm2, %v800_v46  ;;  %v1203_v44 = vsel %vm181_vm1, %v1198_v42, 0  ;;  %v1248_v46 = vld [vmem:[#allocation3 + $0xc] sm:$0xf]  ;;  %v4119_v42 = vcombine.low %v4117_v35, %v4118_v36  ;;  %v2342_v36 = vld [vmem:[#allocation3 + $0x18] sm:$0xf] }
  0x5f   : > { %4397 = vmatpush3.bf16.msra.mxu1 %v855_v45  ;;  %4350 = vmatprep.mubr.msk.bf16.mxu0 %vm5034_vm0, %v5033_v0  ;;  %v1663_v45 = vsel %vm181_vm1, %v1658_v43, 0  ;;  %v1265_v51 = vsel %vm181_vm1, %v1248_v46, 0  ;;  %v2012_v43 = vld [vmem:[#allocation3 + $0x4] sm:$0xf] }
  0x60   : > { %4354 = vmatprep.subr.bf16.mxu0 %v5033_v0  ;;  %4398 = vmatprep.mubr.msk.bf16.mxu1 %vm5034_vm0, %v5033_v0 }
  0x61   : > { %4402 = vmatprep.subr.bf16.mxu1 %v5033_v0 }
  0x69   : > { %4351 = vmatmul.mubr.msk.bf16.vlgmr.msra.gmra.mrb[0].mxu0 %vm177_vm2, %v4013_v50  ;;  %v4967_v50 = vld [vmem:[%s5109_s30 + $0x38] sm:$0x1f]  }
  0x6a   : > { %4355 = vmatpush3.bf16.msra.mxu0 %v456_v52  ;;  %4399 = vmatmul.mubr.msk.bf16.vlgmr.msra.gmra.mrb[0].mxu1 %vm177_vm2, %v4036_v53  ;;  %v4076_v52 = vld [vmem:[%s5109_s30 + $0x38] sm:$0xf]  ;;  %v1725_v53 = vsel %vm181_vm1, %v1708_v47, 0  ;;  %v1717_v55 = vshll.u32 %v4967_v50, 16  ;;  %v1715_v58 = vshrl.u32 %v4967_v50, 16 }
  0x6b   : > { %4403 = vmatpush3.bf16.msra.mxu1 %v917_v54  ;;  %4356 = vmatprep.mubr.msk.bf16.mxu0 %vm5034_vm0, %v5033_v0  ;;  %v1257_v54 = vshll.u32 %v4966_v48, 16  ;;  %v2481_v48 = vshll.u32 %v4119_v42, 16 }
  0x6c   : > { %4360 = vmatprep.subr.bf16.mxu0 %v5033_v0  ;;  %4404 = vmatprep.mubr.msk.bf16.mxu1 %vm5034_vm0, %v5033_v0  ;;  %v1719_v59 = vrot.slane %v1717_v55, 1  ;;  %v2010_v55 = vld [vmem:[#allocation3] sm:$0xf] }
  0x6d   : > { %4408 = vmatprep.subr.bf16.mxu1 %v5033_v0  ;;  %v1259_v57 = vrot.slane %v1257_v54, 1  ;;  %v2483_v54 = vrot.slane %v2481_v48, 1  ;;  %v4134_v48 = vld [vmem:[%s5109_s30 + $0x68] sm:$0xf] }
  0x6e   : > { %v1720_v63 = vor.u32 %v1719_v59, %v1715_v58  ;;  %v2075_v59 = vsel %vm181_vm1, %v2010_v55, 0  ;;  %v4164_v55 = vld [vmem:[%s5109_s30 + $0x74] sm:$0x1] }
  0x6f   : > { %v1260_v61 = vor.u32 %v1259_v57, %v1255_v56  ;;  %v2470_v57 = vld [vmem:[#allocation3] sm:$0xf] }
  0x75   : > { %4357 = vmatmul.mubr.msk.bf16.vlgmr.msra.gmra.mrb[0].mxu0 %vm177_vm2, %v451_v62  ;;  %v1770_v62 = vld [vmem:[#allocation3 + $0x10] sm:$0xf] }
  0x76   : > { %4361 = vmatpush3.bf16.msra.mxu0 %v507_v2  ;;  %4405 = vmatmul.mubr.msk.bf16.vlgmr.msra.gmra.mrb[0].mxu1 %vm177_vm2, %v912_v1  ;;  %v1315_v1 = vsel %vm181_vm1, %v1310_v60, 0  ;;  %v1775_v2 = vsel %vm181_vm1, %v1770_v62, 0  ;;  %v2535_v60 = vsel %vm181_vm1, %v2470_v57, 0  ;;  %v2578_v62 = vld [vmem:[#allocation3 + $0x8] sm:$0xf] }
  0x77   : > { %4409 = vmatpush3.bf16.msra.mxu1 %v967_v3  ;;  %4362 = vmatprep.mubr.msk.bf16.mxu0 %vm5034_vm0, %v5033_v0  ;;  %v1360_v3 = vld [vmem:[#allocation3 + $0x14] sm:$0xf] }
  0x78   : > { %4366 = vmatprep.subr.bf16.mxu0 %v5033_v0  ;;  %4410 = vmatprep.mubr.msk.bf16.mxu1 %vm5034_vm0, %v5033_v0  ;;  %v1377_v8 = vsel %vm181_vm1, %v1360_v3, 0  ;;  %v2628_v3 = vld [vmem:[#allocation3 + $0xc] sm:$0xf] }
  0x79   : > { %4414 = vmatprep.subr.bf16.mxu1 %v5033_v0 }
  0x81   : > { %4363 = vmatmul.mubr.msk.bf16.vlgmr.msra.gmra.mrb[0].mxu0 %vm177_vm2, %v4019_v7  ;;  %v4969_v7 = vld [vmem:[%s5109_s30 + $0x40] sm:$0x1f]  }
  0x82   : > { %4367 = vmatpush3.bf16.msra.mxu0 %v570_v9  ;;  %4411 = vmatmul.mubr.msk.bf16.vlgmr.msra.gmra.mrb[0].mxu1 %vm177_vm2, %v4042_v10  ;;  %v4082_v9 = vld [vmem:[%s5109_s30 + $0x40] sm:$0xf]  ;;  %v1837_v10 = vsel %vm181_vm1, %v1820_v4, 0  ;;  %v1829_v12 = vshll.u32 %v4969_v7, 16  ;;  %v1827_v15 = vshrl.u32 %v4969_v7, 16 }
  0x83   : > { %4415 = vmatpush3.bf16.msra.mxu1 %v1029_v11  ;;  %4368 = vmatprep.mubr.msk.bf16.mxu0 %vm5034_vm0, %v5033_v0  ;;  %v1369_v11 = vshll.u32 %v4968_v5, 16  ;;  %v4974_v4 = vld [vmem:[%s5109_s30 + $0x48] sm:$0x1f]  }
  0x84   : > { %4416 = vmatprep.mubr.msk.bf16.mxu1 %vm5034_vm0, %v5033_v0  ;;  %4420 = vmatprep.subr.bf16.mxu0 %v5033_v0  ;;  %v4099_v5 = vld [vmem:[%s5109_s30 + $0x48] sm:$0xf] }
  0x85   : > { %4468 = vmatprep.subr.bf16.mxu1 %v5033_v0 }
  0x8d   : > { %4369 = vmatmul.mubr.msk.bf16.vlgmr.msra.gmra.mrb[0].mxu0 %vm177_vm2, %v565_v25  ;;  %v4970_v25 = vld [vmem:[%s5109_s30 + $0x38] sm:$0x1f]  }
  0x8e   : > { %4417 = vmatmul.mubr.msk.bf16.vlgmr.msra.gmra.mrb[0].mxu1 %vm177_vm2, %v1024_v28  ;;  %4421 = vmatpush3.bf16.msra.mxu0 %v1109_v30  ;;  %v1489_v28 = vsel %vm181_vm1, %v1472_v23, 0  ;;  %v1949_v30 = vsel %vm181_vm1, %v1932_v24, 0  ;;  %v2740_v23 = vld [vmem:[#allocation3 + $0x14] sm:$0xf] }
  0x8f   : > { %4469 = vmatpush3.bf16.msra.mxu1 %v1569_v31  ;;  %4422 = vmatprep.mubr.msk.bf16.mxu0 %vm5034_vm0, %v5033_v0  ;;  %v1481_v31 = vshll.u32 %v4970_v25, 16  ;;  %v4976_v24 = vld [vmem:[%s5109_s30 + $0x50] sm:$0x1f]  }
  0x90   : > { %4426 = vmatprep.subr.bf16.mxu0 %v5033_v0  ;;  %4470 = vmatprep.mubr.msk.bf16.mxu1 %vm5034_vm0, %v5033_v0 }
  0x91   : > { %4474 = vmatprep.subr.bf16.mxu1 %v5033_v0  ;;  %v1483_v38 = vrot.slane %v1481_v31, 1 }
  0x95   : > { %4423 = vmatmul.mubr.msk.bf16.vlgmr.msra.gmra.mrb[4].mxu0 %vm177_vm2, %v1104_v37  ;;  %v1479_v37 = vshrl.u32 %v4970_v25, 16  ;;  %v4105_v25 = vld [vmem:[%s5109_s30 + $0x50] sm:$0xf] }
  0x96   : > { %4427 = vmatpush3.bf16.msra.mxu0 %v1155_v40  ;;  %4471 = vmatmul.mubr.msk.bf16.vlgmr.msra.gmra.mrb[4].mxu1 %vm177_vm2, %v1564_v39  ;;  %v4096_v39 = vcombine.low %v4094_v33, %v4095_v34  ;;  %v1939_v40 = vshrl.u32 %v4971_v27, 16 }
  0x97   : > { %4475 = vmatpush3.bf16.msra.mxu1 %v1615_v41  ;;  %4428 = vmatprep.mubr.msk.bf16.mxu0 %vm5034_vm0, %v5033_v0  ;;  %v1943_v41 = vrot.slane %v1941_v32, 1  ;;  %v2287_v32 = vshrl.u32 %v4976_v24, 16 }
  0x98   : > { %4432 = vmatprep.subr.bf16.mxu0 %v5033_v0  ;;  %4476 = vmatprep.mubr.msk.bf16.mxu1 %vm5034_vm0, %v5033_v0  ;;  %v2021_v46 = vshll.u32 %v4096_v39, 16 }
  0x99   : > { %4480 = vmatprep.subr.bf16.mxu1 %v5033_v0  ;;  %v1944_v47 = vor.u32 %v1943_v41, %v1939_v40  ;;  %v2347_v40 = vsel %vm181_vm1, %v2342_v36, 0 }
  0xa1   : > { %4429 = vmatmul.mubr.msk.bf16.vlgmr.msra.gmra.mrb[4].mxu0 %vm177_vm2, %v4048_v14  ;;  %v1371_v14 = vrot.slane %v1369_v11, 1 }
  0xa2   : > { %4433 = vmatpush3.bf16.msra.mxu0 %v1203_v44  ;;  %4477 = vmatmul.mubr.msk.bf16.vlgmr.msra.gmra.mrb[4].mxu1 %vm177_vm2, %v4071_v16  ;;  %v1831_v16 = vrot.slane %v1829_v12, 1  ;;  %v1484_v44 = vor.u32 %v1483_v38, %v1479_v37  ;;  %v2175_v12 = vshrl.u32 %v4974_v4, 16  ;;  %v2802_v38 = vld [vmem:[#allocation3 + $0x18] sm:$0xf] }
  0xa3   : > { %4481 = vmatpush3.bf16.msra.mxu1 %v1663_v45  ;;  %4434 = vmatprep.mubr.msk.bf16.mxu0 %vm5034_vm0, %v5033_v0  ;;  %v1372_v18 = vor.u32 %v1371_v14, %v1367_v13  ;;  %v2472_v45 = vld [vmem:[#allocation3 + $0x4] sm:$0xf]  ;;  %v2807_v41 = vsel %vm181_vm1, %v2802_v38, 0 }
  0xa4   : > { %4438 = vmatprep.subr.bf16.mxu0 %v5033_v0  ;;  %4482 = vmatprep.mubr.msk.bf16.mxu1 %vm5034_vm0, %v5033_v0  ;;  %v1832_v20 = vor.u32 %v1831_v16, %v1827_v15  ;;  %v2489_v50 = vsel %vm181_vm1, %v2472_v45, 0  ;;  %v2230_v16 = vld [vmem:[#allocation3 + $0x10] sm:$0xf]  ;;  %v4111_v45 = vld [vmem:[%s5109_s30 + $0x58] sm:$0xf] }
  0xa5   : > { %4486 = vmatprep.subr.bf16.mxu1 %v5033_v0 }
  0xad   : > { %4435 = vmatmul.mubr.msk.bf16.vlgmr.msra.gmra.mrb[4].mxu0 %vm177_vm2, %v4053_v49  ;;  %v2029_v49 = vsel %vm181_vm1, %v2012_v43, 0  ;;  %v2852_v43 = vld [vmem:[#allocation3 + $0x1c] sm:$0xf] }
  0xae   : > { %4439 = vmatpush3.bf16.msra.mxu0 %v1265_v51  ;;  %4483 = vmatmul.mubr.msk.bf16.vlgmr.msra.gmra.mrb[4].mxu1 %vm177_vm2, %v4076_v52  ;;  %v2019_v51 = vshrl.u32 %v4096_v39, 16  ;;  %v2023_v52 = vrot.slane %v2021_v46, 1  ;;  %v4979_v46 = vld [vmem:[%s5109_s30 + $0x68] sm:$0x1f]  }
  0xaf   : > { %4487 = vmatpush3.bf16.msra.mxu1 %v1725_v53  ;;  %4440 = vmatprep.mubr.msk.bf16.mxu0 %vm5034_vm0, %v5033_v0  ;;  %v2479_v53 = vshrl.u32 %v4119_v42, 16  ;;  %v2392_v42 = vld [vmem:[#allocation3 + $0x1c] sm:$0xf] }
  0xb0   : > { %4444 = vmatprep.subr.bf16.mxu0 %v5033_v0  ;;  %4488 = vmatprep.mubr.msk.bf16.mxu1 %vm5034_vm0, %v5033_v0  ;;  %v2024_v56 = vor.u32 %v2023_v52, %v2019_v51  ;;  %v2861_v51 = vshll.u32 %v4979_v46, 16  ;;  %v4140_v52 = vld [vmem:[%s5109_s30 + $0x60] sm:$0xf] }
  0xb1   : > { %4492 = vmatprep.subr.bf16.mxu1 %v5033_v0  ;;  %v2484_v58 = vor.u32 %v2483_v54, %v2479_v53  ;;  %v4141_v53 = vld [vmem:[%s5109_s30 + $0x64] sm:$0x1]  ;;  %v4163_v54 = vld [vmem:[%s5109_s30 + $0x70] sm:$0xf] }
  0xb9   : > { %4441 = vmatmul.mubr.msk.bf16.vlgmr.msra.gmra.mrb[4].mxu0 %vm177_vm2, %v1260_v61  ;;  %v2118_v61 = vld [vmem:[#allocation3 + $0x8] sm:$0xf] }
  0xba   : > { %4445 = vmatpush3.bf16.msra.mxu0 %v1315_v1  ;;  %4489 = vmatmul.mubr.msk.bf16.vlgmr.msra.gmra.mrb[4].mxu1 %vm177_vm2, %v1720_v63  ;;  %v2123_v63 = vsel %vm181_vm1, %v2118_v61, 0  ;;  %v2583_v1 = vsel %vm181_vm1, %v2578_v62, 0  ;;  %v4165_v61 = vcombine.low %v4163_v54, %v4164_v55  ;;  %v2932_v62 = vld [vmem:[#allocation3 + $0x4] sm:$0xf] }
  0xbb   : > { %4493 = vmatpush3.bf16.msra.mxu1 %v1775_v2  ;;  %4446 = vmatprep.mubr.msk.bf16.mxu0 %vm5034_vm0, %v5033_v0  ;;  %v2168_v2 = vld [vmem:[#allocation3 + $0xc] sm:$0xf] }
  0xbc   : > { %4450 = vmatprep.subr.bf16.mxu0 %v5033_v0  ;;  %4494 = vmatprep.mubr.msk.bf16.mxu1 %vm5034_vm0, %v5033_v0  ;;  %v2185_v7 = vsel %vm181_vm1, %v2168_v2, 0 }
  0xbd   : > { %4498 = vmatprep.subr.bf16.mxu1 %v5033_v0 }
  0xc5   : > { %4447 = vmatmul.mubr.msk.bf16.vlgmr.msra.gmra.mrb[4].mxu0 %vm177_vm2, %v4059_v6  ;;  %v4975_v6 = vld [vmem:[%s5109_s30 + $0x58] sm:$0x1f]  }
  0xc6   : > { %4451 = vmatpush3.bf16.msra.mxu0 %v1377_v8  ;;  %4495 = vmatmul.mubr.msk.bf16.vlgmr.msra.gmra.mrb[4].mxu1 %vm177_vm2, %v4082_v9  ;;  %v4122_v8 = vld [vmem:[%s5109_s30 + $0x58] sm:$0xf]  ;;  %v2645_v9 = vsel %vm181_vm1, %v2628_v3, 0  ;;  %v2637_v11 = vshll.u32 %v4975_v6, 16  ;;  %v2635_v14 = vshrl.u32 %v4975_v6, 16 }
  0xc7   : > { %4499 = vmatpush3.bf16.msra.mxu1 %v1837_v10  ;;  %4452 = vmatprep.mubr.msk.bf16.mxu0 %vm5034_vm0, %v5033_v0  ;;  %v2177_v10 = vshll.u32 %v4974_v4, 16  ;;  %v3401_v4 = vshll.u32 %v4165_v61, 16 }
  0xc8   : > { %4456 = vmatprep.subr.bf16.mxu0 %v5033_v0  ;;  %4500 = vmatprep.mubr.msk.bf16.mxu1 %vm5034_vm0, %v5033_v0  ;;  %v2639_v15 = vrot.slane %v2637_v11, 1  ;;  %v2930_v11 = vld [vmem:[#allocation3] sm:$0xf] }
  0xc9   : > { %4504 = vmatprep.subr.bf16.mxu1 %v5033_v0  ;;  %v2179_v13 = vrot.slane %v2177_v10, 1  ;;  %v3403_v10 = vrot.slane %v3401_v4, 1  ;;  %v3150_v4 = vld [vmem:[#allocation3 + $0x10] sm:$0xf] }
  0xca   : > { %v2640_v19 = vor.u32 %v2639_v15, %v2635_v14  ;;  %v2995_v15 = vsel %vm181_vm1, %v2930_v11, 0  ;;  %v3155_v11 = vsel %vm181_vm1, %v3150_v4, 0 }
  0xcb   : > { %v2180_v17 = vor.u32 %v2179_v13, %v2175_v12  ;;  %v3390_v13 = vld [vmem:[#allocation3] sm:$0xf] }
  0xd1   : > { %4453 = vmatmul.mubr.msk.bf16.vlgmr.msra.gmra.mrb[4].mxu0 %vm177_vm2, %v1372_v18  ;;  %v2690_v18 = vld [vmem:[#allocation3 + $0x10] sm:$0xf] }
  0xd2   : > { %4457 = vmatpush3.bf16.msra.mxu0 %v1427_v21  ;;  %4501 = vmatmul.mubr.msk.bf16.vlgmr.msra.gmra.mrb[4].mxu1 %vm177_vm2, %v1832_v20  ;;  %v2235_v20 = vsel %vm181_vm1, %v2230_v16, 0  ;;  %v2695_v21 = vsel %vm181_vm1, %v2690_v18, 0  ;;  %v3455_v16 = vsel %vm181_vm1, %v3390_v13, 0  ;;  %v3498_v18 = vld [vmem:[#allocation3 + $0x8] sm:$0xf] }
  0xd3   : > { %4505 = vmatpush3.bf16.msra.mxu1 %v1887_v22  ;;  %4458 = vmatprep.mubr.msk.bf16.mxu0 %vm5034_vm0, %v5033_v0  ;;  %v2280_v22 = vld [vmem:[#allocation3 + $0x14] sm:$0xf] }
  0xd4   : > { %4462 = vmatprep.subr.bf16.mxu0 %v5033_v0  ;;  %4506 = vmatprep.mubr.msk.bf16.mxu1 %vm5034_vm0, %v5033_v0  ;;  %v2297_v27 = vsel %vm181_vm1, %v2280_v22, 0  ;;  %v4145_v22 = vld [vmem:[%s5109_s30 + $0x68] sm:$0xf] }
  0xd5   : > { %4510 = vmatprep.subr.bf16.mxu1 %v5033_v0 }
  0xdd   : > { %4459 = vmatmul.mubr.msk.bf16.vlgmr.msra.gmra.mrb[4].mxu0 %vm177_vm2, %v4065_v26  ;;  %v4977_v26 = vld [vmem:[%s5109_s30 + $0x60] sm:$0x1f]  }
  0xde   : > { %4463 = vmatpush3.bf16.msra.mxu0 %v1489_v28  ;;  %4507 = vmatmul.mubr.msk.bf16.vlgmr.msra.gmra.mrb[4].mxu1 %vm177_vm2, %v4088_v29  ;;  %v4128_v28 = vld [vmem:[%s5109_s30 + $0x60] sm:$0xf]  ;;  %v2757_v29 = vsel %vm181_vm1, %v2740_v23, 0  ;;  %v2749_v31 = vshll.u32 %v4977_v26, 16  ;;  %v2747_v34 = vshrl.u32 %v4977_v26, 16 }
  0xdf   : > { %4511 = vmatpush3.bf16.msra.mxu1 %v1949_v30  ;;  %4464 = vmatprep.mubr.msk.bf16.mxu0 %vm5034_vm0, %v5033_v0  ;;  %v2289_v30 = vshll.u32 %v4976_v24, 16  ;;  %v3088_v23 = vld [vmem:[#allocation3 + $0xc] sm:$0xf] }
  0xe0   : > { %4512 = vmatprep.mubr.msk.bf16.mxu1 %vm5034_vm0, %v5033_v0  ;;  %4516 = vmatprep.subr.bf16.mxu0 %v5033_v0  ;;  %v4982_v24 = vld [vmem:[%s5109_s30 + $0x68] sm:$0x1f]  }
  0xe1   : > { %4564 = vmatprep.subr.bf16.mxu1 %v5033_v0 }
  0xe9   : > { %4465 = vmatmul.mubr.msk.bf16.vlgmr.msra.gmra.mrb[4].mxu0 %vm177_vm2, %v1484_v44  ;;  %v4978_v44 = vld [vmem:[%s5109_s30 + $0x58] sm:$0x1f]  }
  0xea   : > { %4513 = vmatmul.mubr.msk.bf16.vlgmr.msra.gmra.mrb[4].mxu1 %vm177_vm2, %v1944_v47  ;;  %4517 = vmatpush3.bf16.msra.mxu0 %v2029_v49  ;;  %v2409_v47 = vsel %vm181_vm1, %v2392_v42, 0  ;;  %v2869_v49 = vsel %vm181_vm1, %v2852_v43, 0 }
  0xeb   : > { %4565 = vmatpush3.bf16.msra.mxu1 %v2489_v50  ;;  %4518 = vmatprep.mubr.msk.bf16.mxu0 %vm5034_vm0, %v5033_v0  ;;  %v2401_v50 = vshll.u32 %v4978_v44, 16 }
  0xec   : > { %4522 = vmatprep.subr.bf16.mxu0 %v5033_v0  ;;  %4566 = vmatprep.mubr.msk.bf16.mxu1 %vm5034_vm0, %v5033_v0 }
  0xed   : > { %4570 = vmatprep.subr.bf16.mxu1 %v5033_v0  ;;  %v2403_v57 = vrot.slane %v2401_v50, 1 }
  0xf1   : > { %4519 = vmatmul.mubr.msk.bf16.vlgmr.msra.gmra.mrb[8].mxu0 %vm177_vm2, %v2024_v56  ;;  %v2399_v56 = vshrl.u32 %v4978_v44, 16 }
  0xf2   : > { %4523 = vmatpush3.bf16.msra.mxu0 %v2075_v59  ;;  %4567 = vmatmul.mubr.msk.bf16.vlgmr.msra.gmra.mrb[8].mxu1 %vm177_vm2, %v2484_v58  ;;  %v4142_v58 = vcombine.low %v4140_v52, %v4141_v53  ;;  %v2859_v59 = vshrl.u32 %v4979_v46, 16 }
  0xf3   : > { %4571 = vmatpush3.bf16.msra.mxu1 %v2535_v60  ;;  %4524 = vmatprep.mubr.msk.bf16.mxu0 %vm5034_vm0, %v5033_v0  ;;  %v2863_v60 = vrot.slane %v2861_v51, 1 }
  0xf4   : > { %4528 = vmatprep.subr.bf16.mxu0 %v5033_v0  ;;  %4572 = vmatprep.mubr.msk.bf16.mxu1 %vm5034_vm0, %v5033_v0  ;;  %v2941_v2 = vshll.u32 %v4142_v58, 16 }
  0xf5   : > { %4576 = vmatprep.subr.bf16.mxu1 %v5033_v0  ;;  %v2864_v3 = vor.u32 %v2863_v60, %v2859_v59 }
  0xfd   : > { %4525 = vmatmul.mubr.msk.bf16.vlgmr.msra.gmra.mrb[8].mxu0 %vm177_vm2, %v4094_v33  ;;  %v2291_v33 = vrot.slane %v2289_v30, 1 }
  0xfe   : > { %4529 = vmatpush3.bf16.msra.mxu0 %v2123_v63  ;;  %4573 = vmatmul.mubr.msk.bf16.vlgmr.msra.gmra.mrb[8].mxu1 %vm177_vm2, %v4117_v35  ;;  %v2751_v35 = vrot.slane %v2749_v31, 1  ;;  %v2404_v63 = vor.u32 %v2403_v57, %v2399_v56  ;;  %v3095_v57 = vshrl.u32 %v4982_v24, 16 }
  0xff   : > { %4577 = vmatpush3.bf16.msra.mxu1 %v2583_v1  ;;  %4530 = vmatprep.mubr.msk.bf16.mxu0 %vm5034_vm0, %v5033_v0  ;;  %v2292_v37 = vor.u32 %v2291_v33, %v2287_v32  ;;  %v3392_v1 = vld [vmem:[#allocation3 + $0x4] sm:$0xf] }
 0x100   : > { %4534 = vmatprep.subr.bf16.mxu0 %v5033_v0  ;;  %4578 = vmatprep.mubr.msk.bf16.mxu1 %vm5034_vm0, %v5033_v0  ;;  %v2752_v39 = vor.u32 %v2751_v35, %v2747_v34  ;;  %v3409_v6 = vsel %vm181_vm1, %v3392_v1, 0  ;;  %v4983_v34 = vld [vmem:[%s5109_s30 + $0x78] sm:$0x1f]  }
 0x101   : > { %4582 = vmatprep.subr.bf16.mxu1 %v5033_v0  ;;  %v3557_v50 = vshll.u32 %v4983_v34, 16 }
 0x109   : > { %4531 = vmatmul.mubr.msk.bf16.vlgmr.msra.gmra.mrb[8].mxu0 %vm177_vm2, %v4099_v5  ;;  %v2949_v5 = vsel %vm181_vm1, %v2932_v62, 0  ;;  %v3559_v62 = vrot.slane %v3557_v50, 1 }
 0x10a   : > { %4535 = vmatpush3.bf16.msra.mxu0 %v2185_v7  ;;  %4579 = vmatmul.mubr.msk.bf16.vlgmr.msra.gmra.mrb[8].mxu1 %vm177_vm2, %v4122_v8  ;;  %v2939_v7 = vshrl.u32 %v4142_v58, 16  ;;  %v2943_v8 = vrot.slane %v2941_v2, 1 }
 0x10b   : > { %4583 = vmatpush3.bf16.msra.mxu1 %v2645_v9  ;;  %4536 = vmatprep.mubr.msk.bf16.mxu0 %vm5034_vm0, %v5033_v0  ;;  %v3399_v9 = vshrl.u32 %v4165_v61, 16  ;;  %v3555_v61 = vshrl.u32 %v4983_v34, 16 }
 0x10c   : > { %4540 = vmatprep.subr.bf16.mxu0 %v5033_v0  ;;  %4584 = vmatprep.mubr.msk.bf16.mxu1 %vm5034_vm0, %v5033_v0  ;;  %v2944_v12 = vor.u32 %v2943_v8, %v2939_v7  ;;  %v3610_v7 = vld [vmem:[#allocation3 + $0x10] sm:$0xf] }
 0x10d   : > { %4588 = vmatprep.subr.bf16.mxu1 %v5033_v0  ;;  %v3404_v14 = vor.u32 %v3403_v10, %v3399_v9  ;;  %v3560_v10 = vor.u32 %v3559_v62, %v3555_v61  ;;  %v3615_v13 = vsel %vm181_vm1, %v3610_v7, 0 }
 0x115   : > { %4537 = vmatmul.mubr.msk.bf16.vlgmr.msra.gmra.mrb[8].mxu0 %vm177_vm2, %v2180_v17  ;;  %v3038_v17 = vld [vmem:[#allocation3 + $0x8] sm:$0xf] }
 0x116   : > { %4541 = vmatpush3.bf16.msra.mxu0 %v2235_v20  ;;  %4585 = vmatmul.mubr.msk.bf16.vlgmr.msra.gmra.mrb[8].mxu1 %vm177_vm2, %v2640_v19  ;;  %v3043_v19 = vsel %vm181_vm1, %v3038_v17, 0  ;;  %v3503_v20 = vsel %vm181_vm1, %v3498_v18, 0  ;;  %v4151_v17 = vld [vmem:[%s5109_s30 + $0x70] sm:$0xf]  ;;  %v4985_v18 = vld [vmem:[%s5109_s30 + $0x80] sm:$0x1f]  }
 0x117   : > { %4589 = vmatpush3.bf16.msra.mxu1 %v2695_v21  ;;  %4542 = vmatprep.mubr.msk.bf16.mxu0 %vm5034_vm0, %v5033_v0 }
 0x118   : > { %4546 = vmatprep.subr.bf16.mxu0 %v5033_v0  ;;  %4590 = vmatprep.mubr.msk.bf16.mxu1 %vm5034_vm0, %v5033_v0 }
 0x119   : > { %4594 = vmatprep.subr.bf16.mxu1 %v5033_v0 }
 0x121   : > { %4543 = vmatmul.mubr.msk.bf16.vlgmr.msra.gmra.mrb[8].mxu0 %vm177_vm2, %v4105_v25 }
 0x122   : > { %4547 = vmatpush3.bf16.msra.mxu0 %v2297_v27  ;;  %4591 = vmatmul.mubr.msk.bf16.vlgmr.msra.gmra.mrb[8].mxu1 %vm177_vm2, %v4128_v28 }
 0x123   : > { %4595 = vmatpush3.bf16.msra.mxu1 %v2757_v29  ;;  %4548 = vmatprep.mubr.msk.bf16.mxu0 %vm5034_vm0, %v5033_v0  ;;  %v3548_v29 = vld [vmem:[#allocation3 + $0xc] sm:$0xf] }
 0x124   : > { %4552 = vmatprep.subr.bf16.mxu0 %v5033_v0  ;;  %4596 = vmatprep.mubr.msk.bf16.mxu1 %vm5034_vm0, %v5033_v0  ;;  %v3565_v44 = vsel %vm181_vm1, %v3548_v29, 0 }
 0x125   : > { %4600 = vmatprep.subr.bf16.mxu1 %v5033_v0 }
 0x12d   : > { %4549 = vmatmul.mubr.msk.bf16.vlgmr.msra.gmra.mrb[8].mxu0 %vm177_vm2, %v2292_v37 }
 0x12e   : > { %4553 = vmatpush3.bf16.msra.mxu0 %v2347_v40  ;;  %4597 = vmatmul.mubr.msk.bf16.vlgmr.msra.gmra.mrb[8].mxu1 %vm177_vm2, %v2752_v39  ;;  %v3105_v39 = vsel %vm181_vm1, %v3088_v23, 0  ;;  %v4168_v40 = vld [vmem:[%s5109_s30 + $0x78] sm:$0xf] }
 0x12f   : > { %4601 = vmatpush3.bf16.msra.mxu1 %v2807_v41  ;;  %4554 = vmatprep.mubr.msk.bf16.mxu0 %vm5034_vm0, %v5033_v0 }
 0x130   : > { %4558 = vmatprep.subr.bf16.mxu0 %v5033_v0  ;;  %4602 = vmatprep.mubr.msk.bf16.mxu1 %vm5034_vm0, %v5033_v0 }
 0x131   : > { %4606 = vmatprep.subr.bf16.mxu1 %v5033_v0 }
 0x139   : > { %4555 = vmatmul.mubr.msk.bf16.vlgmr.msra.gmra.mrb[8].mxu0 %vm177_vm2, %v4111_v45 }
 0x13a   : > { %4559 = vmatpush3.bf16.msra.mxu0 %v2409_v47  ;;  %4603 = vmatmul.mubr.msk.bf16.vlgmr.msra.gmra.mrb[8].mxu1 %vm177_vm2, %v4134_v48  ;;  %v3097_v47 = vshll.u32 %v4982_v24, 16  ;;  %v3669_v24 = vshll.u32 %v4985_v18, 16 }
 0x13b   : > { %4607 = vmatpush3.bf16.msra.mxu1 %v2869_v49  ;;  %4560 = vmatprep.mubr.msk.bf16.mxu0 %vm5034_vm0, %v5033_v0 }
 0x13c   : > { %4608 = vmatprep.mubr.msk.bf16.mxu1 %vm5034_vm0, %v5033_v0  ;;  %4612 = vmatprep.subr.bf16.mxu0 %v5033_v0  ;;  %v3099_v58 = vrot.slane %v3097_v47, 1  ;;  %v3671_v29 = vrot.slane %v3669_v24, 1 }
 0x13d   : > { %4660 = vmatprep.subr.bf16.mxu1 %v5033_v0 }
 0x145   : > { %4561 = vmatmul.mubr.msk.bf16.vlgmr.msra.gmra.mrb[8].mxu0 %vm177_vm2, %v2404_v63 }
 0x146   : > { %4609 = vmatmul.mubr.msk.bf16.vlgmr.msra.gmra.mrb[8].mxu1 %vm177_vm2, %v2864_v3  ;;  %4613 = vmatpush3.bf16.msra.mxu0 %v2949_v5 }
 0x147   : > { %4661 = vmatpush3.bf16.msra.mxu1 %v3409_v6  ;;  %4614 = vmatprep.mubr.msk.bf16.mxu0 %vm5034_vm0, %v5033_v0  ;;  %v3100_v6 = vor.u32 %v3099_v58, %v3095_v57 }
 0x148   : > { %4618 = vmatprep.subr.bf16.mxu0 %v5033_v0  ;;  %4662 = vmatprep.mubr.msk.bf16.mxu1 %vm5034_vm0, %v5033_v0 }
 0x149   : > { %4666 = vmatprep.subr.bf16.mxu1 %v5033_v0 }
 0x14d   : > { %4615 = vmatmul.mubr.msk.bf16.vlgmr.msra.gmra.mrb[12].mxu0 %vm177_vm2, %v2944_v12 }
 0x14e   : > { %4619 = vmatpush3.bf16.msra.mxu0 %v2995_v15  ;;  %4663 = vmatmul.mubr.msk.bf16.vlgmr.msra.gmra.mrb[12].mxu1 %vm177_vm2, %v3404_v14  ;;  %v3200_v14 = vld [vmem:[#allocation3 + $0x14] sm:$0xf] }
 0x14f   : > { %4667 = vmatpush3.bf16.msra.mxu1 %v3455_v16  ;;  %4620 = vmatprep.mubr.msk.bf16.mxu0 %vm5034_vm0, %v5033_v0  ;;  %v3660_v15 = vld [vmem:[#allocation3 + $0x14] sm:$0xf] }
 0x150   : > { %4624 = vmatprep.subr.bf16.mxu0 %v5033_v0  ;;  %4668 = vmatprep.mubr.msk.bf16.mxu1 %vm5034_vm0, %v5033_v0  ;;  %v4984_v16 = vld [vmem:[%s5109_s30 + $0x70] sm:$0x1f]  }
 0x151   : > { %4672 = vmatprep.subr.bf16.mxu1 %v5033_v0  ;;  %v3209_v23 = vshll.u32 %v4984_v16, 16 }
 0x159   : > { %4621 = vmatmul.mubr.msk.bf16.vlgmr.msra.gmra.mrb[12].mxu0 %vm177_vm2, %v4140_v52 }
 0x15a   : > { %4625 = vmatpush3.bf16.msra.mxu0 %v3043_v19  ;;  %4669 = vmatmul.mubr.msk.bf16.vlgmr.msra.gmra.mrb[12].mxu1 %vm177_vm2, %v4163_v54  ;;  %v3217_v19 = vsel %vm181_vm1, %v3200_v14, 0 }
 0x15b   : > { %4673 = vmatpush3.bf16.msra.mxu1 %v3503_v20  ;;  %4626 = vmatprep.mubr.msk.bf16.mxu0 %vm5034_vm0, %v5033_v0  ;;  %v4174_v20 = vld [vmem:[%s5109_s30 + $0x80] sm:$0xf] }
 0x15c   : > { %4630 = vmatprep.subr.bf16.mxu0 %v5033_v0  ;;  %4674 = vmatprep.mubr.msk.bf16.mxu1 %vm5034_vm0, %v5033_v0 }
 0x15d   : > { %4678 = vmatprep.subr.bf16.mxu1 %v5033_v0 }
 0x160   : > { %v5427_v21 = vpop.f32.mrb[0].mxu0 }
 0x161   : > { %v614_v25 = vrot.slane %v5427_v21, 4  ;;  %v621_v26 = vmul.f32 %v5427_v21, %v5427_v21  ;;  %v5434_v27 = vpop.f32.mrb[0].mxu1  ;;  %v4370_v28 = vpop.f32.mrb[1].mxu0 }
 0x162   : > { %v1074_v30 = vrot.slane %v5434_v27, 4  ;;  %v1081_v31 = vmul.f32 %v5434_v27, %v5434_v27  ;;  %v4418_v32 = vpop.f32.mrb[1].mxu1  ;;  %v609_v33 = vpop.f32.mrb[2].mxu0  ;;  %v3667_v28 = vshrl.u32 %v4985_v18, 16 }
 0x163   : > { %v615_v35 = vadd.f32 %v614_v25, %v5427_v21  ;;  %v622_v36 = vrot.slane %v621_v26, 4  ;;  %v1068_v37 = vpop.f32.mrb[2].mxu1  ;;  %v4371_v38 = vpop.f32.mrb[3].mxu0  ;;  %v3207_v25 = vshrl.u32 %v4984_v16, 16  ;;  %v3722_v32 = vld [vmem:[#allocation3 + $0x18] sm:$0xf] }
 0x164   : > { %v1075_v41 = vadd.f32 %v1074_v30, %v5434_v27  ;;  %v1082_v42 = vrot.slane %v1081_v31, 4  ;;  %v4419_v43 = vpop.f32.mrb[3].mxu1  ;;  %v3262_v30 = vld [vmem:[#allocation3 + $0x18] sm:$0xf]  ;;  %v3672_v33 = vor.u32 %v3671_v29, %v3667_v28  ;;  %v3772_v37 = vld [vmem:[#allocation3 + $0x1c] sm:$0xf] }
 0x165   : > { %v616_v45 = vrot.slane %v615_v35, 2  ;;  %v623_v46 = vadd.f32 %v622_v36, %v621_v26  ;;  %4627 = vmatmul.mubr.msk.bf16.vlgmr.msra.gmra.mrb[12].mxu0 %vm177_vm2, %v4145_v22  ;;  %v3677_v22 = vsel %vm181_vm1, %v3660_v15, 0  ;;  %v3211_v26 = vrot.slane %v3209_v23, 1  ;;  %v3312_v36 = vld [vmem:[#allocation3 + $0x1c] sm:$0xf] }
 0x166   : > { %v1076_v48 = vrot.slane %v1075_v41, 2  ;;  %v1083_v49 = vadd.f32 %v1082_v42, %v1081_v31  ;;  %4631 = vmatpush3.bf16.msra.mxu0 %v3105_v39  ;;  %4675 = vmatmul.mubr.msk.bf16.vlgmr.msra.gmra.mrb[12].mxu1 %vm177_vm2, %v4168_v40  ;;  %v3267_v34 = vsel %vm181_vm1, %v3262_v30, 0  ;;  %v4986_v38 = vld [vmem:[%s5109_s30 + $0x78] sm:$0x1f]   ;;  %v4987_v40 = vld [vmem:[%s5109_s30 + $0x88] sm:$0x1f]  }
 0x167   : > { %v617_v51 = vadd.f32 %v616_v45, %v615_v35  ;;  %v624_v52 = vrot.slane %v623_v46, 2  ;;  %4679 = vmatpush3.bf16.msra.mxu1 %v3565_v44  ;;  %4632 = vmatprep.mubr.msk.bf16.mxu0 %vm5034_vm0, %v5033_v0  ;;  %v3212_v31 = vor.u32 %v3211_v26, %v3207_v25  ;;  %v3727_v35 = vsel %vm181_vm1, %v3722_v32, 0  ;;  %v4157_v39 = vld [vmem:[%s5109_s30 + $0x78] sm:$0xf]  ;;  %v4180_v42 = vld [vmem:[%s5109_s30 + $0x88] sm:$0xf] }
 0x168   : > { %v1077_v53 = vadd.f32 %v1076_v48, %v1075_v41  ;;  %v1084_v54 = vrot.slane %v1083_v49, 2  ;;  %4636 = vmatprep.subr.bf16.mxu0 %v5033_v0  ;;  %4680 = vmatprep.mubr.msk.bf16.mxu1 %vm5034_vm0, %v5033_v0  ;;  %v3329_v41 = vsel %vm181_vm1, %v3312_v36, 0  ;;  %v3789_v43 = vsel %vm181_vm1, %v3772_v37, 0 }
 0x169   : > { %v618_v55 = vrot.slane %v617_v51, 1  ;;  %v625_v56 = vadd.f32 %v624_v52, %v623_v46  ;;  %4684 = vmatprep.subr.bf16.mxu1 %v5033_v0  ;;  %v3321_v44 = vshll.u32 %v4986_v38, 16  ;;  %v3781_v45 = vshll.u32 %v4987_v40, 16 }
 0x16a   : > { %v1078_v59 = vrot.slane %v1077_v53, 1  ;;  %v1085_v60 = vadd.f32 %v1084_v54, %v1083_v49  ;;  %v3319_v46 = vshrl.u32 %v4986_v38, 16  ;;  %v3779_v48 = vshrl.u32 %v4987_v40, 16 }
 0x16b   : > { %v619_v63 = vadd.f32 %v618_v55, %v617_v51  ;;  %v626_v1 = vrot.slane %v625_v56, 1  ;;  %v3323_v47 = vrot.slane %v3321_v44, 1  ;;  %v3783_v49 = vrot.slane %v3781_v45, 1 }
 0x16c   : > { %v1079_v2 = vadd.f32 %v1078_v59, %v1077_v53  ;;  %v1086_v3 = vrot.slane %v1085_v60, 1 }
 0x16d   : > { %v627_v5 = vadd.f32 %v626_v1, %v625_v56  ;;  %v3324_v50 = vor.u32 %v3323_v47, %v3319_v46  ;;  %v3784_v51 = vor.u32 %v3783_v49, %v3779_v48 }
 0x16e   : > { %v5453_v8 = vadd.f32 %v1079_v2, %v619_v63  ;;  %v1087_v9 = vadd.f32 %v1086_v3, %v1085_v60 }
 0x170   : > { %v5456_v12 = vadd.f32 %v1087_v9, %v627_v5 }
 0x171   : > { %4633 = vmatmul.mubr.msk.bf16.vlgmr.msra.gmra.mrb[12].mxu0 %vm177_vm2, %v3100_v6 }
 0x172   : > { %4637 = vmatpush3.bf16.msra.mxu0 %v3155_v11  ;;  %4681 = vmatmul.mubr.msk.bf16.vlgmr.msra.gmra.mrb[12].mxu1 %vm177_vm2, %v3560_v10 }
 0x173   : > { %4685 = vmatpush3.bf16.msra.mxu1 %v3615_v13  ;;  %4638 = vmatprep.mubr.msk.bf16.mxu0 %vm5034_vm0, %v5033_v0 }
 0x174   : > { %4642 = vmatprep.subr.bf16.mxu0 %v5033_v0  ;;  %4686 = vmatprep.mubr.msk.bf16.mxu1 %vm5034_vm0, %v5033_v0 }
 0x175   : > { %4690 = vmatprep.subr.bf16.mxu1 %v5033_v0 }
 0x17d   : > { %4639 = vmatmul.mubr.msk.bf16.vlgmr.msra.gmra.mrb[12].mxu0 %vm177_vm2, %v4151_v17 }
 0x17e   : > { %4643 = vmatpush3.bf16.msra.mxu0 %v3217_v19  ;;  %4687 = vmatmul.mubr.msk.bf16.vlgmr.msra.gmra.mrb[12].mxu1 %vm177_vm2, %v4174_v20 }
 0x17f   : > { %4691 = vmatpush3.bf16.msra.mxu1 %v3677_v22  ;;  %4644 = vmatprep.mubr.msk.bf16.mxu0 %vm5034_vm0, %v5033_v0 }
 0x180   : > { %4648 = vmatprep.subr.bf16.mxu0 %v5033_v0  ;;  %4692 = vmatprep.mubr.msk.bf16.mxu1 %vm5034_vm0, %v5033_v0 }
 0x181   : > { %4696 = vmatprep.subr.bf16.mxu1 %v5033_v0 }
 0x189   : > { %4645 = vmatmul.mubr.msk.bf16.vlgmr.msra.gmra.mrb[12].mxu0 %vm177_vm2, %v3212_v31 }
 0x18a   : > { %4649 = vmatpush3.bf16.msra.mxu0 %v3267_v34  ;;  %4693 = vmatmul.mubr.msk.bf16.vlgmr.msra.gmra.mrb[12].mxu1 %vm177_vm2, %v3672_v33 }
 0x18b   : > { %4697 = vmatpush3.bf16.msra.mxu1 %v3727_v35  ;;  %4650 = vmatprep.mubr.msk.bf16.mxu0 %vm5034_vm0, %v5033_v0 }
 0x18c   : > { %4654 = vmatprep.subr.bf16.mxu0 %v5033_v0  ;;  %4698 = vmatprep.mubr.msk.bf16.mxu1 %vm5034_vm0, %v5033_v0 }
 0x18d   : > { %4702 = vmatprep.subr.bf16.mxu1 %v5033_v0 }
 0x195   : > { %4651 = vmatmul.mubr.msk.bf16.vlgmr.msra.gmra.mrb[12].mxu0 %vm177_vm2, %v4157_v39 }
 0x196   : > { %4655 = vmatpush3.bf16.msra.mxu0 %v3329_v41  ;;  %4699 = vmatmul.mubr.msk.bf16.vlgmr.msra.gmra.mrb[12].mxu1 %vm177_vm2, %v4180_v42 }
 0x197   : > { %4703 = vmatpush3.bf16.msra.mxu1 %v3789_v43  ;;  %4656 = vmatprep.mubr.msk.bf16.mxu0 %vm5034_vm0, %v5033_v0 }
 0x198   : > { %4704 = vmatprep.mubr.msk.bf16.mxu1 %vm5034_vm0, %v5033_v0 }
 0x1a1   : > { %4657 = vmatmul.mubr.msk.bf16.vlgmr.msra.gmra.mrb[12].mxu0 %vm177_vm2, %v3324_v50 }
 0x1a2   : > { %4705 = vmatmul.mubr.msk.bf16.vlgmr.msra.gmra.mrb[12].mxu1 %vm177_vm2, %v3784_v51 }
 0x1bc   : > { %v5505_v52 = vpop.f32.mrb[4].mxu0 }
 0x1bd   : > { %v1534_v53 = vrot.slane %v5505_v52, 4  ;;  %v1541_v54 = vmul.f32 %v5505_v52, %v5505_v52  ;;  %v5510_v55 = vpop.f32.mrb[4].mxu1  ;;  %v4466_v0 = vpop.f32.mrb[5].mxu0 }
 0x1be   : > { %v1994_v56 = vrot.slane %v5510_v55, 4  ;;  %v2001_v57 = vmul.f32 %v5510_v55, %v5510_v55  ;;  %v4514_v58 = vpop.f32.mrb[5].mxu1  ;;  %v1528_v59 = vpop.f32.mrb[6].mxu0 }
 0x1bf   : > { %v1535_v60 = vadd.f32 %v1534_v53, %v5505_v52  ;;  %v1542_v61 = vrot.slane %v1541_v54, 4  ;;  %v1988_v62 = vpop.f32.mrb[6].mxu1  ;;  %v4467_v63 = vpop.f32.mrb[7].mxu0 }
 0x1c0   : > { %v1995_v1 = vadd.f32 %v1994_v56, %v5510_v55  ;;  %v2002_v2 = vrot.slane %v2001_v57, 4  ;;  %v4515_v3 = vpop.f32.mrb[7].mxu1 }
 0x1c1   : > { %v1536_v4 = vrot.slane %v1535_v60, 2  ;;  %v1543_v5 = vadd.f32 %v1542_v61, %v1541_v54 }
 0x1c2   : > { %v1996_v6 = vrot.slane %v1995_v1, 2  ;;  %v2003_v7 = vadd.f32 %v2002_v2, %v2001_v57 }
 0x1c3   : > { %v1537_v9 = vadd.f32 %v1536_v4, %v1535_v60  ;;  %v1544_v10 = vrot.slane %v1543_v5, 2 }
 0x1c4   : > { %v1997_v11 = vadd.f32 %v1996_v6, %v1995_v1  ;;  %v2004_v13 = vrot.slane %v2003_v7, 2 }
 0x1c5   : > { %v1538_v14 = vrot.slane %v1537_v9, 1  ;;  %v1545_v15 = vadd.f32 %v1544_v10, %v1543_v5 }
 0x1c6   : > { %v1998_v16 = vrot.slane %v1997_v11, 1  ;;  %v2005_v17 = vadd.f32 %v2004_v13, %v2003_v7 }
 0x1c7   : > { %v1539_v18 = vadd.f32 %v1538_v14, %v1537_v9  ;;  %v1546_v19 = vrot.slane %v1545_v15, 1 }
 0x1c8   : > { %v2006_v20 = vrot.slane %v2005_v17, 1  ;;  %v1999_v24 = vadd.f32 %v1998_v16, %v1997_v11 }
 0x1c9   : > { %v1540_v22 = vadd.f32 %v1539_v18, %v5453_v8  ;;  %v1547_v23 = vadd.f32 %v1546_v19, %v1545_v15 }
 0x1ca   : > { %v2007_v28 = vadd.f32 %v2006_v20, %v2005_v17 }
 0x1cb   : > { %v1548_v25 = vadd.f32 %v1547_v23, %v5456_v12  ;;  %v2000_v26 = vadd.f32 %v1999_v24, %v1540_v22 }
 0x1cd   : > { %v2008_v29 = vadd.f32 %v2007_v28, %v1548_v25 }
 0x218   : > { %v5519_v30 = vpop.f32.mrb[8].mxu0 }
 0x219   : > { %v2454_v31 = vrot.slane %v5519_v30, 4  ;;  %v2461_v32 = vmul.f32 %v5519_v30, %v5519_v30  ;;  %v5524_v33 = vpop.f32.mrb[8].mxu1  ;;  %v4562_v34 = vpop.f32.mrb[9].mxu0 }
 0x21a   : > { %v2914_v35 = vrot.slane %v5524_v33, 4  ;;  %v2921_v8 = vmul.f32 %v5524_v33, %v5524_v33  ;;  %v4610_v36 = vpop.f32.mrb[9].mxu1  ;;  %v2448_v12 = vpop.f32.mrb[10].mxu0 }
 0x21b   : > { %v2455_v37 = vadd.f32 %v2454_v31, %v5519_v30  ;;  %v2462_v38 = vrot.slane %v2461_v32, 4  ;;  %v2908_v39 = vpop.f32.mrb[10].mxu1  ;;  %v4563_v40 = vpop.f32.mrb[11].mxu0 }
 0x21c   : > { %v2915_v41 = vadd.f32 %v2914_v35, %v5524_v33  ;;  %v2922_v42 = vrot.slane %v2921_v8, 4  ;;  %v4611_v43 = vpop.f32.mrb[11].mxu1 }
 0x21d   : > { %v2456_v44 = vrot.slane %v2455_v37, 2  ;;  %v2463_v45 = vadd.f32 %v2462_v38, %v2461_v32 }
 0x21e   : > { %v2916_v46 = vrot.slane %v2915_v41, 2  ;;  %v2923_v47 = vadd.f32 %v2922_v42, %v2921_v8 }
 0x21f   : > { %v2457_v48 = vadd.f32 %v2456_v44, %v2455_v37  ;;  %v2464_v49 = vrot.slane %v2463_v45, 2 }
 0x220   : > { %v2917_v50 = vadd.f32 %v2916_v46, %v2915_v41  ;;  %v2924_v51 = vrot.slane %v2923_v47, 2 }
 0x221   : > { %v2458_v53 = vrot.slane %v2457_v48, 1  ;;  %v2465_v54 = vadd.f32 %v2464_v49, %v2463_v45 }
 0x222   : > { %v2918_v0 = vrot.slane %v2917_v50, 1  ;;  %v2925_v56 = vadd.f32 %v2924_v51, %v2923_v47 }
 0x223   : > { %v2459_v57 = vadd.f32 %v2458_v53, %v2457_v48  ;;  %v2466_v58 = vrot.slane %v2465_v54, 1 }
 0x224   : > { %v2926_v59 = vrot.slane %v2925_v56, 1  ;;  %v2919_v62 = vadd.f32 %v2918_v0, %v2917_v50 }
 0x225   : > { %v2460_v60 = vadd.f32 %v2459_v57, %v2000_v26  ;;  %v2467_v61 = vadd.f32 %v2466_v58, %v2465_v54 }
 0x226   : > { %v2927_v2 = vadd.f32 %v2926_v59, %v2925_v56 }
 0x227   : > { %v2468_v63 = vadd.f32 %v2467_v61, %v2008_v29  ;;  %v2920_v1 = vadd.f32 %v2919_v62, %v2460_v60 }
 0x229   : > { %v2928_v3 = vadd.f32 %v2927_v2, %v2468_v63 }
 0x274   : > { %v3365_v4 = vpop.f32.mrb[12].mxu0 }
 0x275   : > { %v3374_v5 = vrot.slane %v3365_v4, 4  ;;  %v3381_v6 = vmul.f32 %v3365_v4, %v3365_v4  ;;  %v3825_v7 = vpop.f32.mrb[12].mxu1  ;;  %v4658_v9 = vpop.f32.mrb[13].mxu0 }
 0x276   : > { %v3834_v10 = vrot.slane %v3825_v7, 4  ;;  %v3841_v11 = vmul.f32 %v3825_v7, %v3825_v7  ;;  %v4706_v13 = vpop.f32.mrb[13].mxu1  ;;  %v3368_v14 = vpop.f32.mrb[14].mxu0 }
 0x277   : > { %v3375_v15 = vadd.f32 %v3374_v5, %v3365_v4  ;;  %v3382_v16 = vrot.slane %v3381_v6, 4  ;;  %v3828_v17 = vpop.f32.mrb[14].mxu1  ;;  %v4659_v18 = vpop.f32.mrb[15].mxu0 }
 0x278   : > { %v3835_v19 = vadd.f32 %v3834_v10, %v3825_v7  ;;  %v3842_v20 = vrot.slane %v3841_v11, 4  ;;  %v4707_v22 = vpop.f32.mrb[15].mxu1 }
 0x279   : > { %v3376_v23 = vrot.slane %v3375_v15, 2  ;;  %v3383_v24 = vadd.f32 %v3382_v16, %v3381_v6 }
 0x27a   : > { %v3836_v25 = vrot.slane %v3835_v19, 2  ;;  %v3843_v26 = vadd.f32 %v3842_v20, %v3841_v11 }
 0x27b   : > { %v3377_v28 = vadd.f32 %v3376_v23, %v3375_v15  ;;  %v3384_v29 = vrot.slane %v3383_v24, 2 }
 0x27c   : > { %v3837_v31 = vadd.f32 %v3836_v25, %v3835_v19  ;;  %v3844_v32 = vrot.slane %v3843_v26, 2 }
 0x27d   : > { %v3378_v34 = vrot.slane %v3377_v28, 1  ;;  %v3385_v35 = vadd.f32 %v3384_v29, %v3383_v24 }
 0x27e   : > { %v3838_v8 = vrot.slane %v3837_v31, 1  ;;  %v3845_v36 = vadd.f32 %v3844_v32, %v3843_v26 }
 0x27f   : > { %v3379_v12 = vadd.f32 %v3378_v34, %v3377_v28  ;;  %v3386_v37 = vrot.slane %v3385_v35, 1 }
 0x280   : > { %v3846_v38 = vrot.slane %v3845_v36, 1  ;;  %v3839_v41 = vadd.f32 %v3838_v8, %v3837_v31 }
 0x281   : > { %v3380_v39 = vadd.f32 %v3379_v12, %v2920_v1  ;;  %v3387_v40 = vadd.f32 %v3386_v37, %v3385_v35 }
 0x282   : > { %v3847_v44 = vadd.f32 %v3846_v38, %v3845_v36 }
 0x283   : > { %v3388_v42 = vadd.f32 %v3387_v40, %v2928_v3  ;;  %v3840_v43 = vadd.f32 %v3839_v41, %v3380_v39 }
 0x285   : > { %v3848_v45 = vadd.f32 %v3847_v44, %v3388_v42  ;;  %v3849_v46 = vmul.f32 0.015625, %v3840_v43 }
 0x287   : > { %v3850_v47 = vmul.f32 0.015625, %v3848_v45  ;;  %v3851_v48 = vmul.f32 %v3849_v46, %v3849_v46  ;;  %v3857_v49 = vsub.f32 %v5427_v21, %v3849_v46  ;;  %v3865_v50 = vsub.f32 %v5434_v27, %v3849_v46 }
 0x288   : > { %v3874_v51 = vsub.f32 %v5505_v52, %v3849_v46  ;;  %v3883_v53 = vsub.f32 %v5510_v55, %v3849_v46  ;;  %v3892_v54 = vsub.f32 %v5519_v30, %v3849_v46  ;;  %v3901_v0 = vsub.f32 %v5524_v33, %v3849_v46 }
 0x289   : > { %v3852_v56 = vsub.f32 %v3850_v47, %v3851_v48  ;;  %v3910_v57 = vsub.f32 %v3365_v4, %v3849_v46  ;;  %v3919_v58 = vsub.f32 %v3825_v7, %v3849_v46 }
 0x28b   : > { %v3853_v59 = vmax.f32 %v3852_v56, 0.0 }
 0x28d   : > { %v3854_v60 = vadd.f32 1e-05, %v3853_v59 }
 0x28f   : > { %4988 = vrsqrt.f32 %v3854_v60 }
 0x299   : > { %v4989_v61 = vpop.eup %4988 }
 0x29a   : > { %v3858_v62 = vmul.f32 %v4989_v61, %v3857_v49  ;;  %v3866_v21 = vmul.f32 %v4989_v61, %v3865_v50  ;;  %v3875_v63 = vmul.f32 %v4989_v61, %v3874_v51  ;;  %v3884_v27 = vmul.f32 %v4989_v61, %v3883_v53 }
 0x29b   : > { %v3893_v1 = vmul.f32 %v4989_v61, %v3892_v54  ;;  %v3902_v52 = vmul.f32 %v4989_v61, %v3901_v0  ;;  %v3911_v2 = vmul.f32 %v4989_v61, %v3910_v57  ;;  %v3920_v55 = vmul.f32 %v4989_v61, %v3919_v58 }
 0x29c   : > { %vm3859_vm3 = vcmp.ge.f32.partialorder %v3858_v62, 0.0  ;;  %v3860_v30 = vmul.f32 0.2, %v3858_v62  ;;  %vm3867_vm4 = vcmp.ge.f32.partialorder %v3866_v21, 0.0  ;;  %v3868_v33 = vmul.f32 0.2, %v3866_v21 }
 0x29d   : > { %vm3876_vm5 = vcmp.ge.f32.partialorder %v3875_v63, 0.0  ;;  %v3877_v3 = vmul.f32 0.2, %v3875_v63  ;;  %vm3885_vm6 = vcmp.ge.f32.partialorder %v3884_v27, 0.0  ;;  %v3886_v4 = vmul.f32 0.2, %v3884_v27 }
 0x29e   : > { %v3861_v5 = vsel %vm3859_vm3, %v3858_v62, %v3860_v30  ;;  %v3869_v6 = vsel %vm3867_vm4, %v3866_v21, %v3868_v33  ;;  %vm3894_vm7 = vcmp.ge.f32.partialorder %v3893_v1, 0.0  ;;  %v3895_v7 = vmul.f32 0.2, %v3893_v1 }
 0x29f   : > { %v3862_v9 = vpack.c.bf16 %v3861_v5, %v3861_v5  ;;  %v3870_v10 = vpack.c.bf16 %v3869_v6, %v3869_v6  ;;  %v3878_v11 = vsel %vm3876_vm5, %v3875_v63, %v3877_v3  ;;  %v3887_v13 = vsel %vm3885_vm6, %v3884_v27, %v3886_v4 }
 0x2a0   : > { %v3879_v14 = vpack.c.bf16 %v3878_v11, %v3878_v11  ;;  %v3888_v15 = vpack.c.bf16 %v3887_v13, %v3887_v13  ;;  %v3896_v16 = vsel %vm3894_vm7, %v3893_v1, %v3895_v7  ;;  %vm3903_vm8 = vcmp.ge.f32.partialorder %v3902_v52, 0.0 }
 0x2a1   : > { %3863 = vst [vmem:[%s5541_s6] sm:$0xf] %v3862_v9  ;;  %4186 = vst [vmem:[%s5541_s6 + $0x4] sm:$0xf] %v3870_v10  ;;  %v3897_v17 = vpack.c.bf16 %v3896_v16, %v3896_v16  ;;  %v3904_v18 = vmul.f32 0.2, %v3902_v52  ;;  %vm3912_vm9 = vcmp.ge.f32.partialorder %v3911_v2, 0.0 }
 0x2a2   : > { %v3913_v19 = vmul.f32 0.2, %v3911_v2  ;;  %4187 = vst [vmem:[%s5541_s6 + $0x8] sm:$0xf] %v3879_v14  ;;  %4188 = vst [vmem:[%s5541_s6 + $0xc] sm:$0xf] %v3888_v15 }
 0x2a3   : > { %vm3921_vm10 = vcmp.ge.f32.partialorder %v3920_v55, 0.0  ;;  %v3922_v20 = vmul.f32 0.2, %v3920_v55  ;;  %4189 = vst [vmem:[%s5541_s6 + $0x10] sm:$0xf] %v3897_v17  ;;  %v3905_v22 = vsel %vm3903_vm8, %v3902_v52, %v3904_v18 }
 0x2a4   : > { %v3914_v23 = vsel %vm3912_vm9, %v3911_v2, %v3913_v19  ;;  %v3906_v24 = vpack.c.bf16 %v3905_v22, %v3905_v22 }
 0x2a5   : > { %v3915_v25 = vpack.c.bf16 %v3914_v23, %v3914_v23  ;;  %v3923_v26 = vsel %vm3921_vm10, %v3920_v55, %v3922_v20 }
 0x2a6   : > { %v3924_v28 = vpack.c.bf16 %v3923_v26, %v3923_v26  ;;  %4190 = vst [vmem:[%s5541_s6 + $0x14] sm:$0xf] %v3906_v24 }
 0x2a7   : > { %4191 = vst [vmem:[%s5541_s6 + $0x18] sm:$0xf] %v3915_v25 }
 0x2a8   : > { %4192 = vst [vmem:[%s5541_s6 + $0x1c] sm:$0xf] %v3924_v28 }
 0x2a9 PF: > { %s13_s9 = sadd.s32 1, %s5028_s9  }
 0x2aa   : > { %p10_p3 = scmp.ge.s32.totalorder %s13_s9, 4  }
 0x2ac   :  { %12 = sbr.rel (!%p10_p3) target bundleno = 1 (0x1), region = 101 }
 0x2b3   :  { %3948 = vsyncpa [#allocation4], 1 }
 0x2b4   :  { %3950 = vsyncpa [#allocation4 + $0x1], 1 }

// kernel: a_call__.5
= control target key start
LH: loop header
LB: loop body
LE: loop exit
PB: predicated region body
PF: predicated region fallthrough
CT: control target
= control target key end

     0   :  { %s6528_s12 = smov 0   ;;  %s7834_s0 = inlined_call_operand.vmem [shape: bf16[2,6,6,128], index: 0, kind: input, shape index: {}]   ;;  %s7835_s1 = inlined_call_operand.vmem [shape: bf16[9,128,128], index: 1, kind: input, shape index: {}]   ;;  %s7836_s2 = inlined_call_operand.vmem [shape: f32[1,128], index: 2, kind: input, shape index: {}]   ;;  %s7837_s3 = inlined_call_operand.vmem [shape: f32[2,4,4,128], index: 3, kind: output, shape index: {}]  }
   0x1 LB: > { %s4258_s13 = sadd.s32 4294967295, %s6504_s12   ;;  %p4262_p0 = scmp.ge.s32.totalorder %s6504_s12, 1  ;;  %s6504_s12 = sphi %s6528_s12, %s13_s12  }
   0x2   : > { %p137_p1 = scmp.lt.s32.totalorder %s6504_s12, 3 }
   0x4   : > { %p138_p2 = pnand %p4262_p0, %p137_p1 }
   0x5   : > { %v6185_v0 = vld [vmem:[%s7835_s1 + $0x40] sm:$0xff] (!%p138_p2)   ;;  %v6506_v1 = vmov (!%p138_p2), 0.0   ;;  %v6187_v3 = vld [vmem:[%s7835_s1 + $0x48] sm:$0xff] (!%p138_p2)   ;;  %vm6507_vm0 = vmmov (!%p138_p2), 0   ;;  %p161_p3 = scmp.lt.s32.totalorder (!%p138_p2), %s4258_s13, 1  ;;  %v6189_v5 = vld [vmem:[%s7835_s1 + $0x50] sm:$0xff] (!%p138_p2)  }
   0x6   : > { %141 = sbr.rel (%p138_p2) target bundleno = 801 (0x321), region = 32  ;;  %5454 = vmatprep.subr.bf16.mxu0 (!%p138_p2), %v6506_v1  ;;  %5474 = vmatprep.subr.bf16.mxu1 (!%p138_p2), %v6506_v1  ;;  %v6186_v2 = vld [vmem:[%s7835_s1] sm:$0xff] (!%p138_p2)   ;;  %v6188_v4 = vld [vmem:[%s7835_s1 + $0x8] sm:$0xff] (!%p138_p2)   ;;  %v6190_v6 = vld [vmem:[%s7835_s1 + $0x10] sm:$0xff] (!%p138_p2)  }
   0x7   : > { %5455 = vmatpush3.bf16.msra.mxu0 (!%p138_p2), %v6185_v0  ;;  %5470 = vmatprep.mubr.msk.bf16.mxu0 (!%p138_p2), %vm6507_vm0, %v6506_v1  ;;  %v6191_v7 = vld [vmem:[%s7835_s1 + $0x58] sm:$0xff] (!%p138_p2)   ;;  %v6193_v9 = vld [vmem:[%s7835_s1 + $0x60] sm:$0xff] (!%p138_p2)   ;;  %v6195_v12 = vld [vmem:[%s7835_s1 + $0x68] sm:$0xff] (!%p138_p2)  }
   0x8   : > { %5475 = vmatpush3.bf16.msra.mxu1 (!%p138_p2), %v6186_v2  ;;  %5456 = vmatprep.subr.bf16.mxu0 (!%p138_p2), %v6506_v1  ;;  %v6192_v8 = vld [vmem:[%s7835_s1 + $0x18] sm:$0xff] (!%p138_p2)   ;;  %v6194_v10 = vld [vmem:[%s7835_s1 + $0x20] sm:$0xff] (!%p138_p2)   ;;  %v6196_v13 = vld [vmem:[%s7835_s1 + $0x28] sm:$0xff] (!%p138_p2)  }
   0x9   : > { %5476 = vmatprep.subr.bf16.mxu1 (!%p138_p2), %v6506_v1  ;;  %5490 = vmatprep.mubr.msk.bf16.mxu1 (!%p138_p2), %vm6507_vm0, %v6506_v1  ;;  %v6197_v15 = vld [vmem:[%s7835_s1 + $0x70] sm:$0xff] (!%p138_p2)   ;;  %v6199_v19 = vld [vmem:[%s7835_s1 + $0x78] sm:$0xff] (!%p138_p2)   ;;  %v6202_v22 = vld [vmem:[%s7835_s1 + $0x80] sm:$0xff] (!%p138_p2)  }
   0xa   : > { %v6198_v16 = vld [vmem:[%s7835_s1 + $0x30] sm:$0xff] (!%p138_p2)   ;;  %v6200_v20 = vld [vmem:[%s7835_s1 + $0x38] sm:$0xff] (!%p138_p2)   ;;  %v6203_v24 = vld [vmem:[%s7835_s1 + $0xc0] sm:$0xff] (!%p138_p2)  }
   0xb   : > { %5457 = vmatpush3.bf16.msra.mxu0 (!%p138_p2), %v6187_v3  ;;  %v6204_v25 = vld [vmem:[%s7835_s1 + $0x88] sm:$0xff] (!%p138_p2)   ;;  %v6206_v27 = vld [vmem:[%s7835_s1 + $0x90] sm:$0xff] (!%p138_p2)   ;;  %v6208_v29 = vld [vmem:[%s7835_s1 + $0x98] sm:$0xff] (!%p138_p2)  }
   0xc   : > { %5477 = vmatpush3.bf16.msra.mxu1 (!%p138_p2), %v6188_v4  ;;  %5458 = vmatprep.subr.bf16.mxu0 (!%p138_p2), %v6506_v1  ;;  %v6205_v26 = vld [vmem:[%s7835_s1 + $0xc8] sm:$0xff] (!%p138_p2)   ;;  %v6207_v28 = vld [vmem:[%s7835_s1 + $0xd0] sm:$0xff] (!%p138_p2)   ;;  %v6209_v30 = vld [vmem:[%s7835_s1 + $0xd8] sm:$0xff] (!%p138_p2)  }
   0xd   : > { %s7839_s13 = smov (!%p161_p3, %s4258_s13), 1  ;;  %5478 = vmatprep.subr.bf16.mxu1 %v6506_v1  ;;  %v6210_v31 = vld [vmem:[%s7835_s1 + $0xa0] sm:$0xff]   ;;  %v6212_v33 = vld [vmem:[%s7835_s1 + $0xa8] sm:$0xff]   ;;  %v6214_v35 = vld [vmem:[%s7835_s1 + $0xb0] sm:$0xff]  }
   0xe   : > { %s6174_s26 = smul.u32 24, %s7839_s13  ;;  %v6211_v32 = vld [vmem:[%s7835_s1 + $0xe0] sm:$0xff]   ;;  %v6213_v34 = vld [vmem:[%s7835_s1 + $0xe8] sm:$0xff]   ;;  %v6215_v36 = vld [vmem:[%s7835_s1 + $0xf0] sm:$0xff]   ;;  %s5129_s4 = sshll.u32 %s7839_s13, 4 }
   0xf   : > { %5459 = vmatpush3.bf16.msra.mxu0 %v6189_v5  ;;  %v6216_v38 = vld [vmem:[%s7835_s1 + $0xb8] sm:$0xff]   ;;  %v6219_v42 = vld [vmem:[%s7835_s1 + $0x100] sm:$0xff]   ;;  %v6221_v44 = vld [vmem:[%s7835_s1 + $0x108] sm:$0xff]   ;;  %s7378_s11 = scalar_lea.vmem %s7837_s3, %s5129_s4 }
  0x10   : > { %5479 = vmatpush3.bf16.msra.mxu1 %v6190_v6  ;;  %5460 = vmatprep.subr.bf16.mxu0 %v6506_v1  ;;  %s6578_s6 = scalar_lea.vmem %s7834_s0, %s6174_s26  ;;  %v6217_v39 = vld [vmem:[%s7835_s1 + $0xf8] sm:$0xff]   ;;  %v6220_v43 = vld [vmem:[%s7835_s1 + $0x140] sm:$0xff]   ;;  %v6222_v45 = vld [vmem:[%s7835_s1 + $0x148] sm:$0xff]  }
  0x11   : > { %5480 = vmatprep.subr.bf16.mxu1 %v6506_v1  ;;  %v6201_v11 = vld [vmem:[%s6578_s6] ss:$0 sps:$4 sm:$0x77]   ;;  %v4324_v41 = vld [vmem:[%s6578_s6 + $0x4] sm:$0x3]  ;;  %v6223_v46 = vld [vmem:[%s7835_s1 + $0x110] sm:$0xff]  }
  0x12   : > { %v214_v14 = vshll.u32 %v6201_v11, 16  ;;  %v212_v17 = vshrl.u32 %v6201_v11, 16  ;;  %v173_v23 = vld [vmem:[%s6578_s6] sm:$0x3]  ;;  %v6224_v47 = vld [vmem:[%s7835_s1 + $0x150] sm:$0xff]   ;;  %v6225_v48 = vld [vmem:[%s7835_s1 + $0x118] sm:$0xff]  }
  0x13   : > { %5461 = vmatpush3.bf16.msra.mxu0 %v6191_v7  ;;  %v6218_v37 = vld [vmem:[%s6578_s6] ss:$0 sps:$4 sm:$0x66]   ;;  %v6226_v49 = vld [vmem:[%s7835_s1 + $0x158] sm:$0xff]   ;;  %v6229_v53 = vld [vmem:[%s7835_s1 + $0x128] sm:$0xff]  }
  0x14   : > { %5481 = vmatpush3.bf16.msra.mxu1 %v6192_v8  ;;  %5462 = vmatprep.subr.bf16.mxu0 %v6506_v1  ;;  %v216_v18 = vrot.slane %v214_v14, 1  ;;  %v416_v40 = vrot.slane %v6218_v37, 1  ;;  %v6227_v50 = vld [vmem:[%s7835_s1 + $0x120] sm:$0xff]   ;;  %v6230_v54 = vld [vmem:[%s7835_s1 + $0x168] sm:$0xff]   ;;  %v6231_v56 = vld [vmem:[%s7835_s1 + $0x130] sm:$0xff]  }
  0x15   : > { %5482 = vmatprep.subr.bf16.mxu1 %v6506_v1  ;;  %v6228_v51 = vld [vmem:[%s7835_s1 + $0x160] sm:$0xff]   ;;  %v6232_v57 = vld [vmem:[%s7835_s1 + $0x170] sm:$0xff]   ;;  %v6233_v61 = vld [vmem:[%s7835_s1 + $0x138] sm:$0xff]  }
  0x16   : > { %v217_v21 = vor.u32 %v216_v18, %v212_v17  ;;  %v6235_v52 = vld [vmem:[%s6578_s6 + $0x4] ss:$0 sps:$4 sm:$0x77]   ;;  %v6234_v62 = vld [vmem:[%s7835_s1 + $0x178] sm:$0xff]   ;;  %v6239_v4 = vld [vmem:[%s7835_s1 + $0x188] sm:$0xff]  }
  0x17   : > { %5463 = vmatpush3.bf16.msra.mxu0 %v6193_v9  ;;  %v639_v55 = vshll.u32 %v6235_v52, 16  ;;  %v6236_v58 = vld [vmem:[%s6578_s6 + $0x4] ss:$0 sps:$4 sm:$0x66]   ;;  %v637_v59 = vshrl.u32 %v6235_v52, 16  ;;  %v6240_v5 = vld [vmem:[%s7835_s1 + $0x1c8] sm:$0xff]  }
  0x18   : > { %5483 = vmatpush3.bf16.msra.mxu1 %v6194_v10  ;;  %5464 = vmatprep.subr.bf16.mxu0 %v6506_v1  ;;  %v754_v0 = vrot.slane %v6236_v58, 1  ;;  %v6237_v2 = vld [vmem:[%s7835_s1 + $0x180] sm:$0xff]   ;;  %v6241_v6 = vld [vmem:[%s7835_s1 + $0x190] sm:$0xff]   ;;  %v6243_v8 = vld [vmem:[%s7835_s1 + $0x198] sm:$0xff]  }
  0x19   : > { %5484 = vmatprep.subr.bf16.mxu1 %v6506_v1  ;;  %v641_v60 = vrot.slane %v639_v55, 1  ;;  %v6238_v3 = vld [vmem:[%s7835_s1 + $0x1c0] sm:$0xff]   ;;  %v6242_v7 = vld [vmem:[%s7835_s1 + $0x1d0] sm:$0xff]   ;;  %v6244_v9 = vld [vmem:[%s7835_s1 + $0x1d8] sm:$0xff]  }
  0x1a   : > { %v6245_v10 = vld [vmem:[%s7835_s1 + $0x1a0] sm:$0xff]   ;;  %v6248_v14 = vld [vmem:[%s7835_s1 + $0x1e8] sm:$0xff]   ;;  %v6250_v17 = vld [vmem:[%s7835_s1 + $0x1f0] sm:$0xff]  }
  0x1b   : > { %5465 = vmatpush3.bf16.msra.mxu0 %v6195_v12  ;;  %v642_v63 = vor.u32 %v641_v60, %v637_v59  ;;  %v6246_v11 = vld [vmem:[%s7835_s1 + $0x1e0] sm:$0xff]   ;;  %v6253_v12 = vld [vmem:[%s6578_s6 + $0x8] ss:$0 sps:$4 sm:$0x77]   ;;  %v6251_v18 = vld [vmem:[%s7835_s1 + $0x1b8] sm:$0xff]  }
  0x1c   : > { %5485 = vmatpush3.bf16.msra.mxu1 %v6196_v13  ;;  %5466 = vmatprep.subr.bf16.mxu0 %v6506_v1  ;;  %v6247_v13 = vld [vmem:[%s7835_s1 + $0x1a8] sm:$0xff]   ;;  %v6266_v37 = vld [vmem:[%s7835_s1 + $0x230] sm:$0xff]   ;;  %v6280_v55 = vld [vmem:[%s7835_s1 + $0x20] sm:$0xff]  }
  0x1d   : > { %5486 = vmatprep.subr.bf16.mxu1 %v6506_v1  ;;  %v6277_v52 = vld [vmem:[%s7835_s1 + $0x90] sm:$0xff]   ;;  %v6283_v58 = vld [vmem:[%s7835_s1 + $0xa8] sm:$0xff]  }
  0x1e   : > { %v6284_v59 = vld [vmem:[%s7835_s1 + $0x30] sm:$0xff]  }
  0x1f   : > { %5467 = vmatpush3.bf16.msra.mxu0 %v6197_v15  ;;  %v6249_v15 = vld [vmem:[%s7835_s1 + $0x1b0] sm:$0xff]  }
  0x20   : > { %5487 = vmatpush3.bf16.msra.mxu1 %v6198_v16  ;;  %5468 = vmatprep.subr.bf16.mxu0 %v6506_v1  ;;  %v977_v16 = vshll.u32 %v6253_v12, 16  ;;  %v6285_v60 = vld [vmem:[%s7835_s1 + $0xb0] sm:$0xff]  }
  0x21   : > { %5488 = vmatprep.subr.bf16.mxu1 %v6506_v1 }
  0x23   : > { %5469 = vmatpush3.bf16.msra.mxu0 %v6199_v19  ;;  %v975_v19 = vshrl.u32 %v6253_v12, 16  ;;  %v6298_v12 = vld [vmem:[%s7835_s1 + $0x120] sm:$0xff]  }
  0x24   : > { %5489 = vmatpush3.bf16.msra.mxu1 %v6200_v20  ;;  %5494 = vmatprep.subr.bf16.mxu0 %v6506_v1  ;;  %v979_v20 = vrot.slane %v977_v16, 1  ;;  %v6301_v16 = vld [vmem:[%s7835_s1 + $0xf0] sm:$0xff]  }
  0x25   : > { %5514 = vmatprep.subr.bf16.mxu1 %v6506_v1 }
  0x26   : > { %5471 = vmatmul.mubr.bf16.vlgmr.msra.gmra.mrb[0].mxu0 %v217_v21  ;;  %v6252_v21 = vld [vmem:[%s7835_s1 + $0x1f8] sm:$0xff]  }
  0x27   : > { %5491 = vmatmul.mubr.bf16.vlgmr.msra.gmra.mrb[0].mxu1 %v173_v23  ;;  %5495 = vmatpush3.bf16.msra.mxu0 %v6202_v22  ;;  %v4401_v22 = vld [vmem:[%s6578_s6 + $0x8] sm:$0x3]  ;;  %v980_v23 = vor.u32 %v979_v20, %v975_v19  ;;  %v6303_v19 = vld [vmem:[%s7835_s1 + $0xf8] sm:$0xff]  }
  0x28   : > { %5515 = vmatpush3.bf16.msra.mxu1 %v6203_v24  ;;  %5496 = vmatprep.subr.bf16.mxu0 %v6506_v1  ;;  %v6254_v24 = vld [vmem:[%s7835_s1 + $0x200] sm:$0xff]   ;;  %v6304_v20 = vld [vmem:[%s7835_s1 + $0x138] sm:$0xff]  }
  0x29   : > { %5516 = vmatprep.subr.bf16.mxu1 %v6506_v1  ;;  %5510 = vmatprep.mubr.msk.bf16.mxu0 %vm6507_vm0, %v6506_v1 }
  0x2a   : > { %5530 = vmatprep.mubr.msk.bf16.mxu1 %vm6507_vm0, %v6506_v1 }
  0x2b   : > { %5497 = vmatpush3.bf16.msra.mxu0 %v6204_v25  ;;  %v6255_v25 = vld [vmem:[%s7835_s1 + $0x40] sm:$0xff]  }
  0x2c   : > { %5517 = vmatpush3.bf16.msra.mxu1 %v6205_v26  ;;  %5498 = vmatprep.subr.bf16.mxu0 %v6506_v1  ;;  %v6256_v26 = vld [vmem:[%s7835_s1 + $0x208] sm:$0xff]  }
  0x2d   : > { %5518 = vmatprep.subr.bf16.mxu1 %v6506_v1 }
  0x2f   : > { %5499 = vmatpush3.bf16.msra.mxu0 %v6206_v27  ;;  %v6257_v27 = vld [vmem:[%s7835_s1 + $0x48] sm:$0xff]  }
  0x30   : > { %5519 = vmatpush3.bf16.msra.mxu1 %v6207_v28  ;;  %5500 = vmatprep.subr.bf16.mxu0 %v6506_v1  ;;  %v6258_v28 = vld [vmem:[%s7835_s1 + $0x210] sm:$0xff]  }
  0x31   : > { %5520 = vmatprep.subr.bf16.mxu1 %v6506_v1 }
  0x33   : > { %5501 = vmatpush3.bf16.msra.mxu0 %v6208_v29  ;;  %v6259_v29 = vld [vmem:[%s7835_s1 + $0x50] sm:$0xff]  }
  0x34   : > { %5521 = vmatpush3.bf16.msra.mxu1 %v6209_v30  ;;  %5502 = vmatprep.subr.bf16.mxu0 %v6506_v1  ;;  %v6260_v30 = vld [vmem:[%s7835_s1 + $0x218] sm:$0xff]  }
  0x35   : > { %5522 = vmatprep.subr.bf16.mxu1 %v6506_v1 }
  0x37   : > { %5503 = vmatpush3.bf16.msra.mxu0 %v6210_v31  ;;  %v6261_v31 = vld [vmem:[%s7835_s1 + $0x58] sm:$0xff]  }
  0x38   : > { %5523 = vmatpush3.bf16.msra.mxu1 %v6211_v32  ;;  %5504 = vmatprep.subr.bf16.mxu0 %v6506_v1  ;;  %v6262_v32 = vld [vmem:[%s7835_s1 + $0x220] sm:$0xff]  }
  0x39   : > { %5524 = vmatprep.subr.bf16.mxu1 %v6506_v1 }
  0x3b   : > { %5505 = vmatpush3.bf16.msra.mxu0 %v6212_v33  ;;  %v6263_v33 = vld [vmem:[%s7835_s1 + $0x60] sm:$0xff]  }
  0x3c   : > { %5525 = vmatpush3.bf16.msra.mxu1 %v6213_v34  ;;  %5506 = vmatprep.subr.bf16.mxu0 %v6506_v1  ;;  %v6271_v34 = vld [vmem:[%s6578_s6 + $0x4] ss:$0 sps:$4 sm:$0x77]  }
  0x3d   : > { %5526 = vmatprep.subr.bf16.mxu1 %v6506_v1 }
  0x3f   : > { %5507 = vmatpush3.bf16.msra.mxu0 %v6214_v35  ;;  %v6264_v35 = vld [vmem:[%s7835_s1 + $0x228] sm:$0xff]  }
  0x40   : > { %5527 = vmatpush3.bf16.msra.mxu1 %v6215_v36  ;;  %5508 = vmatprep.subr.bf16.mxu0 %v6506_v1  ;;  %v6265_v36 = vld [vmem:[%s7835_s1 + $0x68] sm:$0xff]  }
  0x41   : > { %5528 = vmatprep.subr.bf16.mxu1 %v6506_v1 }
  0x43   : > { %5509 = vmatpush3.bf16.msra.mxu0 %v6216_v38  ;;  %v6267_v38 = vld [vmem:[%s7835_s1 + $0x70] sm:$0xff]  }
  0x44   : > { %5529 = vmatpush3.bf16.msra.mxu1 %v6217_v39  ;;  %5534 = vmatprep.subr.bf16.mxu0 %v6506_v1  ;;  %v1231_v39 = vshll.u32 %v6271_v34, 16 }
  0x45   : > { %5554 = vmatprep.subr.bf16.mxu1 %v6506_v1 }
  0x46   : > { %5511 = vmatmul.mubr.bf16.vlgmr.msra.gmra.mrb[4].mxu0 %v416_v40  ;;  %v6270_v40 = vld [vmem:[%s6578_s6 + $0x8] ss:$0 sps:$4 sm:$0x66]  }
  0x47   : > { %5531 = vmatmul.mubr.bf16.vlgmr.msra.gmra.mrb[4].mxu1 %v4324_v41  ;;  %5535 = vmatpush3.bf16.msra.mxu0 %v6219_v42  ;;  %v6268_v41 = vld [vmem:[%s7835_s1 + $0x238] sm:$0xff]  }
  0x48   : > { %5555 = vmatpush3.bf16.msra.mxu1 %v6220_v43  ;;  %5536 = vmatprep.subr.bf16.mxu0 %v6506_v1  ;;  %v6269_v42 = vld [vmem:[%s7835_s1 + $0x78] sm:$0xff]   ;;  %v1229_v43 = vshrl.u32 %v6271_v34, 16  ;;  %v6315_v34 = vld [vmem:[%s7835_s1 + $0x1a0] sm:$0xff]  }
  0x49   : > { %5556 = vmatprep.subr.bf16.mxu1 %v6506_v1  ;;  %5550 = vmatprep.mubr.msk.bf16.mxu0 %vm6507_vm0, %v6506_v1 }
  0x4a   : > { %5570 = vmatprep.mubr.msk.bf16.mxu1 %vm6507_vm0, %v6506_v1 }
  0x4b   : > { %5537 = vmatpush3.bf16.msra.mxu0 %v6221_v44  ;;  %v1233_v44 = vrot.slane %v1231_v39, 1 }
  0x4c   : > { %5557 = vmatpush3.bf16.msra.mxu1 %v6222_v45  ;;  %5538 = vmatprep.subr.bf16.mxu0 %v6506_v1  ;;  %v1092_v45 = vrot.slane %v6270_v40, 1  ;;  %v6318_v40 = vld [vmem:[%s7835_s1 + $0x170] sm:$0xff]  }
  0x4d   : > { %5558 = vmatprep.subr.bf16.mxu1 %v6506_v1 }
  0x4f   : > { %5539 = vmatpush3.bf16.msra.mxu0 %v6223_v46  ;;  %v1234_v46 = vor.u32 %v1233_v44, %v1229_v43 }
  0x50   : > { %5559 = vmatpush3.bf16.msra.mxu1 %v6224_v47  ;;  %5540 = vmatprep.subr.bf16.mxu0 %v6506_v1  ;;  %v6272_v47 = vld [vmem:[%s7835_s1] sm:$0xff]  }
  0x51   : > { %5560 = vmatprep.subr.bf16.mxu1 %v6506_v1 }
  0x53   : > { %5541 = vmatpush3.bf16.msra.mxu0 %v6225_v48  ;;  %v6273_v48 = vld [vmem:[%s7835_s1 + $0x80] sm:$0xff]  }
  0x54   : > { %5561 = vmatpush3.bf16.msra.mxu1 %v6226_v49  ;;  %5542 = vmatprep.subr.bf16.mxu0 %v6506_v1  ;;  %v6274_v49 = vld [vmem:[%s7835_s1 + $0x8] sm:$0xff]  }
  0x55   : > { %5562 = vmatprep.subr.bf16.mxu1 %v6506_v1 }
  0x57   : > { %5543 = vmatpush3.bf16.msra.mxu0 %v6227_v50  ;;  %v6275_v50 = vld [vmem:[%s7835_s1 + $0x88] sm:$0xff]  }
  0x58   : > { %5563 = vmatpush3.bf16.msra.mxu1 %v6228_v51  ;;  %5544 = vmatprep.subr.bf16.mxu0 %v6506_v1  ;;  %v6276_v51 = vld [vmem:[%s7835_s1 + $0x10] sm:$0xff]  }
  0x59   : > { %5564 = vmatprep.subr.bf16.mxu1 %v6506_v1 }
  0x5b   : > { %5545 = vmatpush3.bf16.msra.mxu0 %v6229_v53  ;;  %v6278_v53 = vld [vmem:[%s7835_s1 + $0x18] sm:$0xff]  }
  0x5c   : > { %5565 = vmatpush3.bf16.msra.mxu1 %v6230_v54  ;;  %5546 = vmatprep.subr.bf16.mxu0 %v6506_v1  ;;  %v6279_v54 = vld [vmem:[%s7835_s1 + $0x98] sm:$0xff]  }
  0x5d   : > { %5566 = vmatprep.subr.bf16.mxu1 %v6506_v1 }
  0x5f   : > { %5547 = vmatpush3.bf16.msra.mxu0 %v6231_v56  ;;  %v6281_v56 = vld [vmem:[%s7835_s1 + $0xa0] sm:$0xff]  }
  0x60   : > { %5567 = vmatpush3.bf16.msra.mxu1 %v6232_v57  ;;  %5548 = vmatprep.subr.bf16.mxu0 %v6506_v1  ;;  %v6282_v57 = vld [vmem:[%s7835_s1 + $0x28] sm:$0xff]  }
  0x61   : > { %5568 = vmatprep.subr.bf16.mxu1 %v6506_v1 }
  0x63   : > { %5549 = vmatpush3.bf16.msra.mxu0 %v6233_v61  ;;  %v6286_v61 = vld [vmem:[%s7835_s1 + $0x38] sm:$0xff]  }
  0x64   : > { %5569 = vmatpush3.bf16.msra.mxu1 %v6234_v62  ;;  %5574 = vmatprep.subr.bf16.mxu0 %v6506_v1  ;;  %v6287_v62 = vld [vmem:[%s7835_s1 + $0xb8] sm:$0xff]  }
  0x65   : > { %5594 = vmatprep.subr.bf16.mxu1 %v6506_v1 }
  0x66   : > { %5551 = vmatmul.mubr.bf16.vlgmr.msra.gmra.mrb[8].mxu0 %v642_v63  ;;  %v6288_v63 = vld [vmem:[%s6578_s6 + $0x4] ss:$0 sps:$4 sm:$0x66]  }
  0x67   : > { %5571 = vmatmul.mubr.bf16.vlgmr.msra.gmra.mrb[8].mxu1 %v754_v0  ;;  %5575 = vmatpush3.bf16.msra.mxu0 %v6237_v2  ;;  %v4479_v0 = vld [vmem:[%s6578_s6 + $0x4] sm:$0x3] }
  0x68   : > { %5595 = vmatpush3.bf16.msra.mxu1 %v6238_v3  ;;  %5576 = vmatprep.subr.bf16.mxu0 %v6506_v1  ;;  %v6289_v2 = vld [vmem:[%s7835_s1 + $0xc0] sm:$0xff]   ;;  %v1432_v3 = vrot.slane %v6288_v63, 1  ;;  %v6339_v63 = vld [vmem:[%s6578_s6 + $0xc] ss:$0 sps:$4 sm:$0x77]  }
  0x69   : > { %5596 = vmatprep.subr.bf16.mxu1 %v6506_v1  ;;  %5590 = vmatprep.mubr.msk.bf16.mxu0 %vm6507_vm0, %v6506_v1 }
  0x6a   : > { %5610 = vmatprep.mubr.msk.bf16.mxu1 %vm6507_vm0, %v6506_v1 }
  0x6b   : > { %5577 = vmatpush3.bf16.msra.mxu0 %v6239_v4  ;;  %v6290_v4 = vld [vmem:[%s7835_s1 + $0x100] sm:$0xff]  }
  0x6c   : > { %5597 = vmatpush3.bf16.msra.mxu1 %v6240_v5  ;;  %5578 = vmatprep.subr.bf16.mxu0 %v6506_v1  ;;  %v6291_v5 = vld [vmem:[%s7835_s1 + $0xc8] sm:$0xff]  }
  0x6d   : > { %5598 = vmatprep.subr.bf16.mxu1 %v6506_v1 }
  0x6f   : > { %5579 = vmatpush3.bf16.msra.mxu0 %v6241_v6  ;;  %v6292_v6 = vld [vmem:[%s7835_s1 + $0x108] sm:$0xff]  }
  0x70   : > { %5599 = vmatpush3.bf16.msra.mxu1 %v6242_v7  ;;  %5580 = vmatprep.subr.bf16.mxu0 %v6506_v1  ;;  %v6293_v7 = vld [vmem:[%s7835_s1 + $0xd0] sm:$0xff]  }
  0x71   : > { %5600 = vmatprep.subr.bf16.mxu1 %v6506_v1 }
  0x73   : > { %5581 = vmatpush3.bf16.msra.mxu0 %v6243_v8  ;;  %v6294_v8 = vld [vmem:[%s7835_s1 + $0x110] sm:$0xff]  }
  0x74   : > { %5601 = vmatpush3.bf16.msra.mxu1 %v6244_v9  ;;  %5582 = vmatprep.subr.bf16.mxu0 %v6506_v1  ;;  %v6295_v9 = vld [vmem:[%s7835_s1 + $0xd8] sm:$0xff]  }
  0x75   : > { %5602 = vmatprep.subr.bf16.mxu1 %v6506_v1 }
  0x77   : > { %5583 = vmatpush3.bf16.msra.mxu0 %v6245_v10  ;;  %v6296_v10 = vld [vmem:[%s7835_s1 + $0x118] sm:$0xff]  }
  0x78   : > { %5603 = vmatpush3.bf16.msra.mxu1 %v6246_v11  ;;  %5584 = vmatprep.subr.bf16.mxu0 %v6506_v1  ;;  %v6297_v11 = vld [vmem:[%s7835_s1 + $0xe0] sm:$0xff]  }
  0x79   : > { %5604 = vmatprep.subr.bf16.mxu1 %v6506_v1 }
  0x7b   : > { %5585 = vmatpush3.bf16.msra.mxu0 %v6247_v13  ;;  %v6305_v13 = vld [vmem:[%s6578_s6 + $0x8] ss:$0 sps:$4 sm:$0x77]  }
  0x7c   : > { %5605 = vmatpush3.bf16.msra.mxu1 %v6248_v14  ;;  %5586 = vmatprep.subr.bf16.mxu0 %v6506_v1  ;;  %v6299_v14 = vld [vmem:[%s7835_s1 + $0xe8] sm:$0xff]  }
  0x7d   : > { %5606 = vmatprep.subr.bf16.mxu1 %v6506_v1 }
  0x7f   : > { %5587 = vmatpush3.bf16.msra.mxu0 %v6249_v15  ;;  %v6300_v15 = vld [vmem:[%s7835_s1 + $0x128] sm:$0xff]  }
  0x80   : > { %5607 = vmatpush3.bf16.msra.mxu1 %v6250_v17  ;;  %5588 = vmatprep.subr.bf16.mxu0 %v6506_v1  ;;  %v6302_v17 = vld [vmem:[%s7835_s1 + $0x130] sm:$0xff]  }
  0x81   : > { %5608 = vmatprep.subr.bf16.mxu1 %v6506_v1 }
  0x83   : > { %5589 = vmatpush3.bf16.msra.mxu0 %v6251_v18  ;;  %v1652_v18 = vshll.u32 %v6305_v13, 16 }
  0x84   : > { %5609 = vmatpush3.bf16.msra.mxu1 %v6252_v21  ;;  %5614 = vmatprep.subr.bf16.mxu0 %v6506_v1  ;;  %v1650_v21 = vshrl.u32 %v6305_v13, 16 }
  0x85   : > { %5634 = vmatprep.subr.bf16.mxu1 %v6506_v1 }
  0x86   : > { %5591 = vmatmul.mubr.bf16.vlgmr.msra.gmra.mrb[12].mxu0 %v4401_v22  ;;  %v1654_v22 = vrot.slane %v1652_v18, 1 }
  0x87   : > { %5611 = vmatmul.mubr.bf16.vlgmr.msra.gmra.mrb[12].mxu1 %v980_v23  ;;  %5615 = vmatpush3.bf16.msra.mxu0 %v6254_v24  ;;  %v4540_v23 = vld [vmem:[%s6578_s6 + $0x8] sm:$0x3] }
  0x88   : > { %5635 = vmatpush3.bf16.msra.mxu1 %v6255_v25  ;;  %5616 = vmatprep.subr.bf16.mxu0 %v6506_v1  ;;  %v1655_v24 = vor.u32 %v1654_v22, %v1650_v21  ;;  %v6306_v25 = vld [vmem:[%s7835_s1 + $0x140] sm:$0xff]  }
  0x89   : > { %5636 = vmatprep.subr.bf16.mxu1 %v6506_v1  ;;  %5630 = vmatprep.mubr.msk.bf16.mxu0 %vm6507_vm0, %v6506_v1 }
  0x8a   : > { %5650 = vmatprep.mubr.msk.bf16.mxu1 %vm6507_vm0, %v6506_v1 }
  0x8b   : > { %5617 = vmatpush3.bf16.msra.mxu0 %v6256_v26  ;;  %v6307_v26 = vld [vmem:[%s7835_s1 + $0x180] sm:$0xff]  }
  0x8c   : > { %5637 = vmatpush3.bf16.msra.mxu1 %v6257_v27  ;;  %5618 = vmatprep.subr.bf16.mxu0 %v6506_v1  ;;  %v6308_v27 = vld [vmem:[%s7835_s1 + $0x148] sm:$0xff]  }
  0x8d   : > { %5638 = vmatprep.subr.bf16.mxu1 %v6506_v1 }
  0x8f   : > { %5619 = vmatpush3.bf16.msra.mxu0 %v6258_v28  ;;  %v6309_v28 = vld [vmem:[%s7835_s1 + $0x188] sm:$0xff]  }
  0x90   : > { %5639 = vmatpush3.bf16.msra.mxu1 %v6259_v29  ;;  %5620 = vmatprep.subr.bf16.mxu0 %v6506_v1  ;;  %v6310_v29 = vld [vmem:[%s7835_s1 + $0x150] sm:$0xff]  }
  0x91   : > { %5640 = vmatprep.subr.bf16.mxu1 %v6506_v1 }
  0x93   : > { %5621 = vmatpush3.bf16.msra.mxu0 %v6260_v30  ;;  %v6311_v30 = vld [vmem:[%s7835_s1 + $0x190] sm:$0xff]  }
  0x94   : > { %5641 = vmatpush3.bf16.msra.mxu1 %v6261_v31  ;;  %5622 = vmatprep.subr.bf16.mxu0 %v6506_v1  ;;  %v6312_v31 = vld [vmem:[%s7835_s1 + $0x158] sm:$0xff]  }
  0x95   : > { %5642 = vmatprep.subr.bf16.mxu1 %v6506_v1 }
  0x97   : > { %5623 = vmatpush3.bf16.msra.mxu0 %v6262_v32  ;;  %v6313_v32 = vld [vmem:[%s7835_s1 + $0x198] sm:$0xff]  }
  0x98   : > { %5643 = vmatpush3.bf16.msra.mxu1 %v6263_v33  ;;  %5624 = vmatprep.subr.bf16.mxu0 %v6506_v1  ;;  %v6314_v33 = vld [vmem:[%s7835_s1 + $0x160] sm:$0xff]  }
  0x99   : > { %5644 = vmatprep.subr.bf16.mxu1 %v6506_v1 }
  0x9b   : > { %5625 = vmatpush3.bf16.msra.mxu0 %v6264_v35  ;;  %v6316_v35 = vld [vmem:[%s7835_s1 + $0x168] sm:$0xff]  }
  0x9c   : > { %5645 = vmatpush3.bf16.msra.mxu1 %v6265_v36  ;;  %5626 = vmatprep.subr.bf16.mxu0 %v6506_v1  ;;  %v6317_v36 = vld [vmem:[%s7835_s1 + $0x1a8] sm:$0xff]  }
  0x9d   : > { %5646 = vmatprep.subr.bf16.mxu1 %v6506_v1 }
  0x9f   : > { %5627 = vmatpush3.bf16.msra.mxu0 %v6266_v37 }
  0xa0   : > { %5647 = vmatpush3.bf16.msra.mxu1 %v6267_v38  ;;  %5628 = vmatprep.subr.bf16.mxu0 %v6506_v1 }
  0xa1   : > { %5648 = vmatprep.subr.bf16.mxu1 %v6506_v1 }
  0xa3   : > { %5629 = vmatpush3.bf16.msra.mxu0 %v6268_v41  ;;  %v6319_v41 = vld [vmem:[%s7835_s1 + $0x1b0] sm:$0xff]  }
  0xa4   : > { %5649 = vmatpush3.bf16.msra.mxu1 %v6269_v42  ;;  %5654 = vmatprep.subr.bf16.mxu0 %v6506_v1 }
  0xa5   : > { %5674 = vmatprep.subr.bf16.mxu1 %v6506_v1 }
  0xa6   : > { %5631 = vmatmul.mubr.bf16.vlgmr.msra.gmra.mrb[16].mxu0 %v1092_v45 }
  0xa7   : > { %5651 = vmatmul.mubr.bf16.vlgmr.msra.gmra.mrb[16].mxu1 %v1234_v46  ;;  %5655 = vmatpush3.bf16.msra.mxu0 %v6272_v47 }
  0xa8   : > { %5675 = vmatpush3.bf16.msra.mxu1 %v6273_v48  ;;  %5656 = vmatprep.subr.bf16.mxu0 %v6506_v1  ;;  %v6322_v48 = vld [vmem:[%s6578_s6 + $0x8] ss:$0 sps:$4 sm:$0x66]  }
  0xa9   : > { %5676 = vmatprep.subr.bf16.mxu1 %v6506_v1  ;;  %5670 = vmatprep.mubr.msk.bf16.mxu0 %vm6507_vm0, %v6506_v1 }
  0xaa   : > { %5690 = vmatprep.mubr.msk.bf16.mxu1 %vm6507_vm0, %v6506_v1 }
  0xab   : > { %5657 = vmatpush3.bf16.msra.mxu0 %v6274_v49  ;;  %v6320_v49 = vld [vmem:[%s7835_s1 + $0x178] sm:$0xff]  }
  0xac   : > { %5677 = vmatpush3.bf16.msra.mxu1 %v6275_v50  ;;  %5658 = vmatprep.subr.bf16.mxu0 %v6506_v1  ;;  %v6321_v50 = vld [vmem:[%s7835_s1 + $0x1b8] sm:$0xff]  }
  0xad   : > { %5678 = vmatprep.subr.bf16.mxu1 %v6506_v1 }
  0xaf   : > { %5659 = vmatpush3.bf16.msra.mxu0 %v6276_v51  ;;  %v1766_v51 = vrot.slane %v6322_v48, 1 }
  0xb0   : > { %5679 = vmatpush3.bf16.msra.mxu1 %v6277_v52  ;;  %5660 = vmatprep.subr.bf16.mxu0 %v6506_v1  ;;  %v4617_v52 = vld [vmem:[%s6578_s6 + $0xc] sm:$0x3] }
  0xb1   : > { %5680 = vmatprep.subr.bf16.mxu1 %v6506_v1 }
  0xb3   : > { %5661 = vmatpush3.bf16.msra.mxu0 %v6278_v53  ;;  %v6323_v53 = vld [vmem:[%s7835_s1 + $0x1c0] sm:$0xff]  }
  0xb4   : > { %5681 = vmatpush3.bf16.msra.mxu1 %v6279_v54  ;;  %5662 = vmatprep.subr.bf16.mxu0 %v6506_v1  ;;  %v6324_v54 = vld [vmem:[%s7835_s1 + $0x200] sm:$0xff]  }
  0xb5   : > { %5682 = vmatprep.subr.bf16.mxu1 %v6506_v1 }
  0xb7   : > { %5663 = vmatpush3.bf16.msra.mxu0 %v6280_v55  ;;  %v6325_v55 = vld [vmem:[%s7835_s1 + $0x1c8] sm:$0xff]  }
  0xb8   : > { %5683 = vmatpush3.bf16.msra.mxu1 %v6281_v56  ;;  %5664 = vmatprep.subr.bf16.mxu0 %v6506_v1  ;;  %v6326_v56 = vld [vmem:[%s7835_s1 + $0x208] sm:$0xff]  }
  0xb9   : > { %5684 = vmatprep.subr.bf16.mxu1 %v6506_v1 }
  0xbb   : > { %5665 = vmatpush3.bf16.msra.mxu0 %v6282_v57  ;;  %v6327_v57 = vld [vmem:[%s7835_s1 + $0x1d0] sm:$0xff]  }
  0xbc   : > { %5685 = vmatpush3.bf16.msra.mxu1 %v6283_v58  ;;  %5666 = vmatprep.subr.bf16.mxu0 %v6506_v1  ;;  %v6328_v58 = vld [vmem:[%s7835_s1 + $0x210] sm:$0xff]  }
  0xbd   : > { %5686 = vmatprep.subr.bf16.mxu1 %v6506_v1 }
  0xbf   : > { %5667 = vmatpush3.bf16.msra.mxu0 %v6284_v59  ;;  %v6329_v59 = vld [vmem:[%s7835_s1 + $0x1d8] sm:$0xff]  }
  0xc0   : > { %5687 = vmatpush3.bf16.msra.mxu1 %v6285_v60  ;;  %5668 = vmatprep.subr.bf16.mxu0 %v6506_v1  ;;  %v6330_v60 = vld [vmem:[%s7835_s1 + $0x218] sm:$0xff]  }
  0xc1   : > { %5688 = vmatprep.subr.bf16.mxu1 %v6506_v1 }
  0xc3   : > { %5669 = vmatpush3.bf16.msra.mxu0 %v6286_v61  ;;  %v6331_v61 = vld [vmem:[%s7835_s1 + $0x1e0] sm:$0xff]  }
  0xc4   : > { %5689 = vmatpush3.bf16.msra.mxu1 %v6287_v62  ;;  %5694 = vmatprep.subr.bf16.mxu0 %v6506_v1  ;;  %v6332_v62 = vld [vmem:[%s7835_s1 + $0x220] sm:$0xff]  }
  0xc5   : > { %5714 = vmatprep.subr.bf16.mxu1 %v6506_v1 }
  0xc6   : > { %5671 = vmatmul.mubr.bf16.vlgmr.msra.gmra.mrb[20].mxu0 %v4479_v0  ;;  %v6333_v0 = vld [vmem:[%s7835_s1 + $0x1e8] sm:$0xff]  }
  0xc7   : > { %5691 = vmatmul.mubr.bf16.vlgmr.msra.gmra.mrb[20].mxu1 %v1432_v3  ;;  %5695 = vmatpush3.bf16.msra.mxu0 %v6289_v2  ;;  %v6334_v2 = vld [vmem:[%s7835_s1 + $0x228] sm:$0xff]  }
  0xc8   : > { %5715 = vmatpush3.bf16.msra.mxu1 %v6290_v4  ;;  %5696 = vmatprep.subr.bf16.mxu0 %v6506_v1  ;;  %v6335_v4 = vld [vmem:[%s7835_s1 + $0x1f0] sm:$0xff]  }
  0xc9   : > { %5716 = vmatprep.subr.bf16.mxu1 %v6506_v1  ;;  %5710 = vmatprep.mubr.msk.bf16.mxu0 %vm6507_vm0, %v6506_v1 }
  0xca   : > { %5730 = vmatprep.mubr.msk.bf16.mxu1 %vm6507_vm0, %v6506_v1 }
  0xcb   : > { %5697 = vmatpush3.bf16.msra.mxu0 %v6291_v5 }
  0xcc   : > { %5717 = vmatpush3.bf16.msra.mxu1 %v6292_v6  ;;  %5698 = vmatprep.subr.bf16.mxu0 %v6506_v1 }
  0xcd   : > { %5718 = vmatprep.subr.bf16.mxu1 %v6506_v1 }
  0xcf   : > { %5699 = vmatpush3.bf16.msra.mxu0 %v6293_v7 }
  0xd0   : > { %5719 = vmatpush3.bf16.msra.mxu1 %v6294_v8  ;;  %5700 = vmatprep.subr.bf16.mxu0 %v6506_v1  ;;  %v6336_v8 = vld [vmem:[%s7835_s1 + $0x230] sm:$0xff]  }
  0xd1   : > { %5720 = vmatprep.subr.bf16.mxu1 %v6506_v1 }
  0xd3   : > { %5701 = vmatpush3.bf16.msra.mxu0 %v6295_v9  ;;  %v1987_v9 = vshll.u32 %v6339_v63, 16 }
  0xd4   : > { %5721 = vmatpush3.bf16.msra.mxu1 %v6296_v10  ;;  %5702 = vmatprep.subr.bf16.mxu0 %v6506_v1 }
  0xd5   : > { %5722 = vmatprep.subr.bf16.mxu1 %v6506_v1  ;;  %v1989_v18 = vrot.slane %v1987_v9, 1 }
  0xd7   : > { %5703 = vmatpush3.bf16.msra.mxu0 %v6297_v11 }
  0xd8   : > { %5723 = vmatpush3.bf16.msra.mxu1 %v6298_v12  ;;  %5704 = vmatprep.subr.bf16.mxu0 %v6506_v1 }
  0xd9   : > { %5724 = vmatprep.subr.bf16.mxu1 %v6506_v1 }
  0xdb   : > { %5705 = vmatpush3.bf16.msra.mxu0 %v6299_v14 }
  0xdc   : > { %5725 = vmatpush3.bf16.msra.mxu1 %v6300_v15  ;;  %5706 = vmatprep.subr.bf16.mxu0 %v6506_v1 }
  0xdd   : > { %5726 = vmatprep.subr.bf16.mxu1 %v6506_v1 }
  0xdf   : > { %5707 = vmatpush3.bf16.msra.mxu0 %v6301_v16  ;;  %v6337_v16 = vld [vmem:[%s7835_s1 + $0x1f8] sm:$0xff]  }
  0xe0   : > { %5727 = vmatpush3.bf16.msra.mxu1 %v6302_v17  ;;  %5708 = vmatprep.subr.bf16.mxu0 %v6506_v1  ;;  %v1985_v17 = vshrl.u32 %v6339_v63, 16  ;;  %v6366_v63 = vld [vmem:[%s7835_s1 + $0xa0] sm:$0xff]  }
  0xe1   : > { %5728 = vmatprep.subr.bf16.mxu1 %v6506_v1 }
  0xe2   : > { %v1990_v21 = vor.u32 %v1989_v18, %v1985_v17  ;;  %v6372_v17 = vld [vmem:[%s7835_s1 + $0xb8] sm:$0xff]  }
  0xe3   : > { %5709 = vmatpush3.bf16.msra.mxu0 %v6303_v19  ;;  %v6338_v19 = vld [vmem:[%s7835_s1 + $0x238] sm:$0xff]  }
  0xe4   : > { %5729 = vmatpush3.bf16.msra.mxu1 %v6304_v20  ;;  %5734 = vmatprep.subr.bf16.mxu0 %v6506_v1  ;;  %v6340_v20 = vld [vmem:[%s6578_s6 + $0xc] ss:$0 sps:$4 sm:$0x66]   ;;  %v6373_v18 = vld [vmem:[%s7835_s1 + $0xf8] sm:$0xff]  }
  0xe5   : > { %5754 = vmatprep.subr.bf16.mxu1 %v6506_v1  ;;  %v2101_v22 = vrot.slane %v6340_v20, 1  ;;  %v6375_v20 = vld [vmem:[%s7835_s1 + $0x100] sm:$0xff]  }
  0xe6   : > { %5711 = vmatmul.mubr.bf16.vlgmr.msra.gmra.mrb[24].mxu0 %v4540_v23  ;;  %v6341_v23 = vld [vmem:[%s7835_s1 + $0x40] sm:$0xff]  }
  0xe7   : > { %5731 = vmatmul.mubr.bf16.vlgmr.msra.gmra.mrb[24].mxu1 %v1655_v24  ;;  %5735 = vmatpush3.bf16.msra.mxu0 %v6306_v25  ;;  %v6342_v24 = vld [vmem:[%s7835_s1] sm:$0xff]   ;;  %v6343_v25 = vld [vmem:[%s7835_s1 + $0x48] sm:$0xff]  }
  0xe8   : > { %5755 = vmatpush3.bf16.msra.mxu1 %v6307_v26  ;;  %5736 = vmatprep.subr.bf16.mxu0 %v6506_v1  ;;  %v6344_v26 = vld [vmem:[%s7835_s1 + $0x8] sm:$0xff]  }
  0xe9   : > { %5756 = vmatprep.subr.bf16.mxu1 %v6506_v1  ;;  %5750 = vmatprep.mubr.msk.bf16.mxu0 %vm6507_vm0, %v6506_v1 }
  0xea   : > { %5770 = vmatprep.mubr.msk.bf16.mxu1 %vm6507_vm0, %v6506_v1 }
  0xeb   : > { %5737 = vmatpush3.bf16.msra.mxu0 %v6308_v27  ;;  %v6345_v27 = vld [vmem:[%s7835_s1 + $0x50] sm:$0xff]  }
  0xec   : > { %5757 = vmatpush3.bf16.msra.mxu1 %v6309_v28  ;;  %5738 = vmatprep.subr.bf16.mxu0 %v6506_v1  ;;  %v6346_v28 = vld [vmem:[%s7835_s1 + $0x10] sm:$0xff]  }
  0xed   : > { %5758 = vmatprep.subr.bf16.mxu1 %v6506_v1 }
  0xef   : > { %5739 = vmatpush3.bf16.msra.mxu0 %v6310_v29  ;;  %v6347_v29 = vld [vmem:[%s7835_s1 + $0x58] sm:$0xff]  }
  0xf0   : > { %5759 = vmatpush3.bf16.msra.mxu1 %v6311_v30  ;;  %5740 = vmatprep.subr.bf16.mxu0 %v6506_v1  ;;  %v6348_v30 = vld [vmem:[%s7835_s1 + $0x18] sm:$0xff]  }
  0xf1   : > { %5760 = vmatprep.subr.bf16.mxu1 %v6506_v1 }
  0xf3   : > { %5741 = vmatpush3.bf16.msra.mxu0 %v6312_v31  ;;  %v6349_v31 = vld [vmem:[%s7835_s1 + $0x60] sm:$0xff]  }
  0xf4   : > { %5761 = vmatpush3.bf16.msra.mxu1 %v6313_v32  ;;  %5742 = vmatprep.subr.bf16.mxu0 %v6506_v1  ;;  %v6350_v32 = vld [vmem:[%s7835_s1 + $0x20] sm:$0xff]  }
  0xf5   : > { %5762 = vmatprep.subr.bf16.mxu1 %v6506_v1 }
  0xf7   : > { %5743 = vmatpush3.bf16.msra.mxu0 %v6314_v33  ;;  %v6357_v33 = vld [vmem:[%s6578_s6 + $0x8] ss:$0 sps:$4 sm:$0x77]  }
  0xf8   : > { %5763 = vmatpush3.bf16.msra.mxu1 %v6315_v34  ;;  %5744 = vmatprep.subr.bf16.mxu0 %v6506_v1  ;;  %v6351_v34 = vld [vmem:[%s7835_s1 + $0x68] sm:$0xff]  }
  0xf9   : > { %v301_v37 = vpop.f32.mrb[0].mxu0  ;;  %5764 = vmatprep.subr.bf16.mxu1 %v6506_v1 }
  0xfa   : > { %v389_v38 = vpop.f32.mrb[0].mxu1  ;;  %v5472_v39 = vpop.f32.mrb[1].mxu0 }
  0xfb   : > { %v390_v42 = vadd.f32 %v389_v38, %v301_v37  ;;  %v5492_v43 = vpop.f32.mrb[1].mxu1  ;;  %v304_v44 = vpop.f32.mrb[2].mxu0  ;;  %5745 = vmatpush3.bf16.msra.mxu0 %v6316_v35  ;;  %v6352_v35 = vld [vmem:[%s7835_s1 + $0x28] sm:$0xff]  }
  0xfc   : > { %v392_v45 = vpop.f32.mrb[2].mxu1  ;;  %5765 = vmatpush3.bf16.msra.mxu1 %v6317_v36  ;;  %v5473_v46 = vpop.f32.mrb[3].mxu0  ;;  %5746 = vmatprep.subr.bf16.mxu0 %v6506_v1  ;;  %v6353_v43 = vld [vmem:[%s7835_s1 + $0x70] sm:$0xff]  }
  0xfd   : > { %v5493_v47 = vpop.f32.mrb[3].mxu1  ;;  %5766 = vmatprep.subr.bf16.mxu1 %v6506_v1 }
  0xfe   : > { %v6354_v47 = vld [vmem:[%s7835_s1 + $0x30] sm:$0xff]  }
  0xff   : > { %5747 = vmatpush3.bf16.msra.mxu0 %v6318_v40  ;;  %v2235_v40 = vshll.u32 %v6357_v33, 16 }
 0x100   : > { %5767 = vmatpush3.bf16.msra.mxu1 %v6319_v41  ;;  %5748 = vmatprep.subr.bf16.mxu0 %v6506_v1 }
 0x101   : > { %5768 = vmatprep.subr.bf16.mxu1 %v6506_v1 }
 0x103   : > { %5749 = vmatpush3.bf16.msra.mxu0 %v6320_v49  ;;  %v2233_v49 = vshrl.u32 %v6357_v33, 16  ;;  %v6386_v33 = vld [vmem:[%s7835_s1 + $0x168] sm:$0xff]  }
 0x104   : > { %5769 = vmatpush3.bf16.msra.mxu1 %v6321_v50  ;;  %5774 = vmatprep.subr.bf16.mxu0 %v6506_v1  ;;  %v2237_v50 = vrot.slane %v2235_v40, 1 }
 0x105   : > { %5794 = vmatprep.subr.bf16.mxu1 %v6506_v1 }
 0x106   : > { %5751 = vmatmul.mubr.bf16.vlgmr.msra.gmra.mrb[28].mxu0 %v1766_v51  ;;  %v6355_v51 = vld [vmem:[%s7835_s1 + $0x78] sm:$0xff]  }
 0x107   : > { %5771 = vmatmul.mubr.bf16.vlgmr.msra.gmra.mrb[28].mxu1 %v4617_v52  ;;  %5775 = vmatpush3.bf16.msra.mxu0 %v6323_v53  ;;  %v6356_v52 = vld [vmem:[%s7835_s1 + $0x38] sm:$0xff]   ;;  %v2238_v53 = vor.u32 %v2237_v50, %v2233_v49 }
 0x108   : > { %5795 = vmatpush3.bf16.msra.mxu1 %v6324_v54  ;;  %5776 = vmatprep.subr.bf16.mxu0 %v6506_v1  ;;  %v6358_v54 = vld [vmem:[%s7835_s1 + $0x80] sm:$0xff]   ;;  %v6389_v50 = vld [vmem:[%s7835_s1 + $0x138] sm:$0xff]  }
 0x109   : > { %5796 = vmatprep.subr.bf16.mxu1 %v6506_v1  ;;  %5790 = vmatprep.mubr.msk.bf16.mxu0 %vm6507_vm0, %v6506_v1 }
 0x10a   : > { %5810 = vmatprep.mubr.msk.bf16.mxu1 %vm6507_vm0, %v6506_v1 }
 0x10b   : > { %5777 = vmatpush3.bf16.msra.mxu0 %v6325_v55  ;;  %v4695_v55 = vld [vmem:[%s6578_s6 + $0x8] sm:$0x3] }
 0x10c   : > { %5797 = vmatpush3.bf16.msra.mxu1 %v6326_v56  ;;  %5778 = vmatprep.subr.bf16.mxu0 %v6506_v1  ;;  %v6359_v56 = vld [vmem:[%s7835_s1 + $0xc0] sm:$0xff]  }
 0x10d   : > { %5798 = vmatprep.subr.bf16.mxu1 %v6506_v1 }
 0x10f   : > { %5779 = vmatpush3.bf16.msra.mxu0 %v6327_v57  ;;  %v6360_v57 = vld [vmem:[%s7835_s1 + $0x88] sm:$0xff]  }
 0x110   : > { %5799 = vmatpush3.bf16.msra.mxu1 %v6328_v58  ;;  %5780 = vmatprep.subr.bf16.mxu0 %v6506_v1  ;;  %v6361_v58 = vld [vmem:[%s7835_s1 + $0xc8] sm:$0xff]  }
 0x111   : > { %5800 = vmatprep.subr.bf16.mxu1 %v6506_v1 }
 0x113   : > { %5781 = vmatpush3.bf16.msra.mxu0 %v6329_v59  ;;  %v6362_v59 = vld [vmem:[%s7835_s1 + $0x90] sm:$0xff]  }
 0x114   : > { %5801 = vmatpush3.bf16.msra.mxu1 %v6330_v60  ;;  %5782 = vmatprep.subr.bf16.mxu0 %v6506_v1  ;;  %v6363_v60 = vld [vmem:[%s7835_s1 + $0xd0] sm:$0xff]  }
 0x115   : > { %5802 = vmatprep.subr.bf16.mxu1 %v6506_v1 }
 0x117   : > { %5783 = vmatpush3.bf16.msra.mxu0 %v6331_v61  ;;  %v6364_v61 = vld [vmem:[%s7835_s1 + $0x98] sm:$0xff]  }
 0x118   : > { %5803 = vmatpush3.bf16.msra.mxu1 %v6332_v62  ;;  %5784 = vmatprep.subr.bf16.mxu0 %v6506_v1  ;;  %v6365_v62 = vld [vmem:[%s7835_s1 + $0xd8] sm:$0xff]  }
 0x119   : > { %v500_v3 = vpop.f32.mrb[4].mxu0  ;;  %5804 = vmatprep.subr.bf16.mxu1 %v6506_v1 }
 0x11a   : > { %v506_v5 = vadd.f32 %v500_v3, %v390_v42  ;;  %v608_v6 = vpop.f32.mrb[4].mxu1  ;;  %v5512_v7 = vpop.f32.mrb[5].mxu0  ;;  %v6369_v3 = vld [vmem:[%s7835_s1 + $0xe8] sm:$0xff]  }
 0x11b   : > { %v5532_v10 = vpop.f32.mrb[5].mxu1  ;;  %v503_v11 = vpop.f32.mrb[6].mxu0  ;;  %5785 = vmatpush3.bf16.msra.mxu0 %v6333_v0  ;;  %v6367_v0 = vld [vmem:[%s7835_s1 + $0xe0] sm:$0xff]  }
 0x11c   : > { %v614_v12 = vadd.f32 %v608_v6, %v506_v5  ;;  %v611_v13 = vpop.f32.mrb[6].mxu1  ;;  %5805 = vmatpush3.bf16.msra.mxu1 %v6334_v2  ;;  %v5513_v14 = vpop.f32.mrb[7].mxu0  ;;  %5786 = vmatprep.subr.bf16.mxu0 %v6506_v1  ;;  %v6368_v2 = vld [vmem:[%s7835_s1 + $0xa8] sm:$0xff]   ;;  %v6370_v10 = vld [vmem:[%s7835_s1 + $0xb0] sm:$0xff]  }
 0x11d   : > { %v5533_v15 = vpop.f32.mrb[7].mxu1  ;;  %5806 = vmatprep.subr.bf16.mxu1 %v6506_v1  ;;  %v6371_v14 = vld [vmem:[%s7835_s1 + $0xf0] sm:$0xff]  }
 0x11f   : > { %5787 = vmatpush3.bf16.msra.mxu0 %v6335_v4 }
 0x120   : > { %5807 = vmatpush3.bf16.msra.mxu1 %v6336_v8  ;;  %5788 = vmatprep.subr.bf16.mxu0 %v6506_v1 }
 0x121   : > { %5808 = vmatprep.subr.bf16.mxu1 %v6506_v1 }
 0x123   : > { %5789 = vmatpush3.bf16.msra.mxu0 %v6337_v16  ;;  %v6374_v16 = vld [vmem:[%s6578_s6 + $0x8] ss:$0 sps:$4 sm:$0x66]  }
 0x124   : > { %5809 = vmatpush3.bf16.msra.mxu1 %v6338_v19  ;;  %5814 = vmatprep.subr.bf16.mxu0 %v6506_v1  ;;  %v2436_v19 = vrot.slane %v6374_v16, 1  ;;  %v6406_v16 = vld [vmem:[%s7835_s1 + $0x1f0] sm:$0xff]  }
 0x125   : > { %5834 = vmatprep.subr.bf16.mxu1 %v6506_v1 }
 0x126   : > { %5791 = vmatmul.mubr.bf16.vlgmr.msra.gmra.mrb[32].mxu0 %v1990_v21  ;;  %v4756_v21 = vld [vmem:[%s6578_s6 + $0xc] sm:$0x3] }
 0x127   : > { %5811 = vmatmul.mubr.bf16.vlgmr.msra.gmra.mrb[32].mxu1 %v2101_v22  ;;  %5815 = vmatpush3.bf16.msra.mxu0 %v6341_v23  ;;  %v6376_v22 = vld [vmem:[%s7835_s1 + $0x140] sm:$0xff]   ;;  %v6377_v23 = vld [vmem:[%s7835_s1 + $0x108] sm:$0xff]  }
 0x128   : > { %5835 = vmatpush3.bf16.msra.mxu1 %v6342_v24  ;;  %5816 = vmatprep.subr.bf16.mxu0 %v6506_v1  ;;  %v6378_v24 = vld [vmem:[%s7835_s1 + $0x148] sm:$0xff]  }
 0x129   : > { %5836 = vmatprep.subr.bf16.mxu1 %v6506_v1  ;;  %5830 = vmatprep.mubr.msk.bf16.mxu0 %vm6507_vm0, %v6506_v1 }
 0x12a   : > { %5850 = vmatprep.mubr.msk.bf16.mxu1 %vm6507_vm0, %v6506_v1 }
 0x12b   : > { %5817 = vmatpush3.bf16.msra.mxu0 %v6343_v25  ;;  %v6379_v25 = vld [vmem:[%s7835_s1 + $0x110] sm:$0xff]  }
 0x12c   : > { %5837 = vmatpush3.bf16.msra.mxu1 %v6344_v26  ;;  %5818 = vmatprep.subr.bf16.mxu0 %v6506_v1  ;;  %v6380_v26 = vld [vmem:[%s7835_s1 + $0x150] sm:$0xff]  }
 0x12d   : > { %5838 = vmatprep.subr.bf16.mxu1 %v6506_v1 }
 0x12f   : > { %5819 = vmatpush3.bf16.msra.mxu0 %v6345_v27  ;;  %v6381_v27 = vld [vmem:[%s7835_s1 + $0x118] sm:$0xff]  }
 0x130   : > { %5839 = vmatpush3.bf16.msra.mxu1 %v6346_v28  ;;  %5820 = vmatprep.subr.bf16.mxu0 %v6506_v1  ;;  %v6382_v28 = vld [vmem:[%s7835_s1 + $0x158] sm:$0xff]  }
 0x131   : > { %5840 = vmatprep.subr.bf16.mxu1 %v6506_v1 }
 0x133   : > { %5821 = vmatpush3.bf16.msra.mxu0 %v6347_v29  ;;  %v6383_v29 = vld [vmem:[%s7835_s1 + $0x120] sm:$0xff]  }
 0x134   : > { %5841 = vmatpush3.bf16.msra.mxu1 %v6348_v30  ;;  %5822 = vmatprep.subr.bf16.mxu0 %v6506_v1  ;;  %v6384_v30 = vld [vmem:[%s7835_s1 + $0x160] sm:$0xff]  }
 0x135   : > { %5842 = vmatprep.subr.bf16.mxu1 %v6506_v1 }
 0x137   : > { %5823 = vmatpush3.bf16.msra.mxu0 %v6349_v31  ;;  %v6391_v31 = vld [vmem:[%s6578_s6 + $0xc] ss:$0 sps:$4 sm:$0x77]  }
 0x138   : > { %5843 = vmatpush3.bf16.msra.mxu1 %v6350_v32  ;;  %5824 = vmatprep.subr.bf16.mxu0 %v6506_v1  ;;  %v6385_v32 = vld [vmem:[%s7835_s1 + $0x128] sm:$0xff]  }
 0x139   : > { %v726_v36 = vpop.f32.mrb[8].mxu0  ;;  %5844 = vmatprep.subr.bf16.mxu1 %v6506_v1 }
 0x13a   : > { %v732_v37 = vadd.f32 %v726_v36, %v614_v12  ;;  %v838_v38 = vpop.f32.mrb[8].mxu1  ;;  %v5552_v39 = vpop.f32.mrb[9].mxu0 }
 0x13b   : > { %v5572_v41 = vpop.f32.mrb[9].mxu1  ;;  %v729_v42 = vpop.f32.mrb[10].mxu0  ;;  %5825 = vmatpush3.bf16.msra.mxu0 %v6351_v34  ;;  %v7370_v34 = vld [vmem:[%s7836_s2] ss:$0 sm:$0xff]  ;;  %v2656_v39 = vshll.u32 %v6391_v31, 16 }
 0x13c   : > { %v844_v44 = vadd.f32 %v838_v38, %v732_v37  ;;  %v841_v45 = vpop.f32.mrb[10].mxu1  ;;  %5845 = vmatpush3.bf16.msra.mxu1 %v6352_v35  ;;  %v5553_v46 = vpop.f32.mrb[11].mxu0  ;;  %5826 = vmatprep.subr.bf16.mxu0 %v6506_v1  ;;  %v6387_v42 = vld [vmem:[%s7835_s1 + $0x130] sm:$0xff]  }
 0x13d   : > { %v5573_v48 = vpop.f32.mrb[11].mxu1  ;;  %5846 = vmatprep.subr.bf16.mxu1 %v6506_v1  ;;  %v6388_v46 = vld [vmem:[%s7835_s1 + $0x170] sm:$0xff]   ;;  %v2658_v49 = vrot.slane %v2656_v39, 1 }
 0x13e   : > { %v2654_v48 = vshrl.u32 %v6391_v31, 16  ;;  %v6417_v31 = vld [vmem:[%s7835_s1 + $0x58] sm:$0xff]  }
 0x13f   : > { %5827 = vmatpush3.bf16.msra.mxu0 %v6353_v43 }
 0x140   : > { %5847 = vmatpush3.bf16.msra.mxu1 %v6354_v47  ;;  %5828 = vmatprep.subr.bf16.mxu0 %v6506_v1 }
 0x141   : > { %5848 = vmatprep.subr.bf16.mxu1 %v6506_v1 }
 0x143   : > { %5829 = vmatpush3.bf16.msra.mxu0 %v6355_v51  ;;  %v6392_v51 = vld [vmem:[%s6578_s6 + $0xc] ss:$0 sps:$4 sm:$0x66]  }
 0x144   : > { %5849 = vmatpush3.bf16.msra.mxu1 %v6356_v52  ;;  %5854 = vmatprep.subr.bf16.mxu0 %v6506_v1  ;;  %v6390_v52 = vld [vmem:[%s7835_s1 + $0x178] sm:$0xff]  }
 0x145   : > { %5874 = vmatprep.subr.bf16.mxu1 %v6506_v1 }
 0x146   : > { %5831 = vmatmul.mubr.bf16.vlgmr.msra.gmra.mrb[36].mxu0 %v2238_v53  ;;  %v2659_v53 = vor.u32 %v2658_v49, %v2654_v48  ;;  %v6423_v49 = vld [vmem:[%s7835_s1 + $0x70] sm:$0xff]  }
 0x147   : > { %5851 = vmatmul.mubr.bf16.vlgmr.msra.gmra.mrb[36].mxu1 %v4695_v55  ;;  %5855 = vmatpush3.bf16.msra.mxu0 %v6358_v54  ;;  %v2770_v54 = vrot.slane %v6392_v51, 1  ;;  %v6393_v55 = vld [vmem:[%s7835_s1 + $0x180] sm:$0xff]   ;;  %v6426_v51 = vld [vmem:[%s6578_s6 + $0x10] ss:$0 sps:$4 sm:$0x66]  }
 0x148   : > { %5875 = vmatpush3.bf16.msra.mxu1 %v6359_v56  ;;  %5856 = vmatprep.subr.bf16.mxu0 %v6506_v1  ;;  %v6394_v56 = vld [vmem:[%s7835_s1 + $0x1c0] sm:$0xff]  }
 0x149   : > { %5876 = vmatprep.subr.bf16.mxu1 %v6506_v1  ;;  %5870 = vmatprep.mubr.msk.bf16.mxu0 %vm6507_vm0, %v6506_v1 }
 0x14a   : > { %5890 = vmatprep.mubr.msk.bf16.mxu1 %vm6507_vm0, %v6506_v1 }
 0x14b   : > { %5857 = vmatpush3.bf16.msra.mxu0 %v6360_v57  ;;  %v6395_v57 = vld [vmem:[%s7835_s1 + $0x188] sm:$0xff]  }
 0x14c   : > { %5877 = vmatpush3.bf16.msra.mxu1 %v6361_v58  ;;  %5858 = vmatprep.subr.bf16.mxu0 %v6506_v1  ;;  %v6396_v58 = vld [vmem:[%s7835_s1 + $0x1c8] sm:$0xff]  }
 0x14d   : > { %5878 = vmatprep.subr.bf16.mxu1 %v6506_v1 }
 0x14f   : > { %5859 = vmatpush3.bf16.msra.mxu0 %v6362_v59  ;;  %v6397_v59 = vld [vmem:[%s7835_s1 + $0x190] sm:$0xff]  }
 0x150   : > { %5879 = vmatpush3.bf16.msra.mxu1 %v6363_v60  ;;  %5860 = vmatprep.subr.bf16.mxu0 %v6506_v1  ;;  %v6398_v60 = vld [vmem:[%s7835_s1 + $0x1d0] sm:$0xff]  }
 0x151   : > { %5880 = vmatprep.subr.bf16.mxu1 %v6506_v1 }
 0x153   : > { %5861 = vmatpush3.bf16.msra.mxu0 %v6364_v61  ;;  %v6399_v61 = vld [vmem:[%s7835_s1 + $0x198] sm:$0xff]  }
 0x154   : > { %5881 = vmatpush3.bf16.msra.mxu1 %v6365_v62  ;;  %5862 = vmatprep.subr.bf16.mxu0 %v6506_v1  ;;  %v6400_v62 = vld [vmem:[%s7835_s1 + $0x1d8] sm:$0xff]  }
 0x155   : > { %5882 = vmatprep.subr.bf16.mxu1 %v6506_v1 }
 0x157   : > { %5863 = vmatpush3.bf16.msra.mxu0 %v6366_v63  ;;  %v6401_v63 = vld [vmem:[%s7835_s1 + $0x1a0] sm:$0xff]  }
 0x158   : > { %5883 = vmatpush3.bf16.msra.mxu1 %v6367_v0  ;;  %5864 = vmatprep.subr.bf16.mxu0 %v6506_v1  ;;  %v6402_v0 = vld [vmem:[%s7835_s1 + $0x1e0] sm:$0xff]  }
 0x159   : > { %v946_v4 = vpop.f32.mrb[12].mxu0  ;;  %5884 = vmatprep.subr.bf16.mxu1 %v6506_v1 }
 0x15a   : > { %v952_v5 = vadd.f32 %v946_v4, %v844_v44  ;;  %v1064_v6 = vpop.f32.mrb[12].mxu1  ;;  %v5592_v7 = vpop.f32.mrb[13].mxu0  ;;  %v6404_v4 = vld [vmem:[%s7835_s1 + $0x1e8] sm:$0xff]  }
 0x15b   : > { %v5612_v8 = vpop.f32.mrb[13].mxu1  ;;  %v949_v9 = vpop.f32.mrb[14].mxu0  ;;  %5865 = vmatpush3.bf16.msra.mxu0 %v6368_v2  ;;  %v6403_v2 = vld [vmem:[%s7835_s1 + $0x1a8] sm:$0xff]  }
 0x15c   : > { %v1070_v11 = vadd.f32 %v1064_v6, %v952_v5  ;;  %v1067_v12 = vpop.f32.mrb[14].mxu1  ;;  %5885 = vmatpush3.bf16.msra.mxu1 %v6369_v3  ;;  %v5593_v13 = vpop.f32.mrb[15].mxu0  ;;  %5866 = vmatprep.subr.bf16.mxu0 %v6506_v1  ;;  %v6409_v3 = vld [vmem:[%s6578_s6 + $0x10] ss:$0 sps:$4 sm:$0x77]  }
 0x15d   : > { %v5613_v15 = vpop.f32.mrb[15].mxu1  ;;  %5886 = vmatprep.subr.bf16.mxu1 %v6506_v1  ;;  %v2991_v12 = vshll.u32 %v6409_v3, 16 }
 0x15f   : > { %5867 = vmatpush3.bf16.msra.mxu0 %v6370_v10 }
 0x160   : > { %5887 = vmatpush3.bf16.msra.mxu1 %v6371_v14  ;;  %5868 = vmatprep.subr.bf16.mxu0 %v6506_v1 }
 0x161   : > { %5888 = vmatprep.subr.bf16.mxu1 %v6506_v1 }
 0x163   : > { %5869 = vmatpush3.bf16.msra.mxu0 %v6372_v17 }
 0x164   : > { %5889 = vmatpush3.bf16.msra.mxu1 %v6373_v18  ;;  %5894 = vmatprep.subr.bf16.mxu0 %v6506_v1  ;;  %v6407_v18 = vld [vmem:[%s7835_s1 + $0x1b8] sm:$0xff]  }
 0x165   : > { %5914 = vmatprep.subr.bf16.mxu1 %v6506_v1 }
 0x166   : > { %5871 = vmatmul.mubr.bf16.vlgmr.msra.gmra.mrb[40].mxu0 %v2436_v19  ;;  %v2989_v19 = vshrl.u32 %v6409_v3, 16  ;;  %v6436_v3 = vld [vmem:[%s7835_s1 + $0x20] sm:$0xff]  }
 0x167   : > { %5891 = vmatmul.mubr.bf16.vlgmr.msra.gmra.mrb[40].mxu1 %v4756_v21  ;;  %5895 = vmatpush3.bf16.msra.mxu0 %v6375_v20  ;;  %v2993_v20 = vrot.slane %v2991_v12, 1  ;;  %v6408_v21 = vld [vmem:[%s7835_s1 + $0x1f8] sm:$0xff]  }
 0x168   : > { %5915 = vmatpush3.bf16.msra.mxu1 %v6376_v22  ;;  %5896 = vmatprep.subr.bf16.mxu0 %v6506_v1  ;;  %v4833_v22 = vld [vmem:[%s6578_s6 + $0x10] sm:$0x3] }
 0x169   : > { %5916 = vmatprep.subr.bf16.mxu1 %v6506_v1  ;;  %5910 = vmatprep.mubr.msk.bf16.mxu0 %vm6507_vm0, %v6506_v1 }
 0x16a   : > { %5930 = vmatprep.mubr.msk.bf16.mxu1 %vm6507_vm0, %v6506_v1 }
 0x16b   : > { %5897 = vmatpush3.bf16.msra.mxu0 %v6377_v23  ;;  %v2994_v23 = vor.u32 %v2993_v20, %v2989_v19  ;;  %v6442_v19 = vld [vmem:[%s7835_s1 + $0x38] sm:$0xff]   ;;  %v6444_v20 = vld [vmem:[%s6578_s6 + $0xc] ss:$0 sps:$4 sm:$0x66]  }
 0x16c   : > { %5917 = vmatpush3.bf16.msra.mxu1 %v6378_v24  ;;  %5898 = vmatprep.subr.bf16.mxu0 %v6506_v1  ;;  %v6410_v24 = vld [vmem:[%s7835_s1 + $0x200] sm:$0xff]  }
 0x16d   : > { %5918 = vmatprep.subr.bf16.mxu1 %v6506_v1 }
 0x16f   : > { %5899 = vmatpush3.bf16.msra.mxu0 %v6379_v25  ;;  %v6411_v25 = vld [vmem:[%s7835_s1 + $0x40] sm:$0xff]  }
 0x170   : > { %5919 = vmatpush3.bf16.msra.mxu1 %v6380_v26  ;;  %5900 = vmatprep.subr.bf16.mxu0 %v6506_v1  ;;  %v6412_v26 = vld [vmem:[%s7835_s1 + $0x208] sm:$0xff]  }
 0x171   : > { %5920 = vmatprep.subr.bf16.mxu1 %v6506_v1 }
 0x173   : > { %5901 = vmatpush3.bf16.msra.mxu0 %v6381_v27  ;;  %v6413_v27 = vld [vmem:[%s7835_s1 + $0x48] sm:$0xff]  }
 0x174   : > { %5921 = vmatpush3.bf16.msra.mxu1 %v6382_v28  ;;  %5902 = vmatprep.subr.bf16.mxu0 %v6506_v1  ;;  %v6414_v28 = vld [vmem:[%s7835_s1 + $0x210] sm:$0xff]  }
 0x175   : > { %5922 = vmatprep.subr.bf16.mxu1 %v6506_v1 }
 0x177   : > { %5903 = vmatpush3.bf16.msra.mxu0 %v6383_v29  ;;  %v6415_v29 = vld [vmem:[%s7835_s1 + $0x50] sm:$0xff]  }
 0x178   : > { %5923 = vmatpush3.bf16.msra.mxu1 %v6384_v30  ;;  %5904 = vmatprep.subr.bf16.mxu0 %v6506_v1  ;;  %v6416_v30 = vld [vmem:[%s7835_s1 + $0x218] sm:$0xff]  }
 0x179   : > { %v1176_v35 = vpop.f32.mrb[16].mxu0  ;;  %5924 = vmatprep.subr.bf16.mxu1 %v6506_v1 }
 0x17a   : > { %v1182_v36 = vadd.f32 %v1176_v35, %v1070_v11  ;;  %v7373_v37 = vpop.f32.mrb[16].mxu1  ;;  %v5632_v38 = vpop.f32.mrb[17].mxu0  ;;  %v6405_v11 = vld [vmem:[%s7835_s1 + $0x1b0] sm:$0xff]   ;;  %v6420_v35 = vld [vmem:[%s7835_s1 + $0x228] sm:$0xff]  }
 0x17b   : > { %v5652_v40 = vpop.f32.mrb[17].mxu1  ;;  %v1179_v41 = vpop.f32.mrb[18].mxu0  ;;  %5905 = vmatpush3.bf16.msra.mxu0 %v6385_v32  ;;  %v6418_v32 = vld [vmem:[%s7835_s1 + $0x220] sm:$0xff]  }
 0x17c   : > { %v1189_v43 = vadd.f32 %v7370_v34, %v1182_v36  ;;  %v1321_v44 = vpop.f32.mrb[18].mxu1  ;;  %5925 = vmatpush3.bf16.msra.mxu1 %v6386_v33  ;;  %v5633_v45 = vpop.f32.mrb[19].mxu0  ;;  %5906 = vmatprep.subr.bf16.mxu0 %v6506_v1  ;;  %v6419_v33 = vld [vmem:[%s7835_s1 + $0x60] sm:$0xff]   ;;  %v6427_v36 = vld [vmem:[%s6578_s6 + $0xc] ss:$0 sps:$4 sm:$0x77]  }
 0x17d   : > { %v5653_v47 = vpop.f32.mrb[19].mxu1  ;;  %5926 = vmatprep.subr.bf16.mxu1 %v6506_v1  ;;  %v6422_v44 = vld [vmem:[%s7835_s1 + $0x230] sm:$0xff]   ;;  %v3239_v45 = vshll.u32 %v6427_v36, 16 }
 0x17e   : > { %1190 = vst [vmem:[%s7378_s11] sm:$0xf] %v1189_v43 }
 0x17f   : > { %5907 = vmatpush3.bf16.msra.mxu0 %v6387_v42 }
 0x180   : > { %5927 = vmatpush3.bf16.msra.mxu1 %v6388_v46  ;;  %5908 = vmatprep.subr.bf16.mxu0 %v6506_v1 }
 0x181   : > { %5928 = vmatprep.subr.bf16.mxu1 %v6506_v1 }
 0x183   : > { %5909 = vmatpush3.bf16.msra.mxu0 %v6389_v50 }
 0x184   : > { %5929 = vmatpush3.bf16.msra.mxu1 %v6390_v52  ;;  %5934 = vmatprep.subr.bf16.mxu0 %v6506_v1  ;;  %v6424_v52 = vld [vmem:[%s7835_s1 + $0x238] sm:$0xff]  }
 0x185   : > { %5954 = vmatprep.subr.bf16.mxu1 %v6506_v1 }
 0x186   : > { %5911 = vmatmul.mubr.bf16.vlgmr.msra.gmra.mrb[44].mxu0 %v2659_v53  ;;  %v3237_v53 = vshrl.u32 %v6427_v36, 16  ;;  %v6461_v36 = vld [vmem:[%s6578_s6 + $0x10] ss:$0 sps:$4 sm:$0x77]  }
 0x187   : > { %5931 = vmatmul.mubr.bf16.vlgmr.msra.gmra.mrb[44].mxu1 %v2770_v54  ;;  %5935 = vmatpush3.bf16.msra.mxu0 %v6393_v55  ;;  %v3241_v54 = vrot.slane %v3239_v45, 1  ;;  %v6425_v55 = vld [vmem:[%s7835_s1 + $0x78] sm:$0xff]   ;;  %v3660_v45 = vshll.u32 %v6461_v36, 16 }
 0x188   : > { %5955 = vmatpush3.bf16.msra.mxu1 %v6394_v56  ;;  %5936 = vmatprep.subr.bf16.mxu0 %v6506_v1  ;;  %v3105_v56 = vrot.slane %v6426_v51, 1 }
 0x189   : > { %5956 = vmatprep.subr.bf16.mxu1 %v6506_v1  ;;  %5950 = vmatprep.mubr.msk.bf16.mxu0 %vm6507_vm0, %v6506_v1 }
 0x18a   : > { %5970 = vmatprep.mubr.msk.bf16.mxu1 %vm6507_vm0, %v6506_v1 }
 0x18b   : > { %5937 = vmatpush3.bf16.msra.mxu0 %v6395_v57  ;;  %v3242_v57 = vor.u32 %v3241_v54, %v3237_v53  ;;  %v3658_v53 = vshrl.u32 %v6461_v36, 16  ;;  %v3662_v54 = vrot.slane %v3660_v45, 1  ;;  %v6490_v36 = vld [vmem:[%s7835_s1 + $0x228] sm:$0xff]  }
 0x18c   : > { %5957 = vmatpush3.bf16.msra.mxu1 %v6396_v58  ;;  %5938 = vmatprep.subr.bf16.mxu0 %v6506_v1  ;;  %v6428_v58 = vld [vmem:[%s7835_s1] sm:$0xff]  }
 0x18d   : > { %5958 = vmatprep.subr.bf16.mxu1 %v6506_v1 }
 0x18f   : > { %5939 = vmatpush3.bf16.msra.mxu0 %v6397_v59  ;;  %v6429_v59 = vld [vmem:[%s7835_s1 + $0x80] sm:$0xff]  }
 0x190   : > { %5959 = vmatpush3.bf16.msra.mxu1 %v6398_v60  ;;  %5940 = vmatprep.subr.bf16.mxu0 %v6506_v1  ;;  %v6430_v60 = vld [vmem:[%s7835_s1 + $0x8] sm:$0xff]  }
 0x191   : > { %5960 = vmatprep.subr.bf16.mxu1 %v6506_v1 }
 0x193   : > { %5941 = vmatpush3.bf16.msra.mxu0 %v6399_v61  ;;  %v6431_v61 = vld [vmem:[%s7835_s1 + $0x88] sm:$0xff]  }
 0x194   : > { %5961 = vmatpush3.bf16.msra.mxu1 %v6400_v62  ;;  %5942 = vmatprep.subr.bf16.mxu0 %v6506_v1  ;;  %v6432_v62 = vld [vmem:[%s7835_s1 + $0x10] sm:$0xff]  }
 0x195   : > { %5962 = vmatprep.subr.bf16.mxu1 %v6506_v1 }
 0x197   : > { %5943 = vmatpush3.bf16.msra.mxu0 %v6401_v63  ;;  %v6433_v63 = vld [vmem:[%s7835_s1 + $0x90] sm:$0xff]  }
 0x198   : > { %5963 = vmatpush3.bf16.msra.mxu1 %v6402_v0  ;;  %5944 = vmatprep.subr.bf16.mxu0 %v6506_v1  ;;  %v6434_v0 = vld [vmem:[%s7835_s1 + $0x18] sm:$0xff]  }
 0x199   : > { %v1406_v5 = vpop.f32.mrb[20].mxu0  ;;  %5964 = vmatprep.subr.bf16.mxu1 %v6506_v1 }
 0x19a   : > { %v1407_v6 = vadd.f32 %v1406_v5, %v7373_v37  ;;  %v1516_v7 = vpop.f32.mrb[20].mxu1  ;;  %v5672_v8 = vpop.f32.mrb[21].mxu0  ;;  %v6421_v37 = vld [vmem:[%s7835_s1 + $0x68] sm:$0xff]  }
 0x19b   : > { %v5692_v9 = vpop.f32.mrb[21].mxu1  ;;  %v1409_v10 = vpop.f32.mrb[22].mxu0  ;;  %5945 = vmatpush3.bf16.msra.mxu0 %v6403_v2  ;;  %v6435_v2 = vld [vmem:[%s7835_s1 + $0x98] sm:$0xff]   ;;  %v6438_v5 = vld [vmem:[%s7835_s1 + $0x28] sm:$0xff]  }
 0x19c   : > { %v1522_v13 = vadd.f32 %v1516_v7, %v1407_v6  ;;  %v1519_v14 = vpop.f32.mrb[22].mxu1  ;;  %5965 = vmatpush3.bf16.msra.mxu1 %v6404_v4  ;;  %v5673_v15 = vpop.f32.mrb[23].mxu0  ;;  %5946 = vmatprep.subr.bf16.mxu0 %v6506_v1  ;;  %v6437_v4 = vld [vmem:[%s7835_s1 + $0xa0] sm:$0xff]   ;;  %v6439_v6 = vld [vmem:[%s7835_s1 + $0xa8] sm:$0xff]  }
 0x19d   : > { %v5693_v17 = vpop.f32.mrb[23].mxu1  ;;  %5966 = vmatprep.subr.bf16.mxu1 %v6506_v1 }
 0x19e   : > { %v6441_v17 = vld [vmem:[%s7835_s1 + $0xb0] sm:$0xff]  }
 0x19f   : > { %5947 = vmatpush3.bf16.msra.mxu0 %v6405_v11 }
 0x1a0   : > { %5967 = vmatpush3.bf16.msra.mxu1 %v6406_v16  ;;  %5948 = vmatprep.subr.bf16.mxu0 %v6506_v1 }
 0x1a1   : > { %5968 = vmatprep.subr.bf16.mxu1 %v6506_v1 }
 0x1a3   : > { %5949 = vmatpush3.bf16.msra.mxu0 %v6407_v18 }
 0x1a4   : > { %5969 = vmatpush3.bf16.msra.mxu1 %v6408_v21  ;;  %5974 = vmatprep.subr.bf16.mxu0 %v6506_v1  ;;  %v6443_v21 = vld [vmem:[%s7835_s1 + $0xb8] sm:$0xff]  }
 0x1a5   : > { %5994 = vmatprep.subr.bf16.mxu1 %v6506_v1 }
 0x1a6   : > { %5951 = vmatmul.mubr.bf16.vlgmr.msra.gmra.mrb[48].mxu0 %v4833_v22  ;;  %v4911_v22 = vld [vmem:[%s6578_s6 + $0xc] sm:$0x3] }
 0x1a7   : > { %5971 = vmatmul.mubr.bf16.vlgmr.msra.gmra.mrb[48].mxu1 %v2994_v23  ;;  %5975 = vmatpush3.bf16.msra.mxu0 %v6410_v24  ;;  %v3440_v23 = vrot.slane %v6444_v20, 1  ;;  %v6445_v24 = vld [vmem:[%s7835_s1 + $0xc0] sm:$0xff]   ;;  %v6477_v20 = vld [vmem:[%s7835_s1 + $0x1b8] sm:$0xff]  }
 0x1a8   : > { %5995 = vmatpush3.bf16.msra.mxu1 %v6411_v25  ;;  %5976 = vmatprep.subr.bf16.mxu0 %v6506_v1  ;;  %v6446_v25 = vld [vmem:[%s7835_s1 + $0x100] sm:$0xff]  }
 0x1a9   : > { %5996 = vmatprep.subr.bf16.mxu1 %v6506_v1  ;;  %5990 = vmatprep.mubr.msk.bf16.mxu0 %vm6507_vm0, %v6506_v1 }
 0x1aa   : > { %6010 = vmatprep.mubr.msk.bf16.mxu1 %vm6507_vm0, %v6506_v1 }
 0x1ab   : > { %5977 = vmatpush3.bf16.msra.mxu0 %v6412_v26  ;;  %v6447_v26 = vld [vmem:[%s7835_s1 + $0xc8] sm:$0xff]  }
 0x1ac   : > { %5997 = vmatpush3.bf16.msra.mxu1 %v6413_v27  ;;  %5978 = vmatprep.subr.bf16.mxu0 %v6506_v1  ;;  %v6448_v27 = vld [vmem:[%s7835_s1 + $0x108] sm:$0xff]  }
 0x1ad   : > { %5998 = vmatprep.subr.bf16.mxu1 %v6506_v1 }
 0x1af   : > { %5979 = vmatpush3.bf16.msra.mxu0 %v6414_v28  ;;  %v6449_v28 = vld [vmem:[%s7835_s1 + $0xd0] sm:$0xff]  }
 0x1b0   : > { %5999 = vmatpush3.bf16.msra.mxu1 %v6415_v29  ;;  %5980 = vmatprep.subr.bf16.mxu0 %v6506_v1  ;;  %v6450_v29 = vld [vmem:[%s7835_s1 + $0x110] sm:$0xff]  }
 0x1b1   : > { %6000 = vmatprep.subr.bf16.mxu1 %v6506_v1 }
 0x1b3   : > { %5981 = vmatpush3.bf16.msra.mxu0 %v6416_v30  ;;  %v6451_v30 = vld [vmem:[%s7835_s1 + $0xd8] sm:$0xff]  }
 0x1b4   : > { %6001 = vmatpush3.bf16.msra.mxu1 %v6417_v31  ;;  %5982 = vmatprep.subr.bf16.mxu0 %v6506_v1  ;;  %v6452_v31 = vld [vmem:[%s7835_s1 + $0x118] sm:$0xff]  }
 0x1b5   : > { %6002 = vmatprep.subr.bf16.mxu1 %v6506_v1 }
 0x1b7   : > { %5983 = vmatpush3.bf16.msra.mxu0 %v6418_v32  ;;  %v6453_v32 = vld [vmem:[%s7835_s1 + $0xe0] sm:$0xff]  }
 0x1b8   : > { %6003 = vmatpush3.bf16.msra.mxu1 %v6419_v33  ;;  %5984 = vmatprep.subr.bf16.mxu0 %v6506_v1  ;;  %v6454_v33 = vld [vmem:[%s7835_s1 + $0x120] sm:$0xff]  }
 0x1b9   : > { %v1622_v38 = vpop.f32.mrb[24].mxu0  ;;  %6004 = vmatprep.subr.bf16.mxu1 %v6506_v1 }
 0x1ba   : > { %v1628_v39 = vadd.f32 %v1622_v38, %v1522_v13  ;;  %v1739_v40 = vpop.f32.mrb[24].mxu1  ;;  %v5712_v41 = vpop.f32.mrb[25].mxu0  ;;  %v6440_v13 = vld [vmem:[%s7835_s1 + $0x30] sm:$0xff]  }
 0x1bb   : > { %v5732_v42 = vpop.f32.mrb[25].mxu1  ;;  %v1625_v43 = vpop.f32.mrb[26].mxu0  ;;  %5985 = vmatpush3.bf16.msra.mxu0 %v6420_v35  ;;  %v6455_v35 = vld [vmem:[%s7835_s1 + $0xe8] sm:$0xff]  }
 0x1bc   : > { %v1745_v46 = vadd.f32 %v1739_v40, %v1628_v39  ;;  %v1742_v47 = vpop.f32.mrb[26].mxu1  ;;  %6005 = vmatpush3.bf16.msra.mxu1 %v6421_v37  ;;  %v5713_v48 = vpop.f32.mrb[27].mxu0  ;;  %5986 = vmatprep.subr.bf16.mxu0 %v6506_v1  ;;  %v6456_v37 = vld [vmem:[%s7835_s1 + $0x128] sm:$0xff]  }
 0x1bd   : > { %v5733_v50 = vpop.f32.mrb[27].mxu1  ;;  %6006 = vmatprep.subr.bf16.mxu1 %v6506_v1 }
 0x1bf   : > { %5987 = vmatpush3.bf16.msra.mxu0 %v6422_v44  ;;  %v6457_v44 = vld [vmem:[%s7835_s1 + $0xf0] sm:$0xff]  }
 0x1c0   : > { %6007 = vmatpush3.bf16.msra.mxu1 %v6423_v49  ;;  %5988 = vmatprep.subr.bf16.mxu0 %v6506_v1  ;;  %v6458_v49 = vld [vmem:[%s7835_s1 + $0x130] sm:$0xff]  }
 0x1c1   : > { %6008 = vmatprep.subr.bf16.mxu1 %v6506_v1 }
 0x1c3   : > { %5989 = vmatpush3.bf16.msra.mxu0 %v6424_v52  ;;  %v6459_v52 = vld [vmem:[%s7835_s1 + $0xf8] sm:$0xff]  }
 0x1c4   : > { %6009 = vmatpush3.bf16.msra.mxu1 %v6425_v55  ;;  %6014 = vmatprep.subr.bf16.mxu0 %v6506_v1  ;;  %v6460_v55 = vld [vmem:[%s7835_s1 + $0x138] sm:$0xff]  }
 0x1c5   : > { %6034 = vmatprep.subr.bf16.mxu1 %v6506_v1 }
 0x1c6   : > { %5991 = vmatmul.mubr.bf16.vlgmr.msra.gmra.mrb[52].mxu0 %v3105_v56  ;;  %v4972_v56 = vld [vmem:[%s6578_s6 + $0x10] sm:$0x3] }
 0x1c7   : > { %6011 = vmatmul.mubr.bf16.vlgmr.msra.gmra.mrb[52].mxu1 %v3242_v57  ;;  %6015 = vmatpush3.bf16.msra.mxu0 %v6428_v58  ;;  %v3663_v57 = vor.u32 %v3662_v54, %v3658_v53  ;;  %v6462_v58 = vld [vmem:[%s7835_s1 + $0x140] sm:$0xff]   ;;  %v6496_v53 = vld [vmem:[%s6578_s6 + $0x14] ss:$0 sps:$4 sm:$0x66]   ;;  %v6494_v54 = vld [vmem:[%s7835_s1 + $0x238] sm:$0xff]  }
 0x1c8   : > { %6035 = vmatpush3.bf16.msra.mxu1 %v6429_v59  ;;  %6016 = vmatprep.subr.bf16.mxu0 %v6506_v1  ;;  %v6463_v59 = vld [vmem:[%s7835_s1 + $0x180] sm:$0xff]  }
 0x1c9   : > { %6036 = vmatprep.subr.bf16.mxu1 %v6506_v1  ;;  %6030 = vmatprep.mubr.msk.bf16.mxu0 %vm6507_vm0, %v6506_v1 }
 0x1ca   : > { %6050 = vmatprep.mubr.msk.bf16.mxu1 %vm6507_vm0, %v6506_v1 }
 0x1cb   : > { %6017 = vmatpush3.bf16.msra.mxu0 %v6430_v60  ;;  %v6464_v60 = vld [vmem:[%s7835_s1 + $0x148] sm:$0xff]  }
 0x1cc   : > { %6037 = vmatpush3.bf16.msra.mxu1 %v6431_v61  ;;  %6018 = vmatprep.subr.bf16.mxu0 %v6506_v1  ;;  %v6465_v61 = vld [vmem:[%s7835_s1 + $0x188] sm:$0xff]  }
 0x1cd   : > { %6038 = vmatprep.subr.bf16.mxu1 %v6506_v1 }
 0x1cf   : > { %6019 = vmatpush3.bf16.msra.mxu0 %v6432_v62  ;;  %v6466_v62 = vld [vmem:[%s7835_s1 + $0x150] sm:$0xff]  }
 0x1d0   : > { %6039 = vmatpush3.bf16.msra.mxu1 %v6433_v63  ;;  %6020 = vmatprep.subr.bf16.mxu0 %v6506_v1  ;;  %v6467_v63 = vld [vmem:[%s7835_s1 + $0x190] sm:$0xff]  }
 0x1d1   : > { %6040 = vmatprep.subr.bf16.mxu1 %v6506_v1 }
 0x1d3   : > { %6021 = vmatpush3.bf16.msra.mxu0 %v6434_v0  ;;  %v6468_v0 = vld [vmem:[%s7835_s1 + $0x158] sm:$0xff]  }
 0x1d4   : > { %6041 = vmatpush3.bf16.msra.mxu1 %v6435_v2  ;;  %6022 = vmatprep.subr.bf16.mxu0 %v6506_v1  ;;  %v6469_v2 = vld [vmem:[%s7835_s1 + $0x198] sm:$0xff]  }
 0x1d5   : > { %6042 = vmatprep.subr.bf16.mxu1 %v6506_v1 }
 0x1d7   : > { %6023 = vmatpush3.bf16.msra.mxu0 %v6436_v3  ;;  %v6470_v3 = vld [vmem:[%s7835_s1 + $0x160] sm:$0xff]  }
 0x1d8   : > { %6043 = vmatpush3.bf16.msra.mxu1 %v6437_v4  ;;  %6024 = vmatprep.subr.bf16.mxu0 %v6506_v1  ;;  %v6471_v4 = vld [vmem:[%s7835_s1 + $0x1a0] sm:$0xff]  }
 0x1d9   : > { %v1850_v7 = vpop.f32.mrb[28].mxu0  ;;  %6044 = vmatprep.subr.bf16.mxu1 %v6506_v1 }
 0x1da   : > { %v1856_v8 = vadd.f32 %v1850_v7, %v1745_v46  ;;  %v1957_v9 = vpop.f32.mrb[28].mxu1  ;;  %v5752_v10 = vpop.f32.mrb[29].mxu0 }
 0x1db   : > { %v5772_v11 = vpop.f32.mrb[29].mxu1  ;;  %v1853_v12 = vpop.f32.mrb[30].mxu0  ;;  %6025 = vmatpush3.bf16.msra.mxu0 %v6438_v5  ;;  %v6472_v5 = vld [vmem:[%s7835_s1 + $0x168] sm:$0xff]  }
 0x1dc   : > { %v1963_v14 = vadd.f32 %v1957_v9, %v1856_v8  ;;  %v1960_v15 = vpop.f32.mrb[30].mxu1  ;;  %6045 = vmatpush3.bf16.msra.mxu1 %v6439_v6  ;;  %v5753_v16 = vpop.f32.mrb[31].mxu0  ;;  %6026 = vmatprep.subr.bf16.mxu0 %v6506_v1  ;;  %v6473_v6 = vld [vmem:[%s7835_s1 + $0x1a8] sm:$0xff]  }
 0x1dd   : > { %v5773_v18 = vpop.f32.mrb[31].mxu1  ;;  %6046 = vmatprep.subr.bf16.mxu1 %v6506_v1  ;;  %v6475_v16 = vld [vmem:[%s7835_s1 + $0x1b0] sm:$0xff]  }
 0x1de   : > { %v6478_v18 = vld [vmem:[%s6578_s6 + $0x10] ss:$0 sps:$4 sm:$0x66]  }
 0x1df   : > { %6027 = vmatpush3.bf16.msra.mxu0 %v6440_v13  ;;  %v6474_v13 = vld [vmem:[%s7835_s1 + $0x170] sm:$0xff]  }
 0x1e0   : > { %6047 = vmatpush3.bf16.msra.mxu1 %v6441_v17  ;;  %6028 = vmatprep.subr.bf16.mxu0 %v6506_v1 }
 0x1e1   : > { %6048 = vmatprep.subr.bf16.mxu1 %v6506_v1 }
 0x1e3   : > { %6029 = vmatpush3.bf16.msra.mxu0 %v6442_v19  ;;  %v6476_v19 = vld [vmem:[%s7835_s1 + $0x178] sm:$0xff]  }
 0x1e4   : > { %6049 = vmatpush3.bf16.msra.mxu1 %v6443_v21  ;;  %6054 = vmatprep.subr.bf16.mxu0 %v6506_v1  ;;  %v3774_v21 = vrot.slane %v6478_v18, 1 }
 0x1e5   : > { %6074 = vmatprep.subr.bf16.mxu1 %v6506_v1 }
 0x1e6   : > { %6031 = vmatmul.mubr.bf16.vlgmr.msra.gmra.mrb[56].mxu0 %v4911_v22  ;;  %v6479_v22 = vld [vmem:[%s7835_s1 + $0x1c0] sm:$0xff]  }
 0x1e7   : > { %6051 = vmatmul.mubr.bf16.vlgmr.msra.gmra.mrb[56].mxu1 %v3440_v23  ;;  %6055 = vmatpush3.bf16.msra.mxu0 %v6445_v24  ;;  %v5049_v23 = vld [vmem:[%s6578_s6 + $0x14] sm:$0x3]  ;;  %v6480_v24 = vld [vmem:[%s7835_s1 + $0x200] sm:$0xff]  }
 0x1e8   : > { %6075 = vmatpush3.bf16.msra.mxu1 %v6446_v25  ;;  %6056 = vmatprep.subr.bf16.mxu0 %v6506_v1  ;;  %v6481_v25 = vld [vmem:[%s7835_s1 + $0x1c8] sm:$0xff]  }
 0x1e9   : > { %6076 = vmatprep.subr.bf16.mxu1 %v6506_v1  ;;  %6070 = vmatprep.mubr.msk.bf16.mxu0 %vm6507_vm0, %v6506_v1 }
 0x1ea   : > { %6090 = vmatprep.mubr.msk.bf16.mxu1 %vm6507_vm0, %v6506_v1 }
 0x1eb   : > { %6057 = vmatpush3.bf16.msra.mxu0 %v6447_v26  ;;  %v6482_v26 = vld [vmem:[%s7835_s1 + $0x208] sm:$0xff]  }
 0x1ec   : > { %6077 = vmatpush3.bf16.msra.mxu1 %v6448_v27  ;;  %6058 = vmatprep.subr.bf16.mxu0 %v6506_v1  ;;  %v6483_v27 = vld [vmem:[%s7835_s1 + $0x1d0] sm:$0xff]  }
 0x1ed   : > { %6078 = vmatprep.subr.bf16.mxu1 %v6506_v1 }
 0x1ef   : > { %6059 = vmatpush3.bf16.msra.mxu0 %v6449_v28  ;;  %v6484_v28 = vld [vmem:[%s7835_s1 + $0x210] sm:$0xff]  }
 0x1f0   : > { %6079 = vmatpush3.bf16.msra.mxu1 %v6450_v29  ;;  %6060 = vmatprep.subr.bf16.mxu0 %v6506_v1  ;;  %v6485_v29 = vld [vmem:[%s7835_s1 + $0x1d8] sm:$0xff]  }
 0x1f1   : > { %6080 = vmatprep.subr.bf16.mxu1 %v6506_v1 }
 0x1f3   : > { %6061 = vmatpush3.bf16.msra.mxu0 %v6451_v30  ;;  %v6486_v30 = vld [vmem:[%s7835_s1 + $0x218] sm:$0xff]  }
 0x1f4   : > { %6081 = vmatpush3.bf16.msra.mxu1 %v6452_v31  ;;  %6062 = vmatprep.subr.bf16.mxu0 %v6506_v1  ;;  %v6487_v31 = vld [vmem:[%s7835_s1 + $0x1e0] sm:$0xff]  }
 0x1f5   : > { %6082 = vmatprep.subr.bf16.mxu1 %v6506_v1 }
 0x1f7   : > { %6063 = vmatpush3.bf16.msra.mxu0 %v6453_v32  ;;  %v6488_v32 = vld [vmem:[%s7835_s1 + $0x220] sm:$0xff]  }
 0x1f8   : > { %6083 = vmatpush3.bf16.msra.mxu1 %v6454_v33  ;;  %6064 = vmatprep.subr.bf16.mxu0 %v6506_v1  ;;  %v6495_v33 = vld [vmem:[%s6578_s6 + $0x14] ss:$0 sps:$4 sm:$0x77]  }
 0x1f9   : > { %v2074_v38 = vpop.f32.mrb[32].mxu0  ;;  %6084 = vmatprep.subr.bf16.mxu1 %v6506_v1 }
 0x1fa   : > { %v2080_v39 = vadd.f32 %v2074_v38, %v1963_v14  ;;  %v2185_v40 = vpop.f32.mrb[32].mxu1  ;;  %v5792_v41 = vpop.f32.mrb[33].mxu0 }
 0x1fb   : > { %v5812_v42 = vpop.f32.mrb[33].mxu1  ;;  %v2077_v43 = vpop.f32.mrb[34].mxu0  ;;  %6065 = vmatpush3.bf16.msra.mxu0 %v6455_v35  ;;  %v6489_v35 = vld [vmem:[%s7835_s1 + $0x1e8] sm:$0xff]   ;;  %v3995_v41 = vshll.u32 %v6495_v33, 16 }
 0x1fc   : > { %v2191_v46 = vadd.f32 %v2185_v40, %v2080_v39  ;;  %v2188_v47 = vpop.f32.mrb[34].mxu1  ;;  %6085 = vmatpush3.bf16.msra.mxu1 %v6456_v37  ;;  %v5793_v48 = vpop.f32.mrb[35].mxu0  ;;  %6066 = vmatprep.subr.bf16.mxu0 %v6506_v1 }
 0x1fd   : > { %v5813_v50 = vpop.f32.mrb[35].mxu1  ;;  %6086 = vmatprep.subr.bf16.mxu1 %v6506_v1  ;;  %v6492_v48 = vld [vmem:[%s7835_s1 + $0x230] sm:$0xff]  }
 0x1fe   : > { %v2192_v51 = vadd.f32 %v7370_v34, %v2191_v46  ;;  %v3993_v50 = vshrl.u32 %v6495_v33, 16 }
 0x1ff   : > { %6067 = vmatpush3.bf16.msra.mxu0 %v6457_v44  ;;  %v6491_v44 = vld [vmem:[%s7835_s1 + $0x1f0] sm:$0xff]  }
 0x200   : > { %4694 = vst [vmem:[%s7378_s11 + $0x4] sm:$0xf] %v2192_v51  ;;  %6087 = vmatpush3.bf16.msra.mxu1 %v6458_v49  ;;  %6068 = vmatprep.subr.bf16.mxu0 %v6506_v1  ;;  %v3997_v51 = vrot.slane %v3995_v41, 1 }
 0x201   : > { %6088 = vmatprep.subr.bf16.mxu1 %v6506_v1 }
 0x203   : > { %6069 = vmatpush3.bf16.msra.mxu0 %v6459_v52  ;;  %v6493_v52 = vld [vmem:[%s7835_s1 + $0x1f8] sm:$0xff]  }
 0x204   : > { %6089 = vmatpush3.bf16.msra.mxu1 %v6460_v55  ;;  %6094 = vmatprep.subr.bf16.mxu0 %v6506_v1  ;;  %v3998_v55 = vor.u32 %v3997_v51, %v3993_v50 }
 0x205   : > { %6114 = vmatprep.subr.bf16.mxu1 %v6506_v1 }
 0x206   : > { %6071 = vmatmul.mubr.bf16.vlgmr.msra.gmra.mrb[60].mxu0 %v4972_v56  ;;  %v4109_v56 = vrot.slane %v6496_v53, 1 }
 0x207   : > { %6091 = vmatmul.mubr.bf16.vlgmr.msra.gmra.mrb[60].mxu1 %v3663_v57  ;;  %6095 = vmatpush3.bf16.msra.mxu0 %v6462_v58 }
 0x208   : > { %6115 = vmatpush3.bf16.msra.mxu1 %v6463_v59  ;;  %6096 = vmatprep.subr.bf16.mxu0 %v6506_v1 }
 0x209   : > { %6116 = vmatprep.subr.bf16.mxu1 %v6506_v1  ;;  %6110 = vmatprep.mubr.msk.bf16.mxu0 %vm6507_vm0, %v6506_v1 }
 0x20a   : > { %6130 = vmatprep.mubr.msk.bf16.mxu1 %vm6507_vm0, %v6506_v1 }
 0x20b   : > { %6097 = vmatpush3.bf16.msra.mxu0 %v6464_v60 }
 0x20c   : > { %6117 = vmatpush3.bf16.msra.mxu1 %v6465_v61  ;;  %6098 = vmatprep.subr.bf16.mxu0 %v6506_v1 }
 0x20d   : > { %6118 = vmatprep.subr.bf16.mxu1 %v6506_v1 }
 0x20f   : > { %6099 = vmatpush3.bf16.msra.mxu0 %v6466_v62 }
 0x210   : > { %6119 = vmatpush3.bf16.msra.mxu1 %v6467_v63  ;;  %6100 = vmatprep.subr.bf16.mxu0 %v6506_v1 }
 0x211   : > { %6120 = vmatprep.subr.bf16.mxu1 %v6506_v1 }
 0x213   : > { %6101 = vmatpush3.bf16.msra.mxu0 %v6468_v0 }
 0x214   : > { %6121 = vmatpush3.bf16.msra.mxu1 %v6469_v2  ;;  %6102 = vmatprep.subr.bf16.mxu0 %v6506_v1 }
 0x215   : > { %6122 = vmatprep.subr.bf16.mxu1 %v6506_v1 }
 0x217   : > { %6103 = vmatpush3.bf16.msra.mxu0 %v6470_v3 }
 0x218   : > { %6123 = vmatpush3.bf16.msra.mxu1 %v6471_v4  ;;  %6104 = vmatprep.subr.bf16.mxu0 %v6506_v1 }
 0x219   : > { %v2322_v7 = vpop.f32.mrb[36].mxu0  ;;  %6124 = vmatprep.subr.bf16.mxu1 %v6506_v1 }
 0x21a   : > { %v2410_v8 = vpop.f32.mrb[36].mxu1  ;;  %v5832_v9 = vpop.f32.mrb[37].mxu0 }
 0x21b   : > { %v7734_v10 = vadd.f32 %v2410_v8, %v2322_v7  ;;  %v5852_v11 = vpop.f32.mrb[37].mxu1  ;;  %v2325_v12 = vpop.f32.mrb[38].mxu0  ;;  %6105 = vmatpush3.bf16.msra.mxu0 %v6472_v5 }
 0x21c   : > { %v2413_v14 = vpop.f32.mrb[38].mxu1  ;;  %6125 = vmatpush3.bf16.msra.mxu1 %v6473_v6  ;;  %v5833_v15 = vpop.f32.mrb[39].mxu0  ;;  %6106 = vmatprep.subr.bf16.mxu0 %v6506_v1 }
 0x21d   : > { %v5853_v17 = vpop.f32.mrb[39].mxu1  ;;  %6126 = vmatprep.subr.bf16.mxu1 %v6506_v1 }
 0x21f   : > { %6107 = vmatpush3.bf16.msra.mxu0 %v6474_v13 }
 0x220   : > { %6127 = vmatpush3.bf16.msra.mxu1 %v6475_v16  ;;  %6108 = vmatprep.subr.bf16.mxu0 %v6506_v1 }
 0x221   : > { %6128 = vmatprep.subr.bf16.mxu1 %v6506_v1 }
 0x223   : > { %6109 = vmatpush3.bf16.msra.mxu0 %v6476_v19 }
 0x224   : > { %6129 = vmatpush3.bf16.msra.mxu1 %v6477_v20  ;;  %6134 = vmatprep.subr.bf16.mxu0 %v6506_v1 }
 0x225   : > { %6154 = vmatprep.subr.bf16.mxu1 %v6506_v1 }
 0x226   : > { %6111 = vmatmul.mubr.bf16.vlgmr.msra.gmra.mrb[64].mxu0 %v3774_v21 }
 0x227   : > { %6131 = vmatmul.mubr.bf16.vlgmr.msra.gmra.mrb[64].mxu1 %v5049_v23  ;;  %6135 = vmatpush3.bf16.msra.mxu0 %v6479_v22 }
 0x228   : > { %6155 = vmatpush3.bf16.msra.mxu1 %v6480_v24  ;;  %6136 = vmatprep.subr.bf16.mxu0 %v6506_v1 }
 0x229   : > { %6156 = vmatprep.subr.bf16.mxu1 %v6506_v1  ;;  %6150 = vmatprep.mubr.msk.bf16.mxu0 %vm6507_vm0, %v6506_v1 }
 0x22a   : > { %6170 = vmatprep.mubr.msk.bf16.mxu1 %vm6507_vm0, %v6506_v1 }
 0x22b   : > { %6137 = vmatpush3.bf16.msra.mxu0 %v6481_v25 }
 0x22c   : > { %6157 = vmatpush3.bf16.msra.mxu1 %v6482_v26  ;;  %6138 = vmatprep.subr.bf16.mxu0 %v6506_v1 }
 0x22d   : > { %6158 = vmatprep.subr.bf16.mxu1 %v6506_v1 }
 0x22f   : > { %6139 = vmatpush3.bf16.msra.mxu0 %v6483_v27 }
 0x230   : > { %6159 = vmatpush3.bf16.msra.mxu1 %v6484_v28  ;;  %6140 = vmatprep.subr.bf16.mxu0 %v6506_v1 }
 0x231   : > { %6160 = vmatprep.subr.bf16.mxu1 %v6506_v1 }
 0x233   : > { %6141 = vmatpush3.bf16.msra.mxu0 %v6485_v29 }
 0x234   : > { %6161 = vmatpush3.bf16.msra.mxu1 %v6486_v30  ;;  %6142 = vmatprep.subr.bf16.mxu0 %v6506_v1 }
 0x235   : > { %6162 = vmatprep.subr.bf16.mxu1 %v6506_v1 }
 0x237   : > { %6143 = vmatpush3.bf16.msra.mxu0 %v6487_v31 }
 0x238   : > { %6163 = vmatpush3.bf16.msra.mxu1 %v6488_v32  ;;  %6144 = vmatprep.subr.bf16.mxu0 %v6506_v1 }
 0x239   : > { %v2520_v37 = vpop.f32.mrb[40].mxu0  ;;  %6164 = vmatprep.subr.bf16.mxu1 %v6506_v1 }
 0x23a   : > { %v2526_v38 = vadd.f32 %v2520_v37, %v7734_v10  ;;  %v2626_v39 = vpop.f32.mrb[40].mxu1  ;;  %v5872_v40 = vpop.f32.mrb[41].mxu0 }
 0x23b   : > { %v5892_v42 = vpop.f32.mrb[41].mxu1  ;;  %v2523_v43 = vpop.f32.mrb[42].mxu0  ;;  %6145 = vmatpush3.bf16.msra.mxu0 %v6489_v35 }
 0x23c   : > { %v2632_v45 = vadd.f32 %v2626_v39, %v2526_v38  ;;  %v2629_v46 = vpop.f32.mrb[42].mxu1  ;;  %6165 = vmatpush3.bf16.msra.mxu1 %v6490_v36  ;;  %v5873_v47 = vpop.f32.mrb[43].mxu0  ;;  %6146 = vmatprep.subr.bf16.mxu0 %v6506_v1 }
 0x23d   : > { %v5893_v49 = vpop.f32.mrb[43].mxu1  ;;  %6166 = vmatprep.subr.bf16.mxu1 %v6506_v1 }
 0x23f   : > { %6147 = vmatpush3.bf16.msra.mxu0 %v6491_v44 }
 0x240   : > { %6167 = vmatpush3.bf16.msra.mxu1 %v6492_v48  ;;  %6148 = vmatprep.subr.bf16.mxu0 %v6506_v1 }
 0x241   : > { %6168 = vmatprep.subr.bf16.mxu1 %v6506_v1 }
 0x243   : > { %6149 = vmatpush3.bf16.msra.mxu0 %v6493_v52 }
 0x244   : > { %6169 = vmatpush3.bf16.msra.mxu1 %v6494_v54 }
 0x246   : > { %6151 = vmatmul.mubr.bf16.vlgmr.msra.gmra.mrb[68].mxu0 %v3998_v55 }
 0x247   : > { %6171 = vmatmul.mubr.bf16.vlgmr.msra.gmra.mrb[68].mxu1 %v4109_v56 }
 0x259   : > { %v2743_v57 = vpop.f32.mrb[44].mxu0 }
 0x25a   : > { %v2749_v58 = vadd.f32 %v2743_v57, %v2632_v45  ;;  %v2854_v59 = vpop.f32.mrb[44].mxu1  ;;  %v5912_v60 = vpop.f32.mrb[45].mxu0 }
 0x25b   : > { %v5932_v61 = vpop.f32.mrb[45].mxu1  ;;  %v2746_v62 = vpop.f32.mrb[46].mxu0 }
 0x25c   : > { %v2860_v63 = vadd.f32 %v2854_v59, %v2749_v58  ;;  %v2857_v0 = vpop.f32.mrb[46].mxu1  ;;  %v5913_v2 = vpop.f32.mrb[47].mxu0 }
 0x25d   : > { %v5933_v3 = vpop.f32.mrb[47].mxu1 }
 0x279   : > { %v2961_v4 = vpop.f32.mrb[48].mxu0 }
 0x27a   : > { %v2967_v5 = vadd.f32 %v2961_v4, %v2860_v63  ;;  %v3078_v6 = vpop.f32.mrb[48].mxu1  ;;  %v5952_v1 = vpop.f32.mrb[49].mxu0  ;;  %v6497_v63 = vld [vmem:[%s7836_s2] ss:$0 sm:$0xff] }
 0x27b   : > { %v5972_v7 = vpop.f32.mrb[49].mxu1  ;;  %v2964_v8 = vpop.f32.mrb[50].mxu0 }
 0x27c   : > { %v3084_v9 = vadd.f32 %v3078_v6, %v2967_v5  ;;  %v3081_v10 = vpop.f32.mrb[50].mxu1  ;;  %v5953_v11 = vpop.f32.mrb[51].mxu0 }
 0x27d   : > { %v5973_v12 = vpop.f32.mrb[51].mxu1 }
 0x299   : > { %v3189_v13 = vpop.f32.mrb[52].mxu0 }
 0x29a   : > { %v3195_v14 = vadd.f32 %v3189_v13, %v3084_v9  ;;  %v3326_v15 = vpop.f32.mrb[52].mxu1  ;;  %v5992_v16 = vpop.f32.mrb[53].mxu0 }
 0x29b   : > { %v6012_v17 = vpop.f32.mrb[53].mxu1  ;;  %v3192_v18 = vpop.f32.mrb[54].mxu0 }
 0x29c   : > { %v3196_v19 = vadd.f32 %v7370_v34, %v3195_v14  ;;  %v3329_v20 = vpop.f32.mrb[54].mxu1  ;;  %v5993_v21 = vpop.f32.mrb[55].mxu0 }
 0x29d   : > { %v6013_v22 = vpop.f32.mrb[55].mxu1 }
 0x29e   : > { %4910 = vst [vmem:[%s7378_s11 + $0x8] sm:$0xf] %v3196_v19 }
 0x2b9   : > { %v3414_v23 = vpop.f32.mrb[56].mxu0 }
 0x2ba   : > { %v3415_v24 = vadd.f32 %v3414_v23, %v3326_v15  ;;  %v3524_v25 = vpop.f32.mrb[56].mxu1  ;;  %v6032_v26 = vpop.f32.mrb[57].mxu0 }
 0x2bb   : > { %v6052_v27 = vpop.f32.mrb[57].mxu1  ;;  %v3417_v28 = vpop.f32.mrb[58].mxu0 }
 0x2bc   : > { %v3530_v29 = vadd.f32 %v3524_v25, %v3415_v24  ;;  %v3527_v30 = vpop.f32.mrb[58].mxu1  ;;  %v6033_v31 = vpop.f32.mrb[59].mxu0 }
 0x2bd   : > { %v6053_v32 = vpop.f32.mrb[59].mxu1 }
 0x2d9   : > { %v3630_v33 = vpop.f32.mrb[60].mxu0 }
 0x2da   : > { %v3636_v35 = vadd.f32 %v3630_v33, %v3530_v29  ;;  %v3747_v36 = vpop.f32.mrb[60].mxu1  ;;  %v6072_v37 = vpop.f32.mrb[61].mxu0 }
 0x2db   : > { %v6092_v38 = vpop.f32.mrb[61].mxu1  ;;  %v3633_v34 = vpop.f32.mrb[62].mxu0 }
 0x2dc   : > { %v3753_v39 = vadd.f32 %v3747_v36, %v3636_v35  ;;  %v3750_v40 = vpop.f32.mrb[62].mxu1  ;;  %v6073_v41 = vpop.f32.mrb[63].mxu0 }
 0x2dd   : > { %v6093_v42 = vpop.f32.mrb[63].mxu1 }
 0x2f9   : > { %v3858_v43 = vpop.f32.mrb[64].mxu0 }
 0x2fa   : > { %v3864_v44 = vadd.f32 %v3858_v43, %v3753_v39  ;;  %v3965_v45 = vpop.f32.mrb[64].mxu1  ;;  %v6112_v46 = vpop.f32.mrb[65].mxu0 }
 0x2fb   : > { %v6132_v47 = vpop.f32.mrb[65].mxu1  ;;  %v3861_v48 = vpop.f32.mrb[66].mxu0 }
 0x2fc   : > { %v3971_v49 = vadd.f32 %v3965_v45, %v3864_v44  ;;  %v3968_v50 = vpop.f32.mrb[66].mxu1  ;;  %v6113_v51 = vpop.f32.mrb[67].mxu0 }
 0x2fd   : > { %v6133_v52 = vpop.f32.mrb[67].mxu1 }
 0x319   : > { %v4082_v53 = vpop.f32.mrb[68].mxu0 }
 0x31a   : > { %v4088_v54 = vadd.f32 %v4082_v53, %v3971_v49  ;;  %v4193_v55 = vpop.f32.mrb[68].mxu1  ;;  %v6152_v56 = vpop.f32.mrb[69].mxu0 }
 0x31b   : > { %v6172_v57 = vpop.f32.mrb[69].mxu1  ;;  %v4085_v58 = vpop.f32.mrb[70].mxu0 }
 0x31c   : > { %v4199_v59 = vadd.f32 %v4193_v55, %v4088_v54  ;;  %v4196_v60 = vpop.f32.mrb[70].mxu1  ;;  %v6153_v61 = vpop.f32.mrb[71].mxu0 }
 0x31d   : > { %v6173_v62 = vpop.f32.mrb[71].mxu1 }
 0x31e   : > { %v4200_v0 = vadd.f32 %v6497_v63, %v4199_v59 }
 0x320   : > { %5126 = vst [vmem:[%s7378_s11 + $0xc] sm:$0xf] %v4200_v0 }
 0x321 PF: > { %s13_s12 = sadd.s32 1, %s6504_s12  }
 0x322   : > { %p10_p4 = scmp.ge.s32.totalorder %s13_s12, 4  }
 0x324   :  { %12 = sbr.rel (!%p10_p4) target bundleno = 1 (0x1), region = 78 }

// kernel: a_call__.4
= control target key start
LH: loop header
LB: loop body
LE: loop exit
PB: predicated region body
PF: predicated region fallthrough
CT: control target
= control target key end

     0   :  { %s9044_s9 = smov 0   ;;  %s10683_s0 = inlined_call_operand.vmem [shape: bf16[2,10,5,256], index: 0, kind: input, shape index: {}]   ;;  %s10684_s1 = inlined_call_operand.vmem [shape: bf16[8,256,128], index: 1, kind: input, shape index: {}]   ;;  %s10685_s2 = inlined_call_operand.vmem [shape: bf16[2,4,4,128], index: 2, kind: output, shape index: {}]  }
   0x1 LB: > { %s6214_s10 = sadd.s32 4294967295, %s9027_s9   ;;  %p6218_p0 = scmp.ge.s32.totalorder %s9027_s9, 1  ;;  %s9027_s9 = sphi %s9044_s9, %s12_s9  }
   0x2   : > { %p112_p1 = scmp.lt.s32.totalorder %s9027_s9, 3 }
   0x4   : > { %p113_p2 = pnand %p6218_p0, %p112_p1 }
   0x5   : > { %v8443_v0 = vld [vmem:[%s10684_s1 + $0xc0] sm:$0xff] (!%p113_p2)   ;;  %v8447_v4 = vld [vmem:[%s10684_s1 + $0xc8] sm:$0xff] (!%p113_p2)   ;;  %v8451_v8 = vld [vmem:[%s10684_s1 + $0xd0] sm:$0xff] (!%p113_p2)   ;;  %p134_p3 = scmp.lt.s32.totalorder (!%p113_p2), %s6214_s10, 1  ;;  %vm1626_vm0 = vcmask (!%p113_p2), 1043456  }
   0x6   : > { %116 = sbr.rel (%p113_p2) target bundleno = 783 (0x30f), region = 28  ;;  %v8444_v1 = vld [vmem:[%s10684_s1 + $0x40] sm:$0xff] (!%p113_p2)   ;;  %7730 = vmatprep.subr.bf16.mxu0 (!%p113_p2), %v8443_v0  ;;  %v8448_v5 = vld [vmem:[%s10684_s1 + $0x48] sm:$0xff] (!%p113_p2)   ;;  %v8452_v9 = vld [vmem:[%s10684_s1 + $0x50] sm:$0xff] (!%p113_p2)  }
   0x7   : > { %v8445_v2 = vld [vmem:[%s10684_s1 + $0x80] sm:$0xff] (!%p113_p2)   ;;  %7752 = vmatprep.subr.bf16.mxu1 (!%p113_p2), %v8444_v1  ;;  %v8449_v6 = vld [vmem:[%s10684_s1 + $0x88] sm:$0xff] (!%p113_p2)   ;;  %v8453_v10 = vld [vmem:[%s10684_s1 + $0x90] sm:$0xff] (!%p113_p2)  }
   0x8   : > { %v8446_v3 = vld [vmem:[%s10684_s1] sm:$0xff] (!%p113_p2)   ;;  %7731 = vmatpush3.bf16.msra.mxu0 (!%p113_p2), %v8445_v2  ;;  %v8450_v7 = vld [vmem:[%s10684_s1 + $0x8] sm:$0xff] (!%p113_p2)   ;;  %v8454_v11 = vld [vmem:[%s10684_s1 + $0x10] sm:$0xff] (!%p113_p2)  }
   0x9   : > { %7753 = vmatpush3.bf16.msra.mxu1 (!%p113_p2), %v8446_v3  ;;  %7732 = vmatprep.subr.bf16.mxu0 (!%p113_p2), %v8447_v4  ;;  %v8455_v12 = vld [vmem:[%s10684_s1 + $0xd8] sm:$0xff] (!%p113_p2)   ;;  %v8459_v16 = vld [vmem:[%s10684_s1 + $0xe0] sm:$0xff] (!%p113_p2)   ;;  %v8463_v20 = vld [vmem:[%s10684_s1 + $0xe8] sm:$0xff] (!%p113_p2)  }
   0xa   : > { %7754 = vmatprep.subr.bf16.mxu1 (!%p113_p2), %v8448_v5  ;;  %v8456_v13 = vld [vmem:[%s10684_s1 + $0x58] sm:$0xff] (!%p113_p2)   ;;  %v8460_v17 = vld [vmem:[%s10684_s1 + $0x60] sm:$0xff] (!%p113_p2)   ;;  %v8464_v21 = vld [vmem:[%s10684_s1 + $0x68] sm:$0xff] (!%p113_p2)  }
   0xb   : > { %v8457_v14 = vld [vmem:[%s10684_s1 + $0x98] sm:$0xff] (!%p113_p2)   ;;  %v8461_v18 = vld [vmem:[%s10684_s1 + $0xa0] sm:$0xff] (!%p113_p2)   ;;  %v8465_v22 = vld [vmem:[%s10684_s1 + $0xa8] sm:$0xff] (!%p113_p2)  }
   0xc   : > { %7733 = vmatpush3.bf16.msra.mxu0 (!%p113_p2), %v8449_v6  ;;  %v8458_v15 = vld [vmem:[%s10684_s1 + $0x18] sm:$0xff] (!%p113_p2)   ;;  %v8462_v19 = vld [vmem:[%s10684_s1 + $0x20] sm:$0xff] (!%p113_p2)   ;;  %v8466_v23 = vld [vmem:[%s10684_s1 + $0x28] sm:$0xff] (!%p113_p2)  }
   0xd   : > { %7755 = vmatpush3.bf16.msra.mxu1 %v8450_v7  ;;  %7734 = vmatprep.subr.bf16.mxu0 %v8451_v8  ;;  %s10687_s10 = smov (!%p134_p3, %s6214_s10), 1  ;;  %v8467_v24 = vld [vmem:[%s10684_s1 + $0xf0] sm:$0xff]   ;;  %v8471_v28 = vld [vmem:[%s10684_s1 + $0xf8] sm:$0xff]   ;;  %v8479_v38 = vld [vmem:[%s10684_s1 + $0x140] sm:$0xff]  }
   0xe   : > { %7756 = vmatprep.subr.bf16.mxu1 %v8452_v9  ;;  %v8468_v25 = vld [vmem:[%s10684_s1 + $0x70] sm:$0xff]   ;;  %s8434_s11 = smul.u32 80, %s10687_s10  ;;  %v8472_v29 = vld [vmem:[%s10684_s1 + $0x78] sm:$0xff]   ;;  %v8480_v39 = vld [vmem:[%s10684_s1 + $0x1c0] sm:$0xff]  }
   0xf   : > { %v8469_v26 = vld [vmem:[%s10684_s1 + $0xb0] sm:$0xff]   ;;  %v8473_v30 = vld [vmem:[%s10684_s1 + $0xb8] sm:$0xff]   ;;  %v8481_v46 = vld [vmem:[%s10684_s1 + $0x100] sm:$0xff]  }
  0x10   : > { %7735 = vmatpush3.bf16.msra.mxu0 %v8453_v10  ;;  %v8470_v27 = vld [vmem:[%s10684_s1 + $0x30] sm:$0xff]   ;;  %s9152_s22 = scalar_lea.vmem %s10683_s0, %s8434_s11  ;;  %v8474_v31 = vld [vmem:[%s10684_s1 + $0x38] sm:$0xff]   ;;  %v8482_v47 = vld [vmem:[%s10684_s1 + $0x180] sm:$0xff]  }
  0x11   : > { %7757 = vmatpush3.bf16.msra.mxu1 %v8454_v11  ;;  %7736 = vmatprep.subr.bf16.mxu0 %v8455_v12  ;;  %v178_v32 = vld [vmem:[%s9152_s22] sm:$0x77]  ;;  %v8484_v50 = vld [vmem:[%s10684_s1 + $0x1c8] sm:$0xff]   ;;  %v8488_v54 = vld [vmem:[%s10684_s1 + $0x1d0] sm:$0xff]  }
  0x12   : > { %7758 = vmatprep.subr.bf16.mxu1 %v8456_v13  ;;  %v145_v33 = vld [vmem:[%s9152_s22] sm:$0x33]  ;;  %v6254_v34 = vcombine.low %v178_v32, %v178_v32  ;;  %v6255_v35 = vcombine.high %v178_v32, %v178_v32  ;;  %v8483_v51 = vld [vmem:[%s10684_s1 + $0x148] sm:$0xff]   ;;  %v8487_v55 = vld [vmem:[%s10684_s1 + $0x150] sm:$0xff]  }
  0x13   : > { %v6272_v36 = vcombine.low %v145_v33, %v145_v33  ;;  %v6273_v37 = vcombine.high %v145_v33, %v145_v33  ;;  %v8486_v52 = vld [vmem:[%s10684_s1 + $0x188] sm:$0xff]   ;;  %v8490_v56 = vld [vmem:[%s10684_s1 + $0x190] sm:$0xff]   ;;  %v8492_v58 = vld [vmem:[%s10684_s1 + $0x1d8] sm:$0xff]  }
  0x14   : > { %7737 = vmatpush3.bf16.msra.mxu0 %v8457_v14  ;;  %v225_v40 = vshrl.u32 %v6255_v35, 16  ;;  %v227_v41 = vshll.u32 %v6255_v35, 16  ;;  %v218_v42 = vshrl.u32 %v6254_v34, 16  ;;  %v220_v43 = vshll.u32 %v6254_v34, 16  ;;  %v8485_v53 = vld [vmem:[%s10684_s1 + $0x108] sm:$0xff]   ;;  %v8489_v57 = vld [vmem:[%s10684_s1 + $0x110] sm:$0xff]  }
  0x15   : > { %7759 = vmatpush3.bf16.msra.mxu1 %v8458_v15  ;;  %7738 = vmatprep.subr.bf16.mxu0 %v8459_v16  ;;  %v8491_v59 = vld [vmem:[%s10684_s1 + $0x158] sm:$0xff]   ;;  %v8496_v62 = vld [vmem:[%s10684_s1 + $0x1e0] sm:$0xff]   ;;  %v8500_v2 = vld [vmem:[%s10684_s1 + $0x1e8] sm:$0xff]  }
  0x16   : > { %7760 = vmatprep.subr.bf16.mxu1 %v8460_v17  ;;  %504 = vmatprep.mubr.bf16.mxu1 %v6273_v37  ;;  %v229_v44 = vrot.slane %v227_v41, 1  ;;  %v222_v45 = vrot.slane %v220_v43, 1  ;;  %v8494_v60 = vld [vmem:[%s10684_s1 + $0x198] sm:$0xff]   ;;  %v8495_v63 = vld [vmem:[%s10684_s1 + $0x160] sm:$0xff]   ;;  %v8499_v3 = vld [vmem:[%s10684_s1 + $0x168] sm:$0xff]  }
  0x17   : > { %v8493_v61 = vld [vmem:[%s10684_s1 + $0x118] sm:$0xff]   ;;  %v8498_v0 = vld [vmem:[%s10684_s1 + $0x1a0] sm:$0xff]   ;;  %v8502_v4 = vld [vmem:[%s10684_s1 + $0x1a8] sm:$0xff]  }
  0x18   : > { %7739 = vmatpush3.bf16.msra.mxu0 %v8461_v18  ;;  %v230_v48 = vor.u32 %v229_v44, %v225_v40  ;;  %v223_v49 = vor.u32 %v222_v45, %v218_v42  ;;  %v8497_v1 = vld [vmem:[%s10684_s1 + $0x120] sm:$0xff]   ;;  %v8501_v5 = vld [vmem:[%s10684_s1 + $0x128] sm:$0xff]   ;;  %v8504_v6 = vld [vmem:[%s10684_s1 + $0x1f0] sm:$0xff]  }
  0x19   : > { %7761 = vmatpush3.bf16.msra.mxu1 %v8462_v19  ;;  %7740 = vmatprep.subr.bf16.mxu0 %v8463_v20  ;;  %v8503_v7 = vld [vmem:[%s10684_s1 + $0x170] sm:$0xff]   ;;  %v8508_v10 = vld [vmem:[%s10684_s1 + $0x1f8] sm:$0xff]   ;;  %v6290_v14 = vld [vmem:[%s9152_s22 + $0x8] sm:$0x33] }
  0x1a   : > { %7762 = vmatprep.subr.bf16.mxu1 %v8464_v21  ;;  %361 = vmatprep.mubr.bf16.mxu0 %v230_v48  ;;  %v8506_v8 = vld [vmem:[%s10684_s1 + $0x1b0] sm:$0xff]   ;;  %v8507_v11 = vld [vmem:[%s10684_s1 + $0x178] sm:$0xff]   ;;  %v6341_v15 = vld [vmem:[%s9152_s22 + $0x8] sm:$0x77]  ;;  %v6324_v16 = vcombine.high %v6290_v14, %v6290_v14 }
  0x1b   : > { %v8505_v9 = vld [vmem:[%s10684_s1 + $0x130] sm:$0xff]   ;;  %v8509_v12 = vld [vmem:[%s10684_s1 + $0x138] sm:$0xff]   ;;  %v6374_v17 = vcombine.low %v6341_v15, %v6341_v15  ;;  %v6375_v18 = vcombine.high %v6341_v15, %v6341_v15  ;;  %v8515_v19 = vld [vmem:[%s10684_s1 + $0x240] sm:$0xff]  }
  0x1c   : > { %7741 = vmatpush3.bf16.msra.mxu0 %v8465_v22  ;;  %v8510_v13 = vld [vmem:[%s10684_s1 + $0x1b8] sm:$0xff]   ;;  %v8516_v20 = vld [vmem:[%s10684_s1 + $0x2c0] sm:$0xff]   ;;  %v8520_v33 = vld [vmem:[%s10684_s1 + $0x2c8] sm:$0xff]  }
  0x1d   : > { %7763 = vmatpush3.bf16.msra.mxu1 %v8466_v23  ;;  %7742 = vmatprep.subr.bf16.mxu0 %v8467_v24  ;;  %v738_v21 = vshrl.u32 %v6375_v18, 16  ;;  %v740_v22 = vshll.u32 %v6375_v18, 16  ;;  %v731_v23 = vshrl.u32 %v6374_v17, 16  ;;  %v733_v24 = vshll.u32 %v6374_v17, 16  ;;  %v8521_v34 = vld [vmem:[%s10684_s1 + $0x208] sm:$0xff]   ;;  %v8524_v37 = vld [vmem:[%s10684_s1 + $0x2d0] sm:$0xff]  }
  0x1e   : > { %7764 = vmatprep.subr.bf16.mxu1 %v8468_v25  ;;  %v8517_v25 = vld [vmem:[%s10684_s1 + $0x200] sm:$0xff]   ;;  %v8522_v35 = vld [vmem:[%s10684_s1 + $0x288] sm:$0xff]   ;;  %v8527_v40 = vld [vmem:[%s10684_s1 + $0x258] sm:$0xff]  }
  0x1f   : > { %v8528_v41 = vld [vmem:[%s10684_s1 + $0x2d8] sm:$0xff]   ;;  %v8531_v44 = vld [vmem:[%s10684_s1 + $0x260] sm:$0xff]   ;;  %v8535_v48 = vld [vmem:[%s10684_s1 + $0x268] sm:$0xff]  }
  0x20   : > { %7743 = vmatpush3.bf16.msra.mxu0 %v8469_v26  ;;  %v6323_v26 = vcombine.low %v6290_v14, %v6290_v14  ;;  %v8529_v42 = vld [vmem:[%s10684_s1 + $0x218] sm:$0xff]   ;;  %v8532_v45 = vld [vmem:[%s10684_s1 + $0x2e0] sm:$0xff]   ;;  %v8556_v15 = vld [vmem:[%s10684_s1 + $0x3c8] sm:$0xff]  }
  0x21   : > { %7765 = vmatpush3.bf16.msra.mxu1 %v8470_v27  ;;  %7744 = vmatprep.subr.bf16.mxu0 %v8471_v28  ;;  %v742_v27 = vrot.slane %v740_v22, 1  ;;  %v735_v28 = vrot.slane %v733_v24, 1  ;;  %v8530_v43 = vld [vmem:[%s10684_s1 + $0x298] sm:$0xff]   ;;  %v8559_v17 = vld [vmem:[%s10684_s1 + $0x350] sm:$0xff]   ;;  %v8558_v18 = vld [vmem:[%s10684_s1 + $0x388] sm:$0xff]  }
  0x22   : > { %7766 = vmatprep.subr.bf16.mxu1 %v8472_v29  ;;  %v8518_v29 = vld [vmem:[%s10684_s1 + $0x280] sm:$0xff]   ;;  %v8562_v22 = vld [vmem:[%s10684_s1 + $0x390] sm:$0xff]   ;;  %v8565_v24 = vld [vmem:[%s10684_s1 + $0x318] sm:$0xff]  }
  0x23   : > { %v736_v32 = vor.u32 %v735_v28, %v731_v23  ;;  %v8564_v23 = vld [vmem:[%s10684_s1 + $0x3d8] sm:$0xff]   ;;  %v8569_v28 = vld [vmem:[%s10684_s1 + $0x320] sm:$0xff]  }
  0x24   : > { %7745 = vmatpush3.bf16.msra.mxu0 %v8473_v30  ;;  %v8519_v30 = vld [vmem:[%s10684_s1 + $0x248] sm:$0xff]  }
  0x25   : > { %7767 = vmatpush3.bf16.msra.mxu1 %v8474_v31  ;;  %7774 = vmatprep.subr.bf16.mxu0 %v8479_v38  ;;  %v743_v31 = vor.u32 %v742_v27, %v738_v21  ;;  %v8525_v38 = vld [vmem:[%s10684_s1 + $0x210] sm:$0xff]   ;;  %v8563_v21 = vld [vmem:[%s10684_s1 + $0x358] sm:$0xff]   ;;  %v8568_v27 = vld [vmem:[%s10684_s1 + $0x3e0] sm:$0xff]  }
  0x26   : > { %7796 = vmatprep.subr.bf16.mxu1 %v8480_v39  ;;  %v8526_v39 = vld [vmem:[%s10684_s1 + $0x290] sm:$0xff]  }
  0x27   : > { %362 = vmatmul.mubr.bf16.vlgmr.msra.gmra.mrb[0].mxu0 %v223_v49  ;;  %v8536_v49 = vld [vmem:[%s10684_s1 + $0x2e8] sm:$0xff]  }
  0x28   : > { %505 = vmatmul.mubr.bf16.vlgmr.msra.gmra.mrb[0].mxu1 %v6272_v36  ;;  %7775 = vmatpush3.bf16.msra.mxu0 %v8481_v46  ;;  %v8523_v36 = vld [vmem:[%s10684_s1 + $0x250] sm:$0xff]   ;;  %v8533_v46 = vld [vmem:[%s10684_s1 + $0x220] sm:$0xff]  }
  0x29   : > { %7797 = vmatpush3.bf16.msra.mxu1 %v8482_v47  ;;  %7776 = vmatprep.subr.bf16.mxu0 %v8483_v51  ;;  %v8534_v47 = vld [vmem:[%s10684_s1 + $0x2a0] sm:$0xff]   ;;  %v8538_v51 = vld [vmem:[%s10684_s1 + $0x2a8] sm:$0xff]  }
  0x2a   : > { %7798 = vmatprep.subr.bf16.mxu1 %v8484_v50  ;;  %682 = vmatprep.mubr.bf16.mxu0 %v6324_v16  ;;  %v8537_v50 = vld [vmem:[%s10684_s1 + $0x228] sm:$0xff]  }
  0x2b   : > { %874 = vmatprep.mubr.bf16.mxu1 %v743_v31  ;;  %v8557_v16 = vld [vmem:[%s10684_s1 + $0x308] sm:$0xff]  }
  0x2c   : > { %7777 = vmatpush3.bf16.msra.mxu0 %v8485_v53  ;;  %v8540_v53 = vld [vmem:[%s10684_s1 + $0x2f0] sm:$0xff]   ;;  %v8572_v31 = vld [vmem:[%s10684_s1 + $0x3e8] sm:$0xff]  }
  0x2d   : > { %7799 = vmatpush3.bf16.msra.mxu1 %v8486_v52  ;;  %7778 = vmatprep.subr.bf16.mxu0 %v8487_v55  ;;  %v8539_v52 = vld [vmem:[%s10684_s1 + $0x270] sm:$0xff]  }
  0x2e   : > { %7800 = vmatprep.subr.bf16.mxu1 %v8488_v54  ;;  %v8541_v54 = vld [vmem:[%s10684_s1 + $0x230] sm:$0xff]  }
  0x2f   : > { %v8542_v55 = vld [vmem:[%s10684_s1 + $0x2b0] sm:$0xff]  }
  0x30   : > { %7779 = vmatpush3.bf16.msra.mxu0 %v8489_v57  ;;  %v8544_v57 = vld [vmem:[%s10684_s1 + $0x2f8] sm:$0xff]  }
  0x31   : > { %7801 = vmatpush3.bf16.msra.mxu1 %v8490_v56  ;;  %7780 = vmatprep.subr.bf16.mxu0 %v8491_v59  ;;  %v8543_v56 = vld [vmem:[%s10684_s1 + $0x278] sm:$0xff]  }
  0x32   : > { %7802 = vmatprep.subr.bf16.mxu1 %v8492_v58  ;;  %v8545_v58 = vld [vmem:[%s10684_s1 + $0x238] sm:$0xff]  }
  0x33   : > { %v8546_v59 = vld [vmem:[%s10684_s1 + $0x2b8] sm:$0xff]  }
  0x34   : > { %7781 = vmatpush3.bf16.msra.mxu0 %v8493_v61 }
  0x35   : > { %7803 = vmatpush3.bf16.msra.mxu1 %v8494_v60  ;;  %7782 = vmatprep.subr.bf16.mxu0 %v8495_v63  ;;  %v6392_v60 = vld [vmem:[%s9152_s22 + $0x10] sm:$0x33] }
  0x36   : > { %7804 = vmatprep.subr.bf16.mxu1 %v8496_v62  ;;  %v6426_v61 = vcombine.high %v6392_v60, %v6392_v60  ;;  %v6443_v62 = vld [vmem:[%s9152_s22 + $0x10] sm:$0x77] }
  0x37   : > { %v6476_v63 = vcombine.low %v6443_v62, %v6443_v62 }
  0x38   : > { %7783 = vmatpush3.bf16.msra.mxu0 %v8497_v1  ;;  %v8551_v1 = vld [vmem:[%s10684_s1 + $0x340] sm:$0xff]  }
  0x39   : > { %7805 = vmatpush3.bf16.msra.mxu1 %v8498_v0  ;;  %7784 = vmatprep.subr.bf16.mxu0 %v8499_v3  ;;  %v6477_v0 = vcombine.high %v6443_v62, %v6443_v62  ;;  %v8552_v3 = vld [vmem:[%s10684_s1 + $0x3c0] sm:$0xff]   ;;  %v8592_v62 = vld [vmem:[%s10684_s1 + $0x48] sm:$0xff]  }
  0x3a   : > { %7806 = vmatprep.subr.bf16.mxu1 %v8500_v2  ;;  %v6425_v2 = vcombine.low %v6392_v60, %v6392_v60 }
  0x3c   : > { %7785 = vmatpush3.bf16.msra.mxu0 %v8501_v5  ;;  %v1111_v5 = vshll.u32 %v6477_v0, 16 }
  0x3d   : > { %7807 = vmatpush3.bf16.msra.mxu1 %v8502_v4  ;;  %7786 = vmatprep.subr.bf16.mxu0 %v8503_v7  ;;  %v1109_v4 = vshrl.u32 %v6477_v0, 16  ;;  %v1104_v7 = vshll.u32 %v6476_v63, 16  ;;  %v8594_v0 = vld [vmem:[%s10684_s1 + $0x8] sm:$0xff]  }
  0x3e   : > { %7808 = vmatprep.subr.bf16.mxu1 %v8504_v6  ;;  %v1102_v6 = vshrl.u32 %v6476_v63, 16  ;;  %v8595_v63 = vld [vmem:[%s10684_s1 + $0xd0] sm:$0xff]  }
  0x40   : > { %7787 = vmatpush3.bf16.msra.mxu0 %v8505_v9  ;;  %v1113_v9 = vrot.slane %v1111_v5, 1  ;;  %v8601_v5 = vld [vmem:[%s10684_s1 + $0x98] sm:$0xff]  }
  0x41   : > { %7809 = vmatpush3.bf16.msra.mxu1 %v8506_v8  ;;  %7788 = vmatprep.subr.bf16.mxu0 %v8507_v11  ;;  %v8553_v8 = vld [vmem:[%s10684_s1 + $0x300] sm:$0xff]  }
  0x42   : > { %7810 = vmatprep.subr.bf16.mxu1 %v8508_v10  ;;  %v1106_v10 = vrot.slane %v1104_v7, 1  ;;  %v8554_v11 = vld [vmem:[%s10684_s1 + $0x380] sm:$0xff]  }
  0x43   : > { %v8603_v7 = vld [vmem:[%s10684_s1 + $0xe0] sm:$0xff]  }
  0x44   : > { %7789 = vmatpush3.bf16.msra.mxu0 %v8509_v12  ;;  %v8555_v12 = vld [vmem:[%s10684_s1 + $0x348] sm:$0xff]   ;;  %v1107_v14 = vor.u32 %v1106_v10, %v1102_v6  ;;  %v8600_v6 = vld [vmem:[%s10684_s1 + $0x58] sm:$0xff]   ;;  %v8604_v10 = vld [vmem:[%s10684_s1 + $0x60] sm:$0xff]  }
  0x45   : > { %7811 = vmatpush3.bf16.msra.mxu1 %v8510_v13  ;;  %7818 = vmatprep.subr.bf16.mxu0 %v8515_v19  ;;  %v1114_v13 = vor.u32 %v1113_v9, %v1109_v4  ;;  %v8560_v19 = vld [vmem:[%s10684_s1 + $0x3d0] sm:$0xff]   ;;  %v8605_v9 = vld [vmem:[%s10684_s1 + $0xa0] sm:$0xff]  }
  0x46   : > { %7840 = vmatprep.subr.bf16.mxu1 %v8516_v20  ;;  %v8561_v20 = vld [vmem:[%s10684_s1 + $0x310] sm:$0xff]  }
  0x47   : > { %683 = vmatmul.mubr.bf16.vlgmr.msra.gmra.mrb[4].mxu0 %v6323_v26  ;;  %v8566_v26 = vld [vmem:[%s10684_s1 + $0x398] sm:$0xff]   ;;  %v8598_v4 = vld [vmem:[%s10684_s1 + $0x10] sm:$0xff]  }
  0x48   : > { %875 = vmatmul.mubr.bf16.vlgmr.msra.gmra.mrb[4].mxu1 %v736_v32  ;;  %7819 = vmatpush3.bf16.msra.mxu0 %v8517_v25  ;;  %v8567_v25 = vld [vmem:[%s10684_s1 + $0x360] sm:$0xff]   ;;  %v8573_v32 = vld [vmem:[%s10684_s1 + $0x328] sm:$0xff]  }
  0x49   : > { %7841 = vmatpush3.bf16.msra.mxu1 %v8518_v29  ;;  %7820 = vmatprep.subr.bf16.mxu0 %v8519_v30  ;;  %v8571_v29 = vld [vmem:[%s10684_s1 + $0x368] sm:$0xff]   ;;  %v8570_v30 = vld [vmem:[%s10684_s1 + $0x3a0] sm:$0xff]  }
  0x4a   : > { %7842 = vmatprep.subr.bf16.mxu1 %v8520_v33  ;;  %1053 = vmatprep.mubr.bf16.mxu0 %v6426_v61  ;;  %v8575_v33 = vld [vmem:[%s10684_s1 + $0x370] sm:$0xff]   ;;  %v8593_v61 = vld [vmem:[%s10684_s1 + $0x88] sm:$0xff]  }
  0x4b   : > { %1245 = vmatprep.mubr.bf16.mxu1 %v1114_v13  ;;  %v8609_v13 = vld [vmem:[%s10684_s1 + $0xa8] sm:$0xff]  }
  0x4c   : > { %7821 = vmatpush3.bf16.msra.mxu0 %v8521_v34  ;;  %v8574_v34 = vld [vmem:[%s10684_s1 + $0x3a8] sm:$0xff]  }
  0x4d   : > { %7843 = vmatpush3.bf16.msra.mxu1 %v8522_v35  ;;  %7822 = vmatprep.subr.bf16.mxu0 %v8523_v36  ;;  %v8576_v35 = vld [vmem:[%s10684_s1 + $0x3f0] sm:$0xff]  }
  0x4e   : > { %7844 = vmatprep.subr.bf16.mxu1 %v8524_v37  ;;  %v8577_v36 = vld [vmem:[%s10684_s1 + $0x330] sm:$0xff]   ;;  %v8579_v37 = vld [vmem:[%s10684_s1 + $0x378] sm:$0xff]  }
  0x50   : > { %7823 = vmatpush3.bf16.msra.mxu0 %v8525_v38  ;;  %v8578_v38 = vld [vmem:[%s10684_s1 + $0x3b0] sm:$0xff]  }
  0x51   : > { %7845 = vmatpush3.bf16.msra.mxu1 %v8526_v39  ;;  %7824 = vmatprep.subr.bf16.mxu0 %v8527_v40  ;;  %v8580_v39 = vld [vmem:[%s10684_s1 + $0x3f8] sm:$0xff]  }
  0x52   : > { %7846 = vmatprep.subr.bf16.mxu1 %v8528_v41  ;;  %v8581_v40 = vld [vmem:[%s10684_s1 + $0x338] sm:$0xff]  }
  0x53   : > { %v6494_v41 = vld [vmem:[%s9152_s22 + $0x18] sm:$0x33] }
  0x54   : > { %7825 = vmatpush3.bf16.msra.mxu0 %v8529_v42  ;;  %v6528_v42 = vcombine.high %v6494_v41, %v6494_v41 }
  0x55   : > { %7847 = vmatpush3.bf16.msra.mxu1 %v8530_v43  ;;  %7826 = vmatprep.subr.bf16.mxu0 %v8531_v44  ;;  %v6545_v43 = vld [vmem:[%s9152_s22 + $0x18] sm:$0x77] }
  0x56   : > { %7848 = vmatprep.subr.bf16.mxu1 %v8532_v45  ;;  %v6578_v44 = vcombine.low %v6545_v43, %v6545_v43  ;;  %v6579_v45 = vcombine.high %v6545_v43, %v6545_v43  ;;  %v8628_v43 = vld [vmem:[%s10684_s1 + $0x1c8] sm:$0xff]  }
  0x58   : > { %7827 = vmatpush3.bf16.msra.mxu0 %v8533_v46  ;;  %v8587_v46 = vld [vmem:[%s10684_s1 + $0xc0] sm:$0xff]  }
  0x59   : > { %7849 = vmatpush3.bf16.msra.mxu1 %v8534_v47  ;;  %7828 = vmatprep.subr.bf16.mxu0 %v8535_v48  ;;  %v8582_v47 = vld [vmem:[%s10684_s1 + $0x3b8] sm:$0xff]   ;;  %v6527_v48 = vcombine.low %v6494_v41, %v6494_v41 }
  0x5a   : > { %7850 = vmatprep.subr.bf16.mxu1 %v8536_v49  ;;  %v1480_v49 = vshrl.u32 %v6579_v45, 16 }
  0x5c   : > { %7829 = vmatpush3.bf16.msra.mxu0 %v8537_v50  ;;  %v1482_v50 = vshll.u32 %v6579_v45, 16  ;;  %v8630_v45 = vld [vmem:[%s10684_s1 + $0x188] sm:$0xff]  }
  0x5d   : > { %7851 = vmatpush3.bf16.msra.mxu1 %v8538_v51  ;;  %7830 = vmatprep.subr.bf16.mxu0 %v8539_v52  ;;  %v1473_v51 = vshrl.u32 %v6578_v44, 16  ;;  %v1475_v52 = vshll.u32 %v6578_v44, 16  ;;  %v8629_v44 = vld [vmem:[%s10684_s1 + $0x108] sm:$0xff]  }
  0x5e   : > { %7852 = vmatprep.subr.bf16.mxu1 %v8540_v53  ;;  %v8588_v53 = vld [vmem:[%s10684_s1 + $0x40] sm:$0xff]  }
  0x60   : > { %7831 = vmatpush3.bf16.msra.mxu0 %v8541_v54  ;;  %v8589_v54 = vld [vmem:[%s10684_s1 + $0x80] sm:$0xff]  }
  0x61   : > { %7853 = vmatpush3.bf16.msra.mxu1 %v8542_v55  ;;  %7832 = vmatprep.subr.bf16.mxu0 %v8543_v56  ;;  %v1484_v55 = vrot.slane %v1482_v50, 1  ;;  %v1477_v56 = vrot.slane %v1475_v52, 1  ;;  %v8635_v50 = vld [vmem:[%s10684_s1 + $0x158] sm:$0xff]  }
  0x62   : > { %7854 = vmatprep.subr.bf16.mxu1 %v8544_v57  ;;  %v8590_v57 = vld [vmem:[%s10684_s1] sm:$0xff]   ;;  %v8637_v52 = vld [vmem:[%s10684_s1 + $0x118] sm:$0xff]  }
  0x63   : > { %v1478_v60 = vor.u32 %v1477_v56, %v1473_v51  ;;  %v8636_v51 = vld [vmem:[%s10684_s1 + $0x1d8] sm:$0xff]   ;;  %v8641_v56 = vld [vmem:[%s10684_s1 + $0x120] sm:$0xff]  }
  0x64   : > { %7833 = vmatpush3.bf16.msra.mxu0 %v8545_v58  ;;  %v8591_v58 = vld [vmem:[%s10684_s1 + $0xc8] sm:$0xff]  }
  0x65   : > { %7855 = vmatpush3.bf16.msra.mxu1 %v8546_v59  ;;  %7862 = vmatprep.subr.bf16.mxu0 %v8551_v1  ;;  %v1485_v59 = vor.u32 %v1484_v55, %v1480_v49  ;;  %v8597_v1 = vld [vmem:[%s10684_s1 + $0x90] sm:$0xff]   ;;  %v8640_v55 = vld [vmem:[%s10684_s1 + $0x1e0] sm:$0xff]  }
  0x66   : > { %7884 = vmatprep.subr.bf16.mxu1 %v8552_v3  ;;  %v8599_v3 = vld [vmem:[%s10684_s1 + $0xd8] sm:$0xff]   ;;  %v8634_v49 = vld [vmem:[%s10684_s1 + $0x190] sm:$0xff]  }
  0x67   : > { %1054 = vmatmul.mubr.bf16.vlgmr.msra.gmra.mrb[8].mxu0 %v6425_v2  ;;  %v8596_v2 = vld [vmem:[%s10684_s1 + $0x50] sm:$0xff]  }
  0x68   : > { %7863 = vmatpush3.bf16.msra.mxu0 %v8553_v8  ;;  %1246 = vmatmul.mubr.bf16.vlgmr.msra.gmra.mrb[8].mxu1 %v1107_v14  ;;  %v8602_v8 = vld [vmem:[%s10684_s1 + $0x18] sm:$0xff]   ;;  %v8608_v14 = vld [vmem:[%s10684_s1 + $0x68] sm:$0xff]  }
  0x69   : > { %7864 = vmatprep.subr.bf16.mxu0 %v8555_v12  ;;  %7885 = vmatpush3.bf16.msra.mxu1 %v8554_v11  ;;  %v8607_v11 = vld [vmem:[%s10684_s1 + $0xe8] sm:$0xff]   ;;  %v8606_v12 = vld [vmem:[%s10684_s1 + $0x20] sm:$0xff]  }
  0x6a   : > { %7886 = vmatprep.subr.bf16.mxu1 %v8556_v15  ;;  %1424 = vmatprep.mubr.bf16.mxu0 %v6528_v42  ;;  %v8611_v15 = vld [vmem:[%s10684_s1 + $0xf0] sm:$0xff]   ;;  %v8627_v42 = vld [vmem:[%s10684_s1 + $0x148] sm:$0xff]  }
  0x6b   : > { %1616 = vmatprep.mubr.bf16.mxu1 %v1485_v59  ;;  %v8644_v59 = vld [vmem:[%s10684_s1 + $0x1e8] sm:$0xff]  }
  0x6c   : > { %7865 = vmatpush3.bf16.msra.mxu0 %v8557_v16  ;;  %v8610_v16 = vld [vmem:[%s10684_s1 + $0x28] sm:$0xff]  }
  0x6d   : > { %7866 = vmatprep.subr.bf16.mxu0 %v8559_v17  ;;  %7887 = vmatpush3.bf16.msra.mxu1 %v8558_v18  ;;  %v8613_v17 = vld [vmem:[%s10684_s1 + $0xb0] sm:$0xff]  }
  0x6e   : > { %7888 = vmatprep.subr.bf16.mxu1 %v8560_v19  ;;  %v8612_v18 = vld [vmem:[%s10684_s1 + $0x70] sm:$0xff]   ;;  %v8615_v19 = vld [vmem:[%s10684_s1 + $0xf8] sm:$0xff]  }
  0x70   : > { %7867 = vmatpush3.bf16.msra.mxu0 %v8561_v20  ;;  %v8614_v20 = vld [vmem:[%s10684_s1 + $0x30] sm:$0xff]  }
  0x71   : > { %7868 = vmatprep.subr.bf16.mxu0 %v8563_v21  ;;  %7889 = vmatpush3.bf16.msra.mxu1 %v8562_v22  ;;  %v8617_v21 = vld [vmem:[%s10684_s1 + $0xb8] sm:$0xff]  }
  0x72   : > { %7890 = vmatprep.subr.bf16.mxu1 %v8564_v23  ;;  %v8616_v22 = vld [vmem:[%s10684_s1 + $0x78] sm:$0xff]   ;;  %v6597_v23 = vld [vmem:[%s9152_s22 + $0x10] sm:$0x77] }
  0x74   : > { %7869 = vmatpush3.bf16.msra.mxu0 %v8565_v24  ;;  %v6630_v24 = vcombine.low %v6597_v23, %v6597_v23 }
  0x75   : > { %7870 = vmatprep.subr.bf16.mxu0 %v8567_v25  ;;  %7891 = vmatpush3.bf16.msra.mxu1 %v8566_v26  ;;  %v6631_v25 = vcombine.high %v6597_v23, %v6597_v23  ;;  %v6596_v26 = vld [vmem:[%s9152_s22 + $0x10] sm:$0x33] }
  0x76   : > { %7892 = vmatprep.subr.bf16.mxu1 %v8568_v27  ;;  %v6649_v27 = vcombine.high %v6596_v26, %v6596_v26 }
  0x78   : > { %7871 = vmatpush3.bf16.msra.mxu0 %v8569_v28  ;;  %v8623_v28 = vld [vmem:[%s10684_s1 + $0x140] sm:$0xff]  }
  0x79   : > { %7872 = vmatprep.subr.bf16.mxu0 %v8571_v29  ;;  %7893 = vmatpush3.bf16.msra.mxu1 %v8570_v30  ;;  %v8618_v29 = vld [vmem:[%s10684_s1 + $0x38] sm:$0xff]   ;;  %v1723_v30 = vshrl.u32 %v6631_v25, 16 }
  0x7a   : > { %7894 = vmatprep.subr.bf16.mxu1 %v8572_v31  ;;  %v1725_v31 = vshll.u32 %v6631_v25, 16  ;;  %v8664_v25 = vld [vmem:[%s10684_s1 + $0x2c8] sm:$0xff]  }
  0x7c   : > { %7873 = vmatpush3.bf16.msra.mxu0 %v8573_v32  ;;  %v1716_v32 = vshrl.u32 %v6630_v24, 16 }
  0x7d   : > { %7874 = vmatprep.subr.bf16.mxu0 %v8575_v33  ;;  %7895 = vmatpush3.bf16.msra.mxu1 %v8574_v34  ;;  %v1718_v33 = vshll.u32 %v6630_v24, 16  ;;  %v8624_v34 = vld [vmem:[%s10684_s1 + $0x1c0] sm:$0xff]  }
  0x7e   : > { %7896 = vmatprep.subr.bf16.mxu1 %v8576_v35  ;;  %v1727_v35 = vrot.slane %v1725_v31, 1  ;;  %v8670_v31 = vld [vmem:[%s10684_s1 + $0x290] sm:$0xff]  }
  0x80   : > { %7875 = vmatpush3.bf16.msra.mxu0 %v8577_v36  ;;  %v1720_v36 = vrot.slane %v1718_v33, 1  ;;  %v8672_v33 = vld [vmem:[%s10684_s1 + $0x2d8] sm:$0xff]  }
  0x81   : > { %7876 = vmatprep.subr.bf16.mxu0 %v8579_v37  ;;  %7897 = vmatpush3.bf16.msra.mxu1 %v8578_v38  ;;  %v8625_v37 = vld [vmem:[%s10684_s1 + $0x100] sm:$0xff]  }
  0x82   : > { %7898 = vmatprep.subr.bf16.mxu1 %v8580_v39  ;;  %v8626_v38 = vld [vmem:[%s10684_s1 + $0x180] sm:$0xff]   ;;  %v6648_v39 = vcombine.low %v6596_v26, %v6596_v26  ;;  %v1721_v41 = vor.u32 %v1720_v36, %v1716_v32  ;;  %v8665_v26 = vld [vmem:[%s10684_s1 + $0x208] sm:$0xff]   ;;  %v8671_v32 = vld [vmem:[%s10684_s1 + $0x258] sm:$0xff]  }
  0x83   : > { %v8675_v36 = vld [vmem:[%s10684_s1 + $0x260] sm:$0xff]  }
  0x84   : > { %7877 = vmatpush3.bf16.msra.mxu0 %v8581_v40  ;;  %v1728_v40 = vor.u32 %v1727_v35, %v1723_v30  ;;  %v8669_v30 = vld [vmem:[%s10684_s1 + $0x210] sm:$0xff]   ;;  %v8674_v35 = vld [vmem:[%s10684_s1 + $0x298] sm:$0xff]  }
  0x85   : > { %7906 = vmatprep.subr.bf16.mxu0 %v8587_v46  ;;  %7899 = vmatpush3.bf16.msra.mxu1 %v8582_v47  ;;  %v8631_v46 = vld [vmem:[%s10684_s1 + $0x150] sm:$0xff]  }
  0x86   : > { %7928 = vmatprep.subr.bf16.mxu1 %v8588_v53  ;;  %v8632_v47 = vld [vmem:[%s10684_s1 + $0x1d0] sm:$0xff]   ;;  %v8638_v53 = vld [vmem:[%s10684_s1 + $0x198] sm:$0xff]  }
  0x87   : > { %1425 = vmatmul.mubr.bf16.vlgmr.msra.gmra.mrb[12].mxu0 %v6527_v48  ;;  %v8633_v48 = vld [vmem:[%s10684_s1 + $0x110] sm:$0xff]  }
  0x88   : > { %7907 = vmatpush3.bf16.msra.mxu0 %v8589_v54  ;;  %1617 = vmatmul.mubr.bf16.vlgmr.msra.gmra.mrb[12].mxu1 %v1478_v60  ;;  %v8639_v54 = vld [vmem:[%s10684_s1 + $0x160] sm:$0xff]   ;;  %v8645_v60 = vld [vmem:[%s10684_s1 + $0x128] sm:$0xff]  }
  0x89   : > { %7908 = vmatprep.subr.bf16.mxu0 %v8591_v58  ;;  %7929 = vmatpush3.bf16.msra.mxu1 %v8590_v57  ;;  %v8642_v57 = vld [vmem:[%s10684_s1 + $0x1a0] sm:$0xff]   ;;  %v8643_v58 = vld [vmem:[%s10684_s1 + $0x168] sm:$0xff]  }
  0x8a   : > { %7930 = vmatprep.subr.bf16.mxu1 %v8592_v62  ;;  %2002 = vmatprep.mubr.bf16.mxu1 %v6649_v27  ;;  %v8647_v62 = vld [vmem:[%s10684_s1 + $0x170] sm:$0xff]   ;;  %v8666_v27 = vld [vmem:[%s10684_s1 + $0x288] sm:$0xff]  }
  0x8b   : > { %1859 = vmatprep.mubr.bf16.mxu0 %v1728_v40  ;;  %v8679_v40 = vld [vmem:[%s10684_s1 + $0x268] sm:$0xff]  }
  0x8c   : > { %7909 = vmatpush3.bf16.msra.mxu0 %v8593_v61  ;;  %v8646_v61 = vld [vmem:[%s10684_s1 + $0x1a8] sm:$0xff]  }
  0x8d   : > { %7910 = vmatprep.subr.bf16.mxu0 %v8595_v63  ;;  %7931 = vmatpush3.bf16.msra.mxu1 %v8594_v0  ;;  %v8648_v63 = vld [vmem:[%s10684_s1 + $0x1f0] sm:$0xff]  }
  0x8e   : > { %7932 = vmatprep.subr.bf16.mxu1 %v8596_v2  ;;  %v8649_v0 = vld [vmem:[%s10684_s1 + $0x130] sm:$0xff]   ;;  %v8651_v2 = vld [vmem:[%s10684_s1 + $0x178] sm:$0xff]  }
  0x90   : > { %7911 = vmatpush3.bf16.msra.mxu0 %v8597_v1  ;;  %v8650_v1 = vld [vmem:[%s10684_s1 + $0x1b0] sm:$0xff]  }
  0x91   : > { %7912 = vmatprep.subr.bf16.mxu0 %v8599_v3  ;;  %7933 = vmatpush3.bf16.msra.mxu1 %v8598_v4  ;;  %v8652_v3 = vld [vmem:[%s10684_s1 + $0x1f8] sm:$0xff]  }
  0x92   : > { %7934 = vmatprep.subr.bf16.mxu1 %v8600_v6  ;;  %v8653_v4 = vld [vmem:[%s10684_s1 + $0x138] sm:$0xff]  }
  0x93   : > { %v6666_v6 = vld [vmem:[%s9152_s22 + $0x18] sm:$0x33] }
  0x94   : > { %7913 = vmatpush3.bf16.msra.mxu0 %v8601_v5  ;;  %v8654_v5 = vld [vmem:[%s10684_s1 + $0x1b8] sm:$0xff]  }
  0x95   : > { %7914 = vmatprep.subr.bf16.mxu0 %v8603_v7  ;;  %7935 = vmatpush3.bf16.msra.mxu1 %v8602_v8  ;;  %v6700_v7 = vcombine.high %v6666_v6, %v6666_v6  ;;  %v6717_v8 = vld [vmem:[%s9152_s22 + $0x18] sm:$0x77] }
  0x96   : > { %7936 = vmatprep.subr.bf16.mxu1 %v8604_v10  ;;  %v6751_v10 = vcombine.high %v6717_v8, %v6717_v8 }
  0x98   : > { %7915 = vmatpush3.bf16.msra.mxu0 %v8605_v9  ;;  %v6750_v9 = vcombine.low %v6717_v8, %v6717_v8  ;;  %v8701_v8 = vld [vmem:[%s10684_s1 + $0x308] sm:$0xff]  }
  0x99   : > { %7916 = vmatprep.subr.bf16.mxu0 %v8607_v11  ;;  %7937 = vmatpush3.bf16.msra.mxu1 %v8606_v12  ;;  %v8659_v11 = vld [vmem:[%s10684_s1 + $0x240] sm:$0xff]  }
  0x9a   : > { %7938 = vmatprep.subr.bf16.mxu1 %v8608_v14  ;;  %v8660_v12 = vld [vmem:[%s10684_s1 + $0x2c0] sm:$0xff]   ;;  %v2235_v14 = vshll.u32 %v6751_v10, 16 }
  0x9c   : > { %7917 = vmatpush3.bf16.msra.mxu0 %v8609_v13  ;;  %v2233_v13 = vshrl.u32 %v6751_v10, 16  ;;  %v8702_v10 = vld [vmem:[%s10684_s1 + $0x388] sm:$0xff]  }
  0x9d   : > { %7918 = vmatprep.subr.bf16.mxu0 %v8611_v15  ;;  %7939 = vmatpush3.bf16.msra.mxu1 %v8610_v16  ;;  %v2226_v15 = vshrl.u32 %v6750_v9, 16  ;;  %v2228_v16 = vshll.u32 %v6750_v9, 16  ;;  %v8703_v9 = vld [vmem:[%s10684_s1 + $0x350] sm:$0xff]  }
  0x9e   : > { %7940 = vmatprep.subr.bf16.mxu1 %v8612_v18  ;;  %v6699_v18 = vcombine.low %v6666_v6, %v6666_v6 }
  0xa0   : > { %7919 = vmatpush3.bf16.msra.mxu0 %v8613_v17  ;;  %v8661_v17 = vld [vmem:[%s10684_s1 + $0x200] sm:$0xff]  }
  0xa1   : > { %7920 = vmatprep.subr.bf16.mxu0 %v8615_v19  ;;  %7941 = vmatpush3.bf16.msra.mxu1 %v8614_v20  ;;  %v2237_v19 = vrot.slane %v2235_v14, 1  ;;  %v2230_v20 = vrot.slane %v2228_v16, 1  ;;  %v8706_v14 = vld [vmem:[%s10684_s1 + $0x390] sm:$0xff]   ;;  %v8709_v16 = vld [vmem:[%s10684_s1 + $0x318] sm:$0xff]  }
  0xa2   : > { %7942 = vmatprep.subr.bf16.mxu1 %v8616_v22  ;;  %v8663_v22 = vld [vmem:[%s10684_s1 + $0x248] sm:$0xff]  }
  0xa3   : > { %v2238_v23 = vor.u32 %v2237_v19, %v2233_v13  ;;  %v2231_v24 = vor.u32 %v2230_v20, %v2226_v15  ;;  %v8707_v13 = vld [vmem:[%s10684_s1 + $0x358] sm:$0xff]  }
  0xa4   : > { %7921 = vmatpush3.bf16.msra.mxu0 %v8617_v21  ;;  %v8662_v21 = vld [vmem:[%s10684_s1 + $0x280] sm:$0xff]   ;;  %v8708_v15 = vld [vmem:[%s10684_s1 + $0x3d8] sm:$0xff]  }
  0xa5   : > { %7950 = vmatprep.subr.bf16.mxu0 %v8623_v28  ;;  %7943 = vmatpush3.bf16.msra.mxu1 %v8618_v29  ;;  %v8667_v28 = vld [vmem:[%s10684_s1 + $0x250] sm:$0xff]   ;;  %v8710_v20 = vld [vmem:[%s10684_s1 + $0x398] sm:$0xff]  }
  0xa6   : > { %7972 = vmatprep.subr.bf16.mxu1 %v8624_v34  ;;  %v8668_v29 = vld [vmem:[%s10684_s1 + $0x2d0] sm:$0xff]   ;;  %v8673_v34 = vld [vmem:[%s10684_s1 + $0x218] sm:$0xff]  }
  0xa7   : > { %1860 = vmatmul.mubr.bf16.vlgmr.msra.gmra.mrb[16].mxu0 %v1721_v41  ;;  %v8680_v41 = vld [vmem:[%s10684_s1 + $0x2e8] sm:$0xff]  }
  0xa8   : > { %2003 = vmatmul.mubr.bf16.vlgmr.msra.gmra.mrb[16].mxu1 %v6648_v39  ;;  %7951 = vmatpush3.bf16.msra.mxu0 %v8625_v37  ;;  %v8676_v37 = vld [vmem:[%s10684_s1 + $0x2e0] sm:$0xff]  }
  0xa9   : > { %7973 = vmatpush3.bf16.msra.mxu1 %v8626_v38  ;;  %7952 = vmatprep.subr.bf16.mxu0 %v8627_v42  ;;  %v8677_v38 = vld [vmem:[%s10684_s1 + $0x220] sm:$0xff]   ;;  %v8681_v42 = vld [vmem:[%s10684_s1 + $0x228] sm:$0xff]  }
  0xaa   : > { %7974 = vmatprep.subr.bf16.mxu1 %v8628_v43  ;;  %2178 = vmatprep.mubr.bf16.mxu0 %v6700_v7  ;;  %v8678_v39 = vld [vmem:[%s10684_s1 + $0x2a0] sm:$0xff]   ;;  %v8682_v43 = vld [vmem:[%s10684_s1 + $0x2a8] sm:$0xff]  }
  0xab   : > { %2369 = vmatprep.mubr.bf16.mxu1 %v2238_v23  ;;  %v8700_v7 = vld [vmem:[%s10684_s1 + $0x3c8] sm:$0xff]   ;;  %v8712_v23 = vld [vmem:[%s10684_s1 + $0x3e0] sm:$0xff]  }
  0xac   : > { %7953 = vmatpush3.bf16.msra.mxu0 %v8629_v44  ;;  %v8683_v44 = vld [vmem:[%s10684_s1 + $0x270] sm:$0xff]  }
  0xad   : > { %7975 = vmatpush3.bf16.msra.mxu1 %v8630_v45  ;;  %7954 = vmatprep.subr.bf16.mxu0 %v8631_v46  ;;  %v8684_v45 = vld [vmem:[%s10684_s1 + $0x2f0] sm:$0xff]  }
  0xae   : > { %7976 = vmatprep.subr.bf16.mxu1 %v8632_v47  ;;  %v8685_v46 = vld [vmem:[%s10684_s1 + $0x230] sm:$0xff]  }
  0xaf   : > { %v8686_v47 = vld [vmem:[%s10684_s1 + $0x2b0] sm:$0xff]  }
  0xb0   : > { %7955 = vmatpush3.bf16.msra.mxu0 %v8633_v48  ;;  %v8687_v48 = vld [vmem:[%s10684_s1 + $0x278] sm:$0xff]  }
  0xb1   : > { %7977 = vmatpush3.bf16.msra.mxu1 %v8634_v49  ;;  %7956 = vmatprep.subr.bf16.mxu0 %v8635_v50  ;;  %v8688_v49 = vld [vmem:[%s10684_s1 + $0x2f8] sm:$0xff]  }
  0xb2   : > { %7978 = vmatprep.subr.bf16.mxu1 %v8636_v51  ;;  %v8689_v50 = vld [vmem:[%s10684_s1 + $0x238] sm:$0xff]   ;;  %v6768_v51 = vld [vmem:[%s9152_s22 + $0x20] sm:$0x33] }
  0xb4   : > { %7957 = vmatpush3.bf16.msra.mxu0 %v8637_v52  ;;  %v6802_v52 = vcombine.high %v6768_v51, %v6768_v51 }
  0xb5   : > { %7979 = vmatpush3.bf16.msra.mxu1 %v8638_v53  ;;  %7958 = vmatprep.subr.bf16.mxu0 %v8639_v54  ;;  %v6819_v53 = vld [vmem:[%s9152_s22 + $0x20] sm:$0x77] }
  0xb6   : > { %7980 = vmatprep.subr.bf16.mxu1 %v8640_v55  ;;  %v6852_v54 = vcombine.low %v6819_v53, %v6819_v53  ;;  %v6853_v55 = vcombine.high %v6819_v53, %v6819_v53 }
  0xb8   : > { %7959 = vmatpush3.bf16.msra.mxu0 %v8641_v56  ;;  %v8695_v56 = vld [vmem:[%s10684_s1 + $0x340] sm:$0xff]  }
  0xb9   : > { %7981 = vmatpush3.bf16.msra.mxu1 %v8642_v57  ;;  %7960 = vmatprep.subr.bf16.mxu0 %v8643_v58  ;;  %v8690_v57 = vld [vmem:[%s10684_s1 + $0x2b8] sm:$0xff]   ;;  %v6801_v58 = vcombine.low %v6768_v51, %v6768_v51 }
  0xba   : > { %7982 = vmatprep.subr.bf16.mxu1 %v8644_v59  ;;  %v2602_v59 = vshrl.u32 %v6853_v55, 16 }
  0xbc   : > { %7961 = vmatpush3.bf16.msra.mxu0 %v8645_v60  ;;  %v2604_v60 = vshll.u32 %v6853_v55, 16 }
  0xbd   : > { %7983 = vmatpush3.bf16.msra.mxu1 %v8646_v61  ;;  %7962 = vmatprep.subr.bf16.mxu0 %v8647_v62  ;;  %v2595_v61 = vshrl.u32 %v6852_v54, 16  ;;  %v2597_v62 = vshll.u32 %v6852_v54, 16 }
  0xbe   : > { %7984 = vmatprep.subr.bf16.mxu1 %v8648_v63  ;;  %v8696_v63 = vld [vmem:[%s10684_s1 + $0x3c0] sm:$0xff]  }
  0xc0   : > { %7963 = vmatpush3.bf16.msra.mxu0 %v8649_v0  ;;  %v8697_v0 = vld [vmem:[%s10684_s1 + $0x300] sm:$0xff]  }
  0xc1   : > { %7985 = vmatpush3.bf16.msra.mxu1 %v8650_v1  ;;  %7964 = vmatprep.subr.bf16.mxu0 %v8651_v2  ;;  %v2606_v1 = vrot.slane %v2604_v60, 1  ;;  %v2599_v2 = vrot.slane %v2597_v62, 1  ;;  %v8734_v60 = vld [vmem:[%s10684_s1] sm:$0xff]  }
  0xc2   : > { %7986 = vmatprep.subr.bf16.mxu1 %v8652_v3  ;;  %v8698_v3 = vld [vmem:[%s10684_s1 + $0x380] sm:$0xff]  }
  0xc3   : > { %v2600_v6 = vor.u32 %v2599_v2, %v2595_v61  ;;  %v8735_v61 = vld [vmem:[%s10684_s1 + $0xc8] sm:$0xff]   ;;  %v8739_v2 = vld [vmem:[%s10684_s1 + $0xd0] sm:$0xff]  }
  0xc4   : > { %7965 = vmatpush3.bf16.msra.mxu0 %v8653_v4  ;;  %v8699_v4 = vld [vmem:[%s10684_s1 + $0x348] sm:$0xff]  }
  0xc5   : > { %7987 = vmatpush3.bf16.msra.mxu1 %v8654_v5  ;;  %7994 = vmatprep.subr.bf16.mxu0 %v8659_v11  ;;  %v2607_v5 = vor.u32 %v2606_v1, %v2602_v59  ;;  %v8704_v11 = vld [vmem:[%s10684_s1 + $0x3d0] sm:$0xff]   ;;  %v8736_v1 = vld [vmem:[%s10684_s1 + $0x48] sm:$0xff]  }
  0xc6   : > { %8016 = vmatprep.subr.bf16.mxu1 %v8660_v12  ;;  %v8705_v12 = vld [vmem:[%s10684_s1 + $0x310] sm:$0xff]  }
  0xc7   : > { %2179 = vmatmul.mubr.bf16.vlgmr.msra.gmra.mrb[20].mxu0 %v6699_v18  ;;  %v8711_v18 = vld [vmem:[%s10684_s1 + $0x360] sm:$0xff]  }
  0xc8   : > { %7995 = vmatpush3.bf16.msra.mxu0 %v8661_v17  ;;  %2370 = vmatmul.mubr.bf16.vlgmr.msra.gmra.mrb[20].mxu1 %v2231_v24 }
  0xc9   : > { %7996 = vmatprep.subr.bf16.mxu0 %v8663_v22  ;;  %8017 = vmatpush3.bf16.msra.mxu1 %v8662_v21 }
  0xca   : > { %8018 = vmatprep.subr.bf16.mxu1 %v8664_v25  ;;  %2547 = vmatprep.mubr.bf16.mxu0 %v6802_v52  ;;  %v8713_v25 = vld [vmem:[%s10684_s1 + $0x320] sm:$0xff]  }
  0xcb   : > { %2738 = vmatprep.mubr.bf16.mxu1 %v2607_v5  ;;  %v8740_v5 = vld [vmem:[%s10684_s1 + $0x50] sm:$0xff]  }
  0xcc   : > { %7997 = vmatpush3.bf16.msra.mxu0 %v8665_v26  ;;  %v8715_v26 = vld [vmem:[%s10684_s1 + $0x368] sm:$0xff]  }
  0xcd   : > { %7998 = vmatprep.subr.bf16.mxu0 %v8667_v28  ;;  %8019 = vmatpush3.bf16.msra.mxu1 %v8666_v27  ;;  %v8714_v27 = vld [vmem:[%s10684_s1 + $0x3a0] sm:$0xff]  }
  0xce   : > { %8020 = vmatprep.subr.bf16.mxu1 %v8668_v29 }
  0xd0   : > { %7999 = vmatpush3.bf16.msra.mxu0 %v8669_v30  ;;  %v8716_v30 = vld [vmem:[%s10684_s1 + $0x3e8] sm:$0xff]  }
  0xd1   : > { %8000 = vmatprep.subr.bf16.mxu0 %v8671_v32  ;;  %8021 = vmatpush3.bf16.msra.mxu1 %v8670_v31 }
  0xd2   : > { %8022 = vmatprep.subr.bf16.mxu1 %v8672_v33  ;;  %v8717_v33 = vld [vmem:[%s10684_s1 + $0x328] sm:$0xff]  }
  0xd4   : > { %8001 = vmatpush3.bf16.msra.mxu0 %v8673_v34 }
  0xd5   : > { %8002 = vmatprep.subr.bf16.mxu0 %v8675_v36  ;;  %8023 = vmatpush3.bf16.msra.mxu1 %v8674_v35  ;;  %v8719_v35 = vld [vmem:[%s10684_s1 + $0x370] sm:$0xff]  }
  0xd6   : > { %8024 = vmatprep.subr.bf16.mxu1 %v8676_v37  ;;  %v8718_v37 = vld [vmem:[%s10684_s1 + $0x3a8] sm:$0xff]  }
  0xd8   : > { %8003 = vmatpush3.bf16.msra.mxu0 %v8677_v38  ;;  %v8720_v38 = vld [vmem:[%s10684_s1 + $0x3f0] sm:$0xff]  }
  0xd9   : > { %8004 = vmatprep.subr.bf16.mxu0 %v8679_v40  ;;  %8025 = vmatpush3.bf16.msra.mxu1 %v8678_v39  ;;  %v8721_v39 = vld [vmem:[%s10684_s1 + $0x330] sm:$0xff]   ;;  %v8723_v40 = vld [vmem:[%s10684_s1 + $0x378] sm:$0xff]  }
  0xda   : > { %8026 = vmatprep.subr.bf16.mxu1 %v8680_v41  ;;  %v8722_v41 = vld [vmem:[%s10684_s1 + $0x3b0] sm:$0xff]  }
  0xdc   : > { %8005 = vmatpush3.bf16.msra.mxu0 %v8681_v42  ;;  %v8724_v42 = vld [vmem:[%s10684_s1 + $0x3f8] sm:$0xff]  }
  0xdd   : > { %8006 = vmatprep.subr.bf16.mxu0 %v8683_v44  ;;  %8027 = vmatpush3.bf16.msra.mxu1 %v8682_v43  ;;  %v8725_v43 = vld [vmem:[%s10684_s1 + $0x338] sm:$0xff]   ;;  %v6870_v44 = vld [vmem:[%s9152_s22 + $0x28] sm:$0x33] }
  0xde   : > { %8028 = vmatprep.subr.bf16.mxu1 %v8684_v45  ;;  %v6904_v45 = vcombine.high %v6870_v44, %v6870_v44  ;;  %v6903_v51 = vcombine.low %v6870_v44, %v6870_v44  ;;  %v8767_v44 = vld [vmem:[%s10684_s1 + $0x140] sm:$0xff]  }
  0xe0   : > { %8007 = vmatpush3.bf16.msra.mxu0 %v8685_v46  ;;  %v6921_v46 = vld [vmem:[%s9152_s22 + $0x28] sm:$0x77] }
  0xe1   : > { %8008 = vmatprep.subr.bf16.mxu0 %v8687_v48  ;;  %8029 = vmatpush3.bf16.msra.mxu1 %v8686_v47  ;;  %v6954_v47 = vcombine.low %v6921_v46, %v6921_v46  ;;  %v6955_v48 = vcombine.high %v6921_v46, %v6921_v46 }
  0xe2   : > { %8030 = vmatprep.subr.bf16.mxu1 %v8688_v49  ;;  %v8731_v49 = vld [vmem:[%s10684_s1 + $0xc0] sm:$0xff]  }
  0xe3   : > { %v2971_v52 = vshrl.u32 %v6955_v48, 16  ;;  %v2973_v53 = vshll.u32 %v6955_v48, 16  ;;  %v2964_v54 = vshrl.u32 %v6954_v47, 16  ;;  %v2966_v55 = vshll.u32 %v6954_v47, 16 }
  0xe4   : > { %8009 = vmatpush3.bf16.msra.mxu0 %v8689_v50  ;;  %v8726_v50 = vld [vmem:[%s10684_s1 + $0x3b8] sm:$0xff]  }
  0xe5   : > { %8038 = vmatprep.subr.bf16.mxu0 %v8695_v56  ;;  %8031 = vmatpush3.bf16.msra.mxu1 %v8690_v57  ;;  %v8732_v56 = vld [vmem:[%s10684_s1 + $0x40] sm:$0xff]   ;;  %v2968_v59 = vrot.slane %v2966_v55, 1 }
  0xe6   : > { %8060 = vmatprep.subr.bf16.mxu1 %v8696_v63  ;;  %v8733_v57 = vld [vmem:[%s10684_s1 + $0x80] sm:$0xff]  }
  0xe7   : > { %2548 = vmatmul.mubr.bf16.vlgmr.msra.gmra.mrb[24].mxu0 %v6801_v58  ;;  %v2975_v58 = vrot.slane %v2973_v53, 1  ;;  %v2969_v63 = vor.u32 %v2968_v59, %v2964_v54  ;;  %v8769_v53 = vld [vmem:[%s10684_s1 + $0x100] sm:$0xff]   ;;  %v8773_v59 = vld [vmem:[%s10684_s1 + $0x108] sm:$0xff]  }
  0xe8   : > { %8039 = vmatpush3.bf16.msra.mxu0 %v8697_v0  ;;  %2739 = vmatmul.mubr.bf16.vlgmr.msra.gmra.mrb[24].mxu1 %v2600_v6  ;;  %v8737_v0 = vld [vmem:[%s10684_s1 + $0x88] sm:$0xff]   ;;  %v8743_v6 = vld [vmem:[%s10684_s1 + $0xd8] sm:$0xff]   ;;  %v8770_v54 = vld [vmem:[%s10684_s1 + $0x180] sm:$0xff]  }
  0xe9   : > { %8040 = vmatprep.subr.bf16.mxu0 %v8699_v4  ;;  %8061 = vmatpush3.bf16.msra.mxu1 %v8698_v3  ;;  %v2976_v62 = vor.u32 %v2975_v58, %v2971_v52  ;;  %v8738_v3 = vld [vmem:[%s10684_s1 + $0x8] sm:$0xff]   ;;  %v8741_v4 = vld [vmem:[%s10684_s1 + $0x90] sm:$0xff]  }
  0xea   : > { %8062 = vmatprep.subr.bf16.mxu1 %v8700_v7  ;;  %2916 = vmatprep.mubr.bf16.mxu0 %v6904_v45  ;;  %v8742_v7 = vld [vmem:[%s10684_s1 + $0x10] sm:$0xff]   ;;  %v8768_v45 = vld [vmem:[%s10684_s1 + $0x1c0] sm:$0xff]   ;;  %v8771_v58 = vld [vmem:[%s10684_s1 + $0x148] sm:$0xff]  }
  0xeb   : > { %3107 = vmatprep.mubr.bf16.mxu1 %v2976_v62  ;;  %v8775_v62 = vld [vmem:[%s10684_s1 + $0x150] sm:$0xff]  }
  0xec   : > { %8041 = vmatpush3.bf16.msra.mxu0 %v8701_v8  ;;  %v8745_v8 = vld [vmem:[%s10684_s1 + $0x98] sm:$0xff]  }
  0xed   : > { %8042 = vmatprep.subr.bf16.mxu0 %v8703_v9  ;;  %8063 = vmatpush3.bf16.msra.mxu1 %v8702_v10  ;;  %v8744_v9 = vld [vmem:[%s10684_s1 + $0x58] sm:$0xff]   ;;  %v8747_v10 = vld [vmem:[%s10684_s1 + $0xe0] sm:$0xff]  }
  0xee   : > { %8064 = vmatprep.subr.bf16.mxu1 %v8704_v11  ;;  %v8746_v11 = vld [vmem:[%s10684_s1 + $0x18] sm:$0xff]  }
  0xf0   : > { %8043 = vmatpush3.bf16.msra.mxu0 %v8705_v12  ;;  %v8749_v12 = vld [vmem:[%s10684_s1 + $0xa0] sm:$0xff]  }
  0xf1   : > { %8044 = vmatprep.subr.bf16.mxu0 %v8707_v13  ;;  %8065 = vmatpush3.bf16.msra.mxu1 %v8706_v14  ;;  %v8748_v13 = vld [vmem:[%s10684_s1 + $0x60] sm:$0xff]  }
  0xf2   : > { %8066 = vmatprep.subr.bf16.mxu1 %v8708_v15  ;;  %v8751_v15 = vld [vmem:[%s10684_s1 + $0xe8] sm:$0xff]  }
  0xf4   : > { %8045 = vmatpush3.bf16.msra.mxu0 %v8709_v16  ;;  %v8750_v16 = vld [vmem:[%s10684_s1 + $0x20] sm:$0xff]  }
  0xf5   : > { %8046 = vmatprep.subr.bf16.mxu0 %v8711_v18  ;;  %8067 = vmatpush3.bf16.msra.mxu1 %v8710_v20 }
  0xf6   : > { %8068 = vmatprep.subr.bf16.mxu1 %v8712_v23 }
  0xf8   : > { %8047 = vmatpush3.bf16.msra.mxu0 %v8713_v25 }
  0xf9   : > { %8048 = vmatprep.subr.bf16.mxu0 %v8715_v26  ;;  %8069 = vmatpush3.bf16.msra.mxu1 %v8714_v27  ;;  %v8754_v27 = vld [vmem:[%s10684_s1 + $0x28] sm:$0xff]  }
  0xfa   : > { %v7746_v28 = vpop.f32.mrb[0].mxu0  ;;  %8070 = vmatprep.subr.bf16.mxu1 %v8716_v30  ;;  %v8755_v30 = vld [vmem:[%s10684_s1 + $0xf0] sm:$0xff]  }
  0xfb   : > { %v7768_v17 = vpop.f32.mrb[0].mxu1  ;;  %v7747_v29 = vpop.f32.mrb[1].mxu0 }
  0xfc   : > { %v7769_v19 = vpop.f32.mrb[1].mxu1  ;;  %v7748_v31 = vadd.f32 %v7747_v29, %v7746_v28  ;;  %v7749_v32 = vpop.f32.mrb[2].mxu0  ;;  %8049 = vmatpush3.bf16.msra.mxu0 %v8717_v33  ;;  %v8757_v33 = vld [vmem:[%s10684_s1 + $0xb0] sm:$0xff]  }
  0xfd   : > { %v7770_v21 = vadd.f32 %v7769_v19, %v7768_v17  ;;  %v7771_v22 = vpop.f32.mrb[2].mxu1  ;;  %v7750_v34 = vpop.f32.mrb[3].mxu0  ;;  %8050 = vmatprep.subr.bf16.mxu0 %v8719_v35  ;;  %8071 = vmatpush3.bf16.msra.mxu1 %v8718_v37  ;;  %v8753_v19 = vld [vmem:[%s10684_s1 + $0xa8] sm:$0xff]   ;;  %v8756_v32 = vld [vmem:[%s10684_s1 + $0x70] sm:$0xff]   ;;  %v8759_v35 = vld [vmem:[%s10684_s1 + $0xf8] sm:$0xff]  }
  0xfe   : > { %v7772_v24 = vpop.f32.mrb[3].mxu1  ;;  %8072 = vmatprep.subr.bf16.mxu1 %v8720_v38  ;;  %v8758_v34 = vld [vmem:[%s10684_s1 + $0x30] sm:$0xff]   ;;  %v8761_v37 = vld [vmem:[%s10684_s1 + $0xb8] sm:$0xff]  }
  0xff   : > { %v9822_v36 = vadd.f32 %v7770_v21, %v7748_v31  ;;  %v8752_v24 = vld [vmem:[%s10684_s1 + $0x68] sm:$0xff]   ;;  %v8762_v38 = vld [vmem:[%s10684_s1 + $0x38] sm:$0xff]  }
 0x100   : > { %8051 = vmatpush3.bf16.msra.mxu0 %v8721_v39  ;;  %v6973_v39 = vld [vmem:[%s9152_s22 + $0x20] sm:$0x77] }
 0x101   : > { %8052 = vmatprep.subr.bf16.mxu0 %v8723_v40  ;;  %8073 = vmatpush3.bf16.msra.mxu1 %v8722_v41  ;;  %v6972_v40 = vld [vmem:[%s9152_s22 + $0x20] sm:$0x33]  ;;  %v7006_v41 = vcombine.low %v6973_v39, %v6973_v39 }
 0x102   : > { %8074 = vmatprep.subr.bf16.mxu1 %v8724_v42  ;;  %v7007_v42 = vcombine.high %v6973_v39, %v6973_v39  ;;  %v8804_v39 = vld [vmem:[%s10684_s1 + $0x2c0] sm:$0xff]  }
 0x103   : > { %v3207_v48 = vshrl.u32 %v7006_v41, 16 }
 0x104   : > { %8053 = vmatpush3.bf16.msra.mxu0 %v8725_v43  ;;  %v7025_v43 = vcombine.high %v6972_v40, %v6972_v40  ;;  %v3214_v46 = vshrl.u32 %v7007_v42, 16  ;;  %v3216_v47 = vshll.u32 %v7007_v42, 16 }
 0x105   : > { %8082 = vmatprep.subr.bf16.mxu0 %v8731_v49  ;;  %8075 = vmatpush3.bf16.msra.mxu1 %v8726_v50  ;;  %v3209_v49 = vshll.u32 %v7006_v41, 16 }
 0x106   : > { %8104 = vmatprep.subr.bf16.mxu1 %v8732_v56  ;;  %v3218_v50 = vrot.slane %v3216_v47, 1 }
 0x107   : > { %2917 = vmatmul.mubr.bf16.vlgmr.msra.gmra.mrb[28].mxu0 %v6903_v51  ;;  %v7024_v51 = vcombine.low %v6972_v40, %v6972_v40  ;;  %v3211_v52 = vrot.slane %v3209_v49, 1  ;;  %v8807_v49 = vld [vmem:[%s10684_s1 + $0x248] sm:$0xff]  }
 0x108   : > { %8083 = vmatpush3.bf16.msra.mxu0 %v8733_v57  ;;  %3108 = vmatmul.mubr.bf16.vlgmr.msra.gmra.mrb[28].mxu1 %v2969_v63  ;;  %v3219_v55 = vor.u32 %v3218_v50, %v3214_v46  ;;  %v8772_v57 = vld [vmem:[%s10684_s1 + $0x1c8] sm:$0xff]   ;;  %v8777_v63 = vld [vmem:[%s10684_s1 + $0x110] sm:$0xff]  }
 0x109   : > { %8084 = vmatprep.subr.bf16.mxu0 %v8735_v61  ;;  %8105 = vmatpush3.bf16.msra.mxu1 %v8734_v60  ;;  %v3212_v56 = vor.u32 %v3211_v52, %v3207_v48  ;;  %v8774_v60 = vld [vmem:[%s10684_s1 + $0x188] sm:$0xff]   ;;  %v8776_v61 = vld [vmem:[%s10684_s1 + $0x1d0] sm:$0xff]   ;;  %v8806_v48 = vld [vmem:[%s10684_s1 + $0x280] sm:$0xff]  }
 0x10a   : > { %8106 = vmatprep.subr.bf16.mxu1 %v8736_v1  ;;  %3493 = vmatprep.mubr.bf16.mxu1 %v7025_v43  ;;  %v8780_v1 = vld [vmem:[%s10684_s1 + $0x1d8] sm:$0xff]   ;;  %v8808_v52 = vld [vmem:[%s10684_s1 + $0x2c8] sm:$0xff]  }
 0x10b   : > { %3350 = vmatprep.mubr.bf16.mxu0 %v3219_v55  ;;  %v8811_v55 = vld [vmem:[%s10684_s1 + $0x250] sm:$0xff]  }
 0x10c   : > { %8085 = vmatpush3.bf16.msra.mxu0 %v8737_v0  ;;  %v8778_v0 = vld [vmem:[%s10684_s1 + $0x190] sm:$0xff]  }
 0x10d   : > { %8086 = vmatprep.subr.bf16.mxu0 %v8739_v2  ;;  %8107 = vmatpush3.bf16.msra.mxu1 %v8738_v3  ;;  %v8779_v2 = vld [vmem:[%s10684_s1 + $0x158] sm:$0xff]  }
 0x10e   : > { %8108 = vmatprep.subr.bf16.mxu1 %v8740_v5  ;;  %v8781_v3 = vld [vmem:[%s10684_s1 + $0x118] sm:$0xff]   ;;  %v8784_v5 = vld [vmem:[%s10684_s1 + $0x1e0] sm:$0xff]  }
 0x110   : > { %8087 = vmatpush3.bf16.msra.mxu0 %v8741_v4  ;;  %v8782_v4 = vld [vmem:[%s10684_s1 + $0x198] sm:$0xff]  }
 0x111   : > { %8088 = vmatprep.subr.bf16.mxu0 %v8743_v6  ;;  %8109 = vmatpush3.bf16.msra.mxu1 %v8742_v7  ;;  %v8783_v6 = vld [vmem:[%s10684_s1 + $0x160] sm:$0xff]  }
 0x112   : > { %8110 = vmatprep.subr.bf16.mxu1 %v8744_v9 }
 0x114   : > { %8089 = vmatpush3.bf16.msra.mxu0 %v8745_v8  ;;  %v8785_v8 = vld [vmem:[%s10684_s1 + $0x120] sm:$0xff]  }
 0x115   : > { %8090 = vmatprep.subr.bf16.mxu0 %v8747_v10  ;;  %8111 = vmatpush3.bf16.msra.mxu1 %v8746_v11  ;;  %v8786_v10 = vld [vmem:[%s10684_s1 + $0x1a0] sm:$0xff]  }
 0x116   : > { %8112 = vmatprep.subr.bf16.mxu1 %v8748_v13 }
 0x118   : > { %8091 = vmatpush3.bf16.msra.mxu0 %v8749_v12 }
 0x119   : > { %8092 = vmatprep.subr.bf16.mxu0 %v8751_v15  ;;  %8113 = vmatpush3.bf16.msra.mxu1 %v8750_v16 }
 0x11a   : > { %v7790_v14 = vpop.f32.mrb[4].mxu0  ;;  %8114 = vmatprep.subr.bf16.mxu1 %v8752_v24  ;;  %v8792_v24 = vld [vmem:[%s10684_s1 + $0x1f0] sm:$0xff]  }
 0x11b   : > { %v7812_v17 = vpop.f32.mrb[4].mxu1  ;;  %v7791_v18 = vpop.f32.mrb[5].mxu0 }
 0x11c   : > { %v7792_v20 = vadd.f32 %v7791_v18, %v7790_v14  ;;  %v7813_v21 = vpop.f32.mrb[5].mxu1  ;;  %v7793_v22 = vpop.f32.mrb[6].mxu0  ;;  %8093 = vmatpush3.bf16.msra.mxu0 %v8753_v19  ;;  %v8788_v14 = vld [vmem:[%s10684_s1 + $0x1e8] sm:$0xff]  }
 0x11d   : > { %v7814_v23 = vadd.f32 %v7813_v21, %v7812_v17  ;;  %v7815_v25 = vpop.f32.mrb[6].mxu1  ;;  %v7794_v28 = vpop.f32.mrb[7].mxu0  ;;  %8094 = vmatprep.subr.bf16.mxu0 %v8755_v30  ;;  %8115 = vmatpush3.bf16.msra.mxu1 %v8754_v27  ;;  %v8787_v17 = vld [vmem:[%s10684_s1 + $0x168] sm:$0xff]   ;;  %v8793_v27 = vld [vmem:[%s10684_s1 + $0x130] sm:$0xff]   ;;  %v8795_v30 = vld [vmem:[%s10684_s1 + $0x178] sm:$0xff]  }
 0x11e   : > { %v690_v26 = vadd.f32 %v7792_v20, %v9822_v36  ;;  %v7816_v29 = vpop.f32.mrb[7].mxu1  ;;  %v8760_v36 = vld [vmem:[%s10684_s1 + $0x78] sm:$0xff]   ;;  %8116 = vmatprep.subr.bf16.mxu1 %v8756_v32  ;;  %v8789_v20 = vld [vmem:[%s10684_s1 + $0x128] sm:$0xff]   ;;  %v8794_v28 = vld [vmem:[%s10684_s1 + $0x1b0] sm:$0xff]  }
 0x11f   : > { %v8790_v21 = vld [vmem:[%s10684_s1 + $0x1a8] sm:$0xff]   ;;  %v8796_v29 = vld [vmem:[%s10684_s1 + $0x1f8] sm:$0xff]  }
 0x120   : > { %v9926_v31 = vadd.f32 %v7814_v23, %v690_v26  ;;  %8095 = vmatpush3.bf16.msra.mxu0 %v8757_v33  ;;  %v8791_v26 = vld [vmem:[%s10684_s1 + $0x170] sm:$0xff]   ;;  %v8798_v32 = vld [vmem:[%s10684_s1 + $0x1b8] sm:$0xff]   ;;  %v7042_v33 = vld [vmem:[%s9152_s22 + $0x28] sm:$0x33] }
 0x121   : > { %8096 = vmatprep.subr.bf16.mxu0 %v8759_v35  ;;  %8117 = vmatpush3.bf16.msra.mxu1 %v8758_v34  ;;  %v7076_v34 = vcombine.high %v7042_v33, %v7042_v33  ;;  %v7093_v35 = vld [vmem:[%s9152_s22 + $0x28] sm:$0x77] }
 0x122   : > { %8118 = vmatprep.subr.bf16.mxu1 %v8760_v36  ;;  %v7126_v36 = vcombine.low %v7093_v35, %v7093_v35 }
 0x124   : > { %8097 = vmatpush3.bf16.msra.mxu0 %v8761_v37  ;;  %v7127_v37 = vcombine.high %v7093_v35, %v7093_v35  ;;  %v3717_v42 = vshrl.u32 %v7126_v36, 16  ;;  %v3719_v43 = vshll.u32 %v7126_v36, 16 }
 0x125   : > { %8126 = vmatprep.subr.bf16.mxu0 %v8767_v44  ;;  %8119 = vmatpush3.bf16.msra.mxu1 %v8762_v38  ;;  %v8803_v38 = vld [vmem:[%s10684_s1 + $0x240] sm:$0xff]  }
 0x126   : > { %8148 = vmatprep.subr.bf16.mxu1 %v8768_v45  ;;  %v3724_v40 = vshrl.u32 %v7127_v37, 16  ;;  %v3726_v41 = vshll.u32 %v7127_v37, 16  ;;  %v8805_v44 = vld [vmem:[%s10684_s1 + $0x200] sm:$0xff]   ;;  %v7075_v45 = vcombine.low %v7042_v33, %v7042_v33  ;;  %v3721_v47 = vrot.slane %v3719_v43, 1 }
 0x127   : > { %3351 = vmatmul.mubr.bf16.vlgmr.msra.gmra.mrb[32].mxu0 %v3212_v56  ;;  %v8812_v56 = vld [vmem:[%s10684_s1 + $0x2d0] sm:$0xff]   ;;  %v8842_v43 = vld [vmem:[%s10684_s1 + $0x380] sm:$0xff]  }
 0x128   : > { %3494 = vmatmul.mubr.bf16.vlgmr.msra.gmra.mrb[32].mxu1 %v7024_v51  ;;  %8127 = vmatpush3.bf16.msra.mxu0 %v8769_v53  ;;  %v3728_v46 = vrot.slane %v3726_v41, 1  ;;  %v3722_v51 = vor.u32 %v3721_v47, %v3717_v42  ;;  %v8809_v53 = vld [vmem:[%s10684_s1 + $0x208] sm:$0xff]  }
 0x129   : > { %8149 = vmatpush3.bf16.msra.mxu1 %v8770_v54  ;;  %8128 = vmatprep.subr.bf16.mxu0 %v8771_v58  ;;  %v8810_v54 = vld [vmem:[%s10684_s1 + $0x288] sm:$0xff]   ;;  %v8814_v58 = vld [vmem:[%s10684_s1 + $0x290] sm:$0xff]  }
 0x12a   : > { %8150 = vmatprep.subr.bf16.mxu1 %v8772_v57  ;;  %3669 = vmatprep.mubr.bf16.mxu0 %v7076_v34  ;;  %v3729_v50 = vor.u32 %v3728_v46, %v3724_v40  ;;  %v8813_v57 = vld [vmem:[%s10684_s1 + $0x210] sm:$0xff]   ;;  %v8843_v40 = vld [vmem:[%s10684_s1 + $0x348] sm:$0xff]  }
 0x12b   : > { %v8844_v46 = vld [vmem:[%s10684_s1 + $0x3c8] sm:$0xff]  }
 0x12c   : > { %8129 = vmatpush3.bf16.msra.mxu0 %v8773_v59  ;;  %3860 = vmatprep.mubr.bf16.mxu1 %v3729_v50  ;;  %v8815_v59 = vld [vmem:[%s10684_s1 + $0x258] sm:$0xff]   ;;  %v8845_v47 = vld [vmem:[%s10684_s1 + $0x308] sm:$0xff]   ;;  %v8848_v50 = vld [vmem:[%s10684_s1 + $0x3d0] sm:$0xff]  }
 0x12d   : > { %8151 = vmatpush3.bf16.msra.mxu1 %v8774_v60  ;;  %8130 = vmatprep.subr.bf16.mxu0 %v8775_v62  ;;  %v8816_v60 = vld [vmem:[%s10684_s1 + $0x2d8] sm:$0xff]  }
 0x12e   : > { %8152 = vmatprep.subr.bf16.mxu1 %v8776_v61  ;;  %v8817_v61 = vld [vmem:[%s10684_s1 + $0x218] sm:$0xff]  }
 0x12f   : > { %v8818_v62 = vld [vmem:[%s10684_s1 + $0x298] sm:$0xff]  }
 0x130   : > { %8131 = vmatpush3.bf16.msra.mxu0 %v8777_v63  ;;  %v8819_v63 = vld [vmem:[%s10684_s1 + $0x260] sm:$0xff]  }
 0x131   : > { %8153 = vmatpush3.bf16.msra.mxu1 %v8778_v0  ;;  %8132 = vmatprep.subr.bf16.mxu0 %v8779_v2 }
 0x132   : > { %8154 = vmatprep.subr.bf16.mxu1 %v8780_v1  ;;  %v8820_v1 = vld [vmem:[%s10684_s1 + $0x2e0] sm:$0xff]  }
 0x134   : > { %8133 = vmatpush3.bf16.msra.mxu0 %v8781_v3  ;;  %v8821_v3 = vld [vmem:[%s10684_s1 + $0x220] sm:$0xff]  }
 0x135   : > { %8155 = vmatpush3.bf16.msra.mxu1 %v8782_v4  ;;  %8134 = vmatprep.subr.bf16.mxu0 %v8783_v6  ;;  %v8822_v6 = vld [vmem:[%s10684_s1 + $0x2a0] sm:$0xff]  }
 0x136   : > { %8156 = vmatprep.subr.bf16.mxu1 %v8784_v5 }
 0x138   : > { %8135 = vmatpush3.bf16.msra.mxu0 %v8785_v8 }
 0x139   : > { %8157 = vmatpush3.bf16.msra.mxu1 %v8786_v10  ;;  %8136 = vmatprep.subr.bf16.mxu0 %v8787_v17  ;;  %v8823_v10 = vld [vmem:[%s10684_s1 + $0x268] sm:$0xff]  }
 0x13a   : > { %v7834_v7 = vpop.f32.mrb[8].mxu0  ;;  %8158 = vmatprep.subr.bf16.mxu1 %v8788_v14 }
 0x13b   : > { %v7835_v9 = vpop.f32.mrb[9].mxu0  ;;  %v7856_v13 = vpop.f32.mrb[8].mxu1 }
 0x13c   : > { %v7836_v11 = vadd.f32 %v7835_v9, %v7834_v7  ;;  %v7837_v12 = vpop.f32.mrb[10].mxu0  ;;  %v7857_v16 = vpop.f32.mrb[9].mxu1  ;;  %8137 = vmatpush3.bf16.msra.mxu0 %v8789_v20  ;;  %v8828_v20 = vld [vmem:[%s10684_s1 + $0x2f0] sm:$0xff]  }
 0x13d   : > { %v7858_v18 = vadd.f32 %v7857_v16, %v7856_v13  ;;  %v7859_v19 = vpop.f32.mrb[10].mxu1  ;;  %v7838_v22 = vpop.f32.mrb[11].mxu0  ;;  %8159 = vmatpush3.bf16.msra.mxu1 %v8790_v21  ;;  %8138 = vmatprep.subr.bf16.mxu0 %v8791_v26  ;;  %v8824_v12 = vld [vmem:[%s10684_s1 + $0x2e8] sm:$0xff]   ;;  %v8829_v21 = vld [vmem:[%s10684_s1 + $0x230] sm:$0xff]  }
 0x13e   : > { %v1061_v15 = vadd.f32 %v7836_v11, %v9926_v31  ;;  %v7860_v23 = vpop.f32.mrb[11].mxu1  ;;  %8160 = vmatprep.subr.bf16.mxu1 %v8792_v24  ;;  %v8797_v31 = vld [vmem:[%s10684_s1 + $0x138] sm:$0xff]   ;;  %v8826_v16 = vld [vmem:[%s10684_s1 + $0x2a8] sm:$0xff]   ;;  %v8827_v19 = vld [vmem:[%s10684_s1 + $0x270] sm:$0xff]  }
 0x13f   : > { %v8830_v22 = vld [vmem:[%s10684_s1 + $0x2b0] sm:$0xff]   ;;  %v8831_v23 = vld [vmem:[%s10684_s1 + $0x278] sm:$0xff]  }
 0x140   : > { %v10027_v25 = vadd.f32 %v7858_v18, %v1061_v15  ;;  %8139 = vmatpush3.bf16.msra.mxu0 %v8793_v27  ;;  %v8825_v15 = vld [vmem:[%s10684_s1 + $0x228] sm:$0xff]   ;;  %v8832_v24 = vld [vmem:[%s10684_s1 + $0x2f8] sm:$0xff]   ;;  %v7144_v26 = vld [vmem:[%s9152_s22 + $0x30] sm:$0x33] }
 0x141   : > { %8161 = vmatpush3.bf16.msra.mxu1 %v8794_v28  ;;  %8140 = vmatprep.subr.bf16.mxu0 %v8795_v30  ;;  %v7178_v27 = vcombine.high %v7144_v26, %v7144_v26  ;;  %v7195_v28 = vld [vmem:[%s9152_s22 + $0x30] sm:$0x77]  ;;  %v7177_v33 = vcombine.low %v7144_v26, %v7144_v26 }
 0x142   : > { %8162 = vmatprep.subr.bf16.mxu1 %v8796_v29  ;;  %v8839_v29 = vld [vmem:[%s10684_s1 + $0x340] sm:$0xff]   ;;  %v7228_v30 = vcombine.low %v7195_v28, %v7195_v28 }
 0x144   : > { %8141 = vmatpush3.bf16.msra.mxu0 %v8797_v31  ;;  %v7229_v31 = vcombine.high %v7195_v28, %v7195_v28  ;;  %v4086_v36 = vshrl.u32 %v7228_v30, 16  ;;  %v4088_v37 = vshll.u32 %v7228_v30, 16  ;;  %v8876_v28 = vld [vmem:[%s10684_s1 + $0x40] sm:$0xff]  }
 0x145   : > { %8163 = vmatpush3.bf16.msra.mxu1 %v8798_v32  ;;  %8170 = vmatprep.subr.bf16.mxu0 %v8803_v38  ;;  %v8834_v32 = vld [vmem:[%s10684_s1 + $0x2b8] sm:$0xff]   ;;  %v8840_v38 = vld [vmem:[%s10684_s1 + $0x3c0] sm:$0xff]  }
 0x146   : > { %8192 = vmatprep.subr.bf16.mxu1 %v8804_v39  ;;  %v4093_v34 = vshrl.u32 %v7229_v31, 16  ;;  %v4095_v35 = vshll.u32 %v7229_v31, 16  ;;  %v8841_v39 = vld [vmem:[%s10684_s1 + $0x300] sm:$0xff]   ;;  %v4090_v42 = vrot.slane %v4088_v37, 1  ;;  %v8879_v37 = vld [vmem:[%s10684_s1 + $0xc8] sm:$0xff]  }
 0x147   : > { %3670 = vmatmul.mubr.bf16.vlgmr.msra.gmra.mrb[36].mxu0 %v7075_v45 }
 0x148   : > { %8171 = vmatpush3.bf16.msra.mxu0 %v8805_v44  ;;  %3861 = vmatmul.mubr.bf16.vlgmr.msra.gmra.mrb[36].mxu1 %v3722_v51  ;;  %v4097_v41 = vrot.slane %v4095_v35, 1  ;;  %v4091_v45 = vor.u32 %v4090_v42, %v4086_v36  ;;  %v8849_v51 = vld [vmem:[%s10684_s1 + $0x310] sm:$0xff]   ;;  %v8878_v36 = vld [vmem:[%s10684_s1] sm:$0xff]  }
 0x149   : > { %8172 = vmatprep.subr.bf16.mxu0 %v8807_v49  ;;  %8193 = vmatpush3.bf16.msra.mxu1 %v8806_v48  ;;  %v8847_v48 = vld [vmem:[%s10684_s1 + $0x350] sm:$0xff]   ;;  %v8846_v49 = vld [vmem:[%s10684_s1 + $0x388] sm:$0xff]  }
 0x14a   : > { %8194 = vmatprep.subr.bf16.mxu1 %v8808_v52  ;;  %4038 = vmatprep.mubr.bf16.mxu0 %v7178_v27  ;;  %v4098_v44 = vor.u32 %v4097_v41, %v4093_v34  ;;  %v8851_v52 = vld [vmem:[%s10684_s1 + $0x358] sm:$0xff]   ;;  %v8875_v27 = vld [vmem:[%s10684_s1 + $0xc0] sm:$0xff]   ;;  %v8880_v41 = vld [vmem:[%s10684_s1 + $0x48] sm:$0xff]  }
 0x14b   : > { %v8883_v42 = vld [vmem:[%s10684_s1 + $0xd0] sm:$0xff]  }
 0x14c   : > { %8173 = vmatpush3.bf16.msra.mxu0 %v8809_v53  ;;  %4229 = vmatprep.mubr.bf16.mxu1 %v4098_v44  ;;  %v8850_v53 = vld [vmem:[%s10684_s1 + $0x390] sm:$0xff]  }
 0x14d   : > { %8174 = vmatprep.subr.bf16.mxu0 %v8811_v55  ;;  %8195 = vmatpush3.bf16.msra.mxu1 %v8810_v54  ;;  %v8852_v54 = vld [vmem:[%s10684_s1 + $0x3d8] sm:$0xff]   ;;  %v8885_v44 = vld [vmem:[%s10684_s1 + $0x90] sm:$0xff]  }
 0x14e   : > { %8196 = vmatprep.subr.bf16.mxu1 %v8812_v56  ;;  %v8853_v55 = vld [vmem:[%s10684_s1 + $0x318] sm:$0xff]   ;;  %v8855_v56 = vld [vmem:[%s10684_s1 + $0x360] sm:$0xff]  }
 0x150   : > { %8175 = vmatpush3.bf16.msra.mxu0 %v8813_v57  ;;  %v8854_v57 = vld [vmem:[%s10684_s1 + $0x398] sm:$0xff]  }
 0x151   : > { %8176 = vmatprep.subr.bf16.mxu0 %v8815_v59  ;;  %8197 = vmatpush3.bf16.msra.mxu1 %v8814_v58  ;;  %v8856_v58 = vld [vmem:[%s10684_s1 + $0x3e0] sm:$0xff]  }
 0x152   : > { %8198 = vmatprep.subr.bf16.mxu1 %v8816_v60  ;;  %v8857_v59 = vld [vmem:[%s10684_s1 + $0x320] sm:$0xff]  }
 0x153   : > { %v8858_v60 = vld [vmem:[%s10684_s1 + $0x3a0] sm:$0xff]  }
 0x154   : > { %8177 = vmatpush3.bf16.msra.mxu0 %v8817_v61 }
 0x155   : > { %8178 = vmatprep.subr.bf16.mxu0 %v8819_v63  ;;  %8199 = vmatpush3.bf16.msra.mxu1 %v8818_v62 }
 0x156   : > { %8200 = vmatprep.subr.bf16.mxu1 %v8820_v1  ;;  %v8859_v1 = vld [vmem:[%s10684_s1 + $0x368] sm:$0xff]  }
 0x158   : > { %8179 = vmatpush3.bf16.msra.mxu0 %v8821_v3 }
 0x159   : > { %8180 = vmatprep.subr.bf16.mxu0 %v8823_v10  ;;  %8201 = vmatpush3.bf16.msra.mxu1 %v8822_v6  ;;  %v8862_v10 = vld [vmem:[%s10684_s1 + $0x3a8] sm:$0xff]  }
 0x15a   : > { %v7878_v0 = vpop.f32.mrb[12].mxu0  ;;  %8202 = vmatprep.subr.bf16.mxu1 %v8824_v12  ;;  %v8863_v12 = vld [vmem:[%s10684_s1 + $0x370] sm:$0xff]  }
 0x15b   : > { %v7879_v2 = vpop.f32.mrb[13].mxu0  ;;  %v7900_v8 = vpop.f32.mrb[12].mxu1 }
 0x15c   : > { %v7880_v4 = vadd.f32 %v7879_v2, %v7878_v0  ;;  %v7881_v5 = vpop.f32.mrb[14].mxu0  ;;  %v7901_v11 = vpop.f32.mrb[13].mxu1  ;;  %8181 = vmatpush3.bf16.msra.mxu0 %v8825_v15  ;;  %v8860_v2 = vld [vmem:[%s10684_s1 + $0x3e8] sm:$0xff]   ;;  %v8866_v15 = vld [vmem:[%s10684_s1 + $0x3b0] sm:$0xff]  }
 0x15d   : > { %v7882_v7 = vpop.f32.mrb[15].mxu0  ;;  %v7902_v13 = vadd.f32 %v7901_v11, %v7900_v8  ;;  %v7903_v14 = vpop.f32.mrb[14].mxu1  ;;  %8182 = vmatprep.subr.bf16.mxu0 %v8827_v19  ;;  %8203 = vmatpush3.bf16.msra.mxu1 %v8826_v16  ;;  %v8867_v16 = vld [vmem:[%s10684_s1 + $0x378] sm:$0xff]  }
 0x15e   : > { %v1432_v9 = vadd.f32 %v7880_v4, %v10027_v25  ;;  %v7904_v17 = vpop.f32.mrb[15].mxu1  ;;  %8204 = vmatprep.subr.bf16.mxu1 %v8828_v20  ;;  %v8833_v25 = vld [vmem:[%s10684_s1 + $0x238] sm:$0xff]   ;;  %v8861_v7 = vld [vmem:[%s10684_s1 + $0x328] sm:$0xff]   ;;  %v8865_v14 = vld [vmem:[%s10684_s1 + $0x330] sm:$0xff]  }
 0x15f   : > { %v8868_v17 = vld [vmem:[%s10684_s1 + $0x3f8] sm:$0xff]  }
 0x160   : > { %v10125_v18 = vadd.f32 %v7902_v13, %v1432_v9  ;;  %8183 = vmatpush3.bf16.msra.mxu0 %v8829_v21  ;;  %v8864_v13 = vld [vmem:[%s10684_s1 + $0x3f0] sm:$0xff]   ;;  %v8869_v19 = vld [vmem:[%s10684_s1 + $0x338] sm:$0xff]  }
 0x161   : > { %8184 = vmatprep.subr.bf16.mxu0 %v8831_v23  ;;  %8205 = vmatpush3.bf16.msra.mxu1 %v8830_v22  ;;  %v8870_v20 = vld [vmem:[%s10684_s1 + $0x3b8] sm:$0xff]  }
 0x162   : > { %1625 = vst [vmem:[#allocation2] sm:$0xf] %v10125_v18  ;;  %8206 = vmatprep.subr.bf16.mxu1 %v8832_v24  ;;  %v7246_v21 = vld [vmem:[%s9152_s22 + $0x38] sm:$0x33] }
 0x163   : > { %v7280_v22 = vcombine.high %v7246_v21, %v7246_v21  ;;  %v7297_v23 = vld [vmem:[%s9152_s22 + $0x38] sm:$0x77]  ;;  %v7279_v24 = vcombine.low %v7246_v21, %v7246_v21  ;;  %v8911_v21 = vld [vmem:[%s10684_s1 + $0x140] sm:$0xff]  }
 0x164   : > { %8185 = vmatpush3.bf16.msra.mxu0 %v8833_v25  ;;  %v7330_v25 = vcombine.low %v7297_v23, %v7297_v23  ;;  %v7331_v26 = vcombine.high %v7297_v23, %v7297_v23 }
 0x165   : > { %8214 = vmatprep.subr.bf16.mxu0 %v8839_v29  ;;  %8207 = vmatpush3.bf16.msra.mxu1 %v8834_v32 }
 0x166   : > { %8236 = vmatprep.subr.bf16.mxu1 %v8840_v38  ;;  %v4462_v29 = vshrl.u32 %v7331_v26, 16  ;;  %v4464_v30 = vshll.u32 %v7331_v26, 16  ;;  %v4455_v31 = vshrl.u32 %v7330_v25, 16  ;;  %v4457_v32 = vshll.u32 %v7330_v25, 16 }
 0x167   : > { %4039 = vmatmul.mubr.bf16.vlgmr.msra.gmra.mrb[40].mxu0 %v7177_v33  ;;  %v8877_v33 = vld [vmem:[%s10684_s1 + $0x80] sm:$0xff]  }
 0x168   : > { %8215 = vmatpush3.bf16.msra.mxu0 %v8841_v39  ;;  %4230 = vmatmul.mubr.bf16.vlgmr.msra.gmra.mrb[40].mxu1 %v4091_v45  ;;  %v4466_v34 = vrot.slane %v4464_v30, 1  ;;  %v4459_v35 = vrot.slane %v4457_v32, 1  ;;  %v8884_v45 = vld [vmem:[%s10684_s1 + $0x50] sm:$0xff]   ;;  %v8913_v30 = vld [vmem:[%s10684_s1 + $0x100] sm:$0xff]  }
 0x169   : > { %8216 = vmatprep.subr.bf16.mxu0 %v8843_v40  ;;  %8237 = vmatpush3.bf16.msra.mxu1 %v8842_v43  ;;  %v8881_v40 = vld [vmem:[%s10684_s1 + $0x88] sm:$0xff]  }
 0x16a   : > { %8238 = vmatprep.subr.bf16.mxu1 %v8844_v46  ;;  %4407 = vmatprep.mubr.bf16.mxu0 %v7280_v22  ;;  %v4467_v38 = vor.u32 %v4466_v34, %v4462_v29  ;;  %v4460_v39 = vor.u32 %v4459_v35, %v4455_v31  ;;  %v8882_v43 = vld [vmem:[%s10684_s1 + $0x8] sm:$0xff]   ;;  %v8887_v46 = vld [vmem:[%s10684_s1 + $0xd8] sm:$0xff]   ;;  %v8912_v22 = vld [vmem:[%s10684_s1 + $0x1c0] sm:$0xff]  }
 0x16b   : > { %v8914_v31 = vld [vmem:[%s10684_s1 + $0x180] sm:$0xff]   ;;  %v8916_v34 = vld [vmem:[%s10684_s1 + $0x1c8] sm:$0xff]  }
 0x16c   : > { %8217 = vmatpush3.bf16.msra.mxu0 %v8845_v47  ;;  %4598 = vmatprep.mubr.bf16.mxu1 %v4467_v38  ;;  %v8886_v47 = vld [vmem:[%s10684_s1 + $0x10] sm:$0xff]   ;;  %v8915_v35 = vld [vmem:[%s10684_s1 + $0x148] sm:$0xff]  }
 0x16d   : > { %8218 = vmatprep.subr.bf16.mxu0 %v8847_v48  ;;  %8239 = vmatpush3.bf16.msra.mxu1 %v8846_v49  ;;  %v8889_v48 = vld [vmem:[%s10684_s1 + $0x98] sm:$0xff]   ;;  %v8920_v38 = vld [vmem:[%s10684_s1 + $0x1d0] sm:$0xff]  }
 0x16e   : > { %8240 = vmatprep.subr.bf16.mxu1 %v8848_v50  ;;  %v8888_v49 = vld [vmem:[%s10684_s1 + $0x58] sm:$0xff]   ;;  %v8891_v50 = vld [vmem:[%s10684_s1 + $0xe0] sm:$0xff]  }
 0x170   : > { %8219 = vmatpush3.bf16.msra.mxu0 %v8849_v51  ;;  %v8890_v51 = vld [vmem:[%s10684_s1 + $0x18] sm:$0xff]  }
 0x171   : > { %8220 = vmatprep.subr.bf16.mxu0 %v8851_v52  ;;  %8241 = vmatpush3.bf16.msra.mxu1 %v8850_v53  ;;  %v8893_v52 = vld [vmem:[%s10684_s1 + $0xa0] sm:$0xff]  }
 0x172   : > { %8242 = vmatprep.subr.bf16.mxu1 %v8852_v54  ;;  %v8892_v54 = vld [vmem:[%s10684_s1 + $0x60] sm:$0xff]  }
 0x174   : > { %8221 = vmatpush3.bf16.msra.mxu0 %v8853_v55 }
 0x175   : > { %8222 = vmatprep.subr.bf16.mxu0 %v8855_v56  ;;  %8243 = vmatpush3.bf16.msra.mxu1 %v8854_v57 }
 0x176   : > { %8244 = vmatprep.subr.bf16.mxu1 %v8856_v58  ;;  %v8895_v58 = vld [vmem:[%s10684_s1 + $0xe8] sm:$0xff]  }
 0x178   : > { %8223 = vmatpush3.bf16.msra.mxu0 %v8857_v59  ;;  %v8894_v59 = vld [vmem:[%s10684_s1 + $0x20] sm:$0xff]  }
 0x179   : > { %8224 = vmatprep.subr.bf16.mxu0 %v8859_v1  ;;  %8245 = vmatpush3.bf16.msra.mxu1 %v8858_v60  ;;  %v8896_v1 = vld [vmem:[%s10684_s1 + $0x68] sm:$0xff]  }
 0x17a   : > { %v7922_v61 = vpop.f32.mrb[16].mxu0  ;;  %8246 = vmatprep.subr.bf16.mxu1 %v8860_v2 }
 0x17b   : > { %v7944_v62 = vpop.f32.mrb[16].mxu1  ;;  %v7923_v63 = vpop.f32.mrb[17].mxu0 }
 0x17c   : > { %v7945_v0 = vpop.f32.mrb[17].mxu1  ;;  %v7924_v3 = vadd.f32 %v7923_v63, %v7922_v61  ;;  %v7925_v5 = vpop.f32.mrb[18].mxu0  ;;  %8225 = vmatpush3.bf16.msra.mxu0 %v8861_v7  ;;  %v8898_v7 = vld [vmem:[%s10684_s1 + $0x28] sm:$0xff]  }
 0x17d   : > { %v7946_v4 = vadd.f32 %v7945_v0, %v7944_v62  ;;  %v7947_v6 = vpop.f32.mrb[18].mxu1  ;;  %v7926_v8 = vpop.f32.mrb[19].mxu0  ;;  %8226 = vmatprep.subr.bf16.mxu0 %v8863_v12  ;;  %8247 = vmatpush3.bf16.msra.mxu1 %v8862_v10  ;;  %v8897_v62 = vld [vmem:[%s10684_s1 + $0xa8] sm:$0xff]   ;;  %v8903_v10 = vld [vmem:[%s10684_s1 + $0xf8] sm:$0xff]  }
 0x17e   : > { %v7948_v11 = vpop.f32.mrb[19].mxu1  ;;  %8248 = vmatprep.subr.bf16.mxu1 %v8864_v13  ;;  %v8899_v6 = vld [vmem:[%s10684_s1 + $0xf0] sm:$0xff]   ;;  %v8905_v12 = vld [vmem:[%s10684_s1 + $0xb8] sm:$0xff]  }
 0x17f   : > { %v10223_v9 = vadd.f32 %v7946_v4, %v7924_v3  ;;  %v8901_v8 = vld [vmem:[%s10684_s1 + $0xb0] sm:$0xff]   ;;  %v8904_v13 = vld [vmem:[%s10684_s1 + $0x78] sm:$0xff]  }
 0x180   : > { %8227 = vmatpush3.bf16.msra.mxu0 %v8865_v14  ;;  %v8902_v11 = vld [vmem:[%s10684_s1 + $0x30] sm:$0xff]   ;;  %v8906_v14 = vld [vmem:[%s10684_s1 + $0x38] sm:$0xff]  }
 0x181   : > { %8228 = vmatprep.subr.bf16.mxu0 %v8867_v16  ;;  %8249 = vmatpush3.bf16.msra.mxu1 %v8866_v15  ;;  %v7349_v15 = vld [vmem:[%s9152_s22 + $0x30] sm:$0x77] }
 0x182   : > { %8250 = vmatprep.subr.bf16.mxu1 %v8868_v17  ;;  %v7348_v16 = vld [vmem:[%s9152_s22 + $0x30] sm:$0x33]  ;;  %v7382_v17 = vcombine.low %v7349_v15, %v7349_v15 }
 0x184   : > { %8229 = vmatpush3.bf16.msra.mxu0 %v8869_v19  ;;  %v7383_v19 = vcombine.high %v7349_v15, %v7349_v15  ;;  %v4698_v25 = vshrl.u32 %v7382_v17, 16  ;;  %v4700_v26 = vshll.u32 %v7382_v17, 16  ;;  %v8947_v15 = vld [vmem:[%s10684_s1 + $0x240] sm:$0xff]  }
 0x185   : > { %8258 = vmatprep.subr.bf16.mxu0 %v8875_v27  ;;  %8251 = vmatpush3.bf16.msra.mxu1 %v8870_v20  ;;  %v7401_v20 = vcombine.high %v7348_v16, %v7348_v16 }
 0x186   : > { %8280 = vmatprep.subr.bf16.mxu1 %v8876_v28  ;;  %v4705_v23 = vshrl.u32 %v7383_v19, 16  ;;  %v7400_v28 = vcombine.low %v7348_v16, %v7348_v16  ;;  %v4702_v29 = vrot.slane %v4700_v26, 1  ;;  %v8948_v16 = vld [vmem:[%s10684_s1 + $0x2c0] sm:$0xff]  }
 0x187   : > { %4408 = vmatmul.mubr.bf16.vlgmr.msra.gmra.mrb[44].mxu0 %v7279_v24  ;;  %v4707_v24 = vshll.u32 %v7383_v19, 16 }
 0x188   : > { %8259 = vmatpush3.bf16.msra.mxu0 %v8877_v33  ;;  %4599 = vmatmul.mubr.bf16.vlgmr.msra.gmra.mrb[44].mxu1 %v4460_v39  ;;  %v4703_v33 = vor.u32 %v4702_v29, %v4698_v25  ;;  %v8919_v39 = vld [vmem:[%s10684_s1 + $0x150] sm:$0xff]  }
 0x189   : > { %8260 = vmatprep.subr.bf16.mxu0 %v8879_v37  ;;  %8281 = vmatpush3.bf16.msra.mxu1 %v8878_v36  ;;  %v4709_v27 = vrot.slane %v4707_v24, 1  ;;  %v8917_v36 = vld [vmem:[%s10684_s1 + $0x108] sm:$0xff]  }
 0x18a   : > { %8282 = vmatprep.subr.bf16.mxu1 %v8880_v41  ;;  %4984 = vmatprep.mubr.bf16.mxu1 %v7401_v20  ;;  %v8918_v37 = vld [vmem:[%s10684_s1 + $0x188] sm:$0xff]   ;;  %v8922_v41 = vld [vmem:[%s10684_s1 + $0x190] sm:$0xff]  }
 0x18b   : > { %v4710_v32 = vor.u32 %v4709_v27, %v4705_v23  ;;  %v8949_v23 = vld [vmem:[%s10684_s1 + $0x200] sm:$0xff]  }
 0x18c   : > { %8261 = vmatpush3.bf16.msra.mxu0 %v8881_v40  ;;  %v8921_v40 = vld [vmem:[%s10684_s1 + $0x110] sm:$0xff]   ;;  %v8950_v27 = vld [vmem:[%s10684_s1 + $0x280] sm:$0xff]  }
 0x18d   : > { %8262 = vmatprep.subr.bf16.mxu0 %v8883_v42  ;;  %8283 = vmatpush3.bf16.msra.mxu1 %v8882_v43  ;;  %v8924_v42 = vld [vmem:[%s10684_s1 + $0x1d8] sm:$0xff]  }
 0x18e   : > { %8284 = vmatprep.subr.bf16.mxu1 %v8884_v45  ;;  %4841 = vmatprep.mubr.bf16.mxu0 %v4710_v32  ;;  %v8923_v43 = vld [vmem:[%s10684_s1 + $0x158] sm:$0xff]  }
 0x18f   : > { %v8926_v45 = vld [vmem:[%s10684_s1 + $0x198] sm:$0xff]  }
 0x190   : > { %8263 = vmatpush3.bf16.msra.mxu0 %v8885_v44  ;;  %v8925_v44 = vld [vmem:[%s10684_s1 + $0x118] sm:$0xff]  }
 0x191   : > { %8264 = vmatprep.subr.bf16.mxu0 %v8887_v46  ;;  %8285 = vmatpush3.bf16.msra.mxu1 %v8886_v47  ;;  %v8928_v47 = vld [vmem:[%s10684_s1 + $0x1e0] sm:$0xff]  }
 0x192   : > { %8286 = vmatprep.subr.bf16.mxu1 %v8888_v49  ;;  %v8927_v49 = vld [vmem:[%s10684_s1 + $0x160] sm:$0xff]  }
 0x194   : > { %8265 = vmatpush3.bf16.msra.mxu0 %v8889_v48 }
 0x195   : > { %8266 = vmatprep.subr.bf16.mxu0 %v8891_v50  ;;  %8287 = vmatpush3.bf16.msra.mxu1 %v8890_v51 }
 0x196   : > { %8288 = vmatprep.subr.bf16.mxu1 %v8892_v54  ;;  %v8930_v54 = vld [vmem:[%s10684_s1 + $0x1a0] sm:$0xff]  }
 0x198   : > { %8267 = vmatpush3.bf16.msra.mxu0 %v8893_v52  ;;  %v8929_v52 = vld [vmem:[%s10684_s1 + $0x120] sm:$0xff]  }
 0x199   : > { %8268 = vmatprep.subr.bf16.mxu0 %v8895_v58  ;;  %8289 = vmatpush3.bf16.msra.mxu1 %v8894_v59  ;;  %v8932_v58 = vld [vmem:[%s10684_s1 + $0x1e8] sm:$0xff]  }
 0x19a   : > { %v7966_v53 = vpop.f32.mrb[20].mxu0  ;;  %8290 = vmatprep.subr.bf16.mxu1 %v8896_v1  ;;  %v8934_v1 = vld [vmem:[%s10684_s1 + $0x1a8] sm:$0xff]  }
 0x19b   : > { %v7967_v55 = vpop.f32.mrb[21].mxu0  ;;  %v7988_v56 = vpop.f32.mrb[20].mxu1 }
 0x19c   : > { %v7968_v57 = vadd.f32 %v7967_v55, %v7966_v53  ;;  %v7989_v60 = vpop.f32.mrb[21].mxu1  ;;  %v7969_v61 = vpop.f32.mrb[22].mxu0  ;;  %8269 = vmatpush3.bf16.msra.mxu0 %v8897_v62 }
 0x19d   : > { %v7990_v0 = vadd.f32 %v7989_v60, %v7988_v56  ;;  %v7991_v2 = vpop.f32.mrb[22].mxu1  ;;  %v7970_v3 = vpop.f32.mrb[23].mxu0  ;;  %8270 = vmatprep.subr.bf16.mxu0 %v8899_v6  ;;  %8291 = vmatpush3.bf16.msra.mxu1 %v8898_v7  ;;  %v8931_v60 = vld [vmem:[%s10684_s1 + $0x168] sm:$0xff]   ;;  %v8940_v6 = vld [vmem:[%s10684_s1 + $0x1f8] sm:$0xff]  }
 0x19e   : > { %v2186_v63 = vadd.f32 %v7968_v57, %v10223_v9  ;;  %v7992_v4 = vpop.f32.mrb[23].mxu1  ;;  %v8900_v9 = vld [vmem:[%s10684_s1 + $0x70] sm:$0xff]   ;;  %v8939_v7 = vld [vmem:[%s10684_s1 + $0x178] sm:$0xff]  }
 0x19f   : > { %8292 = vmatprep.subr.bf16.mxu1 %v8900_v9  ;;  %v8936_v2 = vld [vmem:[%s10684_s1 + $0x1f0] sm:$0xff]   ;;  %v8942_v9 = vld [vmem:[%s10684_s1 + $0x1b8] sm:$0xff]  }
 0x1a0   : > { %v10324_v5 = vadd.f32 %v7990_v0, %v2186_v63  ;;  %8271 = vmatpush3.bf16.msra.mxu0 %v8901_v8  ;;  %v8933_v63 = vld [vmem:[%s10684_s1 + $0x128] sm:$0xff]   ;;  %v8935_v3 = vld [vmem:[%s10684_s1 + $0x170] sm:$0xff]   ;;  %v8941_v8 = vld [vmem:[%s10684_s1 + $0x138] sm:$0xff]  }
 0x1a1   : > { %8272 = vmatprep.subr.bf16.mxu0 %v8903_v10  ;;  %8293 = vmatpush3.bf16.msra.mxu1 %v8902_v11  ;;  %v8937_v4 = vld [vmem:[%s10684_s1 + $0x130] sm:$0xff]   ;;  %v7418_v10 = vld [vmem:[%s9152_s22 + $0x38] sm:$0x33] }
 0x1a2   : > { %8294 = vmatprep.subr.bf16.mxu1 %v8904_v13  ;;  %v7469_v11 = vld [vmem:[%s9152_s22 + $0x38] sm:$0x77]  ;;  %v7451_v24 = vcombine.low %v7418_v10, %v7418_v10 }
 0x1a3   : > { %v7502_v13 = vcombine.low %v7469_v11, %v7469_v11 }
 0x1a4   : > { %8273 = vmatpush3.bf16.msra.mxu0 %v8905_v12  ;;  %v7452_v12 = vcombine.high %v7418_v10, %v7418_v10 }
 0x1a5   : > { %8302 = vmatprep.subr.bf16.mxu0 %v8911_v21  ;;  %8295 = vmatpush3.bf16.msra.mxu1 %v8906_v14  ;;  %v7503_v14 = vcombine.high %v7469_v11, %v7469_v11  ;;  %v5208_v20 = vshrl.u32 %v7502_v13, 16  ;;  %v5210_v21 = vshll.u32 %v7502_v13, 16  ;;  %v8973_v11 = vld [vmem:[%s10684_s1 + $0x230] sm:$0xff]  }
 0x1a6   : > { %8324 = vmatprep.subr.bf16.mxu1 %v8912_v22  ;;  %v1627_v22 = vsel %vm1626_vm0, %v10125_v18, 0.0 }
 0x1a7   : > { %4842 = vmatmul.mubr.bf16.vlgmr.msra.gmra.mrb[48].mxu0 %v4703_v33  ;;  %v5215_v17 = vshrl.u32 %v7503_v14, 16  ;;  %v5217_v19 = vshll.u32 %v7503_v14, 16  ;;  %v5212_v26 = vrot.slane %v5210_v21, 1  ;;  %v1628_v32 = vrot.slane %v1627_v22, 4  ;;  %v8974_v14 = vld [vmem:[%s10684_s1 + $0x2b0] sm:$0xff]  }
 0x1a8   : > { %4985 = vmatmul.mubr.bf16.vlgmr.msra.gmra.mrb[48].mxu1 %v7400_v28  ;;  %8303 = vmatpush3.bf16.msra.mxu0 %v8913_v30  ;;  %v8951_v28 = vld [vmem:[%s10684_s1 + $0x248] sm:$0xff]   ;;  %v1635_v33 = vmul.f32 %v10125_v18, %v10125_v18  ;;  %v8956_v18 = vld [vmem:[%s10684_s1 + $0x2d0] sm:$0xff]  }
 0x1a9   : > { %8325 = vmatpush3.bf16.msra.mxu1 %v8914_v31  ;;  %8304 = vmatprep.subr.bf16.mxu0 %v8915_v35  ;;  %v5219_v25 = vrot.slane %v5217_v19, 1  ;;  %v5213_v30 = vor.u32 %v5212_v26, %v5208_v20  ;;  %v8952_v31 = vld [vmem:[%s10684_s1 + $0x2c8] sm:$0xff]   ;;  %v8976_v20 = vld [vmem:[%s10684_s1 + $0x2f8] sm:$0xff]   ;;  %v7520_v26 = vld [vmem:[%s9152_s22 + $0x40] sm:$0x33] }
 0x1aa   : > { %8326 = vmatprep.subr.bf16.mxu1 %v8916_v34  ;;  %5160 = vmatprep.mubr.bf16.mxu0 %v7452_v12  ;;  %v8953_v34 = vld [vmem:[%s10684_s1 + $0x208] sm:$0xff]  }
 0x1ab   : > { %v5220_v29 = vor.u32 %v5219_v25, %v5215_v17  ;;  %v8954_v35 = vld [vmem:[%s10684_s1 + $0x288] sm:$0xff]   ;;  %v8975_v17 = vld [vmem:[%s10684_s1 + $0x278] sm:$0xff]  }
 0x1ac   : > { %8305 = vmatpush3.bf16.msra.mxu0 %v8917_v36  ;;  %v8955_v36 = vld [vmem:[%s10684_s1 + $0x250] sm:$0xff]   ;;  %v8978_v25 = vld [vmem:[%s10684_s1 + $0x2b8] sm:$0xff]  }
 0x1ad   : > { %8327 = vmatpush3.bf16.msra.mxu1 %v8918_v37  ;;  %8306 = vmatprep.subr.bf16.mxu0 %v8919_v39  ;;  %v1629_v37 = vadd.f32 %v1628_v32, %v1627_v22  ;;  %v8957_v39 = vld [vmem:[%s10684_s1 + $0x210] sm:$0xff]  }
 0x1ae   : > { %8328 = vmatprep.subr.bf16.mxu1 %v8920_v38  ;;  %5351 = vmatprep.mubr.bf16.mxu1 %v5220_v29  ;;  %v1636_v38 = vsel %vm1626_vm0, %v1635_v33, 0.0  ;;  %v7554_v29 = vcombine.high %v7520_v26, %v7520_v26 }
 0x1b0   : > { %8307 = vmatpush3.bf16.msra.mxu0 %v8921_v40  ;;  %v8958_v40 = vld [vmem:[%s10684_s1 + $0x290] sm:$0xff]  }
 0x1b1   : > { %8329 = vmatpush3.bf16.msra.mxu1 %v8922_v41  ;;  %8308 = vmatprep.subr.bf16.mxu0 %v8923_v43  ;;  %v8959_v41 = vld [vmem:[%s10684_s1 + $0x258] sm:$0xff]  }
 0x1b2   : > { %8330 = vmatprep.subr.bf16.mxu1 %v8924_v42  ;;  %v1637_v42 = vrot.slane %v1636_v38, 4  ;;  %v8960_v43 = vld [vmem:[%s10684_s1 + $0x2d8] sm:$0xff]  }
 0x1b4   : > { %8309 = vmatpush3.bf16.msra.mxu0 %v8925_v44  ;;  %v1630_v44 = vrot.slane %v1629_v37, 2 }
 0x1b5   : > { %8331 = vmatpush3.bf16.msra.mxu1 %v8926_v45  ;;  %8310 = vmatprep.subr.bf16.mxu0 %v8927_v49  ;;  %v8961_v45 = vld [vmem:[%s10684_s1 + $0x218] sm:$0xff]  }
 0x1b6   : > { %8332 = vmatprep.subr.bf16.mxu1 %v8928_v47 }
 0x1b8   : > { %8311 = vmatpush3.bf16.msra.mxu0 %v8929_v52 }
 0x1b9   : > { %8333 = vmatpush3.bf16.msra.mxu1 %v8930_v54  ;;  %8312 = vmatprep.subr.bf16.mxu0 %v8931_v60  ;;  %v8967_v60 = vld [vmem:[%s10684_s1 + $0x268] sm:$0xff]  }
 0x1ba   : > { %v8010_v46 = vpop.f32.mrb[24].mxu0  ;;  %8334 = vmatprep.subr.bf16.mxu1 %v8932_v58 }
 0x1bb   : > { %v8011_v48 = vpop.f32.mrb[25].mxu0  ;;  %v8032_v53 = vpop.f32.mrb[24].mxu1 }
 0x1bc   : > { %v8012_v50 = vadd.f32 %v8011_v48, %v8010_v46  ;;  %v8013_v51 = vpop.f32.mrb[26].mxu0  ;;  %v8033_v56 = vpop.f32.mrb[25].mxu1  ;;  %8313 = vmatpush3.bf16.msra.mxu0 %v8933_v63  ;;  %v8962_v46 = vld [vmem:[%s10684_s1 + $0x298] sm:$0xff]   ;;  %v8963_v48 = vld [vmem:[%s10684_s1 + $0x260] sm:$0xff]   ;;  %v8968_v63 = vld [vmem:[%s10684_s1 + $0x2e8] sm:$0xff]  }
 0x1bd   : > { %v8034_v57 = vadd.f32 %v8033_v56, %v8032_v53  ;;  %v8035_v59 = vpop.f32.mrb[26].mxu1  ;;  %v8014_v61 = vpop.f32.mrb[27].mxu0  ;;  %8335 = vmatpush3.bf16.msra.mxu1 %v8934_v1  ;;  %8314 = vmatprep.subr.bf16.mxu0 %v8935_v3  ;;  %v8965_v53 = vld [vmem:[%s10684_s1 + $0x220] sm:$0xff]   ;;  %v8969_v1 = vld [vmem:[%s10684_s1 + $0x228] sm:$0xff]  }
 0x1be   : > { %v2555_v55 = vadd.f32 %v8012_v50, %v10324_v5  ;;  %v8036_v0 = vpop.f32.mrb[27].mxu1  ;;  %v8938_v5 = vld [vmem:[%s10684_s1 + $0x1b0] sm:$0xff]   ;;  %8336 = vmatprep.subr.bf16.mxu1 %v8936_v2  ;;  %v8964_v50 = vld [vmem:[%s10684_s1 + $0x2e0] sm:$0xff]  }
 0x1bf   : > { %v8966_v56 = vld [vmem:[%s10684_s1 + $0x2a0] sm:$0xff]  }
 0x1c0   : > { %v10422_v62 = vadd.f32 %v8034_v57, %v2555_v55  ;;  %8315 = vmatpush3.bf16.msra.mxu0 %v8937_v4  ;;  %v1638_v55 = vadd.f32 %v1637_v42, %v1636_v38  ;;  %v8970_v4 = vld [vmem:[%s10684_s1 + $0x2a8] sm:$0xff]  }
 0x1c1   : > { %8337 = vmatpush3.bf16.msra.mxu1 %v8938_v5  ;;  %8316 = vmatprep.subr.bf16.mxu0 %v8939_v7  ;;  %v8971_v5 = vld [vmem:[%s10684_s1 + $0x270] sm:$0xff]  }
 0x1c2   : > { %8338 = vmatprep.subr.bf16.mxu1 %v8940_v6  ;;  %v1639_v2 = vrot.slane %v1638_v55, 2  ;;  %v1631_v6 = vadd.f32 %v1630_v44, %v1629_v37 }
 0x1c4   : > { %8317 = vmatpush3.bf16.msra.mxu0 %v8941_v8  ;;  %v1640_v12 = vadd.f32 %v1639_v2, %v1638_v55  ;;  %v1632_v19 = vrot.slane %v1631_v6, 1  ;;  %v8998_v2 = vld [vmem:[%s10684_s1 + $0x398] sm:$0xff]  }
 0x1c5   : > { %8339 = vmatpush3.bf16.msra.mxu1 %v8942_v9  ;;  %8346 = vmatprep.subr.bf16.mxu0 %v8947_v15  ;;  %v8972_v9 = vld [vmem:[%s10684_s1 + $0x2f0] sm:$0xff]  }
 0x1c6   : > { %8368 = vmatprep.subr.bf16.mxu1 %v8948_v16  ;;  %v1633_v42 = vadd.f32 %v1632_v19, %v1631_v6 }
 0x1c7   : > { %5161 = vmatmul.mubr.bf16.vlgmr.msra.gmra.mrb[52].mxu0 %v7451_v24  ;;  %v1641_v24 = vrot.slane %v1640_v12, 1 }
 0x1c8   : > { %5352 = vmatmul.mubr.bf16.vlgmr.msra.gmra.mrb[52].mxu1 %v5213_v30  ;;  %8347 = vmatpush3.bf16.msra.mxu0 %v8949_v23  ;;  %v8977_v23 = vld [vmem:[%s10684_s1 + $0x238] sm:$0xff]   ;;  %v7571_v30 = vld [vmem:[%s9152_s22 + $0x40] sm:$0x77] }
 0x1c9   : > { %8369 = vmatpush3.bf16.msra.mxu1 %v8950_v27  ;;  %8348 = vmatprep.subr.bf16.mxu0 %v8951_v28  ;;  %v7604_v32 = vcombine.low %v7571_v30, %v7571_v30  ;;  %v7605_v33 = vcombine.high %v7571_v30, %v7571_v30  ;;  %v7673_v30 = vld [vmem:[%s9152_s22 + $0x48] sm:$0x77] }
 0x1ca   : > { %8370 = vmatprep.subr.bf16.mxu1 %v8952_v31  ;;  %v8983_v31 = vld [vmem:[%s10684_s1 + $0x340] sm:$0xff]   ;;  %5529 = vmatprep.mubr.bf16.mxu0 %v7554_v29  ;;  %v7622_v29 = vld [vmem:[%s9152_s22 + $0x48] sm:$0x33]  ;;  %s7729_s22 = sshll.u32 %s10687_s10, 3 }
 0x1cb   : > { %v5584_v37 = vshrl.u32 %v7605_v33, 16  ;;  %v5586_v38 = vshll.u32 %v7605_v33, 16  ;;  %v7707_v33 = vcombine.high %v7673_v30, %v7673_v30  ;;  %s143_s13 = scalar_lea.vmem %s10685_s2, %s7729_s22 }
 0x1cc   : > { %8349 = vmatpush3.bf16.msra.mxu0 %v8953_v34 }
 0x1cd   : > { %8371 = vmatpush3.bf16.msra.mxu1 %v8954_v35  ;;  %8350 = vmatprep.subr.bf16.mxu0 %v8955_v36  ;;  %v7553_v36 = vcombine.low %v7520_v26, %v7520_v26  ;;  %v9011_v26 = vld [vmem:[%s10684_s1 + $0x378] sm:$0xff]  }
 0x1ce   : > { %8372 = vmatprep.subr.bf16.mxu1 %v8956_v18  ;;  %v8984_v18 = vld [vmem:[%s10684_s1 + $0x3c0] sm:$0xff]  }
 0x1d0   : > { %8351 = vmatpush3.bf16.msra.mxu0 %v8957_v39  ;;  %v5577_v39 = vshrl.u32 %v7604_v32, 16 }
 0x1d1   : > { %8373 = vmatpush3.bf16.msra.mxu1 %v8958_v40  ;;  %8352 = vmatprep.subr.bf16.mxu0 %v8959_v41  ;;  %v5579_v40 = vshll.u32 %v7604_v32, 16  ;;  %v8985_v41 = vld [vmem:[%s10684_s1 + $0x300] sm:$0xff]   ;;  %v7706_v32 = vcombine.low %v7673_v30, %v7673_v30 }
 0x1d2   : > { %8374 = vmatprep.subr.bf16.mxu1 %v8960_v43 }
 0x1d4   : > { %8353 = vmatpush3.bf16.msra.mxu0 %v8961_v45  ;;  %v8987_v45 = vld [vmem:[%s10684_s1 + $0x348] sm:$0xff]  }
 0x1d5   : > { %8375 = vmatpush3.bf16.msra.mxu1 %v8962_v46  ;;  %8354 = vmatprep.subr.bf16.mxu0 %v8963_v48  ;;  %v5588_v46 = vrot.slane %v5586_v38, 1  ;;  %v1642_v48 = vadd.f32 %v1641_v24, %v1640_v12  ;;  %v9003_v12 = vld [vmem:[%s10684_s1 + $0x368] sm:$0xff]   ;;  %v9009_v24 = vld [vmem:[%s10684_s1 + $0x330] sm:$0xff]   ;;  %v5948_v38 = vshll.u32 %v7706_v32, 16 }
 0x1d6   : > { %8376 = vmatprep.subr.bf16.mxu1 %v8964_v50 }
 0x1d8   : > { %8355 = vmatpush3.bf16.msra.mxu0 %v8965_v53 }
 0x1d9   : > { %8377 = vmatpush3.bf16.msra.mxu1 %v8966_v56  ;;  %8356 = vmatprep.subr.bf16.mxu0 %v8967_v60  ;;  %v8989_v56 = vld [vmem:[%s10684_s1 + $0x308] sm:$0xff]   ;;  %v8993_v60 = vld [vmem:[%s10684_s1 + $0x310] sm:$0xff]  }
 0x1da   : > { %v8054_v47 = vpop.f32.mrb[28].mxu0  ;;  %8378 = vmatprep.subr.bf16.mxu1 %v8968_v63  ;;  %v8994_v63 = vld [vmem:[%s10684_s1 + $0x390] sm:$0xff]  }
 0x1db   : > { %v8055_v49 = vpop.f32.mrb[29].mxu0  ;;  %v8076_v57 = vpop.f32.mrb[28].mxu1 }
 0x1dc   : > { %v8056_v51 = vadd.f32 %v8055_v49, %v8054_v47  ;;  %v8057_v52 = vpop.f32.mrb[30].mxu0  ;;  %v8077_v59 = vpop.f32.mrb[29].mxu1  ;;  %8357 = vmatpush3.bf16.msra.mxu0 %v8969_v1  ;;  %v5581_v47 = vrot.slane %v5579_v40, 1  ;;  %v8997_v1 = vld [vmem:[%s10684_s1 + $0x318] sm:$0xff]   ;;  %v5950_v40 = vrot.slane %v5948_v38, 1 }
 0x1dd   : > { %v8058_v54 = vpop.f32.mrb[31].mxu0  ;;  %v8078_v61 = vadd.f32 %v8077_v59, %v8076_v57  ;;  %v8079_v0 = vpop.f32.mrb[30].mxu1  ;;  %8379 = vmatpush3.bf16.msra.mxu1 %v8970_v4  ;;  %8358 = vmatprep.subr.bf16.mxu0 %v8971_v5  ;;  %v5589_v52 = vor.u32 %v5588_v46, %v5584_v37  ;;  %v8991_v57 = vld [vmem:[%s10684_s1 + $0x350] sm:$0xff]   ;;  %v9001_v5 = vld [vmem:[%s10684_s1 + $0x320] sm:$0xff]   ;;  %v5946_v37 = vshrl.u32 %v7706_v32, 16 }
 0x1de   : > { %v2924_v58 = vadd.f32 %v8056_v51, %v10422_v62  ;;  %v8080_v62 = vpop.f32.mrb[31].mxu1  ;;  %8380 = vmatprep.subr.bf16.mxu1 %v8972_v9  ;;  %v8986_v51 = vld [vmem:[%s10684_s1 + $0x380] sm:$0xff]   ;;  %v5582_v53 = vor.u32 %v5581_v47, %v5577_v39  ;;  %v8988_v54 = vld [vmem:[%s10684_s1 + $0x3c8] sm:$0xff]   ;;  %v8992_v59 = vld [vmem:[%s10684_s1 + $0x3d0] sm:$0xff]  }
 0x1df   : > { %5720 = vmatprep.mubr.bf16.mxu1 %v5589_v52  ;;  %v8996_v0 = vld [vmem:[%s10684_s1 + $0x3d8] sm:$0xff]   ;;  %v8999_v62 = vld [vmem:[%s10684_s1 + $0x360] sm:$0xff]  }
 0x1e0   : > { %v3115_v3 = vadd.f32 %v8078_v61, %v2924_v58  ;;  %8359 = vmatpush3.bf16.msra.mxu0 %v8973_v11  ;;  %v8990_v58 = vld [vmem:[%s10684_s1 + $0x388] sm:$0xff]   ;;  %v8995_v61 = vld [vmem:[%s10684_s1 + $0x358] sm:$0xff]  }
 0x1e1   : > { %8381 = vmatpush3.bf16.msra.mxu1 %v8974_v14  ;;  %8360 = vmatprep.subr.bf16.mxu0 %v8975_v17  ;;  %v9004_v14 = vld [vmem:[%s10684_s1 + $0x3e8] sm:$0xff]  }
 0x1e2   : > { %3117 = vst [vmem:[#allocation2 + $0x4] sm:$0xf] %v3115_v3  ;;  %v3118_v7 = vsel %vm1626_vm0, %v3115_v3, 0.0  ;;  %v3126_v8 = vmul.f32 %v3115_v3, %v3115_v3  ;;  %8382 = vmatprep.subr.bf16.mxu1 %v8976_v20  ;;  %v9000_v3 = vld [vmem:[%s10684_s1 + $0x3e0] sm:$0xff]   ;;  %v9005_v17 = vld [vmem:[%s10684_s1 + $0x328] sm:$0xff]  }
 0x1e3   : > { %v3119_v10 = vrot.slane %v3118_v7, 4  ;;  %v9006_v20 = vld [vmem:[%s10684_s1 + $0x3a8] sm:$0xff]  }
 0x1e4   : > { %v3127_v13 = vsel %vm1626_vm0, %v3126_v8, 0.0  ;;  %8361 = vmatpush3.bf16.msra.mxu0 %v8977_v23  ;;  %v9008_v23 = vld [vmem:[%s10684_s1 + $0x3f0] sm:$0xff]  }
 0x1e5   : > { %v3120_v15 = vadd.f32 %v3119_v10, %v3118_v7  ;;  %v3128_v16 = vrot.slane %v3127_v13, 4  ;;  %8383 = vmatpush3.bf16.msra.mxu1 %v8978_v25  ;;  %8390 = vmatprep.subr.bf16.mxu0 %v8983_v31  ;;  %v9002_v7 = vld [vmem:[%s10684_s1 + $0x3a0] sm:$0xff]   ;;  %v9010_v25 = vld [vmem:[%s10684_s1 + $0x3b0] sm:$0xff]   ;;  %v7656_v31 = vcombine.high %v7622_v29, %v7622_v29 }
 0x1e6   : > { %8412 = vmatprep.subr.bf16.mxu1 %v8984_v18  ;;  %v5955_v18 = vshll.u32 %v7707_v33, 16 }
 0x1e7   : > { %v3121_v21 = vrot.slane %v3120_v15, 2  ;;  %v3129_v22 = vadd.f32 %v3128_v16, %v3127_v13  ;;  %5530 = vmatmul.mubr.bf16.vlgmr.msra.gmra.mrb[56].mxu0 %v7553_v36  ;;  %v5953_v36 = vshrl.u32 %v7707_v33, 16 }
 0x1e8   : > { %8391 = vmatpush3.bf16.msra.mxu0 %v8985_v41  ;;  %5721 = vmatmul.mubr.bf16.vlgmr.msra.gmra.mrb[56].mxu1 %v5582_v53  ;;  %v5957_v39 = vrot.slane %v5955_v18, 1 }
 0x1e9   : > { %v3122_v27 = vadd.f32 %v3121_v21, %v3120_v15  ;;  %v3130_v28 = vrot.slane %v3129_v22, 2  ;;  %8392 = vmatprep.subr.bf16.mxu0 %v8987_v45  ;;  %8413 = vmatpush3.bf16.msra.mxu1 %v8986_v51 }
 0x1ea   : > { %8414 = vmatprep.subr.bf16.mxu1 %v8988_v54  ;;  %5898 = vmatprep.mubr.bf16.mxu0 %v7656_v31  ;;  %v5958_v41 = vor.u32 %v5957_v39, %v5953_v36 }
 0x1eb   : > { %v3123_v34 = vrot.slane %v3122_v27, 1  ;;  %v3131_v35 = vadd.f32 %v3130_v28, %v3129_v22  ;;  %v9007_v22 = vld [vmem:[%s10684_s1 + $0x370] sm:$0xff]   ;;  %v9013_v28 = vld [vmem:[%s10684_s1 + $0x338] sm:$0xff]  }
 0x1ec   : > { %8393 = vmatpush3.bf16.msra.mxu0 %v8989_v56  ;;  %6089 = vmatprep.mubr.bf16.mxu1 %v5958_v41 }
 0x1ed   : > { %v3124_v43 = vadd.f32 %v3123_v34, %v3122_v27  ;;  %v3132_v44 = vrot.slane %v3131_v35, 1  ;;  %8394 = vmatprep.subr.bf16.mxu0 %v8991_v57  ;;  %8415 = vmatpush3.bf16.msra.mxu1 %v8990_v58  ;;  %v9012_v27 = vld [vmem:[%s10684_s1 + $0x3f8] sm:$0xff]  }
 0x1ee   : > { %8416 = vmatprep.subr.bf16.mxu1 %v8992_v59  ;;  %v9014_v34 = vld [vmem:[%s10684_s1 + $0x3b8] sm:$0xff]  }
 0x1ef   : > { %v10574_v49 = vadd.f32 %v3124_v43, %v1633_v42  ;;  %v3133_v50 = vadd.f32 %v3132_v44, %v3131_v35  ;;  %v7655_v35 = vcombine.low %v7622_v29, %v7622_v29  ;;  %v5951_v42 = vor.u32 %v5950_v40, %v5946_v37 }
 0x1f0   : > { %8395 = vmatpush3.bf16.msra.mxu0 %v8993_v60 }
 0x1f1   : > { %v10582_v55 = vadd.f32 %v3133_v50, %v1642_v48  ;;  %8396 = vmatprep.subr.bf16.mxu0 %v8995_v61  ;;  %8417 = vmatpush3.bf16.msra.mxu1 %v8994_v63 }
 0x1f2   : > { %8418 = vmatprep.subr.bf16.mxu1 %v8996_v0 }
 0x1f4   : > { %8397 = vmatpush3.bf16.msra.mxu0 %v8997_v1 }
 0x1f5   : > { %8398 = vmatprep.subr.bf16.mxu0 %v8999_v62  ;;  %8419 = vmatpush3.bf16.msra.mxu1 %v8998_v2 }
 0x1f6   : > { %8420 = vmatprep.subr.bf16.mxu1 %v9000_v3 }
 0x1f8   : > { %8399 = vmatpush3.bf16.msra.mxu0 %v9001_v5 }
 0x1f9   : > { %8400 = vmatprep.subr.bf16.mxu0 %v9003_v12  ;;  %8421 = vmatpush3.bf16.msra.mxu1 %v9002_v7 }
 0x1fa   : > { %v8098_v6 = vpop.f32.mrb[32].mxu0  ;;  %8422 = vmatprep.subr.bf16.mxu1 %v9004_v14 }
 0x1fb   : > { %v8120_v4 = vpop.f32.mrb[32].mxu1  ;;  %v8099_v8 = vpop.f32.mrb[33].mxu0 }
 0x1fc   : > { %v8121_v9 = vpop.f32.mrb[33].mxu1  ;;  %v8100_v10 = vadd.f32 %v8099_v8, %v8098_v6  ;;  %v8101_v13 = vpop.f32.mrb[34].mxu0  ;;  %8401 = vmatpush3.bf16.msra.mxu0 %v9005_v17 }
 0x1fd   : > { %v8122_v11 = vadd.f32 %v8121_v9, %v8120_v4  ;;  %v8123_v15 = vpop.f32.mrb[34].mxu1  ;;  %v8102_v19 = vpop.f32.mrb[35].mxu0  ;;  %8402 = vmatprep.subr.bf16.mxu0 %v9007_v22  ;;  %8423 = vmatpush3.bf16.msra.mxu1 %v9006_v20 }
 0x1fe   : > { %v8124_v21 = vpop.f32.mrb[35].mxu1  ;;  %8424 = vmatprep.subr.bf16.mxu1 %v9008_v23 }
 0x1ff   : > { %v3496_v16 = vadd.f32 %v8122_v11, %v8100_v10 }
 0x200   : > { %8403 = vmatpush3.bf16.msra.mxu0 %v9009_v24 }
 0x201   : > { %8404 = vmatprep.subr.bf16.mxu0 %v9011_v26  ;;  %8425 = vmatpush3.bf16.msra.mxu1 %v9010_v25 }
 0x202   : > { %8426 = vmatprep.subr.bf16.mxu1 %v9012_v27 }
 0x204   : > { %8405 = vmatpush3.bf16.msra.mxu0 %v9013_v28 }
 0x205   : > { %8427 = vmatpush3.bf16.msra.mxu1 %v9014_v34 }
 0x207   : > { %5899 = vmatmul.mubr.bf16.vlgmr.msra.gmra.mrb[60].mxu0 %v7655_v35 }
 0x208   : > { %6090 = vmatmul.mubr.bf16.vlgmr.msra.gmra.mrb[60].mxu1 %v5951_v42 }
 0x21a   : > { %v8142_v43 = vpop.f32.mrb[36].mxu0 }
 0x21b   : > { %v8143_v44 = vpop.f32.mrb[37].mxu0  ;;  %v8164_v45 = vpop.f32.mrb[36].mxu1 }
 0x21c   : > { %v8144_v46 = vadd.f32 %v8143_v44, %v8142_v43  ;;  %v8145_v47 = vpop.f32.mrb[38].mxu0  ;;  %v8165_v48 = vpop.f32.mrb[37].mxu1 }
 0x21d   : > { %v8146_v50 = vpop.f32.mrb[39].mxu0  ;;  %v8166_v52 = vadd.f32 %v8165_v48, %v8164_v45  ;;  %v8167_v53 = vpop.f32.mrb[38].mxu1 }
 0x21e   : > { %v3677_v51 = vadd.f32 %v8144_v46, %v3496_v16  ;;  %v8168_v54 = vpop.f32.mrb[39].mxu1 }
 0x220   : > { %v3868_v56 = vadd.f32 %v8166_v52, %v3677_v51 }
 0x23a   : > { %v8186_v57 = vpop.f32.mrb[40].mxu0 }
 0x23b   : > { %v8187_v58 = vpop.f32.mrb[41].mxu0  ;;  %v8208_v61 = vpop.f32.mrb[40].mxu1 }
 0x23c   : > { %v8188_v59 = vadd.f32 %v8187_v58, %v8186_v57  ;;  %v8189_v60 = vpop.f32.mrb[42].mxu0  ;;  %v8209_v1 = vpop.f32.mrb[41].mxu1 }
 0x23d   : > { %v8190_v63 = vpop.f32.mrb[43].mxu0  ;;  %v8210_v62 = vadd.f32 %v8209_v1, %v8208_v61  ;;  %v8211_v2 = vpop.f32.mrb[42].mxu1 }
 0x23e   : > { %v4046_v0 = vadd.f32 %v8188_v59, %v3868_v56  ;;  %v8212_v3 = vpop.f32.mrb[43].mxu1 }
 0x240   : > { %v4237_v4 = vadd.f32 %v8210_v62, %v4046_v0 }
 0x25a   : > { %v8230_v5 = vpop.f32.mrb[44].mxu0 }
 0x25b   : > { %v8231_v6 = vpop.f32.mrb[45].mxu0  ;;  %v8252_v11 = vpop.f32.mrb[44].mxu1 }
 0x25c   : > { %v8232_v7 = vadd.f32 %v8231_v6, %v8230_v5  ;;  %v8233_v8 = vpop.f32.mrb[46].mxu0  ;;  %v8253_v12 = vpop.f32.mrb[45].mxu1 }
 0x25d   : > { %v8234_v9 = vpop.f32.mrb[47].mxu0  ;;  %v8254_v13 = vadd.f32 %v8253_v12, %v8252_v11  ;;  %v8255_v14 = vpop.f32.mrb[46].mxu1 }
 0x25e   : > { %v4415_v10 = vadd.f32 %v8232_v7, %v4237_v4  ;;  %v8256_v15 = vpop.f32.mrb[47].mxu1 }
 0x260   : > { %v4606_v16 = vadd.f32 %v8254_v13, %v4415_v10 }
 0x262   : > { %4608 = vst [vmem:[#allocation2 + $0x8] sm:$0xf] %v4606_v16  ;;  %v4609_v17 = vsel %vm1626_vm0, %v4606_v16, 0.0  ;;  %v4617_v19 = vmul.f32 %v4606_v16, %v4606_v16 }
 0x263   : > { %v4610_v20 = vrot.slane %v4609_v17, 4 }
 0x264   : > { %v4618_v21 = vsel %vm1626_vm0, %v4617_v19, 0.0 }
 0x265   : > { %v4611_v22 = vadd.f32 %v4610_v20, %v4609_v17  ;;  %v4619_v23 = vrot.slane %v4618_v21, 4 }
 0x267   : > { %v4612_v24 = vrot.slane %v4611_v22, 2  ;;  %v4620_v25 = vadd.f32 %v4619_v23, %v4618_v21 }
 0x269   : > { %v4613_v26 = vadd.f32 %v4612_v24, %v4611_v22  ;;  %v4621_v27 = vrot.slane %v4620_v25, 2 }
 0x26b   : > { %v4614_v28 = vrot.slane %v4613_v26, 1  ;;  %v4622_v29 = vadd.f32 %v4621_v27, %v4620_v25 }
 0x26d   : > { %v4615_v30 = vadd.f32 %v4614_v28, %v4613_v26  ;;  %v4623_v31 = vrot.slane %v4622_v29, 1 }
 0x26f   : > { %v10667_v32 = vadd.f32 %v4615_v30, %v10574_v49  ;;  %v4624_v33 = vadd.f32 %v4623_v31, %v4622_v29 }
 0x271   : > { %v10670_v34 = vadd.f32 %v4624_v33, %v10582_v55 }
 0x27a   : > { %v8274_v36 = vpop.f32.mrb[48].mxu0 }
 0x27b   : > { %v8296_v35 = vpop.f32.mrb[48].mxu1  ;;  %v8275_v37 = vpop.f32.mrb[49].mxu0 }
 0x27c   : > { %v8297_v18 = vpop.f32.mrb[49].mxu1  ;;  %v8276_v40 = vadd.f32 %v8275_v37, %v8274_v36  ;;  %v8277_v41 = vpop.f32.mrb[50].mxu0 }
 0x27d   : > { %v8298_v38 = vadd.f32 %v8297_v18, %v8296_v35  ;;  %v8299_v39 = vpop.f32.mrb[50].mxu1  ;;  %v8278_v43 = vpop.f32.mrb[51].mxu0 }
 0x27e   : > { %v8300_v42 = vpop.f32.mrb[51].mxu1  ;;  %v6132_v43 = vld [vmem:[#allocation2 + $0x4] sm:$0xf] }
 0x27f   : > { %v4987_v44 = vadd.f32 %v8298_v38, %v8276_v40  ;;  %v6124_v42 = vld [vmem:[#allocation2] sm:$0xf] }
 0x29a   : > { %v8318_v45 = vpop.f32.mrb[52].mxu0 }
 0x29b   : > { %v8340_v46 = vpop.f32.mrb[52].mxu1  ;;  %v8319_v47 = vpop.f32.mrb[53].mxu0 }
 0x29c   : > { %v8320_v49 = vadd.f32 %v8319_v47, %v8318_v45  ;;  %v8341_v48 = vpop.f32.mrb[53].mxu1  ;;  %v8321_v50 = vpop.f32.mrb[54].mxu0 }
 0x29d   : > { %v8342_v51 = vadd.f32 %v8341_v48, %v8340_v46  ;;  %v8343_v55 = vpop.f32.mrb[54].mxu1  ;;  %v8322_v52 = vpop.f32.mrb[55].mxu0 }
 0x29e   : > { %v5168_v53 = vadd.f32 %v8320_v49, %v4987_v44  ;;  %v8344_v54 = vpop.f32.mrb[55].mxu1  ;;  %v6141_v44 = vld [vmem:[#allocation2 + $0x8] sm:$0xf] }
 0x2a0   : > { %v5359_v56 = vadd.f32 %v8342_v51, %v5168_v53 }
 0x2ba   : > { %v8362_v57 = vpop.f32.mrb[56].mxu0 }
 0x2bb   : > { %v8363_v58 = vpop.f32.mrb[57].mxu0  ;;  %v8384_v61 = vpop.f32.mrb[56].mxu1 }
 0x2bc   : > { %v8364_v59 = vadd.f32 %v8363_v58, %v8362_v57  ;;  %v8365_v60 = vpop.f32.mrb[58].mxu0  ;;  %v8385_v1 = vpop.f32.mrb[57].mxu1 }
 0x2bd   : > { %v8366_v63 = vpop.f32.mrb[59].mxu0  ;;  %v8386_v62 = vadd.f32 %v8385_v1, %v8384_v61  ;;  %v8387_v2 = vpop.f32.mrb[58].mxu1 }
 0x2be   : > { %v5537_v0 = vadd.f32 %v8364_v59, %v5359_v56  ;;  %v8388_v3 = vpop.f32.mrb[59].mxu1 }
 0x2c0   : > { %v5728_v4 = vadd.f32 %v8386_v62, %v5537_v0 }
 0x2da   : > { %v8406_v5 = vpop.f32.mrb[60].mxu0 }
 0x2db   : > { %v8407_v6 = vpop.f32.mrb[61].mxu0  ;;  %v8428_v10 = vpop.f32.mrb[60].mxu1 }
 0x2dc   : > { %v8408_v7 = vadd.f32 %v8407_v6, %v8406_v5  ;;  %v8409_v8 = vpop.f32.mrb[62].mxu0  ;;  %v8429_v12 = vpop.f32.mrb[61].mxu1 }
 0x2dd   : > { %v8410_v9 = vpop.f32.mrb[63].mxu0  ;;  %v8430_v13 = vadd.f32 %v8429_v12, %v8428_v10  ;;  %v8431_v14 = vpop.f32.mrb[62].mxu1 }
 0x2de   : > { %v5906_v11 = vadd.f32 %v8408_v7, %v5728_v4  ;;  %v8432_v15 = vpop.f32.mrb[63].mxu1 }
 0x2e0   : > { %v6097_v16 = vadd.f32 %v8430_v13, %v5906_v11 }
 0x2e2   : > { %6099 = vst [vmem:[#allocation2 + $0xc] sm:$0xf] %v6097_v16  ;;  %v6100_v17 = vsel %vm1626_vm0, %v6097_v16, 0.0  ;;  %v6108_v19 = vmul.f32 %v6097_v16, %v6097_v16 }
 0x2e3   : > { %v6101_v20 = vrot.slane %v6100_v17, 4 }
 0x2e4   : > { %v6109_v21 = vsel %vm1626_vm0, %v6108_v19, 0.0 }
 0x2e5   : > { %v6102_v22 = vadd.f32 %v6101_v20, %v6100_v17  ;;  %v6110_v23 = vrot.slane %v6109_v21, 4 }
 0x2e7   : > { %v6103_v24 = vrot.slane %v6102_v22, 2  ;;  %v6111_v25 = vadd.f32 %v6110_v23, %v6109_v21 }
 0x2e9   : > { %v6104_v26 = vadd.f32 %v6103_v24, %v6102_v22  ;;  %v6112_v27 = vrot.slane %v6111_v25, 2  ;;  %v6150_v45 = vld [vmem:[#allocation2 + $0xc] sm:$0xf] }
 0x2eb   : > { %v6105_v28 = vrot.slane %v6104_v26, 1  ;;  %v6113_v29 = vadd.f32 %v6112_v27, %v6111_v25 }
 0x2ed   : > { %v6106_v30 = vadd.f32 %v6105_v28, %v6104_v26  ;;  %v6114_v31 = vrot.slane %v6113_v29, 1 }
 0x2ef   : > { %v6107_v33 = vadd.f32 %v6106_v30, %v10667_v32  ;;  %v6115_v35 = vadd.f32 %v6114_v31, %v6113_v29 }
 0x2f1   : > { %v6116_v36 = vadd.f32 %v6115_v35, %v10670_v34  ;;  %v6117_v18 = vmul.f32 0.0625, %v6107_v33 }
 0x2f3   : > { %v6118_v37 = vmul.f32 0.0625, %v6116_v36  ;;  %v6119_v38 = vmul.f32 %v6117_v18, %v6117_v18  ;;  %v6125_v46 = vsub.f32 %v6124_v42, %v6117_v18  ;;  %v6133_v47 = vsub.f32 %v6132_v43, %v6117_v18 }
 0x2f4   : > { %v6142_v49 = vsub.f32 %v6141_v44, %v6117_v18  ;;  %v6151_v48 = vsub.f32 %v6150_v45, %v6117_v18 }
 0x2f5   : > { %v6120_v39 = vsub.f32 %v6118_v37, %v6119_v38 }
 0x2f7   : > { %v6121_v40 = vmax.f32 %v6120_v39, 0.0 }
 0x2f9   : > { %v6122_v41 = vadd.f32 1e-05, %v6121_v40 }
 0x2fb   : > { %9019 = vrsqrt.f32 %v6122_v41 }
 0x305   : > { %v9020_v32 = vpop.eup %9019 }
 0x306   : > { %v6126_v50 = vmul.f32 %v9020_v32, %v6125_v46  ;;  %v6134_v51 = vmul.f32 %v9020_v32, %v6133_v47  ;;  %v6143_v34 = vmul.f32 %v9020_v32, %v6142_v49  ;;  %v6152_v55 = vmul.f32 %v9020_v32, %v6151_v48 }
 0x308   : > { %vm6127_vm1 = vcmp.ge.f32.partialorder %v6126_v50, 0.0  ;;  %v6128_v52 = vmul.f32 0.2, %v6126_v50  ;;  %vm6135_vm2 = vcmp.ge.f32.partialorder %v6134_v51, 0.0  ;;  %v6136_v53 = vmul.f32 0.2, %v6134_v51 }
 0x309   : > { %vm6144_vm3 = vcmp.ge.f32.partialorder %v6143_v34, 0.0  ;;  %v6145_v54 = vmul.f32 0.2, %v6143_v34  ;;  %vm6153_vm4 = vcmp.ge.f32.partialorder %v6152_v55, 0.0  ;;  %v6154_v56 = vmul.f32 0.2, %v6152_v55 }
 0x30a   : > { %v6129_v57 = vsel %vm6127_vm1, %v6126_v50, %v6128_v52  ;;  %v6137_v58 = vsel %vm6135_vm2, %v6134_v51, %v6136_v53 }
 0x30b   : > { %v6130_v59 = vpack.c.bf16 %v6129_v57, %v6129_v57  ;;  %v6138_v60 = vpack.c.bf16 %v6137_v58, %v6137_v58  ;;  %v6146_v61 = vsel %vm6144_vm3, %v6143_v34, %v6145_v54  ;;  %v6155_v63 = vsel %vm6153_vm4, %v6152_v55, %v6154_v56 }
 0x30c   : > { %v6147_v0 = vpack.c.bf16 %v6146_v61, %v6146_v61  ;;  %v6156_v1 = vpack.c.bf16 %v6155_v63, %v6155_v63 }
 0x30d   : > { %6131 = vst [vmem:[%s143_s13] sm:$0x3] %v6130_v59  ;;  %7724 = vst [vmem:[%s143_s13 + $0x2] sm:$0x3] %v6138_v60 }
 0x30e   : > { %7725 = vst [vmem:[%s143_s13 + $0x4] sm:$0x3] %v6147_v0  ;;  %7726 = vst [vmem:[%s143_s13 + $0x6] sm:$0x3] %v6156_v1 }
 0x30f PF: > { %s12_s9 = sadd.s32 1, %s9027_s9  }
 0x310   : > { %p9_p4 = scmp.ge.s32.totalorder %s12_s9, 4  }
 0x312   :  { %11 = sbr.rel (!%p9_p4) target bundleno = 1 (0x1), region = 80 }

</bundles_post_ra>
